<compile_context>
chip_gen: v7x
topology: tpu7x:2x2x1
jax: 0.10.0
libtpu: 0.0.40
codegen_flags: <defaults>
</compile_context>

<pallas_src>
import numpy as np
import jax
import jax.numpy as jnp
from jax import lax
from jax.experimental import pallas as pl
from jax.experimental.pallas import tpu as pltpu


# ------------------------------- fused kernel --------------------------------

def _make_up_kernel(H, W, C, inv_count, eps):
    """Fused Up kernel: H-lerp -> concat -> conv1 -> BN1+ReLU -> conv2 -> BN2+ReLU."""
    WC = W * C

    def lane_group_sum(v):
        # v: (R, W*C).  Returns, at every (w, c) lane, the sum over all w of channel c.
        # Summing rolls by every multiple of C covers each residue class mod C exactly once,
        # so the result is exact f32 and direction-independent; the rolls run on the XLU.
        tot = v
        for k in range(1, W):
            tot = tot + pltpu.roll(v, shift=k * C, axis=1)
        return tot

    def conv3x3(x, band_cat):
        # x: (N*H, K) bf16 packed rows; band_cat: (K, 3*W*C) bf16 with columns [dy=0|dy=1|dy=2],
        # the dx taps and the 'SAME' padding along W already folded into each dy band.
        nh = x.shape[0]
        p = jnp.dot(x, band_cat, preferred_element_type=jnp.float32)      # single MXU push
        p0, p1, p2 = p[:, :WC], p[:, WC:2 * WC], p[:, 2 * WC:]
        zrow = jnp.zeros((1, WC), jnp.float32)
        up = jnp.concatenate([zrow, p0[:-1, :]], axis=0)     # out row r gets p0[r-1]
        dn = jnp.concatenate([p2[1:, :], zrow], axis=0)      # out row r gets p2[r+1]
        h = lax.broadcasted_iota(jnp.int32, (nh, WC), 0) % H
        # zero the contributions that would cross an image boundary along H ('SAME' padding)
        return p1 + jnp.where(h == 0, 0.0, up) + jnp.where(h == H - 1, 0.0, dn)

    def bn_relu(y, gamma_p, beta_p):
        # y: (N*H, W*C) f32. Training-mode batch stats (biased variance), fully in-kernel.
        s = jnp.concatenate([jnp.sum(y, axis=0, keepdims=True),
                             jnp.sum(y * y, axis=0, keepdims=True)], axis=0)   # (2, W*C)
        tot = lane_group_sum(s)
        mean = tot[0:1, :] * inv_count
        var = jnp.maximum(tot[1:2, :] * inv_count - mean * mean, 0.0)
        scale = gamma_p * lax.rsqrt(var + eps)
        bias = beta_p - mean * scale
        return jnp.maximum(y * scale + bias, 0.0)

    def kernel(x2_ref, x1_ref, lh_ref, w1_ref, w2_ref,
               g1_ref, b1_ref, g2_ref, b2_ref, o_ref):
        # 1) align_corners H-lerp of x1 for every image (block-diagonal lerp matrix), f32.
        x1h = jnp.dot(lh_ref[...], x1_ref[...], preferred_element_type=jnp.float32)
        # 2) channel concat as a lane concat [x2 | x1h]; conv1 band rows use the same order.
        #    Single bf16 cast of the conv input (no padded scratch copy, no re-stores).
        xin = jnp.concatenate([x2_ref[...], x1h], axis=1).astype(jnp.bfloat16)
        # 3) conv1 (W-lerp of x1 folded into its band) + BN1 + ReLU, all VMEM-resident.
        z1 = bn_relu(conv3x3(xin, w1_ref[...]), g1_ref[...], b1_ref[...])
        # 4) conv2 + BN2 + ReLU, written straight to the lane-dense output.
        o_ref[...] = bn_relu(conv3x3(z1.astype(jnp.bfloat16), w2_ref[...]),
                             g2_ref[...], b2_ref[...])

    return kernel


# --------------------------- wrapper-side preprocessing -----------------------

def _lerp_matrix(size_in, size_out):
    """(size_out, size_in) dense matrix of bilinear align_corners=True lerp weights."""
    if size_in == 1 or size_out == 1:
        return jnp.zeros((size_out, size_in), jnp.float32).at[:, 0].set(1.0)
    src = jnp.arange(size_out, dtype=jnp.float32) * (size_in - 1) / (size_out - 1)
    i0 = jnp.clip(jnp.floor(src).astype(jnp.int32), 0, size_in - 2)
    t = (src - i0.astype(jnp.float32))[:, None]
    cols = jnp.arange(size_in)[None, :]
    i0 = i0[:, None]
    return (jnp.where(cols == i0, 1.0 - t, 0.0) +
            jnp.where(cols == i0 + 1, t, 0.0)).astype(jnp.float32)


def _dx_select(W):
    """sel[dx, wi, wo] = 1 iff input column wi feeds output column wo via tap dx ('SAME' pad)."""
    wi = np.arange(W)[None, :, None]
    wo = np.arange(W)[None, None, :]
    dx = np.arange(3)[:, None, None]
    return jnp.asarray((wi == wo + dx - 1).astype(np.float32))


def _band_conv(w_hwio, W):
    """3x3 HWIO conv -> per-dy banded (W*Cin, W*Cout) weights, concatenated along the output
    columns into a single (W*Cin, 3*W*Cout) bf16 RHS (one MXU push per conv)."""
    _, _, cin, cout = w_hwio.shape
    sel = _dx_select(W)
    b = jnp.einsum('xao,yxic->yaioc', sel, w_hwio).reshape(3, W * cin, W * cout)
    return jnp.concatenate([b[0], b[1], b[2]], axis=1).astype(jnp.bfloat16)


def _band_conv1_fused_upsample(w_hwio, W, W1, c2, c1, lw):
    """conv1 band with the input split as [x2 block | x1 block] along K and the align_corners
    W-lerp (lw: (W, W1)) folded into the x1 half of the weight (folded in f32, one bf16 cast)."""
    _, _, cin, cout = w_hwio.shape
    assert cin == c2 + c1
    sel = _dx_select(W)
    b_x2 = jnp.einsum('xao,yxic->yaioc', sel,
                      w_hwio[:, :, :c2, :]).reshape(3, W * c2, W * cout)
    b_x1 = jnp.einsum('uj,xuo,yxic->yjioc', lw, sel,
                      w_hwio[:, :, c2:, :]).reshape(3, W1 * c1, W * cout)
    b = jnp.concatenate([b_x2, b_x1], axis=1)            # (3, W*c2 + W1*c1, W*cout)
    return jnp.concatenate([b[0], b[1], b[2]], axis=1).astype(jnp.bfloat16)


def up_forward(x1_nchw, x2_nchw, w1_hwio, w2_hwio,
               gamma1, beta1, gamma2, beta2, eps=1e-5, scale_factor=2):
    N, c1, H1, W1 = x1_nchw.shape
    N2, c2, H, W = x2_nchw.shape
    cout = w1_hwio.shape[-1]
    assert N2 == N and H == H1 * scale_factor and W == W1 * scale_factor

    # Packed, lane-dense 2D layouts: rows = (n, h), lanes = (w, c) with c minor.
    x1p = jnp.transpose(x1_nchw, (0, 2, 3, 1)).astype(jnp.float32).reshape(N * H1, W1 * c1)
    x2p = jnp.transpose(x2_nchw, (0, 2, 3, 1)).astype(jnp.float32).reshape(N * H, W * c2)

    # One-time weight / lerp-matrix preprocessing (pre-kernel XLA glue, tiny).
    lw = _lerp_matrix(W1, W)                                        # (W, W1)  W-lerp
    lh = _lerp_matrix(H1, H)                                        # (H, H1)  H-lerp
    lh_bd = jnp.kron(jnp.eye(N, dtype=jnp.float32), lh)            # (N*H, N*H1) block-diag
    band1 = _band_conv1_fused_upsample(w1_hwio, W, W1, c2, c1, lw)  # (W*c2+W1*c1, 3*W*cout)
    band2 = _band_conv(w2_hwio, W)                                  # (W*cout,     3*W*cout)

    def tile_wc(v):
        return jnp.tile(v.astype(jnp.float32), W).reshape(1, W * cout)
    g1p, b1p, g2p, b2p = tile_wc(gamma1), tile_wc(beta1), tile_wc(gamma2), tile_wc(beta2)

    kernel = _make_up_kernel(H, W, cout, 1.0 / float(N * H * W), float(eps))

    def full2d(a):      # whole-array block; everything fits one VMEM-resident grid step
        return pl.BlockSpec(a.shape, lambda i: (0, 0))

    args = (x2p, x1p, lh_bd, band1, band2, g1p, b1p, g2p, b2p)
    out_p = pl.pallas_call(
        kernel,
        out_shape=jax.ShapeDtypeStruct((N * H, W * cout), jnp.float32),
        grid_spec=pltpu.PrefetchScalarGridSpec(
            num_scalar_prefetch=0,
            grid=(1,),
            in_specs=[full2d(a) for a in args],
            out_specs=pl.BlockSpec((N * H, W * cout), lambda i: (0, 0)),
        ),
        compiler_params=pltpu.CompilerParams(dimension_semantics=("arbitrary",)),
    )(*args)

    out = out_p.reshape(N, H, W, cout)
    return jnp.transpose(out, (0, 3, 1, 2))              # NHWC -> NCHW


# ------------------------------- pure-JAX reference ---------------------------

def bilinear_upsample_align_corners(x, sf):
    """NHWC bilinear upsample matching nn.Upsample(mode='bilinear', align_corners=True)."""
    def lerp_axis(arr, size_in, size_out, axis):
        if size_in == 1 or size_out == 1:
            return jnp.take(arr, jnp.zeros((size_out,), jnp.int32), axis=axis)
        src = jnp.arange(size_out, dtype=jnp.float32) * (size_in - 1) / (size_out - 1)
        i0 = jnp.clip(jnp.floor(src).astype(jnp.int32), 0, size_in - 2)
        t = src - i0.astype(jnp.float32)
        a0 = jnp.take(arr, i0, axis=axis)
        a1 = jnp.take(arr, i0 + 1, axis=axis)
        shape = [1] * arr.ndim
        shape[axis] = size_out
        return a0 * (1.0 - t.reshape(shape)) + a1 * t.reshape(shape)

    N, H, W, C = x.shape
    x = lerp_axis(x, H, H * sf, axis=1)
    x = lerp_axis(x, W, W * sf, axis=2)
    return x


def up_forward_ref(x1_nchw, x2_nchw, w1_hwio, w2_hwio,
                   gamma1, beta1, gamma2, beta2, eps=1e-5, scale_factor=2):
    """Full-f32 reference with the PyTorch module's semantics (training-mode BatchNorm)."""
    x1 = jnp.transpose(x1_nchw, (0, 2, 3, 1)).astype(jnp.float32)
    x2 = jnp.transpose(x2_nchw, (0, 2, 3, 1)).astype(jnp.float32)
    x = jnp.concatenate([x2, bilinear_upsample_align_corners(x1, scale_factor)], axis=-1)

    def block(inp, w, gamma, beta):
        y = lax.conv_general_dilated(
            inp, w, (1, 1), 'SAME',
            dimension_numbers=('NHWC', 'HWIO', 'NHWC'),
            precision=lax.Precision.HIGHEST,
            preferred_element_type=jnp.float32)
        mean = jnp.mean(y, axis=(0, 1, 2))
        var = jnp.var(y, axis=(0, 1, 2))
        return jnp.maximum((y - mean) * lax.rsqrt(var + eps) * gamma + beta, 0.0)

    out = block(block(x, w1_hwio, gamma1, beta1), w2_hwio, gamma2, beta2)
    return jnp.transpose(out, (0, 3, 1, 2))


# ----------------------------------- main --------------------------------------

if __name__ == "__main__":
    key = jax.random.PRNGKey(0)
    N = 2
    c_x1, c_x2 = 8, 4                 # x1 is upsampled, x2 is the skip path
    in_channels = c_x1 + c_x2         # 12
    out_channels = 8
    H1 = W1 = 8                       # x1 spatial; x2 spatial = 16x16
    sf = 2

    k1, k2, k3, k4, k5, k6 = jax.random.split(key, 6)
    x1 = jax.random.normal(k1, (N, c_x1, H1, W1), jnp.float32)
    x2 = jax.random.normal(k2, (N, c_x2, H1 * sf, W1 * sf), jnp.float32)

    # Conv weights: kaiming-uniform-ish init, torch OIHW -> HWIO.
    fan1 = in_channels * 9
    w1_oihw = jax.random.uniform(k3, (out_channels, in_channels, 3, 3),
                                 jnp.float32, -1.0 / np.sqrt(fan1), 1.0 / np.sqrt(fan1))
    fan2 = out_channels * 9
    w2_oihw = jax.random.uniform(k4, (out_channels, out_channels, 3, 3),
                                 jnp.float32, -1.0 / np.sqrt(fan2), 1.0 / np.sqrt(fan2))
    w1_hwio = jnp.transpose(w1_oihw, (2, 3, 1, 0))
    w2_hwio = jnp.transpose(w2_oihw, (2, 3, 1, 0))

    # BatchNorm affine params (non-trivial values to exercise the affine path).
    gamma1 = 1.0 + 0.1 * jax.random.normal(k5, (out_channels,), jnp.float32)
    beta1 = 0.1 * jax.random.normal(k6, (out_channels,), jnp.float32)
    gamma2 = 1.0 - 0.05 * jnp.arange(out_channels, dtype=jnp.float32) / out_channels
    beta2 = 0.02 * jnp.arange(out_channels, dtype=jnp.float32)

    fwd = jax.jit(up_forward)
    out = jax.block_until_ready(fwd(x1, x2, w1_hwio, w2_hwio, gamma1, beta1, gamma2, beta2))
    assert out.shape == (N, out_channels, H1 * sf, W1 * sf), out.shape

    ref = np.asarray(up_forward_ref(x1, x2, w1_hwio, w2_hwio, gamma1, beta1, gamma2, beta2))
    got = np.asarray(out)
    # bf16 MXU operands (with the bilinear lerp folded into the bf16 conv1 weights) vs a full-f32
    # reference: use a relative-Frobenius + max-abs check; real indexing bugs give O(1) errors.
    err = np.abs(got - ref)
    rel = float(np.linalg.norm(got - ref) / (np.linalg.norm(ref) + 1e-12))
    if rel > 2e-2 or float(err.max()) > 1e-1:
        raise SystemExit(f"MISMATCH vs pure-JAX reference: rel={rel:.3e} max={err.max():.3e}")

    print("KERNEL_OK")
</pallas_src>

<mosaic_0001>
module attributes {stable_mosaic.version = 11 : i64} {
  func.func @kernel(%arg0: i32, %arg1: memref<32x64xf32, #tpu.memory_space<vmem>>, %arg2: memref<16x64xf32, #tpu.memory_space<vmem>>, %arg3: memref<32x16xf32, #tpu.memory_space<vmem>>, %arg4: memref<128x384xbf16, #tpu.memory_space<vmem>>, %arg5: memref<128x384xbf16, #tpu.memory_space<vmem>>, %arg6: memref<1x128xf32, #tpu.memory_space<vmem>>, %arg7: memref<1x128xf32, #tpu.memory_space<vmem>>, %arg8: memref<1x128xf32, #tpu.memory_space<vmem>>, %arg9: memref<1x128xf32, #tpu.memory_space<vmem>>, %arg10: memref<32x128xf32, #tpu.memory_space<vmem>>) attributes {dimension_semantics = [#tpu.dimension_semantics<arbitrary>], iteration_bounds = array<i64: 1>, scalar_prefetch = 0 : i64, scratch_operands = 0 : i64, tpu.core_type = #tpu.core_type<tc>, window_params = [{pipeline_mode = #tpu.pipeline_mode<synchronous>, transform_indices = @transform_0, window_bounds = array<i64: 32, 64>}, {pipeline_mode = #tpu.pipeline_mode<synchronous>, transform_indices = @transform_1, window_bounds = array<i64: 16, 64>}, {pipeline_mode = #tpu.pipeline_mode<synchronous>, transform_indices = @transform_2, window_bounds = array<i64: 32, 16>}, {pipeline_mode = #tpu.pipeline_mode<synchronous>, transform_indices = @transform_3, window_bounds = array<i64: 128, 384>}, {pipeline_mode = #tpu.pipeline_mode<synchronous>, transform_indices = @transform_4, window_bounds = array<i64: 128, 384>}, {pipeline_mode = #tpu.pipeline_mode<synchronous>, transform_indices = @transform_5, window_bounds = array<i64: 1, 128>}, {pipeline_mode = #tpu.pipeline_mode<synchronous>, transform_indices = @transform_6, window_bounds = array<i64: 1, 128>}, {pipeline_mode = #tpu.pipeline_mode<synchronous>, transform_indices = @transform_7, window_bounds = array<i64: 1, 128>}, {pipeline_mode = #tpu.pipeline_mode<synchronous>, transform_indices = @transform_8, window_bounds = array<i64: 1, 128>}, {pipeline_mode = #tpu.pipeline_mode<synchronous>, transform_indices = @transform_9, window_bounds = array<i64: 32, 128>}]} {
    %c0 = arith.constant 0 : index
    %c0_0 = arith.constant 0 : index
    %0 = vector.load %arg3[%c0, %c0_0] : memref<32x16xf32, #tpu.memory_space<vmem>>, vector<32x16xf32>
    %c0_1 = arith.constant 0 : index
    %c0_2 = arith.constant 0 : index
    %1 = vector.load %arg2[%c0_1, %c0_2] : memref<16x64xf32, #tpu.memory_space<vmem>>, vector<16x64xf32>
    %cst = arith.constant dense<0.000000e+00> : vector<32x64xf32>
    %2 = tpu.matmul %0, %1, %cst {dimension_numbers = #tpu.dot_dimension_numbers<[1], [0], [0], [1], [0, 0, 1, 1], [], []>} : vector<32x16xf32>, vector<16x64xf32>, vector<32x64xf32> -> vector<32x64xf32>
    %c0_3 = arith.constant 0 : index
    %c0_4 = arith.constant 0 : index
    %3 = vector.load %arg1[%c0_3, %c0_4] : memref<32x64xf32, #tpu.memory_space<vmem>>, vector<32x64xf32>
    %4 = tpu.concatenate %3, %2 in 1 : vector<32x64xf32>, vector<32x64xf32> -> vector<32x128xf32>
    %5 = arith.truncf %4 : vector<32x128xf32> to vector<32x128xbf16>
    %c0_5 = arith.constant 0 : index
    %c0_6 = arith.constant 0 : index
    %6 = vector.load %arg4[%c0_5, %c0_6] : memref<128x384xbf16, #tpu.memory_space<vmem>>, vector<128x384xbf16>
    %cst_7 = arith.constant dense<0.000000e+00> : vector<32x384xf32>
    %7 = tpu.matmul %5, %6, %cst_7 {dimension_numbers = #tpu.dot_dimension_numbers<[1], [0], [0], [1], [0, 0, 1, 1], [], []>} : vector<32x128xbf16>, vector<128x384xbf16>, vector<32x384xf32> -> vector<32x384xf32>
    %8 = vector.extract_strided_slice %7 {offsets = [0, 0], sizes = [32, 128], strides = [1, 1]} : vector<32x384xf32> to vector<32x128xf32>
    %9 = vector.extract_strided_slice %7 {offsets = [0, 128], sizes = [32, 128], strides = [1, 1]} : vector<32x384xf32> to vector<32x128xf32>
    %10 = vector.extract_strided_slice %7 {offsets = [0, 256], sizes = [32, 128], strides = [1, 1]} : vector<32x384xf32> to vector<32x128xf32>
    %cst_8 = arith.constant 0.000000e+00 : f32
    %11 = vector.broadcast %cst_8 : f32 to vector<1x128xf32>
    %12 = vector.extract_strided_slice %8 {offsets = [0, 0], sizes = [31, 128], strides = [1, 1]} : vector<32x128xf32> to vector<31x128xf32>
    %13 = tpu.concatenate %11, %12 in 0 : vector<1x128xf32>, vector<31x128xf32> -> vector<32x128xf32>
    %14 = vector.extract_strided_slice %10 {offsets = [1, 0], sizes = [31, 128], strides = [1, 1]} : vector<32x128xf32> to vector<31x128xf32>
    %15 = tpu.concatenate %14, %11 in 0 : vector<31x128xf32>, vector<1x128xf32> -> vector<32x128xf32>
    %16 = tpu.iota {dimensions = array<i32: 0>} : vector<32x128xi32>
    %c16_i32 = arith.constant 16 : i32
    %c0_i32 = arith.constant 0 : i32
    %17 = arith.cmpi eq, %c16_i32, %c0_i32 : i32
    %c1_i32 = arith.constant 1 : i32
    %18 = arith.select %17, %c1_i32, %c16_i32 : i32
    %19 = vector.broadcast %18 : i32 to vector<32x128xi32>
    %20 = arith.remsi %16, %19 : vector<32x128xi32>
    %c0_i32_9 = arith.constant 0 : i32
    %21 = vector.broadcast %c0_i32_9 : i32 to vector<32x128xi32>
    %22 = arith.cmpi ne, %20, %21 : vector<32x128xi32>
    %c0_i32_10 = arith.constant 0 : i32
    %23 = vector.broadcast %c0_i32_10 : i32 to vector<32x128xi32>
    %24 = arith.cmpi slt, %20, %23 : vector<32x128xi32>
    %c0_i32_11 = arith.constant 0 : i32
    %25 = arith.cmpi slt, %18, %c0_i32_11 : i32
    %26 = vector.broadcast %25 : i1 to vector<32x128xi1>
    %27 = vector.broadcast %26 : vector<32x128xi1> to vector<32x128xi1>
    %28 = arith.xori %24, %27 : vector<32x128xi1>
    %29 = arith.andi %28, %22 : vector<32x128xi1>
    %30 = vector.broadcast %18 : i32 to vector<32x128xi32>
    %31 = arith.addi %20, %30 : vector<32x128xi32>
    %32 = arith.select %29, %31, %20 : vector<32x128xi1>, vector<32x128xi32>
    %c0_i32_12 = arith.constant 0 : i32
    %33 = vector.broadcast %c0_i32_12 : i32 to vector<32x128xi32>
    %34 = arith.cmpi eq, %32, %33 : vector<32x128xi32>
    %cst_13 = arith.constant 0.000000e+00 : f32
    %35 = vector.broadcast %cst_13 : f32 to vector<32x128xf32>
    %36 = arith.select %34, %35, %13 : vector<32x128xi1>, vector<32x128xf32>
    %37 = arith.addf %9, %36 : vector<32x128xf32>
    %c15_i32 = arith.constant 15 : i32
    %38 = vector.broadcast %c15_i32 : i32 to vector<32x128xi32>
    %39 = arith.cmpi eq, %32, %38 : vector<32x128xi32>
    %cst_14 = arith.constant 0.000000e+00 : f32
    %40 = vector.broadcast %cst_14 : f32 to vector<32x128xf32>
    %41 = arith.select %39, %40, %15 : vector<32x128xi1>, vector<32x128xf32>
    %42 = arith.addf %37, %41 : vector<32x128xf32>
    %c0_15 = arith.constant 0 : index
    %c0_16 = arith.constant 0 : index
    %43 = vector.load %arg6[%c0_15, %c0_16] : memref<1x128xf32, #tpu.memory_space<vmem>>, vector<1x128xf32>
    %c0_17 = arith.constant 0 : index
    %c0_18 = arith.constant 0 : index
    %44 = vector.load %arg7[%c0_17, %c0_18] : memref<1x128xf32, #tpu.memory_space<vmem>>, vector<1x128xf32>
    %cst_19 = arith.constant dense<0.000000e+00> : vector<128xf32>
    %45 = vector.multi_reduction <add>, %42, %cst_19 [0] : vector<32x128xf32> to vector<128xf32>
    %46 = vector.shape_cast %45 : vector<128xf32> to vector<1x128xf32>
    %47 = arith.mulf %42, %42 : vector<32x128xf32>
    %cst_20 = arith.constant dense<0.000000e+00> : vector<128xf32>
    %48 = vector.multi_reduction <add>, %47, %cst_20 [0] : vector<32x128xf32> to vector<128xf32>
    %49 = vector.shape_cast %48 : vector<128xf32> to vector<1x128xf32>
    %50 = tpu.concatenate %46, %49 in 0 : vector<1x128xf32>, vector<1x128xf32> -> vector<2x128xf32>
    %c8_i32 = arith.constant 8 : i32
    %51 = tpu.dynamic_rotate %50 by %c8_i32 dim 1 : vector<2x128xf32>, i32 -> vector<2x128xf32>
    %52 = arith.addf %50, %51 : vector<2x128xf32>
    %c16_i32_21 = arith.constant 16 : i32
    %53 = tpu.dynamic_rotate %50 by %c16_i32_21 dim 1 : vector<2x128xf32>, i32 -> vector<2x128xf32>
    %54 = arith.addf %52, %53 : vector<2x128xf32>
    %c24_i32 = arith.constant 24 : i32
    %55 = tpu.dynamic_rotate %50 by %c24_i32 dim 1 : vector<2x128xf32>, i32 -> vector<2x128xf32>
    %56 = arith.addf %54, %55 : vector<2x128xf32>
    %c32_i32 = arith.constant 32 : i32
    %57 = tpu.dynamic_rotate %50 by %c32_i32 dim 1 : vector<2x128xf32>, i32 -> vector<2x128xf32>
    %58 = arith.addf %56, %57 : vector<2x128xf32>
    %c40_i32 = arith.constant 40 : i32
    %59 = tpu.dynamic_rotate %50 by %c40_i32 dim 1 : vector<2x128xf32>, i32 -> vector<2x128xf32>
    %60 = arith.addf %58, %59 : vector<2x128xf32>
    %c48_i32 = arith.constant 48 : i32
    %61 = tpu.dynamic_rotate %50 by %c48_i32 dim 1 : vector<2x128xf32>, i32 -> vector<2x128xf32>
    %62 = arith.addf %60, %61 : vector<2x128xf32>
    %c56_i32 = arith.constant 56 : i32
    %63 = tpu.dynamic_rotate %50 by %c56_i32 dim 1 : vector<2x128xf32>, i32 -> vector<2x128xf32>
    %64 = arith.addf %62, %63 : vector<2x128xf32>
    %c64_i32 = arith.constant 64 : i32
    %65 = tpu.dynamic_rotate %50 by %c64_i32 dim 1 : vector<2x128xf32>, i32 -> vector<2x128xf32>
    %66 = arith.addf %64, %65 : vector<2x128xf32>
    %c72_i32 = arith.constant 72 : i32
    %67 = tpu.dynamic_rotate %50 by %c72_i32 dim 1 : vector<2x128xf32>, i32 -> vector<2x128xf32>
    %68 = arith.addf %66, %67 : vector<2x128xf32>
    %c80_i32 = arith.constant 80 : i32
    %69 = tpu.dynamic_rotate %50 by %c80_i32 dim 1 : vector<2x128xf32>, i32 -> vector<2x128xf32>
    %70 = arith.addf %68, %69 : vector<2x128xf32>
    %c88_i32 = arith.constant 88 : i32
    %71 = tpu.dynamic_rotate %50 by %c88_i32 dim 1 : vector<2x128xf32>, i32 -> vector<2x128xf32>
    %72 = arith.addf %70, %71 : vector<2x128xf32>
    %c96_i32 = arith.constant 96 : i32
    %73 = tpu.dynamic_rotate %50 by %c96_i32 dim 1 : vector<2x128xf32>, i32 -> vector<2x128xf32>
    %74 = arith.addf %72, %73 : vector<2x128xf32>
    %c104_i32 = arith.constant 104 : i32
    %75 = tpu.dynamic_rotate %50 by %c104_i32 dim 1 : vector<2x128xf32>, i32 -> vector<2x128xf32>
    %76 = arith.addf %74, %75 : vector<2x128xf32>
    %c112_i32 = arith.constant 112 : i32
    %77 = tpu.dynamic_rotate %50 by %c112_i32 dim 1 : vector<2x128xf32>, i32 -> vector<2x128xf32>
    %78 = arith.addf %76, %77 : vector<2x128xf32>
    %c120_i32 = arith.constant 120 : i32
    %79 = tpu.dynamic_rotate %50 by %c120_i32 dim 1 : vector<2x128xf32>, i32 -> vector<2x128xf32>
    %80 = arith.addf %78, %79 : vector<2x128xf32>
    %81 = vector.extract_strided_slice %80 {offsets = [0, 0], sizes = [1, 128], strides = [1, 1]} : vector<2x128xf32> to vector<1x128xf32>
    %cst_22 = arith.constant 0.001953125 : f32
    %82 = vector.broadcast %cst_22 : f32 to vector<1x128xf32>
    %83 = arith.mulf %81, %82 : vector<1x128xf32>
    %84 = vector.extract_strided_slice %80 {offsets = [1, 0], sizes = [1, 128], strides = [1, 1]} : vector<2x128xf32> to vector<1x128xf32>
    %cst_23 = arith.constant 0.001953125 : f32
    %85 = vector.broadcast %cst_23 : f32 to vector<1x128xf32>
    %86 = arith.mulf %84, %85 : vector<1x128xf32>
    %87 = arith.mulf %83, %83 : vector<1x128xf32>
    %88 = arith.subf %86, %87 : vector<1x128xf32>
    %cst_24 = arith.constant 0.000000e+00 : f32
    %89 = vector.broadcast %cst_24 : f32 to vector<1x128xf32>
    %90 = arith.maximumf %88, %89 : vector<1x128xf32>
    %cst_25 = arith.constant 9.99999974E-6 : f32
    %91 = vector.broadcast %cst_25 : f32 to vector<1x128xf32>
    %92 = arith.addf %90, %91 : vector<1x128xf32>
    %93 = math.rsqrt %92 : vector<1x128xf32>
    %94 = arith.mulf %43, %93 : vector<1x128xf32>
    %95 = arith.mulf %83, %94 : vector<1x128xf32>
    %96 = arith.subf %44, %95 : vector<1x128xf32>
    %97 = vector.broadcast %94 : vector<1x128xf32> to vector<32x128xf32>
    %98 = arith.mulf %42, %97 : vector<32x128xf32>
    %99 = vector.broadcast %96 : vector<1x128xf32> to vector<32x128xf32>
    %100 = arith.addf %98, %99 : vector<32x128xf32>
    %cst_26 = arith.constant 0.000000e+00 : f32
    %101 = vector.broadcast %cst_26 : f32 to vector<32x128xf32>
    %102 = arith.maximumf %100, %101 : vector<32x128xf32>
    %103 = arith.truncf %102 : vector<32x128xf32> to vector<32x128xbf16>
    %c0_27 = arith.constant 0 : index
    %c0_28 = arith.constant 0 : index
    %104 = vector.load %arg5[%c0_27, %c0_28] : memref<128x384xbf16, #tpu.memory_space<vmem>>, vector<128x384xbf16>
    %cst_29 = arith.constant dense<0.000000e+00> : vector<32x384xf32>
    %105 = tpu.matmul %103, %104, %cst_29 {dimension_numbers = #tpu.dot_dimension_numbers<[1], [0], [0], [1], [0, 0, 1, 1], [], []>} : vector<32x128xbf16>, vector<128x384xbf16>, vector<32x384xf32> -> vector<32x384xf32>
    %106 = vector.extract_strided_slice %105 {offsets = [0, 0], sizes = [32, 128], strides = [1, 1]} : vector<32x384xf32> to vector<32x128xf32>
    %107 = vector.extract_strided_slice %105 {offsets = [0, 128], sizes = [32, 128], strides = [1, 1]} : vector<32x384xf32> to vector<32x128xf32>
    %108 = vector.extract_strided_slice %105 {offsets = [0, 256], sizes = [32, 128], strides = [1, 1]} : vector<32x384xf32> to vector<32x128xf32>
    %cst_30 = arith.constant 0.000000e+00 : f32
    %109 = vector.broadcast %cst_30 : f32 to vector<1x128xf32>
    %110 = vector.extract_strided_slice %106 {offsets = [0, 0], sizes = [31, 128], strides = [1, 1]} : vector<32x128xf32> to vector<31x128xf32>
    %111 = tpu.concatenate %109, %110 in 0 : vector<1x128xf32>, vector<31x128xf32> -> vector<32x128xf32>
    %112 = vector.extract_strided_slice %108 {offsets = [1, 0], sizes = [31, 128], strides = [1, 1]} : vector<32x128xf32> to vector<31x128xf32>
    %113 = tpu.concatenate %112, %109 in 0 : vector<31x128xf32>, vector<1x128xf32> -> vector<32x128xf32>
    %114 = tpu.iota {dimensions = array<i32: 0>} : vector<32x128xi32>
    %c16_i32_31 = arith.constant 16 : i32
    %c0_i32_32 = arith.constant 0 : i32
    %115 = arith.cmpi eq, %c16_i32_31, %c0_i32_32 : i32
    %c1_i32_33 = arith.constant 1 : i32
    %116 = arith.select %115, %c1_i32_33, %c16_i32_31 : i32
    %117 = vector.broadcast %116 : i32 to vector<32x128xi32>
    %118 = arith.remsi %114, %117 : vector<32x128xi32>
    %c0_i32_34 = arith.constant 0 : i32
    %119 = vector.broadcast %c0_i32_34 : i32 to vector<32x128xi32>
    %120 = arith.cmpi ne, %118, %119 : vector<32x128xi32>
    %c0_i32_35 = arith.constant 0 : i32
    %121 = vector.broadcast %c0_i32_35 : i32 to vector<32x128xi32>
    %122 = arith.cmpi slt, %118, %121 : vector<32x128xi32>
    %c0_i32_36 = arith.constant 0 : i32
    %123 = arith.cmpi slt, %116, %c0_i32_36 : i32
    %124 = vector.broadcast %123 : i1 to vector<32x128xi1>
    %125 = vector.broadcast %124 : vector<32x128xi1> to vector<32x128xi1>
    %126 = arith.xori %122, %125 : vector<32x128xi1>
    %127 = arith.andi %126, %120 : vector<32x128xi1>
    %128 = vector.broadcast %116 : i32 to vector<32x128xi32>
    %129 = arith.addi %118, %128 : vector<32x128xi32>
    %130 = arith.select %127, %129, %118 : vector<32x128xi1>, vector<32x128xi32>
    %c0_i32_37 = arith.constant 0 : i32
    %131 = vector.broadcast %c0_i32_37 : i32 to vector<32x128xi32>
    %132 = arith.cmpi eq, %130, %131 : vector<32x128xi32>
    %cst_38 = arith.constant 0.000000e+00 : f32
    %133 = vector.broadcast %cst_38 : f32 to vector<32x128xf32>
    %134 = arith.select %132, %133, %111 : vector<32x128xi1>, vector<32x128xf32>
    %135 = arith.addf %107, %134 : vector<32x128xf32>
    %c15_i32_39 = arith.constant 15 : i32
    %136 = vector.broadcast %c15_i32_39 : i32 to vector<32x128xi32>
    %137 = arith.cmpi eq, %130, %136 : vector<32x128xi32>
    %cst_40 = arith.constant 0.000000e+00 : f32
    %138 = vector.broadcast %cst_40 : f32 to vector<32x128xf32>
    %139 = arith.select %137, %138, %113 : vector<32x128xi1>, vector<32x128xf32>
    %140 = arith.addf %135, %139 : vector<32x128xf32>
    %c0_41 = arith.constant 0 : index
    %c0_42 = arith.constant 0 : index
    %141 = vector.load %arg8[%c0_41, %c0_42] : memref<1x128xf32, #tpu.memory_space<vmem>>, vector<1x128xf32>
    %c0_43 = arith.constant 0 : index
    %c0_44 = arith.constant 0 : index
    %142 = vector.load %arg9[%c0_43, %c0_44] : memref<1x128xf32, #tpu.memory_space<vmem>>, vector<1x128xf32>
    %cst_45 = arith.constant dense<0.000000e+00> : vector<128xf32>
    %143 = vector.multi_reduction <add>, %140, %cst_45 [0] : vector<32x128xf32> to vector<128xf32>
    %144 = vector.shape_cast %143 : vector<128xf32> to vector<1x128xf32>
    %145 = arith.mulf %140, %140 : vector<32x128xf32>
    %cst_46 = arith.constant dense<0.000000e+00> : vector<128xf32>
    %146 = vector.multi_reduction <add>, %145, %cst_46 [0] : vector<32x128xf32> to vector<128xf32>
    %147 = vector.shape_cast %146 : vector<128xf32> to vector<1x128xf32>
    %148 = tpu.concatenate %144, %147 in 0 : vector<1x128xf32>, vector<1x128xf32> -> vector<2x128xf32>
    %c8_i32_47 = arith.constant 8 : i32
    %149 = tpu.dynamic_rotate %148 by %c8_i32_47 dim 1 : vector<2x128xf32>, i32 -> vector<2x128xf32>
    %150 = arith.addf %148, %149 : vector<2x128xf32>
    %c16_i32_48 = arith.constant 16 : i32
    %151 = tpu.dynamic_rotate %148 by %c16_i32_48 dim 1 : vector<2x128xf32>, i32 -> vector<2x128xf32>
    %152 = arith.addf %150, %151 : vector<2x128xf32>
    %c24_i32_49 = arith.constant 24 : i32
    %153 = tpu.dynamic_rotate %148 by %c24_i32_49 dim 1 : vector<2x128xf32>, i32 -> vector<2x128xf32>
    %154 = arith.addf %152, %153 : vector<2x128xf32>
    %c32_i32_50 = arith.constant 32 : i32
    %155 = tpu.dynamic_rotate %148 by %c32_i32_50 dim 1 : vector<2x128xf32>, i32 -> vector<2x128xf32>
    %156 = arith.addf %154, %155 : vector<2x128xf32>
    %c40_i32_51 = arith.constant 40 : i32
    %157 = tpu.dynamic_rotate %148 by %c40_i32_51 dim 1 : vector<2x128xf32>, i32 -> vector<2x128xf32>
    %158 = arith.addf %156, %157 : vector<2x128xf32>
    %c48_i32_52 = arith.constant 48 : i32
    %159 = tpu.dynamic_rotate %148 by %c48_i32_52 dim 1 : vector<2x128xf32>, i32 -> vector<2x128xf32>
    %160 = arith.addf %158, %159 : vector<2x128xf32>
    %c56_i32_53 = arith.constant 56 : i32
    %161 = tpu.dynamic_rotate %148 by %c56_i32_53 dim 1 : vector<2x128xf32>, i32 -> vector<2x128xf32>
    %162 = arith.addf %160, %161 : vector<2x128xf32>
    %c64_i32_54 = arith.constant 64 : i32
    %163 = tpu.dynamic_rotate %148 by %c64_i32_54 dim 1 : vector<2x128xf32>, i32 -> vector<2x128xf32>
    %164 = arith.addf %162, %163 : vector<2x128xf32>
    %c72_i32_55 = arith.constant 72 : i32
    %165 = tpu.dynamic_rotate %148 by %c72_i32_55 dim 1 : vector<2x128xf32>, i32 -> vector<2x128xf32>
    %166 = arith.addf %164, %165 : vector<2x128xf32>
    %c80_i32_56 = arith.constant 80 : i32
    %167 = tpu.dynamic_rotate %148 by %c80_i32_56 dim 1 : vector<2x128xf32>, i32 -> vector<2x128xf32>
    %168 = arith.addf %166, %167 : vector<2x128xf32>
    %c88_i32_57 = arith.constant 88 : i32
    %169 = tpu.dynamic_rotate %148 by %c88_i32_57 dim 1 : vector<2x128xf32>, i32 -> vector<2x128xf32>
    %170 = arith.addf %168, %169 : vector<2x128xf32>
    %c96_i32_58 = arith.constant 96 : i32
    %171 = tpu.dynamic_rotate %148 by %c96_i32_58 dim 1 : vector<2x128xf32>, i32 -> vector<2x128xf32>
    %172 = arith.addf %170, %171 : vector<2x128xf32>
    %c104_i32_59 = arith.constant 104 : i32
    %173 = tpu.dynamic_rotate %148 by %c104_i32_59 dim 1 : vector<2x128xf32>, i32 -> vector<2x128xf32>
    %174 = arith.addf %172, %173 : vector<2x128xf32>
    %c112_i32_60 = arith.constant 112 : i32
    %175 = tpu.dynamic_rotate %148 by %c112_i32_60 dim 1 : vector<2x128xf32>, i32 -> vector<2x128xf32>
    %176 = arith.addf %174, %175 : vector<2x128xf32>
    %c120_i32_61 = arith.constant 120 : i32
    %177 = tpu.dynamic_rotate %148 by %c120_i32_61 dim 1 : vector<2x128xf32>, i32 -> vector<2x128xf32>
    %178 = arith.addf %176, %177 : vector<2x128xf32>
    %179 = vector.extract_strided_slice %178 {offsets = [0, 0], sizes = [1, 128], strides = [1, 1]} : vector<2x128xf32> to vector<1x128xf32>
    %cst_62 = arith.constant 0.001953125 : f32
    %180 = vector.broadcast %cst_62 : f32 to vector<1x128xf32>
    %181 = arith.mulf %179, %180 : vector<1x128xf32>
    %182 = vector.extract_strided_slice %178 {offsets = [1, 0], sizes = [1, 128], strides = [1, 1]} : vector<2x128xf32> to vector<1x128xf32>
    %cst_63 = arith.constant 0.001953125 : f32
    %183 = vector.broadcast %cst_63 : f32 to vector<1x128xf32>
    %184 = arith.mulf %182, %183 : vector<1x128xf32>
    %185 = arith.mulf %181, %181 : vector<1x128xf32>
    %186 = arith.subf %184, %185 : vector<1x128xf32>
    %cst_64 = arith.constant 0.000000e+00 : f32
    %187 = vector.broadcast %cst_64 : f32 to vector<1x128xf32>
    %188 = arith.maximumf %186, %187 : vector<1x128xf32>
    %cst_65 = arith.constant 9.99999974E-6 : f32
    %189 = vector.broadcast %cst_65 : f32 to vector<1x128xf32>
    %190 = arith.addf %188, %189 : vector<1x128xf32>
    %191 = math.rsqrt %190 : vector<1x128xf32>
    %192 = arith.mulf %141, %191 : vector<1x128xf32>
    %193 = arith.mulf %181, %192 : vector<1x128xf32>
    %194 = arith.subf %142, %193 : vector<1x128xf32>
    %195 = vector.broadcast %192 : vector<1x128xf32> to vector<32x128xf32>
    %196 = arith.mulf %140, %195 : vector<32x128xf32>
    %197 = vector.broadcast %194 : vector<1x128xf32> to vector<32x128xf32>
    %198 = arith.addf %196, %197 : vector<32x128xf32>
    %cst_66 = arith.constant 0.000000e+00 : f32
    %199 = vector.broadcast %cst_66 : f32 to vector<32x128xf32>
    %200 = arith.maximumf %198, %199 : vector<32x128xf32>
    %c0_67 = arith.constant 0 : index
    %c0_68 = arith.constant 0 : index
    %201 = vector.load %arg10[%c0_67, %c0_68] : memref<32x128xf32, #tpu.memory_space<vmem>>, vector<32x128xf32>
    tpu.vector_store %arg10[%c0_67, %c0_68], %200 {strides = array<i32>} : memref<32x128xf32, #tpu.memory_space<vmem>>, vector<32x128xf32>,
    return
  }
  func.func @transform_0(%arg0: i32) -> (i32, i32) {
    %c0_i32 = arith.constant 0 : i32
    %c0_i32_0 = arith.constant 0 : i32
    %c0_i32_1 = arith.constant 0 : i32
    return %c0_i32, %c0_i32_0 : i32, i32
  }
  func.func @transform_1(%arg0: i32) -> (i32, i32) {
    %c0_i32 = arith.constant 0 : i32
    %c0_i32_0 = arith.constant 0 : i32
    %c0_i32_1 = arith.constant 0 : i32
    return %c0_i32, %c0_i32_0 : i32, i32
  }
  func.func @transform_2(%arg0: i32) -> (i32, i32) {
    %c0_i32 = arith.constant 0 : i32
    %c0_i32_0 = arith.constant 0 : i32
    %c0_i32_1 = arith.constant 0 : i32
    return %c0_i32, %c0_i32_0 : i32, i32
  }
  func.func @transform_3(%arg0: i32) -> (i32, i32) {
    %c0_i32 = arith.constant 0 : i32
    %c0_i32_0 = arith.constant 0 : i32
    %c0_i32_1 = arith.constant 0 : i32
    return %c0_i32, %c0_i32_0 : i32, i32
  }
  func.func @transform_4(%arg0: i32) -> (i32, i32) {
    %c0_i32 = arith.constant 0 : i32
    %c0_i32_0 = arith.constant 0 : i32
    %c0_i32_1 = arith.constant 0 : i32
    return %c0_i32, %c0_i32_0 : i32, i32
  }
  func.func @transform_5(%arg0: i32) -> (i32, i32) {
    %c0_i32 = arith.constant 0 : i32
    %c0_i32_0 = arith.constant 0 : i32
    %c0_i32_1 = arith.constant 0 : i32
    return %c0_i32, %c0_i32_0 : i32, i32
  }
  func.func @transform_6(%arg0: i32) -> (i32, i32) {
    %c0_i32 = arith.constant 0 : i32
    %c0_i32_0 = arith.constant 0 : i32
    %c0_i32_1 = arith.constant 0 : i32
    return %c0_i32, %c0_i32_0 : i32, i32
  }
  func.func @transform_7(%arg0: i32) -> (i32, i32) {
    %c0_i32 = arith.constant 0 : i32
    %c0_i32_0 = arith.constant 0 : i32
    %c0_i32_1 = arith.constant 0 : i32
    return %c0_i32, %c0_i32_0 : i32, i32
  }
  func.func @transform_8(%arg0: i32) -> (i32, i32) {
    %c0_i32 = arith.constant 0 : i32
    %c0_i32_0 = arith.constant 0 : i32
    %c0_i32_1 = arith.constant 0 : i32
    return %c0_i32, %c0_i32_0 : i32, i32
  }
  func.func @transform_9(%arg0: i32) -> (i32, i32) {
    %c0_i32 = arith.constant 0 : i32
    %c0_i32_0 = arith.constant 0 : i32
    %c0_i32_1 = arith.constant 0 : i32
    return %c0_i32, %c0_i32_0 : i32, i32
  }
}

</mosaic_0001>

<bundles_post_ra>
// kernel: tile.23
= control target key start
LH: loop header
LB: loop body
LE: loop exit
PB: predicated region body
PF: predicated region fallthrough
CT: control target
= control target key end

     0   :  { %2 = vsyncpa [#allocation1], 0  ;;  %s47_s6 = smov [#allocation0]   ;;  %s76_s0 = inlined_call_operand.hbm [shape: f32[8], index: 0, kind: input, shape index: {}]   ;;  %s77_s1 = inlined_call_operand.vmem [shape: f32[16,8], index: 1, kind: output, shape index: {}]  }
   0x1   :  { %s9_s7 = sshll.u32 %s47_s6, 4  ;;  %s23_s10 = scalar_lea.hbm %s76_s0, 16  ;;  %s10_s7 = int_to_ptr.vmem [resolvable:$true] %s9_s7 }
   0x2   :  { %p24_p0 = scmp.ne.s32.totalorder %s76_s0, %s23_s10  ;;  %p27_p1 = scmp.lt.u32.totalorder %s23_s10, %s76_s0 }
   0x4   :  { %p29_p2 = pnand %p27_p1, %p24_p0 }
   0x6   :  { %32 = shalt.err (!%p29_p2)
}
   0x7   :  { %s33_s15 = scalar_lea.vmem %s10_s7, 16  ;;  %s37_s16 = scalar_lea.vmem %s10_s7, 32 }
   0x8   :  { %p34_p3 = scmp.ne.s32.totalorder %s10_s7, %s33_s15  ;;  %p38_p4 = scmp.lt.s32.totalorder %s10_s7, %s10_s7 }
   0x9   :  { %p39_p5 = scmp.lt.s32.totalorder %s37_s16, %s33_s15 }
   0xb   :  { %p40_p6 = por %p39_p5, %p38_p4 }
   0xd   :  { %p41_p7 = pnand %p40_p6, %p34_p3 }
   0xf   :  { %44 = shalt.err (!%p41_p7)
}
  0x10   :  { %12 = dma.hbm_to_vmem [thread:$0]  %s76_s0, 16, %s10_s7, [#allocation1]  }
  0x11   :  { %45 = dma.done.wait [#allocation1], 16  }
  0x12   :  { %46 = vsyncadd [#allocation1], 4294967280  ;;  %v16_v0 = vld [vmem:[#allocation0] ss:$0 sm:$0xff] }
  0x13   :  { %17 = vst [vmem:[%s77_s1] sm:$0xff] %v16_v0  ;;  %21 = vst [vmem:[%s77_s1 + $0x8] sm:$0xff] %v16_v0 }
  0x14   :  { %20 = vsyncpa [#allocation1], 1 }

// kernel: tile.24
= control target key start
LH: loop header
LB: loop body
LE: loop exit
PB: predicated region body
PF: predicated region fallthrough
CT: control target
= control target key end

     0   :  { %s131_s10 = smov 120   ;;  %s132_s11 = smov 104   ;;  %vm3_vm0 = vcmask 64512   ;;  %vm9_vm1 = vcmask 1048512   ;;  %vm15_vm2 = vcmask 982912   ;;  %vm21_vm3 = vcmask 917312   ;;  %s207_s0 = inlined_call_operand.vmem [shape: f32[16,8], index: 0, kind: input, shape index: {}]   ;;  %s208_s1 = inlined_call_operand.vmem [shape: f32[1,128], index: 1, kind: output, shape index: {}]  }
   0x1   :  { %v101_v0 = vld [vmem:[%s207_s0 + $0xf] sm:$0x1]   ;;  %v103_v1 = vld [vmem:[%s207_s0 + $0xd] sm:$0x1]   ;;  %v102_v2 = vld [vmem:[%s207_s0 + $0xe] sm:$0x1]  }
   0x2   :  { %7 = vrot.lane.b32.xlu0 %v101_v0, %s131_s10  ;;  %19 = vrot.lane.b32.xlu1 %v103_v1, %s132_s11  ;;  %v104_v3 = vld [vmem:[%s207_s0 + $0xc] sm:$0x1]   ;;  %s133_s16 = smov 112   ;;  %s134_s17 = smov 96   ;;  %v105_v4 = vld [vmem:[%s207_s0 + $0xb] sm:$0x1]  }
   0x3   :  { %v106_v5 = vld [vmem:[%s207_s0 + $0xa] sm:$0x1]   ;;  %v2_v6 = vld [vmem:[%s207_s0] sm:$0x1]   ;;  %s135_s24 = smov 88   ;;  %s136_s25 = smov 80  }
   0x4   :  { %4 = vst.msk [vmem:[#allocation0] sm:$0x1] %vm3_vm0, %v2_v6   ;;  %v107_v7 = vld [vmem:[%s207_s0 + $0x9] sm:$0x1]   ;;  %v108_v8 = vld [vmem:[%s207_s0 + $0x8] sm:$0x1]  }
   0x5   :  { %s137_s30 = smov 72   ;;  %s138_s2 = smov 64   ;;  %v109_v9 = vld [vmem:[%s207_s0 + $0x7] sm:$0x1]   ;;  %v110_v10 = vld [vmem:[%s207_s0 + $0x6] sm:$0x1]  }
   0x6   :  { %13 = vrot.lane.b32.xlu0 %v102_v2, %s133_s16  ;;  %25 = vrot.lane.b32.xlu1 %v104_v3, %s134_s17  ;;  %s139_s7 = smov 56   ;;  %s140_s8 = smov 48   ;;  %v111_v11 = vld [vmem:[%s207_s0 + $0x5] sm:$0x1]   ;;  %v112_v12 = vld [vmem:[%s207_s0 + $0x4] sm:$0x1]  }
   0x7   :  { %s141_s13 = smov 40   ;;  %s142_s14 = smov 32   ;;  %v113_v13 = vld [vmem:[%s207_s0 + $0x3] sm:$0x1]   ;;  %v114_v14 = vld [vmem:[%s207_s0 + $0x2] sm:$0x1]  }
   0x8   :  { %s143_s19 = smov 24   ;;  %s144_s20 = smov 16   ;;  %v115_v15 = vld [vmem:[%s207_s0 + $0x1] sm:$0x1]   ;;  %vm27_vm4 = vcmask 851712   ;;  %vm33_vm5 = vcmask 786112  }
   0x9   :  { %s145_s0 = smov 8   ;;  %vm39_vm6 = vcmask 720512   ;;  %vm45_vm7 = vcmask 654912   ;;  %vm51_vm8 = vcmask 589312   ;;  %vm57_vm9 = vcmask 523712  }
   0xa   :  { %31 = vrot.lane.b32.xlu0 %v105_v4, %s135_s24  ;;  %37 = vrot.lane.b32.xlu1 %v106_v5, %s136_s25  ;;  %vm63_vm10 = vcmask 458112   ;;  %vm69_vm11 = vcmask 392512   ;;  %vm75_vm12 = vcmask 326912   ;;  %vm81_vm13 = vcmask 261312  }
   0xb   :  { %vm87_vm14 = vcmask 195712   ;;  %vm93_vm15 = vcmask 130112  }
   0xe   :  { %43 = vrot.lane.b32.xlu0 %v107_v7, %s137_s30  ;;  %49 = vrot.lane.b32.xlu1 %v108_v8, %s138_s2 }
  0x12   :  { %55 = vrot.lane.b32.xlu0 %v109_v9, %s139_s7  ;;  %61 = vrot.lane.b32.xlu1 %v110_v10, %s140_s8 }
  0x16   :  { %67 = vrot.lane.b32.xlu0 %v111_v11, %s141_s13  ;;  %73 = vrot.lane.b32.xlu1 %v112_v12, %s142_s14 }
  0x1a   :  { %79 = vrot.lane.b32.xlu0 %v113_v13, %s143_s19  ;;  %85 = vrot.lane.b32.xlu1 %v114_v14, %s144_s20 }
  0x1e   :  { %91 = vrot.lane.b32.xlu0 %v115_v15, %s145_s0 }
  0x74   :  { %v8_v16 = vpop.permute.xlu0 %7   ;;  %v20_v17 = vpop.permute.xlu1 %19  }
  0x75   :  { %10 = vst.msk [vmem:[#allocation0] sm:$0x1] %vm9_vm1, %v8_v16  }
  0x78   :  { %v14_v18 = vpop.permute.xlu0 %13   ;;  %v26_v19 = vpop.permute.xlu1 %25  }
  0x79   :  { %16 = vst.msk [vmem:[#allocation0] sm:$0x1] %vm15_vm2, %v14_v18  }
  0x7a   :  { %22 = vst.msk [vmem:[#allocation0] sm:$0x1] %vm21_vm3, %v20_v17  }
  0x7b   :  { %28 = vst.msk [vmem:[#allocation0] sm:$0x1] %vm27_vm4, %v26_v19  }
  0x7c   :  { %v32_v20 = vpop.permute.xlu0 %31   ;;  %v38_v21 = vpop.permute.xlu1 %37  }
  0x7d   :  { %34 = vst.msk [vmem:[#allocation0] sm:$0x1] %vm33_vm5, %v32_v20  }
  0x7e   :  { %40 = vst.msk [vmem:[#allocation0] sm:$0x1] %vm39_vm6, %v38_v21  }
  0x80   :  { %v44_v22 = vpop.permute.xlu0 %43   ;;  %v50_v23 = vpop.permute.xlu1 %49  }
  0x81   :  { %46 = vst.msk [vmem:[#allocation0] sm:$0x1] %vm45_vm7, %v44_v22  }
  0x82   :  { %52 = vst.msk [vmem:[#allocation0] sm:$0x1] %vm51_vm8, %v50_v23  }
  0x84   :  { %v56_v24 = vpop.permute.xlu0 %55   ;;  %v62_v25 = vpop.permute.xlu1 %61  }
  0x85   :  { %58 = vst.msk [vmem:[#allocation0] sm:$0x1] %vm57_vm9, %v56_v24  }
  0x86   :  { %64 = vst.msk [vmem:[#allocation0] sm:$0x1] %vm63_vm10, %v62_v25  }
  0x88   :  { %v68_v26 = vpop.permute.xlu0 %67   ;;  %v74_v27 = vpop.permute.xlu1 %73  }
  0x89   :  { %70 = vst.msk [vmem:[#allocation0] sm:$0x1] %vm69_vm11, %v68_v26  }
  0x8a   :  { %76 = vst.msk [vmem:[#allocation0] sm:$0x1] %vm75_vm12, %v74_v27  }
  0x8c   :  { %v80_v28 = vpop.permute.xlu0 %79   ;;  %v86_v29 = vpop.permute.xlu1 %85  }
  0x8d   :  { %82 = vst.msk [vmem:[#allocation0] sm:$0x1] %vm81_vm13, %v80_v28  }
  0x8e   :  { %88 = vst.msk [vmem:[#allocation0] sm:$0x1] %vm87_vm14, %v86_v29  }
  0x90   :  { %v92_v30 = vpop.permute.xlu0 %91  }
  0x91   :  { %94 = vst.msk [vmem:[#allocation0] sm:$0x1] %vm93_vm15, %v92_v30  }
  0x98   :  { %v98_v31 = vld [vmem:[#allocation0] sm:$0x1] }
  0x99   :  { %100 = vst [vmem:[%s208_s1] sm:$0x1] %v98_v31 }

// kernel: squeeze.2
= control target key start
LH: loop header
LB: loop body
LE: loop exit
PB: predicated region body
PF: predicated region fallthrough
CT: control target
= control target key end

     0   :  { %s14531_s0 = inlined_call_operand.vmem [shape: bf16[1,16,8,16,8], index: 0, kind: input, shape index: {}]   ;;  %s14532_s1 = inlined_call_operand.vmem [shape: bf16[128,128], index: 1, kind: output, shape index: {}]  }
   0x1   :  { %14536 = sst [smem:[#allocation11_spill]] %s14532_s1 }
   0x2   :  { %v12008_v0 = vld [vmem:[%s14531_s0 + $0x138] sm:$0xff]   ;;  %v11224_v1 = vld [vmem:[%s14531_s0 + $0x130] sm:$0xff]   ;;  %v11225_v2 = vld [vmem:[%s14531_s0 + $0x128] sm:$0xff]   ;;  %s12026_s18 = smov 3  ;;  %s12028_s19 = smov 12  ;;  %vm4101_vm0 = vcmask 1043458  }
   0x3   :  { %v10938_v3 = vunpack.c.h.bf16 %v12008_v0  ;;  %v10941_v4 = vunpack.c.l.bf16 %v11224_v1  ;;  %v10942_v5 = vunpack.c.h.bf16 %v11224_v1  ;;  %v10945_v6 = vunpack.c.l.bf16 %v11225_v2  ;;  %v11226_v7 = vld [vmem:[%s14531_s0 + $0x120] sm:$0xff]   ;;  %v11227_v8 = vld [vmem:[%s14531_s0 + $0x118] sm:$0xff]   ;;  %v11228_v9 = vld [vmem:[%s14531_s0 + $0x110] sm:$0xff]   ;;  %s12039_s26 = smov 48  ;;  %s12041_s27 = smov 192 }
   0x4   :  { %v10946_v10 = vunpack.c.h.bf16 %v11225_v2  ;;  %v10949_v11 = vunpack.c.l.bf16 %v11226_v7  ;;  %v10950_v12 = vunpack.c.h.bf16 %v11226_v7  ;;  %v10953_v13 = vunpack.c.l.bf16 %v11227_v8  ;;  %v11229_v14 = vld [vmem:[%s14531_s0 + $0x108] sm:$0xff]   ;;  %v11230_v15 = vld [vmem:[%s14531_s0 + $0x100] sm:$0xff]   ;;  %v11255_v16 = vld [vmem:[%s14531_s0 + $0x38] sm:$0xff]   ;;  %s12052_s5 = smov 3  ;;  %s12060_s10 = smov 12 }
   0x5   :  { %2836 = vst [vmem:[#allocation1 + $0x278] sm:$0xff] %v10938_v3  ;;  %2868 = vst [vmem:[#allocation1 + $0x268] sm:$0xff] %v10942_v5  ;;  %v10954_v17 = vunpack.c.h.bf16 %v11227_v8  ;;  %v10957_v18 = vunpack.c.l.bf16 %v11228_v9  ;;  %v10958_v19 = vunpack.c.h.bf16 %v11228_v9  ;;  %v10961_v20 = vunpack.c.l.bf16 %v11229_v14  ;;  %v11256_v21 = vld [vmem:[%s14531_s0 + $0x30] sm:$0xff]   ;;  %v11257_v22 = vld [vmem:[%s14531_s0 + $0x28] sm:$0xff]   ;;  %s12062_s11 = smov 48  ;;  %s12070_s16 = smov 192 }
   0x6   :  { %v11258_v23 = vld [vmem:[%s14531_s0 + $0x20] sm:$0xff]   ;;  %2884 = vst [vmem:[#allocation1 + $0x260] sm:$0xff] %v10941_v4  ;;  %2916 = vst [vmem:[#allocation1 + $0x250] sm:$0xff] %v10945_v6  ;;  %v10962_v24 = vunpack.c.h.bf16 %v11229_v14  ;;  %v10965_v25 = vunpack.c.l.bf16 %v11230_v15  ;;  %v10966_v26 = vunpack.c.h.bf16 %v11230_v15  ;;  %v11065_v27 = vunpack.c.l.bf16 %v11255_v16  ;;  %v11259_v28 = vld [vmem:[%s14531_s0 + $0x18] sm:$0xff]   ;;  %s12072_s17 = smov 3  ;;  %s12082_s24 = smov 12 }
   0x7   :  { %2900 = vst [vmem:[#allocation1 + $0x258] sm:$0xff] %v10946_v10  ;;  %2932 = vst [vmem:[#allocation1 + $0x248] sm:$0xff] %v10950_v12  ;;  %v11260_v29 = vld [vmem:[%s14531_s0 + $0x10] sm:$0xff]   ;;  %vm4105_vm1 = vcmask 1045508   ;;  %v11066_v30 = vunpack.c.h.bf16 %v11255_v16  ;;  %v11069_v31 = vunpack.c.l.bf16 %v11256_v21  ;;  %v11070_v32 = vunpack.c.h.bf16 %v11256_v21  ;;  %v11261_v34 = vld [vmem:[%s14531_s0 + $0x8] sm:$0xff]   ;;  %s12084_s25 = smov 48 }
   0x8   :  { %2948 = vst [vmem:[#allocation1 + $0x240] sm:$0xff] %v10949_v11  ;;  %2980 = vst [vmem:[#allocation1 + $0x230] sm:$0xff] %v10953_v13  ;;  %v11073_v33 = vunpack.c.l.bf16 %v11257_v22  ;;  %v11092_v35 = vld [vmem:[%s14531_s0] sm:$0xff]   ;;  %vm4109_vm2 = vcmask 1047558   ;;  %v11074_v36 = vunpack.c.h.bf16 %v11257_v22  ;;  %v11077_v37 = vunpack.c.l.bf16 %v11258_v23  ;;  %v12077_v40 = vld [vmem:[%s14531_s0 + $0x178] sm:$0xff]   ;;  %s12092_s3 = smov 192 }
   0x9   :  { %2964 = vst [vmem:[#allocation1 + $0x238] sm:$0xff] %v10954_v17  ;;  %2996 = vst [vmem:[#allocation1 + $0x228] sm:$0xff] %v10958_v19  ;;  %v11078_v38 = vunpack.c.h.bf16 %v11258_v23  ;;  %v11081_v39 = vunpack.c.l.bf16 %v11259_v28  ;;  %v11216_v41 = vld [vmem:[%s14531_s0 + $0x170] sm:$0xff]   ;;  %v11082_v42 = vunpack.c.h.bf16 %v11259_v28  ;;  %v11085_v43 = vunpack.c.l.bf16 %v11260_v29  ;;  %v11217_v46 = vld [vmem:[%s14531_s0 + $0x168] sm:$0xff]   ;;  %s12094_s4 = smov 3  ;;  %s12105_s12 = smov 12 }
   0xa   :  { %3012 = vst [vmem:[#allocation1 + $0x220] sm:$0xff] %v10957_v18  ;;  %3044 = vst [vmem:[#allocation1 + $0x210] sm:$0xff] %v10961_v20  ;;  %v11086_v44 = vunpack.c.h.bf16 %v11260_v29  ;;  %v11089_v45 = vunpack.c.l.bf16 %v11261_v34  ;;  %v11218_v47 = vld [vmem:[%s14531_s0 + $0x160] sm:$0xff]   ;;  %v11090_v48 = vunpack.c.h.bf16 %v11261_v34  ;;  %v11093_v49 = vunpack.c.l.bf16 %v11092_v35  ;;  %v11219_v52 = vld [vmem:[%s14531_s0 + $0x158] sm:$0xff]   ;;  %s12107_s13 = smov 48  ;;  %s12118_s22 = smov 192 }
   0xb   :  { %3028 = vst [vmem:[#allocation1 + $0x218] sm:$0xff] %v10962_v24  ;;  %3060 = vst [vmem:[#allocation1 + $0x208] sm:$0xff] %v10966_v26  ;;  %v11094_v50 = vunpack.c.h.bf16 %v11092_v35  ;;  %v10937_v51 = vunpack.c.l.bf16 %v12008_v0  ;;  %v12103_v53 = vld [vmem:[%s14531_s0 + $0x150] sm:$0xff]   ;;  %v10906_v54 = vunpack.c.h.bf16 %v12077_v40  ;;  %v10909_v55 = vunpack.c.l.bf16 %v11216_v41  ;;  %v11221_v58 = vld [vmem:[%s14531_s0 + $0x148] sm:$0xff]   ;;  %s12120_s23 = smov 3  ;;  %s12135_s8 = smov 12 }
   0xc   :  { %3076 = vst [vmem:[#allocation1 + $0x200] sm:$0xff] %v10965_v25  ;;  %3876 = vst [vmem:[#allocation1 + $0x70] sm:$0xff] %v11065_v27  ;;  %v10910_v56 = vunpack.c.h.bf16 %v11216_v41  ;;  %v10913_v57 = vunpack.c.l.bf16 %v11217_v46  ;;  %v12116_v59 = vld [vmem:[%s14531_s0 + $0x140] sm:$0xff]   ;;  %v10914_v60 = vunpack.c.h.bf16 %v11217_v46  ;;  %v10917_v61 = vunpack.c.l.bf16 %v11218_v47  ;;  %v11247_v0 = vld [vmem:[%s14531_s0 + $0x78] sm:$0xff]   ;;  %s12137_s9 = smov 48  ;;  %s12156_s30 = smov 192 }
   0xd   :  { %3860 = vst [vmem:[#allocation1 + $0x78] sm:$0xff] %v11066_v30  ;;  %3892 = vst [vmem:[#allocation1 + $0x68] sm:$0xff] %v11070_v32  ;;  %v10918_v62 = vunpack.c.h.bf16 %v11218_v47  ;;  %v10921_v63 = vunpack.c.l.bf16 %v11219_v52  ;;  %v12128_v1 = vld [vmem:[%s14531_s0 + $0x70] sm:$0xff]   ;;  %v12133_v2 = vld [vmem:[%s14531_s0 + $0x68] sm:$0xff]   ;;  %v10922_v3 = vunpack.c.h.bf16 %v11219_v52  ;;  %v10925_v4 = vunpack.c.l.bf16 %v12103_v53  ;;  %s12158_s2 = smov 3  ;;  %s12177_s28 = smov 12 }
   0xe   :  { %3908 = vst [vmem:[#allocation1 + $0x60] sm:$0xff] %v11069_v31  ;;  %3940 = vst [vmem:[#allocation1 + $0x50] sm:$0xff] %v11073_v33  ;;  %v10926_v5 = vunpack.c.h.bf16 %v12103_v53  ;;  %v10929_v6 = vunpack.c.l.bf16 %v11221_v58  ;;  %v12144_v7 = vld [vmem:[%s14531_s0 + $0x60] sm:$0xff]   ;;  %v12149_v8 = vld [vmem:[%s14531_s0 + $0x58] sm:$0xff]   ;;  %v10930_v10 = vunpack.c.h.bf16 %v11221_v58  ;;  %v10933_v11 = vunpack.c.l.bf16 %v12116_v59  ;;  %s12179_s29 = smov 48  ;;  %s12224_s6 = smov 3 }
   0xf   :  { %3924 = vst [vmem:[#allocation1 + $0x58] sm:$0xff] %v11074_v36  ;;  %3956 = vst [vmem:[#allocation1 + $0x48] sm:$0xff] %v11078_v38  ;;  %v12154_v9 = vld [vmem:[%s14531_s0 + $0x50] sm:$0xff]   ;;  %v10934_v12 = vunpack.c.h.bf16 %v12116_v59  ;;  %v11033_v13 = vunpack.c.l.bf16 %v11247_v0  ;;  %v12165_v14 = vld [vmem:[%s14531_s0 + $0x48] sm:$0xff]   ;;  %v11034_v20 = vunpack.c.h.bf16 %v11247_v0  ;;  %v11037_v21 = vunpack.c.l.bf16 %v12128_v1  ;;  %s12270_s7 = smov 192  ;;  %s12272_s14 = smov 3 }
  0x10   :  { %3972 = vst [vmem:[#allocation1 + $0x40] sm:$0xff] %v11077_v37  ;;  %4004 = vst [vmem:[#allocation1 + $0x30] sm:$0xff] %v11081_v39  ;;  %v12170_v15 = vld [vmem:[%s14531_s0 + $0x40] sm:$0xff]   ;;  %v12175_v16 = vld [vmem:[%s14531_s0 + $0x338] sm:$0xff]   ;;  %v11038_v22 = vunpack.c.h.bf16 %v12128_v1  ;;  %v11041_v23 = vunpack.c.l.bf16 %v12133_v2  ;;  %v11042_v29 = vunpack.c.h.bf16 %v12133_v2  ;;  %v11045_v30 = vunpack.c.l.bf16 %v12144_v7  ;;  %s12352_s20 = smov 12  ;;  %s12354_s21 = smov 48 }
  0x11   :  { %3988 = vst [vmem:[#allocation1 + $0x38] sm:$0xff] %v11082_v42  ;;  %4020 = vst [vmem:[#allocation1 + $0x28] sm:$0xff] %v11086_v44  ;;  %v12190_v24 = vld [vmem:[%s14531_s0 + $0x330] sm:$0xff]   ;;  %v12195_v25 = vld [vmem:[%s14531_s0 + $0x328] sm:$0xff]   ;;  %v11046_v31 = vunpack.c.h.bf16 %v12144_v7  ;;  %v11049_v36 = vunpack.c.l.bf16 %v12149_v8  ;;  %v11050_v37 = vunpack.c.h.bf16 %v12149_v8  ;;  %v11053_v38 = vunpack.c.l.bf16 %v12154_v9  ;;  %s12376_s15 = smov 3  ;;  %s12425_s1 = smov 12 }
  0x12   :  { %4036 = vst [vmem:[#allocation1 + $0x20] sm:$0xff] %v11085_v43  ;;  %4068 = vst [vmem:[#allocation1 + $0x10] sm:$0xff] %v11089_v45  ;;  %v4452_v17 = vld [vmem:[#allocation1 + $0x20f] ss:$16 sm:%s12052_s5]   ;;  %v12200_v26 = vld [vmem:[%s14531_s0 + $0x320] sm:$0xff]   ;;  %s12245_s5 = smov 12  ;;  %v11054_v44 = vunpack.c.h.bf16 %v12154_v9  ;;  %v11057_v45 = vunpack.c.l.bf16 %v12165_v14  ;;  %v11058_v46 = vunpack.c.h.bf16 %v12165_v14  ;;  %v11061_v53 = vunpack.c.l.bf16 %v12170_v15 }
  0x13   :  { %4052 = vst [vmem:[#allocation1 + $0x18] sm:$0xff] %v11090_v48  ;;  %4083 = vst [vmem:[#allocation1 + $0x8] sm:$0xff] %v11094_v50  ;;  %v4455_v18 = vld [vmem:[#allocation1 + $0x20f] ss:$16 sm:%s12060_s10]   ;;  %v12215_v33 = vld [vmem:[%s14531_s0 + $0x310] sm:$0xff]   ;;  %s12247_s10 = smov 48  ;;  %v10905_v40 = vunpack.c.l.bf16 %v12077_v40 }
  0x14   :  { %2852 = vst [vmem:[#allocation1 + $0x270] sm:$0xff] %v10937_v51  ;;  %4096 = vst [vmem:[#allocation1] sm:$0xff] %v11093_v49  ;;  %v4460_v19 = vld [vmem:[#allocation1 + $0x20f] ss:$16 sm:%s12062_s11]   ;;  %v4457_v27 = vsel %vm4101_vm0, %v4455_v18, %v4452_v17  ;;  %s12222_s11 = smov 192  ;;  %v12233_v39 = vld [vmem:[%s14531_s0 + $0x300] sm:$0xff]  }
  0x15   :  { %2580 = vst [vmem:[#allocation1 + $0x2f8] sm:$0xff] %v10906_v54  ;;  %2612 = vst [vmem:[#allocation1 + $0x2e8] sm:$0xff] %v10910_v56  ;;  %v4465_v28 = vld [vmem:[#allocation1 + $0x20f] ss:$16 sm:%s12070_s16]   ;;  %v4462_v35 = vsel %vm4105_vm1, %v4460_v19, %v4457_v27  ;;  %v12243_v42 = vld [vmem:[%s14531_s0 + $0x230] sm:$0xff]   ;;  %v11062_v54 = vunpack.c.h.bf16 %v12170_v15  ;;  %s12331_s16 = smov 3  ;;  %v10710_v9 = vunpack.c.h.bf16 %v12233_v39 }
  0x16   :  { %2628 = vst [vmem:[#allocation1 + $0x2e0] sm:$0xff] %v10909_v55  ;;  %2660 = vst [vmem:[#allocation1 + $0x2d0] sm:$0xff] %v10913_v57  ;;  %v12210_v32 = vld [vmem:[%s14531_s0 + $0x318] sm:$0xff]   ;;  %v12220_v34 = vld [vmem:[%s14531_s0 + $0x308] sm:$0xff]   ;;  %v12250_v43 = vsel %vm4109_vm2, %v4465_v28, %v4462_v35  ;;  %v10682_v55 = vunpack.c.h.bf16 %v12175_v16  ;;  %vm4111_vm3 = vcmask 64512   ;;  %vm4448_vm4 = vcmask 1048512  }
  0x17   :  { %2644 = vst [vmem:[#allocation1 + $0x2d8] sm:$0xff] %v10914_v60  ;;  %2676 = vst [vmem:[#allocation1 + $0x2c8] sm:$0xff] %v10918_v62  ;;  %v12238_v41 = vld [vmem:[%s14531_s0 + $0x238] sm:$0xff]   ;;  %v12258_v47 = vld [vmem:[%s14531_s0 + $0x228] sm:$0xff]   ;;  %v10686_v60 = vunpack.c.h.bf16 %v12190_v24  ;;  %v10694_v62 = vunpack.c.h.bf16 %v12200_v26  ;;  %v10698_v2 = vunpack.c.h.bf16 %v12210_v32  ;;  %vm4815_vm5 = vcmask 982912  }
  0x18   :  { %2692 = vst [vmem:[#allocation1 + $0x2c0] sm:$0xff] %v10917_v61  ;;  %2724 = vst [vmem:[#allocation1 + $0x2b0] sm:$0xff] %v10921_v63  ;;  %v12263_v48 = vld [vmem:[%s14531_s0 + $0x220] sm:$0xff]   ;;  %v12268_v49 = vld [vmem:[%s14531_s0 + $0x218] sm:$0xff]   ;;  %v10690_v61 = vunpack.c.h.bf16 %v12195_v25  ;;  %v10818_v19 = vunpack.c.h.bf16 %v12258_v47  ;;  %vm5182_vm6 = vcmask 917312   ;;  %vm5549_vm7 = vcmask 851712  }
  0x19   :  { %2708 = vst [vmem:[#allocation1 + $0x2b8] sm:$0xff] %v10922_v3  ;;  %2740 = vst [vmem:[#allocation1 + $0x2a8] sm:$0xff] %v10926_v5  ;;  %v12284_v56 = vld [vmem:[%s14531_s0 + $0x210] sm:$0xff]   ;;  %v12289_v57 = vld [vmem:[%s14531_s0 + $0x208] sm:$0xff]   ;;  %v10702_v3 = vunpack.c.h.bf16 %v12215_v33  ;;  %vm5916_vm8 = vcmask 786112   ;;  %vm6283_vm9 = vcmask 720512  }
  0x1a   :  { %2756 = vst [vmem:[#allocation1 + $0x2a0] sm:$0xff] %v10925_v4  ;;  %2788 = vst [vmem:[#allocation1 + $0x290] sm:$0xff] %v10929_v6  ;;  %v4430_v50 = vld [vmem:[#allocation1 + $0xf] ss:$16 sm:%s12026_s18]   ;;  %v12299_v63 = vld [vmem:[%s14531_s0 + $0x200] sm:$0xff]   ;;  %s12306_s18 = smov 12  ;;  %v10706_v4 = vunpack.c.h.bf16 %v12220_v34  ;;  %v10830_v24 = vunpack.c.h.bf16 %v12284_v56  ;;  %v10834_v25 = vunpack.c.h.bf16 %v12289_v57 }
  0x1b   :  { %2772 = vst [vmem:[#allocation1 + $0x298] sm:$0xff] %v10930_v10  ;;  %2804 = vst [vmem:[#allocation1 + $0x288] sm:$0xff] %v10934_v12  ;;  %v4433_v51 = vld [vmem:[#allocation1 + $0xf] ss:$16 sm:%s12028_s19]   ;;  %s12308_s19 = smov 48  ;;  %v12317_v5 = vld [vmem:[%s14531_s0 + $0x370] sm:$0xff]   ;;  %v10810_v10 = vunpack.c.h.bf16 %v12238_v41  ;;  %v10838_v26 = vunpack.c.h.bf16 %v12299_v63 }
  0x1c   :  { %2820 = vst [vmem:[#allocation1 + $0x280] sm:$0xff] %v10933_v11  ;;  %3620 = vst [vmem:[#allocation1 + $0xf0] sm:$0xff] %v11033_v13  ;;  %v4438_v52 = vld [vmem:[#allocation1 + $0xf] ss:$16 sm:%s12039_s26]   ;;  %v4435_v58 = vsel %vm4101_vm0, %v4433_v51, %v4430_v50  ;;  %v12327_v7 = vld [vmem:[%s14531_s0 + $0x360] sm:$0xff]   ;;  %s12329_s26 = smov 192  ;;  %v10814_v11 = vunpack.c.h.bf16 %v12243_v42 }
  0x1d   :  { %3604 = vst [vmem:[#allocation1 + $0xf8] sm:$0xff] %v11034_v20  ;;  %3636 = vst [vmem:[#allocation1 + $0xe8] sm:$0xff] %v11038_v22  ;;  %v4443_v59 = vld [vmem:[#allocation1 + $0xf] ss:$16 sm:%s12041_s27]   ;;  %v4440_v1 = vsel %vm4105_vm1, %v4438_v52, %v4435_v58  ;;  %v12345_v13 = vld [vmem:[%s14531_s0 + $0x350] sm:$0xff]   ;;  %v10822_v20 = vunpack.c.h.bf16 %v12263_v48  ;;  %s12374_s27 = smov 192 }
  0x1e   :  { %3652 = vst [vmem:[#allocation1 + $0xe0] sm:$0xff] %v11037_v21  ;;  %3684 = vst [vmem:[#allocation1 + $0xd0] sm:$0xff] %v11041_v23  ;;  %v12304_v0 = vld [vmem:[%s14531_s0 + $0x378] sm:$0xff]   ;;  %v12322_v6 = vld [vmem:[%s14531_s0 + $0x368] sm:$0xff]   ;;  %v4445_v8 = vsel %vm4109_vm2, %v4443_v59, %v4440_v1  ;;  %v10826_v21 = vunpack.c.h.bf16 %v12268_v49  ;;  %v10670_v39 = vunpack.c.h.bf16 %v12345_v13  ;;  %vm6650_vm10 = vcmask 654912  }
  0x1f   :  { %3668 = vst [vmem:[#allocation1 + $0xd8] sm:$0xff] %v11042_v29  ;;  %3700 = vst [vmem:[#allocation1 + $0xc8] sm:$0xff] %v11046_v31  ;;  %v12340_v12 = vld [vmem:[%s14531_s0 + $0x358] sm:$0xff]   ;;  %v12350_v14 = vld [vmem:[%s14531_s0 + $0x348] sm:$0xff]   ;;  %v11284_v15 = vpack.i.bf16 %v12250_v43, %v4445_v8  ;;  %v10654_v31 = vunpack.c.h.bf16 %v12317_v5  ;;  %v10658_v32 = vunpack.c.h.bf16 %v12322_v6  ;;  %vm7017_vm11 = vcmask 589312  }
  0x20   :  { %3716 = vst [vmem:[#allocation1 + $0xc0] sm:$0xff] %v11045_v30  ;;  %3732 = vst [vmem:[#allocation1 + $0xb8] sm:$0xff] %v11050_v37  ;;  %v11158_v27 = vld [vmem:[%s14531_s0 + $0x340] sm:$0xff]   ;;  %v11183_v28 = vld [vmem:[%s14531_s0 + $0x278] sm:$0xff]   ;;  %v10650_v30 = vunpack.c.h.bf16 %v12304_v0  ;;  %v10662_v37 = vunpack.c.h.bf16 %v12327_v7  ;;  %vm7384_vm12 = vcmask 523712   ;;  %vm7751_vm13 = vcmask 458112  }
  0x21   :  { %3748 = vst [vmem:[#allocation1 + $0xb0] sm:$0xff] %v11049_v36  ;;  %3780 = vst [vmem:[#allocation1 + $0xa0] sm:$0xff] %v11053_v38  ;;  %v11184_v33 = vld [vmem:[%s14531_s0 + $0x270] sm:$0xff]   ;;  %v11185_v34 = vld [vmem:[%s14531_s0 + $0x268] sm:$0xff]   ;;  %v10666_v38 = vunpack.c.h.bf16 %v12340_v12  ;;  %vm8118_vm14 = vcmask 392512   ;;  %vm8485_vm15 = vcmask 326912  }
  0x22   :  { %3764 = vst [vmem:[#allocation1 + $0xa8] sm:$0xff] %v11054_v44  ;;  %3796 = vst [vmem:[#allocation1 + $0x98] sm:$0xff] %v11058_v46  ;;  %v4544_v16 = vld [vmem:[#allocation1 + $0x28f] ss:$16 sm:%s12094_s4]   ;;  %s14533_s4 = smov 120   ;;  %v11186_v35 = vld [vmem:[%s14531_s0 + $0x260] sm:$0xff]   ;;  %v10674_v44 = vunpack.c.h.bf16 %v12350_v14  ;;  %v10778_v46 = vunpack.c.h.bf16 %v11183_v28  ;;  %v10782_v47 = vunpack.c.h.bf16 %v11184_v33 }
  0x23   :  { %3812 = vst [vmem:[#allocation1 + $0x90] sm:$0xff] %v11057_v45  ;;  %3828 = vst [vmem:[#allocation1 + $0x88] sm:$0xff] %v11062_v54  ;;  %v4547_v17 = vld [vmem:[#allocation1 + $0x28f] ss:$16 sm:%s12105_s12]   ;;  %11285 = vrot.lane.b32.xlu0 %v11284_v15, %s14533_s4  ;;  %s12392_s12 = smov 12  ;;  %v11188_v42 = vld [vmem:[%s14531_s0 + $0x250] sm:$0xff]   ;;  %v10678_v45 = vunpack.c.h.bf16 %v11158_v27  ;;  %v10786_v54 = vunpack.c.h.bf16 %v11185_v34 }
  0x24   :  { %2596 = vst [vmem:[#allocation1 + $0x2f0] sm:$0xff] %v10905_v40  ;;  %3844 = vst [vmem:[#allocation1 + $0x80] sm:$0xff] %v11061_v53  ;;  %v4552_v18 = vld [vmem:[#allocation1 + $0x28f] ss:$16 sm:%s12107_s13]   ;;  %v4549_v22 = vsel %vm4101_vm0, %v4547_v17, %v4544_v16  ;;  %s12394_s13 = smov 48  ;;  %s12411_s4 = smov 192  ;;  %v10790_v40 = vunpack.c.h.bf16 %v11186_v35  ;;  %v10798_v56 = vunpack.c.h.bf16 %v11188_v42 }
  0x25   :  { %788 = vst [vmem:[#allocation1 + $0x678] sm:$0xff] %v10682_v55  ;;  %820 = vst [vmem:[#allocation1 + $0x668] sm:$0xff] %v10686_v60  ;;  %v4557_v23 = vld [vmem:[#allocation1 + $0x28f] ss:$16 sm:%s12118_s22]   ;;  %v4554_v29 = vsel %vm4105_vm1, %v4552_v18, %v4549_v22  ;;  %s12413_s22 = smov 3  ;;  %v11190_v48 = vld [vmem:[%s14531_s0 + $0x240] sm:$0xff]  }
  0x26   :  { %852 = vst [vmem:[#allocation1 + $0x658] sm:$0xff] %v10690_v61  ;;  %884 = vst [vmem:[#allocation1 + $0x648] sm:$0xff] %v10694_v62  ;;  %v12397_v36 = vsel %vm4109_vm2, %v4557_v23, %v4554_v29  ;;  %v11187_v41 = vld [vmem:[%s14531_s0 + $0x258] sm:$0xff]   ;;  %v11189_v43 = vld [vmem:[%s14531_s0 + $0x248] sm:$0xff]   ;;  %14537 = sst [smem:[#allocation2_spill]] %s12413_s22  ;;  %s12427_s22 = smov 48  ;;  %v10806_v60 = vunpack.c.h.bf16 %v11190_v48 }
  0x27   :  { %916 = vst [vmem:[#allocation1 + $0x638] sm:$0xff] %v10698_v2  ;;  %948 = vst [vmem:[#allocation1 + $0x628] sm:$0xff] %v10702_v3  ;;  %v11207_v49 = vld [vmem:[%s14531_s0 + $0x1b8] sm:$0xff]   ;;  %v11208_v50 = vld [vmem:[%s14531_s0 + $0x1b0] sm:$0xff]   ;;  %v10794_v55 = vunpack.c.h.bf16 %v11187_v41  ;;  %v10802_v59 = vunpack.c.h.bf16 %v11189_v43 }
  0x28   :  { %980 = vst [vmem:[#allocation1 + $0x618] sm:$0xff] %v10706_v4  ;;  %1012 = vst [vmem:[#allocation1 + $0x608] sm:$0xff] %v10710_v9  ;;  %v10874_v61 = vunpack.c.h.bf16 %v11207_v49  ;;  %v11209_v62 = vld [vmem:[%s14531_s0 + $0x1a8] sm:$0xff]   ;;  %v11210_v63 = vld [vmem:[%s14531_s0 + $0x1a0] sm:$0xff]   ;;  %v10878_v1 = vunpack.c.h.bf16 %v11208_v50 }
  0x29   :  { %1812 = vst [vmem:[#allocation1 + $0x478] sm:$0xff] %v10810_v10  ;;  %1844 = vst [vmem:[#allocation1 + $0x468] sm:$0xff] %v10814_v11  ;;  %v10882_v2 = vunpack.c.h.bf16 %v11209_v62  ;;  %v10886_v3 = vunpack.c.h.bf16 %v11210_v63  ;;  %v11211_v4 = vld [vmem:[%s14531_s0 + $0x198] sm:$0xff]   ;;  %v11212_v5 = vld [vmem:[%s14531_s0 + $0x190] sm:$0xff]  }
  0x2a   :  { %1876 = vst [vmem:[#allocation1 + $0x458] sm:$0xff] %v10818_v19  ;;  %1908 = vst [vmem:[#allocation1 + $0x448] sm:$0xff] %v10822_v20  ;;  %v4521_v51 = vld [vmem:[#allocation1 + $0x8f] ss:$16 sm:%s12072_s17]   ;;  %s12440_s17 = smov 192  ;;  %v10890_v11 = vunpack.c.h.bf16 %v11211_v4  ;;  %v10894_v12 = vunpack.c.h.bf16 %v11212_v5  ;;  %v11214_v17 = vld [vmem:[%s14531_s0 + $0x180] sm:$0xff]  }
  0x2b   :  { %1940 = vst [vmem:[#allocation1 + $0x438] sm:$0xff] %v10826_v21  ;;  %1972 = vst [vmem:[#allocation1 + $0x428] sm:$0xff] %v10830_v24  ;;  %v4524_v52 = vld [vmem:[#allocation1 + $0x8f] ss:$16 sm:%s12082_s24]   ;;  %s12442_s24 = smov 3  ;;  %v10902_v23 = vunpack.c.h.bf16 %v11214_v17  ;;  %v11240_v28 = vld [vmem:[%s14531_s0 + $0xb0] sm:$0xff]  }
  0x2c   :  { %2004 = vst [vmem:[#allocation1 + $0x418] sm:$0xff] %v10834_v25  ;;  %2036 = vst [vmem:[#allocation1 + $0x408] sm:$0xff] %v10838_v26  ;;  %v4529_v53 = vld [vmem:[#allocation1 + $0x8f] ss:$16 sm:%s12084_s25]   ;;  %v4526_v57 = vsel %vm4101_vm0, %v4524_v52, %v4521_v51  ;;  %s12454_s25 = smov 12  ;;  %v11242_v33 = vld [vmem:[%s14531_s0 + $0xa0] sm:$0xff]  }
  0x2d   :  { %532 = vst [vmem:[#allocation1 + $0x6f8] sm:$0xff] %v10650_v30  ;;  %564 = vst [vmem:[#allocation1 + $0x6e8] sm:$0xff] %v10654_v31  ;;  %v4534_v58 = vld [vmem:[#allocation1 + $0x8f] ss:$16 sm:%s12092_s3]   ;;  %v4531_v0 = vsel %vm4105_vm1, %v4529_v53, %v4526_v57  ;;  %s12456_s3 = smov 48  ;;  %v11006_v31 = vunpack.c.h.bf16 %v11240_v28  ;;  %v11244_v35 = vld [vmem:[%s14531_s0 + $0x90] sm:$0xff]   ;;  %v11014_v41 = vunpack.c.h.bf16 %v11242_v33 }
  0x2e   :  { %596 = vst [vmem:[#allocation1 + $0x6d8] sm:$0xff] %v10658_v32  ;;  %628 = vst [vmem:[#allocation1 + $0x6c8] sm:$0xff] %v10662_v37  ;;  %v11213_v6 = vld [vmem:[%s14531_s0 + $0x188] sm:$0xff]   ;;  %v4536_v7 = vsel %vm4109_vm2, %v4534_v58, %v4531_v0  ;;  %v11239_v18 = vld [vmem:[%s14531_s0 + $0xb8] sm:$0xff]   ;;  %v11022_v43 = vunpack.c.h.bf16 %v11244_v35 }
  0x2f   :  { %660 = vst [vmem:[#allocation1 + $0x6b8] sm:$0xff] %v10666_v38  ;;  %692 = vst [vmem:[#allocation1 + $0x6a8] sm:$0xff] %v10670_v39  ;;  %v4498_v8 = vld [vmem:[#allocation1 + $0x60f] ss:$16 sm:%s12158_s2]   ;;  %v10898_v13 = vunpack.c.h.bf16 %v11213_v6  ;;  %v11294_v14 = vpack.i.bf16 %v12397_v36, %v4536_v7  ;;  %s12471_s2 = smov 192  ;;  %v11002_v24 = vunpack.c.h.bf16 %v11239_v18  ;;  %v11246_v48 = vld [vmem:[%s14531_s0 + $0x80] sm:$0xff]  }
  0x30   :  { %724 = vst [vmem:[#allocation1 + $0x698] sm:$0xff] %v10674_v44  ;;  %756 = vst [vmem:[#allocation1 + $0x688] sm:$0xff] %v10678_v45  ;;  %v4501_v9 = vld [vmem:[#allocation1 + $0x60f] ss:$16 sm:%s12177_s28]   ;;  %s12473_s28 = smov 3  ;;  %v11144_v58 = vld [vmem:[%s14531_s0 + $0x3b0] sm:$0xff]  }
  0x31   :  { %1556 = vst [vmem:[#allocation1 + $0x4f8] sm:$0xff] %v10778_v46  ;;  %1588 = vst [vmem:[#allocation1 + $0x4e8] sm:$0xff] %v10782_v47  ;;  %v4506_v10 = vld [vmem:[#allocation1 + $0x60f] ss:$16 sm:%s12179_s29]   ;;  %v4503_v15 = vsel %vm4101_vm0, %v4501_v9, %v4498_v8  ;;  %s12519_s29 = smov 12  ;;  %v11146_v63 = vld [vmem:[%s14531_s0 + $0x3a0] sm:$0xff]  }
  0x32   :  { %1620 = vst [vmem:[#allocation1 + $0x4d8] sm:$0xff] %v10786_v54  ;;  %1652 = vst [vmem:[#allocation1 + $0x4c8] sm:$0xff] %v10790_v40  ;;  %v4511_v16 = vld [vmem:[#allocation1 + $0x60f] ss:$16 sm:%s12222_s11]   ;;  %v4508_v22 = vsel %vm4105_vm1, %v4506_v10, %v4503_v15  ;;  %s12489_s11 = smov 12  ;;  %v11030_v54 = vunpack.c.h.bf16 %v11246_v48  ;;  %v11148_v5 = vld [vmem:[%s14531_s0 + $0x390] sm:$0xff]  }
  0x33   :  { %1684 = vst [vmem:[#allocation1 + $0x4b8] sm:$0xff] %v10794_v55  ;;  %1716 = vst [vmem:[#allocation1 + $0x4a8] sm:$0xff] %v10798_v56  ;;  %v4475_v19 = vld [vmem:[#allocation1 + $0x40f] ss:$16 sm:%s12120_s23]   ;;  %s14538_s23 = smov 120   ;;  %v4513_v27 = vsel %vm4109_vm2, %v4511_v16, %v4508_v22  ;;  %v11150_v7 = vld [vmem:[%s14531_s0 + $0x380] sm:$0xff]  }
  0x34   :  { %1748 = vst [vmem:[#allocation1 + $0x498] sm:$0xff] %v10802_v59  ;;  %1780 = vst [vmem:[#allocation1 + $0x488] sm:$0xff] %v10806_v60  ;;  %v4478_v20 = vld [vmem:[#allocation1 + $0x40f] ss:$16 sm:%s12135_s8]   ;;  %11295 = vrot.lane.b32.xlu1 %v11294_v14, %s14538_s23  ;;  %s12491_s8 = smov 48  ;;  %v10646_v14 = vunpack.c.h.bf16 %v11150_v7  ;;  %v11176_v18 = vld [vmem:[%s14531_s0 + $0x2b0] sm:$0xff]  }
  0x35   :  { %2324 = vst [vmem:[#allocation1 + $0x378] sm:$0xff] %v10874_v61  ;;  %2356 = vst [vmem:[#allocation1 + $0x368] sm:$0xff] %v10878_v1  ;;  %v4483_v21 = vld [vmem:[#allocation1 + $0x40f] ss:$16 sm:%s12137_s9]   ;;  %v4480_v25 = vsel %vm4101_vm0, %v4478_v20, %v4475_v19  ;;  %s12503_s9 = smov 192  ;;  %v10622_v61 = vunpack.c.h.bf16 %v11144_v58  ;;  %v10750_v20 = vunpack.c.h.bf16 %v11176_v18  ;;  %v11178_v22 = vld [vmem:[%s14531_s0 + $0x2a0] sm:$0xff]  }
  0x36   :  { %2388 = vst [vmem:[#allocation1 + $0x358] sm:$0xff] %v10882_v2  ;;  %2420 = vst [vmem:[#allocation1 + $0x348] sm:$0xff] %v10886_v3  ;;  %v4488_v26 = vld [vmem:[#allocation1 + $0x40f] ss:$16 sm:%s12156_s30]   ;;  %v4485_v30 = vsel %vm4105_vm1, %v4483_v21, %v4480_v25  ;;  %s12505_s30 = smov 3  ;;  %v10630_v3 = vunpack.c.h.bf16 %v11146_v63  ;;  %v11180_v28 = vld [vmem:[%s14531_s0 + $0x290] sm:$0xff]  }
  0x37   :  { %2452 = vst [vmem:[#allocation1 + $0x338] sm:$0xff] %v10890_v11  ;;  %2484 = vst [vmem:[#allocation1 + $0x328] sm:$0xff] %v10894_v12  ;;  %v11241_v29 = vld [vmem:[%s14531_s0 + $0xa8] sm:$0xff]   ;;  %v11243_v34 = vld [vmem:[%s14531_s0 + $0x98] sm:$0xff]   ;;  %v4490_v36 = vsel %vm4109_vm2, %v4488_v26, %v4485_v30  ;;  %v10638_v12 = vunpack.c.h.bf16 %v11148_v5  ;;  %v10758_v26 = vunpack.c.h.bf16 %v11178_v22 }
  0x38   :  { %2516 = vst [vmem:[#allocation1 + $0x318] sm:$0xff] %v10898_v13  ;;  %2548 = vst [vmem:[#allocation1 + $0x308] sm:$0xff] %v10902_v23  ;;  %v11010_v32 = vunpack.c.h.bf16 %v11241_v29  ;;  %v4590_v37 = vld [vmem:[#allocation1 + $0x68f] ss:$16 sm:%s12272_s14]   ;;  %v11018_v42 = vunpack.c.h.bf16 %v11243_v34  ;;  %v11289_v44 = vpack.i.bf16 %v4513_v27, %v4490_v36  ;;  %s12521_s14 = smov 48  ;;  %v11182_v30 = vld [vmem:[%s14531_s0 + $0x280] sm:$0xff]  }
  0x39   :  { %3348 = vst [vmem:[#allocation1 + $0x178] sm:$0xff] %v11002_v24  ;;  %v4593_v38 = vld [vmem:[#allocation1 + $0x68f] ss:$16 sm:%s12306_s18]   ;;  %3380 = vst [vmem:[#allocation1 + $0x168] sm:$0xff] %v11006_v31  ;;  %s12537_s18 = smov 192  ;;  %v10766_v31 = vunpack.c.h.bf16 %v11180_v28  ;;  %v10774_v33 = vunpack.c.h.bf16 %v11182_v30  ;;  %v11200_v35 = vld [vmem:[%s14531_s0 + $0x1f0] sm:$0xff]  }
  0x3a   :  { %v4598_v39 = vld [vmem:[#allocation1 + $0x68f] ss:$16 sm:%s12308_s19]   ;;  %v4595_v45 = vsel %vm4101_vm0, %v4593_v38, %v4590_v37  ;;  %3412 = vst [vmem:[#allocation1 + $0x158] sm:$0xff] %v11010_v32  ;;  %3444 = vst [vmem:[#allocation1 + $0x148] sm:$0xff] %v11014_v41  ;;  %11290 = vrot.lane.b32.xlu0 %v11289_v44, %s14538_s23  ;;  %s12539_s19 = smov 3  ;;  %v11136_v18 = vld [vmem:[%s14531_s0 + $0x3f0] sm:$0xff]  }
  0x3b   :  { %v4603_v46 = vld [vmem:[#allocation1 + $0x68f] ss:$16 sm:%s12329_s26]   ;;  %v4600_v52 = vsel %vm4105_vm1, %v4598_v39, %v4595_v45  ;;  %3476 = vst [vmem:[#allocation1 + $0x138] sm:$0xff] %v11018_v42  ;;  %3508 = vst [vmem:[#allocation1 + $0x128] sm:$0xff] %v11022_v43  ;;  %14539 = sst [smem:[#allocation3_spill]] %s12539_s19  ;;  %s12580_s26 = smov 12  ;;  %v10846_v42 = vunpack.c.h.bf16 %v11200_v35 }
  0x3c   :  { %v11245_v47 = vld [vmem:[%s14531_s0 + $0x88] sm:$0xff]   ;;  %v4605_v56 = vsel %vm4109_vm2, %v4603_v46, %v4600_v52  ;;  %v11143_v57 = vld [vmem:[%s14531_s0 + $0x3b8] sm:$0xff]   ;;  %3572 = vst [vmem:[#allocation1 + $0x108] sm:$0xff] %v11030_v54  ;;  %308 = vst [vmem:[#allocation1 + $0x768] sm:$0xff] %v10622_v61  ;;  %s12663_s19 = smov 3 }
  0x3d   :  { %v4567_v49 = vld [vmem:[#allocation1 + $0x48f] ss:$16 sm:%s12224_s6]   ;;  %v11026_v53 = vunpack.c.h.bf16 %v11245_v47  ;;  %v10618_v60 = vunpack.c.h.bf16 %v11143_v57  ;;  %s12551_s6 = smov 12  ;;  %372 = vst [vmem:[#allocation1 + $0x748] sm:$0xff] %v10630_v3  ;;  %436 = vst [vmem:[#allocation1 + $0x728] sm:$0xff] %v10638_v12  ;;  %v11202_v47 = vld [vmem:[%s14531_s0 + $0x1e0] sm:$0xff]  }
  0x3e   :  { %v4570_v50 = vld [vmem:[#allocation1 + $0x48f] ss:$16 sm:%s12245_s5]   ;;  %14540 = sst [smem:[#allocation4_spill]] %s12551_s6  ;;  %s12553_s5 = smov 48  ;;  %500 = vst [vmem:[#allocation1 + $0x708] sm:$0xff] %v10646_v14  ;;  %1332 = vst [vmem:[#allocation1 + $0x568] sm:$0xff] %v10750_v20 }
  0x3f   :  { %v4575_v51 = vld [vmem:[#allocation1 + $0x48f] ss:$16 sm:%s12247_s10]   ;;  %v4572_v40 = vsel %vm4101_vm0, %v4570_v50, %v4567_v49  ;;  %3540 = vst [vmem:[#allocation1 + $0x118] sm:$0xff] %v11026_v53  ;;  %14541 = sst [smem:[#allocation5_spill]] %s12553_s5  ;;  %s12565_s10 = smov 192  ;;  %276 = vst [vmem:[#allocation1 + $0x778] sm:$0xff] %v10618_v60  ;;  %v10854_v50 = vunpack.c.h.bf16 %v11202_v47 }
  0x40   :  { %v4580_v55 = vld [vmem:[#allocation1 + $0x48f] ss:$16 sm:%s12270_s7]   ;;  %v4577_v59 = vsel %vm4105_vm1, %v4575_v51, %v4572_v40  ;;  %14542 = sst [smem:[#allocation6_spill]] %s12565_s10  ;;  %s12567_s7 = smov 3  ;;  %1396 = vst [vmem:[#allocation1 + $0x548] sm:$0xff] %v10758_v26  ;;  %1460 = vst [vmem:[#allocation1 + $0x528] sm:$0xff] %v10766_v31 }
  0x41   :  { %v11145_v62 = vld [vmem:[%s14531_s0 + $0x3a8] sm:$0xff]   ;;  %v11147_v0 = vld [vmem:[%s14531_s0 + $0x398] sm:$0xff]   ;;  %v4582_v1 = vsel %vm4109_vm2, %v4580_v55, %v4577_v59  ;;  %s12608_s10 = smov 12  ;;  %s12621_s6 = smov 192  ;;  %1524 = vst [vmem:[#allocation1 + $0x508] sm:$0xff] %v10774_v33  ;;  %2100 = vst [vmem:[#allocation1 + $0x3e8] sm:$0xff] %v10846_v42 }
  0x42   :  { %v10626_v2 = vunpack.c.h.bf16 %v11145_v62  ;;  %v10634_v4 = vunpack.c.h.bf16 %v11147_v0  ;;  %v11149_v6 = vld [vmem:[%s14531_s0 + $0x388] sm:$0xff]   ;;  %v11299_v8 = vpack.i.bf16 %v4605_v56, %v4582_v1  ;;  %v11175_v17 = vld [vmem:[%s14531_s0 + $0x2b8] sm:$0xff]   ;;  %s12635_s5 = smov 3  ;;  %v11204_v52 = vld [vmem:[%s14531_s0 + $0x1d0] sm:$0xff]   ;;  %2164 = vst [vmem:[#allocation1 + $0x3c8] sm:$0xff] %v10854_v50 }
  0x43   :  { %v4636_v9 = vld [vmem:[#allocation1 + $0x30f] ss:$16 sm:%s12376_s15]   ;;  %v10642_v13 = vunpack.c.h.bf16 %v11149_v6  ;;  %s12582_s15 = smov 48  ;;  %v10746_v19 = vunpack.c.h.bf16 %v11175_v17  ;;  %v11206_v54 = vld [vmem:[%s14531_s0 + $0x1c0] sm:$0xff]   ;;  %v10862_v55 = vunpack.c.h.bf16 %v11204_v52  ;;  %v11232_v59 = vld [vmem:[%s14531_s0 + $0xf0] sm:$0xff]  }
  0x44   :  { %v4639_v10 = vld [vmem:[#allocation1 + $0x30f] ss:$16 sm:%s12392_s12]   ;;  %340 = vst [vmem:[#allocation1 + $0x758] sm:$0xff] %v10626_v2  ;;  %404 = vst [vmem:[#allocation1 + $0x738] sm:$0xff] %v10634_v4  ;;  %11300 = vrot.lane.b32.xlu1 %v11299_v8, %s14538_s23  ;;  %s12594_s12 = smov 192  ;;  %v10870_v57 = vunpack.c.h.bf16 %v11206_v54  ;;  %v10974_v2 = vunpack.c.h.bf16 %v11232_v59  ;;  %v11234_v6 = vld [vmem:[%s14531_s0 + $0xe0] sm:$0xff]  }
  0x45   :  { %v4644_v11 = vld [vmem:[#allocation1 + $0x30f] ss:$16 sm:%s12394_s13]   ;;  %v4641_v15 = vsel %vm4101_vm0, %v4639_v10, %v4636_v9  ;;  %468 = vst [vmem:[#allocation1 + $0x718] sm:$0xff] %v10642_v13  ;;  %s12596_s13 = smov 3  ;;  %1300 = vst [vmem:[#allocation1 + $0x578] sm:$0xff] %v10746_v19  ;;  %v10982_v9 = vunpack.c.h.bf16 %v11234_v6  ;;  %v11238_v13 = vld [vmem:[%s14531_s0 + $0xc0] sm:$0xff]  }
  0x46   :  { %v4649_v16 = vld [vmem:[#allocation1 + $0x30f] ss:$16 sm:%s12411_s4]   ;;  %v4646_v24 = vsel %vm4105_vm1, %v4644_v11, %v4641_v15  ;;  %s12610_s4 = smov 48  ;;  %2228 = vst [vmem:[#allocation1 + $0x3a8] sm:$0xff] %v10862_v55  ;;  %2292 = vst [vmem:[#allocation1 + $0x388] sm:$0xff] %v10870_v57  ;;  %v11236_v11 = vld [vmem:[%s14531_s0 + $0xd0] sm:$0xff]  }
  0x47   :  { %v11177_v21 = vld [vmem:[%s14531_s0 + $0x2a8] sm:$0xff]   ;;  %v11179_v23 = vld [vmem:[%s14531_s0 + $0x298] sm:$0xff]   ;;  %v4651_v46 = vsel %vm4109_vm2, %v4649_v16, %v4646_v24  ;;  %3124 = vst [vmem:[#allocation1 + $0x1e8] sm:$0xff] %v10974_v2  ;;  %v10990_v14 = vunpack.c.h.bf16 %v11236_v11  ;;  %v10998_v16 = vunpack.c.h.bf16 %v11238_v13  ;;  %3188 = vst [vmem:[#allocation1 + $0x1c8] sm:$0xff] %v10982_v9  ;;  %v10590_v24 = vunpack.c.h.bf16 %v11136_v18 }
  0x48   :  { %v10754_v25 = vunpack.c.h.bf16 %v11177_v21  ;;  %v10762_v27 = vunpack.c.h.bf16 %v11179_v23  ;;  %v11181_v29 = vld [vmem:[%s14531_s0 + $0x288] sm:$0xff]   ;;  %v11199_v34 = vld [vmem:[%s14531_s0 + $0x1f8] sm:$0xff]   ;;  %v11170_v54 = vld [vmem:[%s14531_s0 + $0x2e0] sm:$0xff]  }
  0x49   :  { %v10770_v32 = vunpack.c.h.bf16 %v11181_v29  ;;  %v11201_v36 = vld [vmem:[%s14531_s0 + $0x1e8] sm:$0xff]   ;;  %v10842_v41 = vunpack.c.h.bf16 %v11199_v34  ;;  %v11203_v48 = vld [vmem:[%s14531_s0 + $0x1d8] sm:$0xff]   ;;  %3252 = vst [vmem:[#allocation1 + $0x1a8] sm:$0xff] %v10990_v14  ;;  %3316 = vst [vmem:[#allocation1 + $0x188] sm:$0xff] %v10998_v16 }
  0x4a   :  { %v4613_v37 = vld [vmem:[#allocation1 + $0x10f] ss:$16 sm:%s12331_s16]   ;;  %1364 = vst [vmem:[#allocation1 + $0x558] sm:$0xff] %v10754_v25  ;;  %1428 = vst [vmem:[#allocation1 + $0x538] sm:$0xff] %v10762_v27  ;;  %v10850_v43 = vunpack.c.h.bf16 %v11201_v36  ;;  %s12637_s16 = smov 12  ;;  %v10858_v51 = vunpack.c.h.bf16 %v11203_v48  ;;  %v11138_v29 = vld [vmem:[%s14531_s0 + $0x3e0] sm:$0xff]  }
  0x4b   :  { %v4616_v38 = vld [vmem:[#allocation1 + $0x10f] ss:$16 sm:%s12352_s20]   ;;  %1492 = vst [vmem:[#allocation1 + $0x518] sm:$0xff] %v10770_v32  ;;  %2068 = vst [vmem:[#allocation1 + $0x3f8] sm:$0xff] %v10842_v41  ;;  %s12649_s20 = smov 48  ;;  %v10598_v32 = vunpack.c.h.bf16 %v11138_v29  ;;  %v11140_v34 = vld [vmem:[%s14531_s0 + $0x3d0] sm:$0xff]  }
  0x4c   :  { %v4621_v39 = vld [vmem:[#allocation1 + $0x10f] ss:$16 sm:%s12354_s21]   ;;  %v4618_v44 = vsel %vm4101_vm0, %v4616_v38, %v4613_v37  ;;  %2132 = vst [vmem:[#allocation1 + $0x3d8] sm:$0xff] %v10850_v43  ;;  %s12651_s21 = smov 192  ;;  %2196 = vst [vmem:[#allocation1 + $0x3b8] sm:$0xff] %v10858_v51  ;;  %v11142_v36 = vld [vmem:[%s14531_s0 + $0x3c0] sm:$0xff]   ;;  %v10606_v38 = vunpack.c.h.bf16 %v11140_v34 }
  0x4d   :  { %v4626_v45 = vld [vmem:[#allocation1 + $0x10f] ss:$16 sm:%s12374_s27]   ;;  %v4623_v49 = vsel %vm4105_vm1, %v4621_v39, %v4618_v44  ;;  %s12665_s27 = smov 12  ;;  %52 = vst [vmem:[#allocation1 + $0x7e8] sm:$0xff] %v10590_v24  ;;  %v10614_v41 = vunpack.c.h.bf16 %v11142_v36  ;;  %v11168_v43 = vld [vmem:[%s14531_s0 + $0x2f0] sm:$0xff]   ;;  %116 = vst [vmem:[#allocation1 + $0x7c8] sm:$0xff] %v10598_v32 }
  0x4e   :  { %v11205_v53 = vld [vmem:[%s14531_s0 + $0x1c8] sm:$0xff]   ;;  %v4628_v40 = vsel %vm4109_vm2, %v4626_v45, %v4623_v49  ;;  %v11231_v58 = vld [vmem:[%s14531_s0 + $0xf8] sm:$0xff]   ;;  %v10718_v50 = vunpack.c.h.bf16 %v11168_v43  ;;  %180 = vst [vmem:[#allocation1 + $0x7a8] sm:$0xff] %v10606_v38 }
  0x4f   :  { %v10866_v56 = vunpack.c.h.bf16 %v11205_v53  ;;  %v11233_v60 = vld [vmem:[%s14531_s0 + $0xe8] sm:$0xff]   ;;  %v11304_v61 = vpack.i.bf16 %v4651_v46, %v4628_v40  ;;  %v10970_v1 = vunpack.c.h.bf16 %v11231_v58  ;;  %v11235_v7 = vld [vmem:[%s14531_s0 + $0xd8] sm:$0xff]   ;;  %244 = vst [vmem:[#allocation1 + $0x788] sm:$0xff] %v10614_v41  ;;  %v11172_v58 = vld [vmem:[%s14531_s0 + $0x2d0] sm:$0xff]  }
  0x50   :  { %v4682_v62 = vld [vmem:[#allocation1 + $0x70f] ss:$16 sm:%s12442_s24]   ;;  %v10978_v3 = vunpack.c.h.bf16 %v11233_v60  ;;  %s12678_s24 = smov 48  ;;  %v10986_v10 = vunpack.c.h.bf16 %v11235_v7  ;;  %1076 = vst [vmem:[#allocation1 + $0x5e8] sm:$0xff] %v10718_v50  ;;  %v11174_v60 = vld [vmem:[%s14531_s0 + $0x2c0] sm:$0xff]  }
  0x51   :  { %v4685_v63 = vld [vmem:[#allocation1 + $0x70f] ss:$16 sm:%s12454_s25]   ;;  %2260 = vst [vmem:[#allocation1 + $0x398] sm:$0xff] %v10866_v56  ;;  %s12680_s25 = smov 192  ;;  %11305 = vrot.lane.b32.xlu0 %v11304_v61, %s14538_s23  ;;  %3092 = vst [vmem:[#allocation1 + $0x1f8] sm:$0xff] %v10970_v1  ;;  %v10726_v56 = vunpack.c.h.bf16 %v11170_v54  ;;  %v10734_v61 = vunpack.c.h.bf16 %v11172_v58 }
  0x52   :  { %v4690_v0 = vld [vmem:[#allocation1 + $0x70f] ss:$16 sm:%s12456_s3]   ;;  %v4687_v4 = vsel %vm4101_vm0, %v4685_v63, %v4682_v62  ;;  %14543 = sst [smem:[#allocation7_spill]] %s12680_s25  ;;  %3156 = vst [vmem:[#allocation1 + $0x1d8] sm:$0xff] %v10978_v3  ;;  %s14544_s3 = sld [smem:[#allocation2_spill]]  ;;  %3220 = vst [vmem:[#allocation1 + $0x1b8] sm:$0xff] %v10986_v10  ;;  %v10742_v63 = vunpack.c.h.bf16 %v11174_v60 }
  0x53   :  { %v4695_v5 = vld [vmem:[#allocation1 + $0x70f] ss:$16 sm:%s12471_s2]   ;;  %v4692_v8 = vsel %vm4105_vm1, %v4690_v0, %v4687_v4  ;;  %s12693_s25 = smov 3  ;;  %s12695_s2 = smov 12  ;;  %v4797_v0 = vld [vmem:[#allocation1 + $0xe] ss:$16 sm:%s12596_s13]  }
  0x54   :  { %v11237_v12 = vld [vmem:[%s14531_s0 + $0xc8] sm:$0xff]   ;;  %14545 = sst [smem:[#allocation2_spill]] %s12693_s25  ;;  %v11135_v17 = vld [vmem:[%s14531_s0 + $0x3f8] sm:$0xff]   ;;  %s12706_s25 = smov 48  ;;  %v4697_v28 = vsel %vm4109_vm2, %v4695_v5, %v4692_v8  ;;  %1140 = vst [vmem:[#allocation1 + $0x5c8] sm:$0xff] %v10726_v56  ;;  %1204 = vst [vmem:[#allocation1 + $0x5a8] sm:$0xff] %v10734_v61 }
  0x55   :  { %14546 = sst [smem:[#allocation8_spill]] %s12695_s2  ;;  %v10994_v15 = vunpack.c.h.bf16 %v11237_v12  ;;  %v11137_v19 = vld [vmem:[%s14531_s0 + $0x3e8] sm:$0xff]   ;;  %s12708_s2 = smov 192  ;;  %v10586_v23 = vunpack.c.h.bf16 %v11135_v17  ;;  %v11139_v30 = vld [vmem:[%s14531_s0 + $0x3d8] sm:$0xff]   ;;  %1268 = vst [vmem:[#allocation1 + $0x588] sm:$0xff] %v10742_v63 }
  0x56   :  { %v4662_v21 = vld [vmem:[#allocation1 + $0x50f] ss:$16 sm:%s12425_s1]   ;;  %v10594_v25 = vunpack.c.h.bf16 %v11137_v19  ;;  %s12722_s1 = smov 3  ;;  %v10602_v33 = vunpack.c.h.bf16 %v11139_v30  ;;  %v4800_v1 = vld [vmem:[#allocation1 + $0xe] ss:$16 sm:%s12608_s10]   ;;  %s11981_s10 = smov 112  }
  0x57   :  { %v4667_v22 = vld [vmem:[#allocation1 + $0x50f] ss:$16 sm:%s12427_s22]   ;;  %3284 = vst [vmem:[#allocation1 + $0x198] sm:$0xff] %v10994_v15  ;;  %s12724_s22 = smov 12  ;;  %20 = vst [vmem:[#allocation1 + $0x7f8] sm:$0xff] %v10586_v23  ;;  %v4802_v6 = vsel %vm4101_vm0, %v4800_v1, %v4797_v0 }
  0x58   :  { %v4659_v20 = vld [vmem:[#allocation1 + $0x50f] ss:$16 sm:%s14544_s3]   ;;  %84 = vst [vmem:[#allocation1 + $0x7d8] sm:$0xff] %v10594_v25  ;;  %s12738_s3 = smov 192  ;;  %148 = vst [vmem:[#allocation1 + $0x7b8] sm:$0xff] %v10602_v33 }
  0x59   :  { %v4664_v26 = vsel %vm4101_vm0, %v4662_v21, %v4659_v20  ;;  %v4672_v27 = vld [vmem:[#allocation1 + $0x50f] ss:$16 sm:%s12440_s17]   ;;  %s12736_s17 = smov 48  ;;  %14548 = sst [smem:[#allocation10_spill]] %s12738_s3  ;;  %v4805_v2 = vld [vmem:[#allocation1 + $0xe] ss:$16 sm:%s12610_s4]  }
  0x5a   :  { %v4669_v31 = vsel %vm4105_vm1, %v4667_v22, %v4664_v26  ;;  %v11141_v35 = vld [vmem:[%s14531_s0 + $0x3c8] sm:$0xff]   ;;  %14547 = sst [smem:[#allocation9_spill]] %s12736_s17  ;;  %v11167_v42 = vld [vmem:[%s14531_s0 + $0x2f8] sm:$0xff]   ;;  %s12750_s17 = smov 3  ;;  %v4807_v10 = vsel %vm4105_vm1, %v4805_v2, %v4802_v6 }
  0x5b   :  { %v4674_v37 = vsel %vm4109_vm2, %v4672_v27, %v4669_v31  ;;  %v10610_v39 = vunpack.c.h.bf16 %v11141_v35  ;;  %v11169_v44 = vld [vmem:[%s14531_s0 + $0x2e8] sm:$0xff]   ;;  %s12752_s3 = smov 12  ;;  %v10714_v49 = vunpack.c.h.bf16 %v11167_v42  ;;  %v11171_v40 = vld [vmem:[%s14531_s0 + $0x2d8] sm:$0xff]   ;;  %s14557_s13 = sld [smem:[#allocation10_spill]] }
  0x5c   :  { %v11309_v45 = vpack.i.bf16 %v4697_v28, %v4674_v37  ;;  %v4728_v46 = vld [vmem:[#allocation1 + $0x38f] ss:$16 sm:%s12505_s30]   ;;  %v10722_v51 = vunpack.c.h.bf16 %v11169_v44  ;;  %s12765_s30 = smov 48  ;;  %v10730_v57 = vunpack.c.h.bf16 %v11171_v40  ;;  %v4810_v11 = vld [vmem:[#allocation1 + $0xe] ss:$16 sm:%s12621_s6]   ;;  %s4941_s4 = smov 48 }
  0x5d   :  { %v4731_v47 = vld [vmem:[#allocation1 + $0x38f] ss:$16 sm:%s12519_s29]   ;;  %212 = vst [vmem:[#allocation1 + $0x798] sm:$0xff] %v10610_v39  ;;  %s12767_s29 = smov 192  ;;  %1044 = vst [vmem:[#allocation1 + $0x5f8] sm:$0xff] %v10714_v49  ;;  %v4812_v18 = vsel %vm4109_vm2, %v4810_v11, %v4807_v10  ;;  %s4946_s6 = smov 192 }
  0x5e   :  { %v4736_v48 = vld [vmem:[#allocation1 + $0x38f] ss:$16 sm:%s12521_s14]   ;;  %v4733_v52 = vsel %vm4101_vm0, %v4731_v47, %v4728_v46  ;;  %11310 = vrot.lane.b32.xlu1 %v11309_v45, %s14538_s23  ;;  %1108 = vst [vmem:[#allocation1 + $0x5d8] sm:$0xff] %v10722_v51  ;;  %s12780_s14 = smov 3  ;;  %1172 = vst [vmem:[#allocation1 + $0x5b8] sm:$0xff] %v10730_v57 }
  0x5f   :  { %v4741_v53 = vld [vmem:[#allocation1 + $0x38f] ss:$16 sm:%s12537_s18]   ;;  %v4738_v55 = vsel %vm4105_vm1, %v4736_v48, %v4733_v52  ;;  %s12782_s18 = smov 12  ;;  %v4819_v12 = vld [vmem:[#allocation1 + $0x20e] ss:$16 sm:%s12635_s5]   ;;  %s4956_s5 = smov 3 }
  0x60   :  { %v11173_v59 = vld [vmem:[%s14531_s0 + $0x2c8] sm:$0xff]   ;;  %v4743_v9 = vsel %vm4109_vm2, %v4741_v53, %v4738_v55 }
  0x61   :  { %v10738_v62 = vunpack.c.h.bf16 %v11173_v59  ;;  %v4705_v3 = vld [vmem:[#allocation1 + $0x18f] ss:$16 sm:%s12473_s28]   ;;  %v4822_v14 = vld [vmem:[#allocation1 + $0x20e] ss:$16 sm:%s12637_s16]   ;;  %s14549_s28 = sld [smem:[#allocation7_spill]]  ;;  %s4959_s16 = smov 12 }
  0x62   :  { %v4708_v4 = vld [vmem:[#allocation1 + $0x18f] ss:$16 sm:%s12489_s11]   ;;  %v4827_v15 = vld [vmem:[#allocation1 + $0x20e] ss:$16 sm:%s12649_s20]   ;;  %s14550_s11 = sld [smem:[#allocation2_spill]]  ;;  %v4824_v19 = vsel %vm4101_vm0, %v4822_v14, %v4819_v12  ;;  %s4964_s20 = smov 48 }
  0x63   :  { %v4713_v5 = vld [vmem:[#allocation1 + $0x18f] ss:$16 sm:%s12491_s8]   ;;  %v4710_v7 = vsel %vm4101_vm0, %v4708_v4, %v4705_v3  ;;  %1236 = vst [vmem:[#allocation1 + $0x598] sm:$0xff] %v10738_v62  ;;  %v4832_v16 = vld [vmem:[#allocation1 + $0x20e] ss:$16 sm:%s12651_s21]   ;;  %s14551_s8 = sld [smem:[#allocation8_spill]]  ;;  %v4829_v27 = vsel %vm4105_vm1, %v4827_v15, %v4824_v19 }
  0x64   :  { %v4718_v8 = vld [vmem:[#allocation1 + $0x18f] ss:$16 sm:%s12503_s9]   ;;  %v4715_v13 = vsel %vm4105_vm1, %v4713_v5, %v4710_v7  ;;  %v4842_v20 = vld [vmem:[#allocation1 + $0x40e] ss:$16 sm:%s12663_s19]   ;;  %s14552_s9 = sld [smem:[#allocation9_spill]]  ;;  %v4834_v31 = vsel %vm4109_vm2, %v4832_v16, %v4829_v27  ;;  %s4969_s21 = smov 192 }
  0x65   :  { %v4720_v17 = vsel %vm4109_vm2, %v4718_v8, %v4715_v13  ;;  %v4845_v21 = vld [vmem:[#allocation1 + $0x40e] ss:$16 sm:%s12665_s27]   ;;  %v4774_v24 = vld [vmem:[#allocation1 + $0x78f] ss:$16 sm:%s12567_s7]   ;;  %s14553_s7 = sld [smem:[#allocation3_spill]]  ;;  %v11324_v35 = vpack.i.bf16 %v4834_v31, %v4812_v18  ;;  %s4982_s19 = smov 12 }
  0x66   :  { %v4850_v22 = vld [vmem:[#allocation1 + $0x40e] ss:$16 sm:%s12678_s24]   ;;  %v11314_v23 = vpack.i.bf16 %v4743_v9, %v4720_v17  ;;  %v4777_v25 = vld [vmem:[#allocation1 + $0x78f] ss:$16 sm:%s12580_s26]   ;;  %v4847_v28 = vsel %vm4101_vm0, %v4845_v21, %v4842_v20  ;;  %s14554_s26 = sld [smem:[#allocation4_spill]]  ;;  %s4987_s27 = smov 48 }
  0x67   :  { %v4782_v26 = vld [vmem:[#allocation1 + $0x78f] ss:$16 sm:%s12582_s15]   ;;  %v4779_v29 = vsel %vm4101_vm0, %v4777_v25, %v4774_v24  ;;  %s14555_s15 = sld [smem:[#allocation5_spill]]  ;;  %v4855_v32 = vld [vmem:[#allocation1 + $0x40e] ss:$16 sm:%s14549_s28]   ;;  %v4852_v39 = vsel %vm4105_vm1, %v4850_v22, %v4847_v28  ;;  %s4992_s24 = smov 192 }
  0x68   :  { %v4787_v30 = vld [vmem:[#allocation1 + $0x78f] ss:$16 sm:%s12594_s12]   ;;  %v4865_v33 = vld [vmem:[#allocation1 + $0x60e] ss:$16 sm:%s14550_s11]   ;;  %11315 = vrot.lane.b32.xlu0 %v11314_v23, %s14538_s23  ;;  %v4784_v34 = vsel %vm4105_vm1, %v4782_v26, %v4779_v29  ;;  %s14556_s12 = sld [smem:[#allocation6_spill]]  ;;  %v4857_v56 = vsel %vm4109_vm2, %v4855_v32, %v4852_v39  ;;  %s5056_s28 = smov 48 }
  0x69   :  { %v4868_v36 = vld [vmem:[#allocation1 + $0x60e] ss:$16 sm:%s14551_s8]   ;;  %v4789_v52 = vsel %vm4109_vm2, %v4787_v30, %v4784_v34  ;;  %s5061_s11 = smov 192  ;;  %s5071_s8 = smov 3 }
  0x6a   :  { %v4873_v37 = vld [vmem:[#allocation1 + $0x60e] ss:$16 sm:%s12706_s25]   ;;  %v4870_v41 = vsel %vm4101_vm0, %v4868_v36, %v4865_v33  ;;  %s5002_s25 = smov 3 }
  0x6b   :  { %v4878_v38 = vld [vmem:[#allocation1 + $0x60e] ss:$16 sm:%s12708_s2]   ;;  %v4751_v45 = vld [vmem:[#allocation1 + $0x58f] ss:$16 sm:%s14553_s7]   ;;  %v4875_v48 = vsel %vm4105_vm1, %v4873_v37, %v4870_v41  ;;  %s5005_s2 = smov 12  ;;  %s5079_s7 = smov 48 }
  0x6c   :  { %v4888_v42 = vld [vmem:[#allocation1 + $0x8e] ss:$16 sm:%s12722_s1]   ;;  %v4754_v46 = vld [vmem:[#allocation1 + $0x58f] ss:$16 sm:%s14554_s26]   ;;  %11325 = vrot.lane.b32.xlu0 %v11324_v35, %s11981_s10  ;;  %v4880_v61 = vsel %vm4109_vm2, %v4878_v38, %v4875_v48  ;;  %s5010_s1 = smov 48  ;;  %s5084_s26 = smov 192 }
  0x6d   :  { %v4891_v43 = vld [vmem:[#allocation1 + $0x8e] ss:$16 sm:%s12724_s22]   ;;  %v4759_v47 = vld [vmem:[#allocation1 + $0x58f] ss:$16 sm:%s14555_s15]   ;;  %v4756_v50 = vsel %vm4101_vm0, %v4754_v46, %v4751_v45  ;;  %v11329_v11 = vpack.i.bf16 %v4880_v61, %v4857_v56  ;;  %s5015_s22 = smov 192  ;;  %s5094_s15 = smov 3 }
  0x6e   :  { %v4896_v44 = vld [vmem:[#allocation1 + $0x8e] ss:$16 sm:%s14552_s9]   ;;  %v4893_v49 = vsel %vm4101_vm0, %v4891_v43, %v4888_v42  ;;  %v4764_v51 = vld [vmem:[#allocation1 + $0x58f] ss:$16 sm:%s14556_s12]   ;;  %v4761_v55 = vsel %vm4105_vm1, %v4759_v47, %v4756_v50  ;;  %s5074_s9 = smov 12  ;;  %s5097_s12 = smov 12 }
  0x6f   :  { %v4898_v53 = vsel %vm4105_vm1, %v4896_v44, %v4893_v49  ;;  %v4901_v54 = vld [vmem:[#allocation1 + $0x8e] ss:$16 sm:%s14557_s13]   ;;  %v4766_v60 = vsel %vm4109_vm2, %v4764_v51, %v4761_v55  ;;  %s5102_s13 = smov 48 }
  0x70   :  { %v4911_v40 = vld [vmem:[#allocation1 + $0x28e] ss:$16 sm:%s12750_s17]   ;;  %v4903_v62 = vsel %vm4109_vm2, %v4901_v54, %v4898_v53  ;;  %v11319_v2 = vpack.i.bf16 %v4789_v52, %v4766_v60  ;;  %s5025_s17 = smov 3 }
  0x71   :  { %v4914_v57 = vld [vmem:[#allocation1 + $0x28e] ss:$16 sm:%s12752_s3]   ;;  %s5028_s3 = smov 12 }
  0x72   :  { %v4919_v58 = vld [vmem:[#allocation1 + $0x28e] ss:$16 sm:%s12765_s30]   ;;  %v4916_v63 = vsel %vm4101_vm0, %v4914_v57, %v4911_v40  ;;  %11320 = vrot.lane.b32.xlu1 %v11319_v2, %s14538_s23  ;;  %s4979_s23 = smov 3  ;;  %s5033_s30 = smov 48 }
  0x73   :  { %v4924_v59 = vld [vmem:[#allocation1 + $0x28e] ss:$16 sm:%s12767_s29]   ;;  %v4921_v3 = vsel %vm4105_vm1, %v4919_v58, %v4916_v63  ;;  %s5038_s29 = smov 192 }
  0x74   :  { %v4934_v0 = vld [vmem:[#allocation1 + $0x48e] ss:$16 sm:%s12780_s14]   ;;  %v4926_v7 = vsel %vm4109_vm2, %v4924_v59, %v4921_v3  ;;  %s5048_s14 = smov 3 }
  0x75   :  { %v4937_v1 = vld [vmem:[#allocation1 + $0x48e] ss:$16 sm:%s12782_s18]   ;;  %v11334_v12 = vpack.i.bf16 %v4926_v7, %v4903_v62  ;;  %s5051_s18 = smov 12 }
  0x76   :  { %v4939_v4 = vsel %vm4101_vm0, %v4937_v1, %v4934_v0  ;;  %v4942_v5 = vld [vmem:[#allocation1 + $0x48e] ss:$16 sm:%s4941_s4]   ;;  %11330 = vrot.lane.b32.xlu1 %v11329_v11, %s11981_s10  ;;  %s5107_s4 = smov 192 }
  0x77   :  { %v4947_v6 = vld [vmem:[#allocation1 + $0x48e] ss:$16 sm:%s4946_s6]   ;;  %v4944_v8 = vsel %vm4105_vm1, %v4942_v5, %v4939_v4  ;;  %11335 = vrot.lane.b32.xlu0 %v11334_v12, %s11981_s10  ;;  %s5117_s6 = smov 3 }
  0x78   :  { %v4957_v9 = vld [vmem:[#allocation1 + $0x68e] ss:$16 sm:%s4956_s5]   ;;  %v4949_v16 = vsel %vm4109_vm2, %v4947_v6, %v4944_v8  ;;  %s5120_s5 = smov 12 }
  0x79   :  { %v4960_v10 = vld [vmem:[#allocation1 + $0x68e] ss:$16 sm:%s4959_s16]   ;;  %s5125_s16 = smov 48 }
  0x7a   :  { %v4962_v13 = vsel %vm4101_vm0, %v4960_v10, %v4957_v9  ;;  %v4965_v14 = vld [vmem:[#allocation1 + $0x68e] ss:$16 sm:%s4964_s20]   ;;  %s5130_s20 = smov 192 }
  0x7b   :  { %v4970_v15 = vld [vmem:[#allocation1 + $0x68e] ss:$16 sm:%s4969_s21]   ;;  %v4967_v17 = vsel %vm4105_vm1, %v4965_v14, %v4962_v13  ;;  %s5140_s21 = smov 3 }
  0x7c   :  { %v4980_v18 = vld [vmem:[#allocation1 + $0x10e] ss:$16 sm:%s4979_s23]   ;;  %v4972_v20 = vsel %vm4109_vm2, %v4970_v15, %v4967_v17  ;;  %s5143_s23 = smov 12 }
  0x7d   :  { %v4983_v19 = vld [vmem:[#allocation1 + $0x10e] ss:$16 sm:%s4982_s19]   ;;  %v11339_v27 = vpack.i.bf16 %v4972_v20, %v4949_v16  ;;  %s5148_s19 = smov 48 }
  0x7e   :  { %v4985_v21 = vsel %vm4101_vm0, %v4983_v19, %v4980_v18  ;;  %v4988_v22 = vld [vmem:[#allocation1 + $0x10e] ss:$16 sm:%s4987_s27]   ;;  %s5153_s27 = smov 192 }
  0x7f   :  { %v4993_v23 = vld [vmem:[#allocation1 + $0x10e] ss:$16 sm:%s4992_s24]   ;;  %v4990_v24 = vsel %vm4105_vm1, %v4988_v22, %v4985_v21  ;;  %11340 = vrot.lane.b32.xlu1 %v11339_v27, %s11981_s10  ;;  %s5163_s24 = smov 3 }
  0x80   :  { %v5003_v25 = vld [vmem:[#allocation1 + $0x30e] ss:$16 sm:%s5002_s25]   ;;  %v4995_v28 = vsel %vm4109_vm2, %v4993_v23, %v4990_v24  ;;  %s5166_s25 = smov 12  ;;  %v5164_v14 = vld [vmem:[#allocation1 + $0xd] ss:$16 sm:%s5163_s24]   ;;  %s5326_s24 = smov 12 }
  0x81   :  { %v5006_v26 = vld [vmem:[#allocation1 + $0x30e] ss:$16 sm:%s5005_s2]   ;;  %v5167_v15 = vld [vmem:[#allocation1 + $0xd] ss:$16 sm:%s5166_s25]   ;;  %s5171_s2 = smov 48  ;;  %s5331_s25 = smov 48 }
  0x82   :  { %v5008_v29 = vsel %vm4101_vm0, %v5006_v26, %v5003_v25  ;;  %v5011_v30 = vld [vmem:[#allocation1 + $0x30e] ss:$16 sm:%s5010_s1]   ;;  %s5176_s1 = smov 192  ;;  %v5169_v17 = vsel %vm4101_vm0, %v5167_v15, %v5164_v14  ;;  %v5172_v18 = vld [vmem:[#allocation1 + $0xd] ss:$16 sm:%s5171_s2]   ;;  %s5336_s2 = smov 192 }
  0x83   :  { %v5016_v31 = vld [vmem:[#allocation1 + $0x30e] ss:$16 sm:%s5015_s22]   ;;  %v5013_v32 = vsel %vm4105_vm1, %v5011_v30, %v5008_v29  ;;  %v5177_v19 = vld [vmem:[#allocation1 + $0xd] ss:$16 sm:%s5176_s1]   ;;  %s5185_s22 = smov 3  ;;  %v5174_v21 = vsel %vm4105_vm1, %v5172_v18, %v5169_v17  ;;  %s5346_s1 = smov 3 }
  0x84   :  { %v5026_v33 = vld [vmem:[#allocation1 + $0x50e] ss:$16 sm:%s5025_s17]   ;;  %v5018_v35 = vsel %vm4109_vm2, %v5016_v31, %v5013_v32  ;;  %v5186_v22 = vld [vmem:[#allocation1 + $0x20d] ss:$16 sm:%s5185_s22]   ;;  %s5188_s17 = smov 12  ;;  %v5179_v25 = vsel %vm4109_vm2, %v5177_v19, %v5174_v21  ;;  %s5349_s22 = smov 12 }
  0x85   :  { %v5029_v34 = vld [vmem:[#allocation1 + $0x50e] ss:$16 sm:%s5028_s3]   ;;  %v11344_v39 = vpack.i.bf16 %v5018_v35, %v4995_v28  ;;  %s5193_s3 = smov 48  ;;  %v5189_v23 = vld [vmem:[#allocation1 + $0x20d] ss:$16 sm:%s5188_s17]   ;;  %s5354_s17 = smov 48 }
  0x86   :  { %v5031_v36 = vsel %vm4101_vm0, %v5029_v34, %v5026_v33  ;;  %v5034_v37 = vld [vmem:[#allocation1 + $0x50e] ss:$16 sm:%s5033_s30]   ;;  %v5194_v24 = vld [vmem:[#allocation1 + $0x20d] ss:$16 sm:%s5193_s3]   ;;  %s5198_s30 = smov 192  ;;  %v5191_v26 = vsel %vm4101_vm0, %v5189_v23, %v5186_v22  ;;  %s5359_s3 = smov 192 }
  0x87   :  { %v5039_v38 = vld [vmem:[#allocation1 + $0x50e] ss:$16 sm:%s5038_s29]   ;;  %v5036_v41 = vsel %vm4105_vm1, %v5034_v37, %v5031_v36  ;;  %11345 = vrot.lane.b32.xlu0 %v11344_v39, %s11981_s10  ;;  %s5208_s29 = smov 3  ;;  %v5199_v27 = vld [vmem:[#allocation1 + $0x20d] ss:$16 sm:%s5198_s30]   ;;  %v5196_v29 = vsel %vm4105_vm1, %v5194_v24, %v5191_v26  ;;  %s5369_s30 = smov 3 }
  0x88   :  { %v5049_v42 = vld [vmem:[#allocation1 + $0x70e] ss:$16 sm:%s5048_s14]   ;;  %v5041_v44 = vsel %vm4109_vm2, %v5039_v38, %v5036_v41  ;;  %v5209_v28 = vld [vmem:[#allocation1 + $0x40d] ss:$16 sm:%s5208_s29]   ;;  %s5216_s14 = smov 48  ;;  %v5201_v32 = vsel %vm4109_vm2, %v5199_v27, %v5196_v29  ;;  %s5372_s29 = smov 12 }
  0x89   :  { %v5052_v43 = vld [vmem:[#allocation1 + $0x70e] ss:$16 sm:%s5051_s18]   ;;  %v5217_v31 = vld [vmem:[#allocation1 + $0x40d] ss:$16 sm:%s5216_s14]   ;;  %s5221_s18 = smov 192  ;;  %v11364_v36 = vpack.i.bf16 %v5201_v32, %v5179_v25  ;;  %s5382_s14 = smov 192 }
  0x8a   :  { %v5054_v45 = vsel %vm4101_vm0, %v5052_v43, %v5049_v42  ;;  %v5057_v46 = vld [vmem:[#allocation1 + $0x70e] ss:$16 sm:%s5056_s28]   ;;  %s5231_s28 = smov 3  ;;  %v5222_v34 = vld [vmem:[#allocation1 + $0x40d] ss:$16 sm:%s5221_s18]   ;;  %s5392_s18 = smov 3 }
  0x8b   :  { %v5062_v47 = vld [vmem:[#allocation1 + $0x70e] ss:$16 sm:%s5061_s11]   ;;  %v5059_v48 = vsel %vm4105_vm1, %v5057_v46, %v5054_v45  ;;  %v5232_v35 = vld [vmem:[#allocation1 + $0x60d] ss:$16 sm:%s5231_s28]   ;;  %s5234_s11 = smov 12  ;;  %s5395_s28 = smov 12 }
  0x8c   :  { %v5072_v49 = vld [vmem:[#allocation1 + $0x18e] ss:$16 sm:%s5071_s8]   ;;  %v5064_v51 = vsel %vm4109_vm2, %v5062_v47, %v5059_v48  ;;  %s5239_s8 = smov 48  ;;  %v5235_v38 = vld [vmem:[#allocation1 + $0x60d] ss:$16 sm:%s5234_s11]   ;;  %s5400_s11 = smov 48 }
  0x8d   :  { %v5075_v50 = vld [vmem:[#allocation1 + $0x18e] ss:$16 sm:%s5074_s9]   ;;  %v11349_v40 = vpack.i.bf16 %v5064_v51, %v5041_v44  ;;  %v5240_v39 = vld [vmem:[#allocation1 + $0x60d] ss:$16 sm:%s5239_s8]   ;;  %s5244_s9 = smov 192  ;;  %v5237_v42 = vsel %vm4101_vm0, %v5235_v38, %v5232_v35  ;;  %s5405_s8 = smov 192 }
  0x8e   :  { %v5077_v52 = vsel %vm4101_vm0, %v5075_v50, %v5072_v49  ;;  %v5080_v53 = vld [vmem:[#allocation1 + $0x18e] ss:$16 sm:%s5079_s7]   ;;  %s5254_s7 = smov 3  ;;  %v5245_v43 = vld [vmem:[#allocation1 + $0x60d] ss:$16 sm:%s5244_s9]   ;;  %v5242_v45 = vsel %vm4105_vm1, %v5240_v39, %v5237_v42  ;;  %s5415_s9 = smov 3 }
  0x8f   :  { %v5085_v54 = vld [vmem:[#allocation1 + $0x18e] ss:$16 sm:%s5084_s26]   ;;  %v5082_v55 = vsel %vm4105_vm1, %v5080_v53, %v5077_v52  ;;  %11350 = vrot.lane.b32.xlu1 %v11349_v40, %s11981_s10  ;;  %v5255_v44 = vld [vmem:[#allocation1 + $0x8d] ss:$16 sm:%s5254_s7]   ;;  %s5257_s26 = smov 12  ;;  %v5247_v48 = vsel %vm4109_vm2, %v5245_v43, %v5242_v45  ;;  %s5418_s7 = smov 12 }
  0x90   :  { %v5095_v56 = vld [vmem:[#allocation1 + $0x38e] ss:$16 sm:%s5094_s15]   ;;  %v5087_v58 = vsel %vm4109_vm2, %v5085_v54, %v5082_v55  ;;  %s5262_s15 = smov 48  ;;  %v5258_v46 = vld [vmem:[#allocation1 + $0x8d] ss:$16 sm:%s5257_s26]   ;;  %s5423_s26 = smov 48 }
  0x91   :  { %v5098_v57 = vld [vmem:[#allocation1 + $0x38e] ss:$16 sm:%s5097_s12]   ;;  %s11982_s12 = smov 104   ;;  %v5263_v47 = vld [vmem:[#allocation1 + $0x8d] ss:$16 sm:%s5262_s15]   ;;  %v5260_v49 = vsel %vm4101_vm0, %v5258_v46, %v5255_v44  ;;  %s5428_s15 = smov 192 }
  0x92   :  { %v5100_v59 = vsel %vm4101_vm0, %v5098_v57, %v5095_v56  ;;  %v5103_v60 = vld [vmem:[#allocation1 + $0x38e] ss:$16 sm:%s5102_s13]   ;;  %s5267_s13 = smov 192  ;;  %v5265_v53 = vsel %vm4105_vm1, %v5263_v47, %v5260_v49  ;;  %v5360_v15 = vld [vmem:[#allocation1 + $0x10d] ss:$16 sm:%s5359_s3]   ;;  %s5530_s3 = smov 3 }
  0x93   :  { %v5108_v61 = vld [vmem:[#allocation1 + $0x38e] ss:$16 sm:%s5107_s4]   ;;  %v5105_v62 = vsel %vm4105_vm1, %v5103_v60, %v5100_v59  ;;  %s5277_s4 = smov 3  ;;  %v5268_v50 = vld [vmem:[#allocation1 + $0x8d] ss:$16 sm:%s5267_s13]   ;;  %s5438_s13 = smov 3 }
  0x94   :  { %v5118_v63 = vld [vmem:[#allocation1 + $0x58e] ss:$16 sm:%s5117_s6]   ;;  %v5110_v1 = vsel %vm4109_vm2, %v5108_v61, %v5105_v62  ;;  %v5278_v51 = vld [vmem:[#allocation1 + $0x28d] ss:$16 sm:%s5277_s4]   ;;  %s5280_s6 = smov 12  ;;  %v5270_v55 = vsel %vm4109_vm2, %v5268_v50, %v5265_v53  ;;  %s5441_s4 = smov 12 }
  0x95   :  { %v5121_v0 = vld [vmem:[#allocation1 + $0x58e] ss:$16 sm:%s5120_s5]   ;;  %v11354_v5 = vpack.i.bf16 %v5110_v1, %v5087_v58  ;;  %s5285_s5 = smov 48  ;;  %v5281_v54 = vld [vmem:[#allocation1 + $0x28d] ss:$16 sm:%s5280_s6]   ;;  %s5446_s6 = smov 48 }
  0x96   :  { %v5123_v2 = vsel %vm4101_vm0, %v5121_v0, %v5118_v63  ;;  %v5126_v3 = vld [vmem:[#allocation1 + $0x58e] ss:$16 sm:%s5125_s16]   ;;  %v5286_v40 = vld [vmem:[#allocation1 + $0x28d] ss:$16 sm:%s5285_s5]   ;;  %s5290_s16 = smov 192  ;;  %v5283_v56 = vsel %vm4101_vm0, %v5281_v54, %v5278_v51  ;;  %s5451_s5 = smov 192 }
  0x97   :  { %v5131_v4 = vld [vmem:[#allocation1 + $0x58e] ss:$16 sm:%s5130_s20]   ;;  %v5128_v6 = vsel %vm4105_vm1, %v5126_v3, %v5123_v2  ;;  %11355 = vrot.lane.b32.xlu0 %v11354_v5, %s11981_s10  ;;  %s5300_s20 = smov 3  ;;  %v5291_v57 = vld [vmem:[#allocation1 + $0x28d] ss:$16 sm:%s5290_s16]   ;;  %v5288_v59 = vsel %vm4105_vm1, %v5286_v40, %v5283_v56  ;;  %s5461_s16 = smov 3 }
  0x98   :  { %v5141_v7 = vld [vmem:[#allocation1 + $0x78e] ss:$16 sm:%s5140_s21]   ;;  %v5133_v9 = vsel %vm4109_vm2, %v5131_v4, %v5128_v6  ;;  %v5301_v58 = vld [vmem:[#allocation1 + $0x48d] ss:$16 sm:%s5300_s20]   ;;  %s5303_s21 = smov 12  ;;  %v5293_v62 = vsel %vm4109_vm2, %v5291_v57, %v5288_v59  ;;  %s5464_s20 = smov 12 }
  0x99   :  { %v5144_v8 = vld [vmem:[#allocation1 + $0x78e] ss:$16 sm:%s5143_s23]   ;;  %s5308_s23 = smov 48  ;;  %v5304_v60 = vld [vmem:[#allocation1 + $0x48d] ss:$16 sm:%s5303_s21]   ;;  %v11374_v2 = vpack.i.bf16 %v5293_v62, %v5270_v55  ;;  %s5469_s21 = smov 48 }
  0x9a   :  { %v5146_v10 = vsel %vm4101_vm0, %v5144_v8, %v5141_v7  ;;  %v5149_v11 = vld [vmem:[#allocation1 + $0x78e] ss:$16 sm:%s5148_s19]   ;;  %v5309_v61 = vld [vmem:[#allocation1 + $0x48d] ss:$16 sm:%s5308_s23]   ;;  %s5313_s19 = smov 192  ;;  %v5306_v63 = vsel %vm4101_vm0, %v5304_v60, %v5301_v58  ;;  %s5474_s23 = smov 192 }
  0x9b   :  { %v5154_v12 = vld [vmem:[#allocation1 + $0x78e] ss:$16 sm:%s5153_s27]   ;;  %v5151_v13 = vsel %vm4105_vm1, %v5149_v11, %v5146_v10  ;;  %11365 = vrot.lane.b32.xlu0 %v11364_v36, %s11982_s12  ;;  %s5323_s27 = smov 3  ;;  %v5314_v0 = vld [vmem:[#allocation1 + $0x48d] ss:$16 sm:%s5313_s19]   ;;  %v5311_v3 = vsel %vm4105_vm1, %v5309_v61, %v5306_v63  ;;  %s5484_s19 = smov 3 }
  0x9c   :  { %v5156_v16 = vsel %vm4109_vm2, %v5154_v12, %v5151_v13  ;;  %v5324_v1 = vld [vmem:[#allocation1 + $0x68d] ss:$16 sm:%s5323_s27]   ;;  %v5316_v6 = vsel %vm4109_vm2, %v5314_v0, %v5311_v3  ;;  %s5487_s27 = smov 12 }
  0x9d   :  { %v11359_v20 = vpack.i.bf16 %v5156_v16, %v5133_v9  ;;  %v5327_v4 = vld [vmem:[#allocation1 + $0x68d] ss:$16 sm:%s5326_s24]   ;;  %s5492_s24 = smov 48 }
  0x9e   :  { %v5332_v5 = vld [vmem:[#allocation1 + $0x68d] ss:$16 sm:%s5331_s25]   ;;  %v5329_v7 = vsel %vm4101_vm0, %v5327_v4, %v5324_v1  ;;  %s5497_s25 = smov 192 }
  0x9f   :  { %11360 = vrot.lane.b32.xlu1 %v11359_v20, %s11981_s10  ;;  %s5211_s10 = smov 12  ;;  %v5337_v8 = vld [vmem:[#allocation1 + $0x68d] ss:$16 sm:%s5336_s2]   ;;  %11375 = vrot.lane.b32.xlu0 %v11374_v2, %s11982_s12  ;;  %v5334_v10 = vsel %vm4105_vm1, %v5332_v5, %v5329_v7  ;;  %s5507_s2 = smov 3  ;;  %v5531_v5 = vld [vmem:[#allocation1 + $0xc] ss:$16 sm:%s5530_s3]  }
  0xa0   :  { %v5212_v30 = vld [vmem:[#allocation1 + $0x40d] ss:$16 sm:%s5211_s10]   ;;  %v5339_v13 = vsel %vm4109_vm2, %v5337_v8, %v5334_v10  ;;  %s5377_s10 = smov 48  ;;  %s5693_s3 = smov 12 }
  0xa1   :  { %v5214_v33 = vsel %vm4101_vm0, %v5212_v30, %v5209_v28  ;;  %v5347_v9 = vld [vmem:[#allocation1 + $0x10d] ss:$16 sm:%s5346_s1]   ;;  %v11379_v17 = vpack.i.bf16 %v5339_v13, %v5316_v6  ;;  %s5510_s1 = smov 12 }
  0xa2   :  { %v5219_v37 = vsel %vm4105_vm1, %v5217_v31, %v5214_v33  ;;  %v5350_v11 = vld [vmem:[#allocation1 + $0x10d] ss:$16 sm:%s5349_s22]   ;;  %s5515_s22 = smov 48 }
  0xa3   :  { %v5224_v41 = vsel %vm4109_vm2, %v5222_v34, %v5219_v37  ;;  %v5355_v12 = vld [vmem:[#allocation1 + $0x10d] ss:$16 sm:%s5354_s17]   ;;  %v5352_v14 = vsel %vm4101_vm0, %v5350_v11, %v5347_v9  ;;  %s5520_s17 = smov 192 }
  0xa4   :  { %v11369_v52 = vpack.i.bf16 %v5247_v48, %v5224_v41  ;;  %v5370_v16 = vld [vmem:[#allocation1 + $0x30d] ss:$16 sm:%s5369_s30]   ;;  %v5357_v18 = vsel %vm4105_vm1, %v5355_v12, %v5352_v14  ;;  %s5533_s30 = smov 12 }
  0xa5   :  { %v5373_v19 = vld [vmem:[#allocation1 + $0x30d] ss:$16 sm:%s5372_s29]   ;;  %v5362_v21 = vsel %vm4109_vm2, %v5360_v15, %v5357_v18  ;;  %s5538_s29 = smov 48  ;;  %v5534_v7 = vld [vmem:[#allocation1 + $0xc] ss:$16 sm:%s5533_s30]   ;;  %s5698_s30 = smov 48 }
  0xa6   :  { %11370 = vrot.lane.b32.xlu1 %v11369_v52, %s11982_s12  ;;  %v5378_v20 = vld [vmem:[#allocation1 + $0x30d] ss:$16 sm:%s5377_s10]   ;;  %v5375_v22 = vsel %vm4101_vm0, %v5373_v19, %v5370_v16  ;;  %v5539_v8 = vld [vmem:[#allocation1 + $0xc] ss:$16 sm:%s5538_s29]   ;;  %s5543_s10 = smov 192  ;;  %v5536_v10 = vsel %vm4101_vm0, %v5534_v7, %v5531_v5  ;;  %s5703_s29 = smov 192 }
  0xa7   :  { %v5383_v23 = vld [vmem:[#allocation1 + $0x30d] ss:$16 sm:%s5382_s14]   ;;  %v5380_v25 = vsel %vm4105_vm1, %v5378_v20, %v5375_v22  ;;  %v5544_v11 = vld [vmem:[#allocation1 + $0xc] ss:$16 sm:%s5543_s10]   ;;  %s5552_s14 = smov 3  ;;  %v5541_v13 = vsel %vm4105_vm1, %v5539_v8, %v5536_v10  ;;  %s5713_s10 = smov 3 }
  0xa8   :  { %v5393_v24 = vld [vmem:[#allocation1 + $0x50d] ss:$16 sm:%s5392_s18]   ;;  %v5385_v28 = vsel %vm4109_vm2, %v5383_v23, %v5380_v25  ;;  %s5555_s18 = smov 12  ;;  %v5553_v14 = vld [vmem:[#allocation1 + $0x20c] ss:$16 sm:%s5552_s14]   ;;  %v5546_v16 = vsel %vm4109_vm2, %v5544_v11, %v5541_v13  ;;  %s5716_s14 = smov 12 }
  0xa9   :  { %v5396_v26 = vld [vmem:[#allocation1 + $0x50d] ss:$16 sm:%s5395_s28]   ;;  %v11384_v32 = vpack.i.bf16 %v5385_v28, %v5362_v21  ;;  %v5556_v15 = vld [vmem:[#allocation1 + $0x20c] ss:$16 sm:%s5555_s18]   ;;  %s5560_s28 = smov 48  ;;  %s5721_s18 = smov 48 }
  0xaa   :  { %11380 = vrot.lane.b32.xlu1 %v11379_v17, %s11982_s12  ;;  %v5401_v27 = vld [vmem:[#allocation1 + $0x50d] ss:$16 sm:%s5400_s11]   ;;  %v5398_v29 = vsel %vm4101_vm0, %v5396_v26, %v5393_v24  ;;  %s5565_s11 = smov 192  ;;  %v5558_v17 = vsel %vm4101_vm0, %v5556_v15, %v5553_v14  ;;  %v5561_v18 = vld [vmem:[#allocation1 + $0x20c] ss:$16 sm:%s5560_s28]   ;;  %s5726_s28 = smov 192 }
  0xab   :  { %v5406_v30 = vld [vmem:[#allocation1 + $0x50d] ss:$16 sm:%s5405_s8]   ;;  %v5403_v33 = vsel %vm4105_vm1, %v5401_v27, %v5398_v29  ;;  %11385 = vrot.lane.b32.xlu0 %v11384_v32, %s11982_s12  ;;  %v5566_v19 = vld [vmem:[#allocation1 + $0x20c] ss:$16 sm:%s5565_s11]   ;;  %s5575_s8 = smov 3  ;;  %v5563_v20 = vsel %vm4105_vm1, %v5561_v18, %v5558_v17  ;;  %s5736_s11 = smov 3 }
  0xac   :  { %v5416_v31 = vld [vmem:[#allocation1 + $0x70d] ss:$16 sm:%s5415_s9]   ;;  %v5408_v36 = vsel %vm4109_vm2, %v5406_v30, %v5403_v33  ;;  %s5578_s9 = smov 12  ;;  %v5576_v21 = vld [vmem:[#allocation1 + $0x40c] ss:$16 sm:%s5575_s8]   ;;  %v5568_v23 = vsel %vm4109_vm2, %v5566_v19, %v5563_v20  ;;  %s5739_s8 = smov 12 }
  0xad   :  { %v5419_v34 = vld [vmem:[#allocation1 + $0x70d] ss:$16 sm:%s5418_s7]   ;;  %v5579_v22 = vld [vmem:[#allocation1 + $0x40c] ss:$16 sm:%s5578_s9]   ;;  %s5588_s7 = smov 192  ;;  %v11404_v27 = vpack.i.bf16 %v5568_v23, %v5546_v16  ;;  %s5744_s9 = smov 48 }
  0xae   :  { %v5424_v35 = vld [vmem:[#allocation1 + $0x70d] ss:$16 sm:%s5423_s26]   ;;  %v5421_v37 = vsel %vm4101_vm0, %v5419_v34, %v5416_v31  ;;  %v5581_v24 = vsel %vm4101_vm0, %v5579_v22, %v5576_v21  ;;  %v5589_v26 = vld [vmem:[#allocation1 + $0x40c] ss:$16 sm:%s5588_s7]   ;;  %s5598_s26 = smov 3  ;;  %s5759_s7 = smov 3 }
  0xaf   :  { %v5429_v38 = vld [vmem:[#allocation1 + $0x70d] ss:$16 sm:%s5428_s15]   ;;  %v5426_v41 = vsel %vm4105_vm1, %v5424_v35, %v5421_v37  ;;  %s5601_s15 = smov 12  ;;  %v5599_v29 = vld [vmem:[#allocation1 + $0x60c] ss:$16 sm:%s5598_s26]   ;;  %s5762_s26 = smov 12 }
  0xb0   :  { %v5439_v39 = vld [vmem:[#allocation1 + $0x18d] ss:$16 sm:%s5438_s13]   ;;  %v5431_v44 = vsel %vm4109_vm2, %v5429_v38, %v5426_v41  ;;  %v5602_v30 = vld [vmem:[#allocation1 + $0x60c] ss:$16 sm:%s5601_s15]   ;;  %s5606_s13 = smov 48  ;;  %s5767_s15 = smov 48 }
  0xb1   :  { %v5442_v42 = vld [vmem:[#allocation1 + $0x18d] ss:$16 sm:%s5441_s4]   ;;  %v11389_v48 = vpack.i.bf16 %v5431_v44, %v5408_v36  ;;  %s5611_s4 = smov 192  ;;  %v5604_v32 = vsel %vm4101_vm0, %v5602_v30, %v5599_v29  ;;  %v5607_v33 = vld [vmem:[#allocation1 + $0x60c] ss:$16 sm:%s5606_s13]   ;;  %s5772_s13 = smov 192 }
  0xb2   :  { %v5447_v43 = vld [vmem:[#allocation1 + $0x18d] ss:$16 sm:%s5446_s6]   ;;  %v5444_v45 = vsel %vm4101_vm0, %v5442_v42, %v5439_v39  ;;  %v5612_v34 = vld [vmem:[#allocation1 + $0x60c] ss:$16 sm:%s5611_s4]   ;;  %s5621_s6 = smov 3  ;;  %v5609_v35 = vsel %vm4105_vm1, %v5607_v33, %v5604_v32  ;;  %s5782_s4 = smov 3 }
  0xb3   :  { %v5452_v46 = vld [vmem:[#allocation1 + $0x18d] ss:$16 sm:%s5451_s5]   ;;  %v5449_v49 = vsel %vm4105_vm1, %v5447_v43, %v5444_v45  ;;  %11390 = vrot.lane.b32.xlu1 %v11389_v48, %s11982_s12  ;;  %s5624_s5 = smov 12  ;;  %v5622_v36 = vld [vmem:[#allocation1 + $0x8c] ss:$16 sm:%s5621_s6]   ;;  %v5614_v38 = vsel %vm4109_vm2, %v5612_v34, %v5609_v35  ;;  %s5785_s6 = smov 12 }
  0xb4   :  { %v5462_v47 = vld [vmem:[#allocation1 + $0x38d] ss:$16 sm:%s5461_s16]   ;;  %v5454_v52 = vsel %vm4109_vm2, %v5452_v46, %v5449_v49  ;;  %s11983_s16 = smov 96   ;;  %v5625_v37 = vld [vmem:[#allocation1 + $0x8c] ss:$16 sm:%s5624_s5]   ;;  %s5897_s5 = smov 3 }
  0xb5   :  { %v5465_v50 = vld [vmem:[#allocation1 + $0x38d] ss:$16 sm:%s5464_s20]   ;;  %s5629_s20 = smov 48  ;;  %v5627_v39 = vsel %vm4101_vm0, %v5625_v37, %v5622_v36  ;;  %v5722_v7 = vld [vmem:[#allocation1 + $0x10c] ss:$16 sm:%s5721_s18]   ;;  %v11886_v37 = vld [vmem:[%s14531_s0 + $0x320] sm:$0xff]  }
  0xb6   :  { %v5470_v51 = vld [vmem:[#allocation1 + $0x38d] ss:$16 sm:%s5469_s21]   ;;  %v5467_v53 = vsel %vm4101_vm0, %v5465_v50, %v5462_v47  ;;  %s5634_s21 = smov 192  ;;  %v5630_v41 = vld [vmem:[#allocation1 + $0x8c] ss:$16 sm:%s5629_s20]   ;;  %s5874_s18 = smov 3 }
  0xb7   :  { %v5475_v54 = vld [vmem:[#allocation1 + $0x38d] ss:$16 sm:%s5474_s23]   ;;  %v5472_v55 = vsel %vm4105_vm1, %v5470_v51, %v5467_v53  ;;  %v5635_v42 = vld [vmem:[#allocation1 + $0x8c] ss:$16 sm:%s5634_s21]   ;;  %s5644_s23 = smov 3  ;;  %v5632_v44 = vsel %vm4105_vm1, %v5630_v41, %v5627_v39  ;;  %s5900_s20 = smov 12 }
  0xb8   :  { %v5485_v40 = vld [vmem:[#allocation1 + $0x58d] ss:$16 sm:%s5484_s19]   ;;  %v5477_v58 = vsel %vm4109_vm2, %v5475_v54, %v5472_v55  ;;  %s5647_s19 = smov 12  ;;  %v5645_v45 = vld [vmem:[#allocation1 + $0x28c] ss:$16 sm:%s5644_s23]   ;;  %v5637_v47 = vsel %vm4109_vm2, %v5635_v42, %v5632_v44  ;;  %s5851_s23 = smov 3 }
  0xb9   :  { %v5488_v56 = vld [vmem:[#allocation1 + $0x58d] ss:$16 sm:%s5487_s27]   ;;  %v11394_v62 = vpack.i.bf16 %v5477_v58, %v5454_v52  ;;  %v5648_v46 = vld [vmem:[#allocation1 + $0x28c] ss:$16 sm:%s5647_s19]   ;;  %s5652_s27 = smov 48  ;;  %s5790_s19 = smov 48 }
  0xba   :  { %v5493_v57 = vld [vmem:[#allocation1 + $0x58d] ss:$16 sm:%s5492_s24]   ;;  %v5490_v59 = vsel %vm4101_vm0, %v5488_v56, %v5485_v40  ;;  %s5657_s24 = smov 192  ;;  %v5650_v48 = vsel %vm4101_vm0, %v5648_v46, %v5645_v45  ;;  %v5653_v49 = vld [vmem:[#allocation1 + $0x28c] ss:$16 sm:%s5652_s27]   ;;  %s5795_s27 = smov 192 }
  0xbb   :  { %v5498_v60 = vld [vmem:[#allocation1 + $0x58d] ss:$16 sm:%s5497_s25]   ;;  %v5495_v63 = vsel %vm4105_vm1, %v5493_v57, %v5490_v59  ;;  %11395 = vrot.lane.b32.xlu0 %v11394_v62, %s11982_s12  ;;  %v5658_v50 = vld [vmem:[#allocation1 + $0x28c] ss:$16 sm:%s5657_s24]   ;;  %s5667_s25 = smov 3  ;;  %v5655_v51 = vsel %vm4105_vm1, %v5653_v49, %v5650_v48  ;;  %s5805_s24 = smov 3 }
  0xbc   :  { %v5508_v61 = vld [vmem:[#allocation1 + $0x78d] ss:$16 sm:%s5507_s2]   ;;  %v5500_v2 = vsel %vm4109_vm2, %v5498_v60, %v5495_v63  ;;  %s5670_s2 = smov 12  ;;  %v5668_v52 = vld [vmem:[#allocation1 + $0x48c] ss:$16 sm:%s5667_s25]   ;;  %v5660_v54 = vsel %vm4109_vm2, %v5658_v50, %v5655_v51  ;;  %s5808_s25 = smov 12 }
  0xbd   :  { %v5511_v0 = vld [vmem:[#allocation1 + $0x78d] ss:$16 sm:%s5510_s1]   ;;  %v5671_v53 = vld [vmem:[#allocation1 + $0x48c] ss:$16 sm:%s5670_s2]   ;;  %s5675_s1 = smov 48  ;;  %v11414_v57 = vpack.i.bf16 %v5660_v54, %v5637_v47  ;;  %v11888_v45 = vld [vmem:[%s14531_s0 + $0x310] sm:$0xff]  }
  0xbe   :  { %v5516_v1 = vld [vmem:[#allocation1 + $0x78d] ss:$16 sm:%s5515_s22]   ;;  %v5513_v3 = vsel %vm4101_vm0, %v5511_v0, %v5508_v61  ;;  %s5680_s22 = smov 192  ;;  %v5673_v40 = vsel %vm4101_vm0, %v5671_v53, %v5668_v52  ;;  %v5676_v55 = vld [vmem:[#allocation1 + $0x48c] ss:$16 sm:%s5675_s1]   ;;  %v12968_v61 = vpop.permute.xlu0 %11285  ;;  %v10701_v46 = vunpack.c.l.bf16 %v11888_v45  ;;  %v11890_v49 = vld [vmem:[%s14531_s0 + $0x300] sm:$0xff]  }
  0xbf   :  { %v5521_v4 = vld [vmem:[#allocation1 + $0x78d] ss:$16 sm:%s5520_s17]   ;;  %v5518_v6 = vsel %vm4105_vm1, %v5516_v1, %v5513_v3  ;;  %11405 = vrot.lane.b32.xlu0 %v11404_v27, %s11983_s16  ;;  %v5681_v56 = vld [vmem:[#allocation1 + $0x48c] ss:$16 sm:%s5680_s22]   ;;  %s5690_s17 = smov 3  ;;  %v5678_v58 = vsel %vm4105_vm1, %v5676_v55, %v5673_v40  ;;  %v10709_v50 = vunpack.c.l.bf16 %v11890_v49  ;;  %s5859_s1 = smov 48 }
  0xc0   :  { %v5523_v9 = vsel %vm4109_vm2, %v5521_v4, %v5518_v6  ;;  %v5691_v59 = vld [vmem:[#allocation1 + $0x68c] ss:$16 sm:%s5690_s17]   ;;  %v5683_v62 = vsel %vm4109_vm2, %v5681_v56, %v5678_v58  ;;  %v11892_v56 = vld [vmem:[%s14531_s0 + $0x230] sm:$0xff]   ;;  %964 = vst [vmem:[#allocation1 + $0x620] sm:$0xff] %v10701_v46  ;;  %s5864_s22 = smov 192  ;;  %s5905_s21 = smov 48 }
  0xc1   :  { %v11399_v12 = vpack.i.bf16 %v5523_v9, %v5500_v2  ;;  %v5694_v60 = vld [vmem:[#allocation1 + $0x68c] ss:$16 sm:%s5693_s3]   ;;  %s5813_s3 = smov 48  ;;  %1028 = vst [vmem:[#allocation1 + $0x600] sm:$0xff] %v10709_v50  ;;  %v5901_v45 = vld [vmem:[#allocation1 + $0xb] ss:$16 sm:%s5900_s20]  }
  0xc2   :  { %v5696_v63 = vsel %vm4101_vm0, %v5694_v60, %v5691_v59  ;;  %v5699_v0 = vld [vmem:[#allocation1 + $0x68c] ss:$16 sm:%s5698_s30]   ;;  %s5818_s30 = smov 192  ;;  %v11904_v46 = vld [vmem:[%s14531_s0 + $0x350] sm:$0xff]   ;;  %v11906_v50 = vld [vmem:[%s14531_s0 + $0x340] sm:$0xff]   ;;  %s5973_s2 = smov 48 }
  0xc3   :  { %11400 = vrot.lane.b32.xlu1 %v11399_v12, %s11982_s12  ;;  %s5583_s12 = smov 48  ;;  %v5704_v1 = vld [vmem:[#allocation1 + $0x68c] ss:$16 sm:%s5703_s29]   ;;  %11415 = vrot.lane.b32.xlu0 %v11414_v57, %s11983_s16  ;;  %v5701_v2 = vsel %vm4105_vm1, %v5699_v0, %v5696_v63  ;;  %v10813_v57 = vunpack.c.l.bf16 %v11892_v56  ;;  %s5988_s29 = smov 3 }
  0xc4   :  { %v5584_v25 = vld [vmem:[#allocation1 + $0x40c] ss:$16 sm:%s5583_s12]   ;;  %v5706_v5 = vsel %vm4109_vm2, %v5704_v1, %v5701_v2  ;;  %s5749_s12 = smov 192  ;;  %v11894_v1 = vld [vmem:[%s14531_s0 + $0x220] sm:$0xff]   ;;  %s6034_s17 = smov 3 }
  0xc5   :  { %v5586_v28 = vsel %vm4105_vm1, %v5584_v25, %v5581_v24  ;;  %v5714_v3 = vld [vmem:[#allocation1 + $0x10c] ss:$16 sm:%s5713_s10]   ;;  %v11419_v9 = vpack.i.bf16 %v5706_v5, %v5683_v62  ;;  %v12983_v24 = vpop.permute.xlu1 %11295  ;;  %v11884_v25 = vld [vmem:[%s14531_s0 + $0x330] sm:$0xff]   ;;  %v10821_v2 = vunpack.c.l.bf16 %v11894_v1  ;;  %1860 = vst [vmem:[#allocation1 + $0x460] sm:$0xff] %v10813_v57  ;;  %s5922_s10 = smov 12  ;;  %s6060_s20 = smov 12 }
  0xc6   :  { %v5591_v31 = vsel %vm4109_vm2, %v5589_v26, %v5586_v28  ;;  %v5717_v4 = vld [vmem:[#allocation1 + $0x10c] ss:$16 sm:%s5716_s14]   ;;  %v10685_v26 = vunpack.c.l.bf16 %v11884_v25  ;;  %v11900_v25 = vld [vmem:[%s14531_s0 + $0x370] sm:$0xff]   ;;  %s5927_s14 = smov 48  ;;  %v5923_v1 = vld [vmem:[#allocation1 + $0x20b] ss:$16 sm:%s5922_s10]  }
  0xc7   :  { %v11409_v43 = vpack.i.bf16 %v5614_v38, %v5591_v31  ;;  %v5719_v6 = vsel %vm4101_vm0, %v5717_v4, %v5714_v3  ;;  %v5727_v8 = vld [vmem:[#allocation1 + $0x10c] ss:$16 sm:%s5726_s28]   ;;  %v10693_v38 = vunpack.c.l.bf16 %v11886_v37  ;;  %1924 = vst [vmem:[#allocation1 + $0x440] sm:$0xff] %v10821_v2  ;;  %s5877_s28 = smov 12  ;;  %v11908_v57 = vld [vmem:[%s14531_s0 + $0x270] sm:$0xff]   ;;  %s6312_s10 = smov 12 }
  0xc8   :  { %v5724_v10 = vsel %vm4105_vm1, %v5722_v7, %v5719_v6  ;;  %v5737_v11 = vld [vmem:[#allocation1 + $0x30c] ss:$16 sm:%s5736_s11]   ;;  %836 = vst [vmem:[#allocation1 + $0x660] sm:$0xff] %v10685_v26  ;;  %v10653_v26 = vunpack.c.l.bf16 %v11900_v25  ;;  %v5928_v2 = vld [vmem:[#allocation1 + $0x20b] ss:$16 sm:%s5927_s14]   ;;  %s5991_s11 = smov 12 }
  0xc9   :  { %11410 = vrot.lane.b32.xlu1 %v11409_v43, %s11983_s16  ;;  %v5740_v12 = vld [vmem:[#allocation1 + $0x30c] ss:$16 sm:%s5739_s8]   ;;  %v5729_v13 = vsel %vm4109_vm2, %v5727_v8, %v5724_v10  ;;  %s5828_s8 = smov 3  ;;  %900 = vst [vmem:[#allocation1 + $0x640] sm:$0xff] %v10693_v38  ;;  %s6037_s14 = smov 12 }
  0xca   :  { %v5742_v14 = vsel %vm4101_vm0, %v5740_v12, %v5737_v11  ;;  %v5745_v15 = vld [vmem:[#allocation1 + $0x30c] ss:$16 sm:%s5744_s9]   ;;  %s5831_s9 = smov 12  ;;  %580 = vst [vmem:[#allocation1 + $0x6e0] sm:$0xff] %v10653_v26 }
  0xcb   :  { %v5750_v16 = vld [vmem:[#allocation1 + $0x30c] ss:$16 sm:%s5749_s12]   ;;  %v5747_v17 = vsel %vm4105_vm1, %v5745_v15, %v5742_v14  ;;  %s6047_s12 = smov 192 }
  0xcc   :  { %v5760_v18 = vld [vmem:[#allocation1 + $0x50c] ss:$16 sm:%s5759_s7]   ;;  %v5752_v20 = vsel %vm4109_vm2, %v5750_v16, %v5747_v17  ;;  %v11898_v16 = vld [vmem:[%s14531_s0 + $0x200] sm:$0xff]   ;;  %s5882_s7 = smov 48 }
  0xcd   :  { %11420 = vrot.lane.b32.xlu1 %v11419_v9, %s11983_s16  ;;  %v5763_v19 = vld [vmem:[#allocation1 + $0x50c] ss:$16 sm:%s5762_s26]   ;;  %v11424_v29 = vpack.i.bf16 %v5752_v20, %v5729_v13  ;;  %v11896_v9 = vld [vmem:[%s14531_s0 + $0x210] sm:$0xff]   ;;  %v10837_v17 = vunpack.c.l.bf16 %v11898_v16  ;;  %s5887_s26 = smov 192  ;;  %v11914_v16 = vld [vmem:[%s14531_s0 + $0x240] sm:$0xff]  }
  0xce   :  { %v5765_v21 = vsel %vm4101_vm0, %v5763_v19, %v5760_v18  ;;  %v5768_v22 = vld [vmem:[#allocation1 + $0x50c] ss:$16 sm:%s5767_s15]   ;;  %v10829_v10 = vunpack.c.l.bf16 %v11896_v9  ;;  %s5950_s15 = smov 48 }
  0xcf   :  { %v5773_v23 = vld [vmem:[#allocation1 + $0x50c] ss:$16 sm:%s5772_s13]   ;;  %v5770_v30 = vsel %vm4105_vm1, %v5768_v22, %v5765_v21  ;;  %11425 = vrot.lane.b32.xlu0 %v11424_v29, %s11983_s16  ;;  %s5836_s13 = smov 48  ;;  %2052 = vst [vmem:[#allocation1 + $0x400] sm:$0xff] %v10837_v17  ;;  %v10805_v17 = vunpack.c.l.bf16 %v11914_v16  ;;  %v11929_v16 = vld [vmem:[%s14531_s0 + $0x90] sm:$0xff]  }
  0xd0   :  { %v11885_v27 = vld [vmem:[%s14531_s0 + $0x328] sm:$0xff]   ;;  %v5775_v33 = vsel %vm4109_vm2, %v5773_v23, %v5770_v30  ;;  %v11887_v39 = vld [vmem:[%s14531_s0 + $0x318] sm:$0xff]   ;;  %1988 = vst [vmem:[#allocation1 + $0x420] sm:$0xff] %v10829_v10 }
  0xd1   :  { %v10689_v28 = vunpack.c.l.bf16 %v11885_v27  ;;  %v5783_v31 = vld [vmem:[#allocation1 + $0x70c] ss:$16 sm:%s5782_s4]   ;;  %v10697_v41 = vunpack.c.l.bf16 %v11887_v39  ;;  %s5841_s4 = smov 192  ;;  %1796 = vst [vmem:[#allocation1 + $0x480] sm:$0xff] %v10805_v17  ;;  %v11021_v17 = vunpack.c.l.bf16 %v11929_v16 }
  0xd2   :  { %v5786_v32 = vld [vmem:[#allocation1 + $0x70c] ss:$16 sm:%s5785_s6]   ;;  %s6175_s6 = smov 12 }
  0xd3   :  { %v5788_v34 = vsel %vm4101_vm0, %v5786_v32, %v5783_v31  ;;  %v5791_v35 = vld [vmem:[#allocation1 + $0x70c] ss:$16 sm:%s5790_s19]   ;;  %868 = vst [vmem:[#allocation1 + $0x650] sm:$0xff] %v10689_v28  ;;  %932 = vst [vmem:[#allocation1 + $0x630] sm:$0xff] %v10697_v41  ;;  %s5854_s19 = smov 12 }
  0xd4   :  { %v5796_v36 = vld [vmem:[#allocation1 + $0x70c] ss:$16 sm:%s5795_s27]   ;;  %v5793_v42 = vsel %vm4105_vm1, %v5791_v35, %v5788_v34  ;;  %v11902_v34 = vld [vmem:[%s14531_s0 + $0x360] sm:$0xff]   ;;  %s6019_s27 = smov 48  ;;  %3524 = vst [vmem:[#allocation1 + $0x120] sm:$0xff] %v11021_v17 }
  0xd5   :  { %v5806_v43 = vld [vmem:[#allocation1 + $0x18c] ss:$16 sm:%s5805_s24]   ;;  %v5798_v51 = vsel %vm4109_vm2, %v5796_v36, %v5793_v42  ;;  %v10661_v35 = vunpack.c.l.bf16 %v11902_v34  ;;  %s6129_s24 = smov 12 }
  0xd6   :  { %v5809_v44 = vld [vmem:[#allocation1 + $0x18c] ss:$16 sm:%s5808_s25]   ;;  %v11429_v58 = vpack.i.bf16 %v5798_v51, %v5775_v33  ;;  %v13054_v33 = vpop.permute.xlu0 %11290  ;;  %v10677_v51 = vunpack.c.l.bf16 %v11906_v50  ;;  %s5968_s25 = smov 12 }
  0xd7   :  { %v11889_v47 = vld [vmem:[%s14531_s0 + $0x308] sm:$0xff]   ;;  %v5811_v52 = vsel %vm4101_vm0, %v5809_v44, %v5806_v43  ;;  %v11891_v40 = vld [vmem:[%s14531_s0 + $0x238] sm:$0xff]   ;;  %644 = vst [vmem:[#allocation1 + $0x6c0] sm:$0xff] %v10661_v35 }
  0xd8   :  { %v10705_v48 = vunpack.c.l.bf16 %v11889_v47  ;;  %v5814_v53 = vld [vmem:[#allocation1 + $0x18c] ss:$16 sm:%s5813_s3]   ;;  %v10809_v55 = vunpack.c.l.bf16 %v11891_v40  ;;  %11430 = vrot.lane.b32.xlu1 %v11429_v58, %s11983_s16  ;;  %v5898_v44 = vld [vmem:[#allocation1 + $0xb] ss:$16 sm:%s5897_s5]   ;;  %v10669_v47 = vunpack.c.l.bf16 %v11904_v46  ;;  %v10781_v58 = vunpack.c.l.bf16 %v11908_v57  ;;  %772 = vst [vmem:[#allocation1 + $0x680] sm:$0xff] %v10677_v51  ;;  %s6116_s5 = smov 192 }
  0xd9   :  { %v5819_v54 = vld [vmem:[#allocation1 + $0x18c] ss:$16 sm:%s5818_s30]   ;;  %v5816_v59 = vsel %vm4105_vm1, %v5814_v53, %v5811_v52  ;;  %v5903_v53 = vsel %vm4101_vm0, %v5901_v45, %v5898_v44  ;;  %v5969_v35 = vld [vmem:[#allocation1 + $0x60b] ss:$16 sm:%s5968_s25]   ;;  %s5978_s30 = smov 192  ;;  %s6070_s25 = smov 192 }
  0xda   :  { %v5829_v60 = vld [vmem:[#allocation1 + $0x38c] ss:$16 sm:%s5828_s8]   ;;  %996 = vst [vmem:[#allocation1 + $0x610] sm:$0xff] %v10705_v48  ;;  %v5821_v3 = vsel %vm4109_vm2, %v5819_v54, %v5816_v59  ;;  %1828 = vst [vmem:[#allocation1 + $0x470] sm:$0xff] %v10809_v55  ;;  %v5906_v54 = vld [vmem:[#allocation1 + $0xb] ss:$16 sm:%s5905_s21]  }
  0xdb   :  { %v5832_v62 = vld [vmem:[#allocation1 + $0x38c] ss:$16 sm:%s5831_s9]   ;;  %708 = vst [vmem:[#allocation1 + $0x6a0] sm:$0xff] %v10669_v47  ;;  %1604 = vst [vmem:[#allocation1 + $0x4e0] sm:$0xff] %v10781_v58  ;;  %v5979_v44 = vld [vmem:[#allocation1 + $0x60b] ss:$16 sm:%s5978_s30]  }
  0xdc   :  { %v11893_v63 = vld [vmem:[%s14531_s0 + $0x228] sm:$0xff]   ;;  %v5834_v4 = vsel %vm4101_vm0, %v5832_v62, %v5829_v60  ;;  %v11895_v7 = vld [vmem:[%s14531_s0 + $0x218] sm:$0xff]   ;;  %v5908_v60 = vsel %vm4105_vm1, %v5906_v54, %v5903_v53  ;;  %s5996_s8 = smov 48  ;;  %s6065_s21 = smov 48 }
  0xdd   :  { %v10817_v0 = vunpack.c.l.bf16 %v11893_v63  ;;  %v5837_v5 = vld [vmem:[#allocation1 + $0x38c] ss:$16 sm:%s5836_s13]   ;;  %v10825_v8 = vunpack.c.l.bf16 %v11895_v7  ;;  %v13084_v63 = vpop.permute.xlu1 %11300  ;;  %v5989_v45 = vld [vmem:[#allocation1 + $0x8b] ss:$16 sm:%s5988_s29]   ;;  %s6011_s13 = smov 3  ;;  %s6083_s30 = smov 12 }
  0xde   :  { %v5842_v6 = vld [vmem:[#allocation1 + $0x38c] ss:$16 sm:%s5841_s4]   ;;  %v5839_v11 = vsel %vm4105_vm1, %v5837_v5, %v5834_v4  ;;  %v11910_v5 = vld [vmem:[%s14531_s0 + $0x260] sm:$0xff]   ;;  %v5992_v51 = vld [vmem:[#allocation1 + $0x8b] ss:$16 sm:%s5991_s11]   ;;  %s6088_s29 = smov 48 }
  0xdf   :  { %v5852_v12 = vld [vmem:[#allocation1 + $0x58c] ss:$16 sm:%s5851_s23]   ;;  %1892 = vst [vmem:[#allocation1 + $0x450] sm:$0xff] %v10817_v0  ;;  %v5844_v20 = vsel %vm4109_vm2, %v5842_v6, %v5839_v11  ;;  %1956 = vst [vmem:[#allocation1 + $0x430] sm:$0xff] %v10825_v8  ;;  %s5910_s23 = smov 192  ;;  %v10789_v6 = vunpack.c.l.bf16 %v11910_v5  ;;  %s6093_s11 = smov 192 }
  0xe0   :  { %v5855_v13 = vld [vmem:[#allocation1 + $0x58c] ss:$16 sm:%s5854_s19]   ;;  %v11434_v29 = vpack.i.bf16 %v5844_v20, %v5821_v3  ;;  %v5911_v40 = vld [vmem:[#allocation1 + $0xb] ss:$16 sm:%s5910_s23]   ;;  %s5955_s23 = smov 192  ;;  %s5965_s19 = smov 3 }
  0xe1   :  { %v11897_v14 = vld [vmem:[%s14531_s0 + $0x208] sm:$0xff]   ;;  %v11899_v18 = vld [vmem:[%s14531_s0 + $0x338] sm:$0xff]   ;;  %v5857_v21 = vsel %vm4101_vm0, %v5855_v13, %v5852_v12  ;;  %v13087_v0 = vsel %vm4109_vm2, %v5911_v40, %v5908_v60  ;;  %v11912_v12 = vld [vmem:[%s14531_s0 + $0x250] sm:$0xff]   ;;  %1668 = vst [vmem:[#allocation1 + $0x4c0] sm:$0xff] %v10789_v6  ;;  %s6139_s3 = smov 192  ;;  %s6358_s4 = smov 12 }
  0xe2   :  { %v10833_v15 = vunpack.c.l.bf16 %v11897_v14  ;;  %v10681_v19 = vunpack.c.l.bf16 %v11899_v18  ;;  %v5860_v22 = vld [vmem:[#allocation1 + $0x58c] ss:$16 sm:%s5859_s1]   ;;  %11435 = vrot.lane.b32.xlu0 %v11434_v29, %s11983_s16  ;;  %v10797_v13 = vunpack.c.l.bf16 %v11912_v12  ;;  %v5951_v20 = vld [vmem:[#allocation1 + $0x40b] ss:$16 sm:%s5950_s15]   ;;  %s6001_s15 = smov 192  ;;  %v11923_v40 = vld [vmem:[%s14531_s0 + $0x180] sm:$0xff]  }
  0xe3   :  { %v5865_v23 = vld [vmem:[#allocation1 + $0x58c] ss:$16 sm:%s5864_s22]   ;;  %v5862_v30 = vsel %vm4105_vm1, %v5860_v22, %v5857_v21  ;;  %s5919_s22 = smov 3  ;;  %v5956_v26 = vld [vmem:[#allocation1 + $0x40b] ss:$16 sm:%s5955_s23]   ;;  %s6241_s23 = smov 3 }
  0xe4   :  { %v11901_v27 = vld [vmem:[%s14531_s0 + $0x368] sm:$0xff]   ;;  %2020 = vst [vmem:[#allocation1 + $0x410] sm:$0xff] %v10833_v15  ;;  %804 = vst [vmem:[#allocation1 + $0x670] sm:$0xff] %v10681_v19  ;;  %v11903_v36 = vld [vmem:[%s14531_s0 + $0x358] sm:$0xff]   ;;  %v5867_v38 = vsel %vm4109_vm2, %v5865_v23, %v5862_v30  ;;  %s6299_s1 = smov 192  ;;  %s6493_s9 = smov 3 }
  0xe5   :  { %v10657_v28 = vunpack.c.l.bf16 %v11901_v27  ;;  %v5875_v31 = vld [vmem:[#allocation1 + $0x78c] ss:$16 sm:%s5874_s18]   ;;  %v10665_v37 = vunpack.c.l.bf16 %v11903_v36  ;;  %v5920_v62 = vld [vmem:[#allocation1 + $0x20b] ss:$16 sm:%s5919_s22]   ;;  %s5932_s18 = smov 192  ;;  %1732 = vst [vmem:[#allocation1 + $0x4a0] sm:$0xff] %v10797_v13 }
  0xe6   :  { %v5878_v32 = vld [vmem:[#allocation1 + $0x78c] ss:$16 sm:%s5877_s28]   ;;  %s5942_s28 = smov 3  ;;  %v5925_v9 = vsel %vm4101_vm0, %v5923_v1, %v5920_v62  ;;  %v5933_v10 = vld [vmem:[#allocation1 + $0x20b] ss:$16 sm:%s5932_s18]   ;;  %v11917_v30 = vld [vmem:[%s14531_s0 + $0x1b0] sm:$0xff]  }
  0xe7   :  { %v5880_v39 = vsel %vm4101_vm0, %v5878_v32, %v5875_v31  ;;  %v5883_v41 = vld [vmem:[#allocation1 + $0x78c] ss:$16 sm:%s5882_s7]   ;;  %612 = vst [vmem:[#allocation1 + $0x6d0] sm:$0xff] %v10657_v28  ;;  %676 = vst [vmem:[#allocation1 + $0x6b0] sm:$0xff] %v10665_v37  ;;  %v5943_v11 = vld [vmem:[#allocation1 + $0x40b] ss:$16 sm:%s5942_s28]   ;;  %v5930_v18 = vsel %vm4105_vm1, %v5928_v2, %v5925_v9  ;;  %v10877_v31 = vunpack.c.l.bf16 %v11917_v30 }
  0xe8   :  { %v5888_v42 = vld [vmem:[#allocation1 + $0x78c] ss:$16 sm:%s5887_s26]   ;;  %v5885_v43 = vsel %vm4105_vm1, %v5883_v41, %v5880_v39  ;;  %v5935_v23 = vsel %vm4109_vm2, %v5933_v10, %v5930_v18  ;;  %v5966_v27 = vld [vmem:[#allocation1 + $0x60b] ss:$16 sm:%s5965_s19]   ;;  %v11919_v39 = vld [vmem:[%s14531_s0 + $0x1a0] sm:$0xff]   ;;  %s6014_s19 = smov 12 }
  0xe9   :  { %v11905_v48 = vld [vmem:[%s14531_s0 + $0x348] sm:$0xff]   ;;  %v5890_v52 = vsel %vm4109_vm2, %v5888_v42, %v5885_v43  ;;  %v11907_v55 = vld [vmem:[%s14531_s0 + $0x278] sm:$0xff]   ;;  %v11444_v32 = vpack.i.bf16 %v5935_v23, %v13087_v0  ;;  %v10885_v41 = vunpack.c.l.bf16 %v11919_v39  ;;  %v5971_v43 = vsel %vm4101_vm0, %v5969_v35, %v5966_v27  ;;  %2372 = vst [vmem:[#allocation1 + $0x360] sm:$0xff] %v10877_v31  ;;  %v11925_v0 = vld [vmem:[%s14531_s0 + $0xb0] sm:$0xff]   ;;  %s6024_s22 = smov 192  ;;  %s6042_s18 = smov 48 }
  0xea   :  { %v10673_v49 = vunpack.c.l.bf16 %v11905_v48  ;;  %v10777_v56 = vunpack.c.l.bf16 %v11907_v55  ;;  %v11439_v59 = vpack.i.bf16 %v5890_v52, %v5867_v38  ;;  %v11909_v3 = vld [vmem:[%s14531_s0 + $0x268] sm:$0xff]   ;;  %v11911_v7 = vld [vmem:[%s14531_s0 + $0x258] sm:$0xff]   ;;  %v11921_v48 = vld [vmem:[%s14531_s0 + $0x190] sm:$0xff]   ;;  %v10901_v55 = vunpack.c.l.bf16 %v11923_v40  ;;  %s6057_s7 = smov 3  ;;  %s6111_s26 = smov 48 }
  0xeb   :  { %v10785_v4 = vunpack.c.l.bf16 %v11909_v3  ;;  %v10793_v8 = vunpack.c.l.bf16 %v11911_v7  ;;  %v11913_v14 = vld [vmem:[%s14531_s0 + $0x248] sm:$0xff]   ;;  %v11915_v21 = vld [vmem:[%s14531_s0 + $0x378] sm:$0xff]   ;;  %2436 = vst [vmem:[#allocation1 + $0x340] sm:$0xff] %v10885_v41  ;;  %v11005_v1 = vunpack.c.l.bf16 %v11925_v0  ;;  %v11931_v23 = vld [vmem:[%s14531_s0 + $0x80] sm:$0xff]   ;;  %s6470_s28 = smov 3 }
  0xec   :  { %740 = vst [vmem:[#allocation1 + $0x690] sm:$0xff] %v10673_v49  ;;  %1572 = vst [vmem:[#allocation1 + $0x4f0] sm:$0xff] %v10777_v56  ;;  %11440 = vrot.lane.b32.xlu1 %v11439_v59, %s11983_s16  ;;  %s5945_s16 = smov 12  ;;  %v10801_v15 = vunpack.c.l.bf16 %v11913_v14  ;;  %v10649_v22 = vunpack.c.l.bf16 %v11915_v21  ;;  %v11916_v28 = vld [vmem:[%s14531_s0 + $0x1b8] sm:$0xff]   ;;  %v11918_v37 = vld [vmem:[%s14531_s0 + $0x1a8] sm:$0xff]   ;;  %v10893_v49 = vunpack.c.l.bf16 %v11921_v48  ;;  %v5994_v59 = vsel %vm4101_vm0, %v5992_v51, %v5989_v45 }
  0xed   :  { %v5946_v19 = vld [vmem:[#allocation1 + $0x40b] ss:$16 sm:%s5945_s16]   ;;  %1636 = vst [vmem:[#allocation1 + $0x4d0] sm:$0xff] %v10785_v4  ;;  %1700 = vst [vmem:[#allocation1 + $0x4b0] sm:$0xff] %v10793_v8  ;;  %v10873_v29 = vunpack.c.l.bf16 %v11916_v28  ;;  %v10881_v38 = vunpack.c.l.bf16 %v11918_v37  ;;  %s11984_s16 = smov 88   ;;  %v11927_v8 = vld [vmem:[%s14531_s0 + $0xa0] sm:$0xff]  }
  0xee   :  { %v5948_v25 = vsel %vm4101_vm0, %v5946_v19, %v5943_v11  ;;  %1764 = vst [vmem:[#allocation1 + $0x490] sm:$0xff] %v10801_v15  ;;  %v5974_v36 = vld [vmem:[#allocation1 + $0x60b] ss:$16 sm:%s5973_s2]   ;;  %548 = vst [vmem:[#allocation1 + $0x6f0] sm:$0xff] %v10649_v22  ;;  %11445 = vrot.lane.b32.xlu0 %v11444_v32, %s11984_s16  ;;  %v11013_v9 = vunpack.c.l.bf16 %v11927_v8  ;;  %v11934_v35 = vld [vmem:[%s14531_s0 + $0x3a0] sm:$0xff]   ;;  %s6080_s2 = smov 3 }
  0xef   :  { %v5953_v34 = vsel %vm4105_vm1, %v5951_v20, %v5948_v25  ;;  %2340 = vst [vmem:[#allocation1 + $0x370] sm:$0xff] %v10873_v29  ;;  %v11920_v46 = vld [vmem:[%s14531_s0 + $0x198] sm:$0xff]   ;;  %v5976_v50 = vsel %vm4105_vm1, %v5974_v36, %v5971_v43  ;;  %2404 = vst [vmem:[#allocation1 + $0x350] sm:$0xff] %v10881_v38  ;;  %v11922_v53 = vld [vmem:[%s14531_s0 + $0x188] sm:$0xff]   ;;  %v11029_v25 = vunpack.c.l.bf16 %v11931_v23  ;;  %v10629_v36 = vunpack.c.l.bf16 %v11934_v35 }
  0xf0   :  { %v13130_v42 = vsel %vm4109_vm2, %v5956_v26, %v5953_v34  ;;  %v10889_v47 = vunpack.c.l.bf16 %v11920_v46  ;;  %v5997_v52 = vld [vmem:[#allocation1 + $0x8b] ss:$16 sm:%s5996_s8]   ;;  %v10897_v54 = vunpack.c.l.bf16 %v11922_v53  ;;  %v5981_v58 = vsel %vm4109_vm2, %v5979_v44, %v5976_v50  ;;  %2500 = vst [vmem:[#allocation1 + $0x320] sm:$0xff] %v10893_v49  ;;  %2564 = vst [vmem:[#allocation1 + $0x300] sm:$0xff] %v10901_v55  ;;  %v11932_v26 = vld [vmem:[%s14531_s0 + $0x3b0] sm:$0xff]   ;;  %s6103_s8 = smov 3 }
  0xf1   :  { %v11924_v56 = vld [vmem:[%s14531_s0 + $0xb8] sm:$0xff]   ;;  %v11926_v2 = vld [vmem:[%s14531_s0 + $0xa8] sm:$0xff]   ;;  %v11449_v4 = vpack.i.bf16 %v5981_v58, %v13130_v42  ;;  %v5999_v5 = vsel %vm4105_vm1, %v5997_v52, %v5994_v59  ;;  %3396 = vst [vmem:[#allocation1 + $0x160] sm:$0xff] %v11005_v1  ;;  %3460 = vst [vmem:[#allocation1 + $0x140] sm:$0xff] %v11013_v9  ;;  %v10621_v27 = vunpack.c.l.bf16 %v11932_v26  ;;  %v13205_v52 = vpop.permute.xlu0 %11305 }
  0xf2   :  { %v11001_v57 = vunpack.c.l.bf16 %v11924_v56  ;;  %v6002_v60 = vld [vmem:[#allocation1 + $0x8b] ss:$16 sm:%s6001_s15]   ;;  %2468 = vst [vmem:[#allocation1 + $0x330] sm:$0xff] %v10889_v47  ;;  %v11009_v3 = vunpack.c.l.bf16 %v11926_v2  ;;  %2532 = vst [vmem:[#allocation1 + $0x310] sm:$0xff] %v10897_v54  ;;  %v11936_v44 = vld [vmem:[%s14531_s0 + $0x390] sm:$0xff]   ;;  %s6221_s15 = smov 12 }
  0xf3   :  { %v6012_v62 = vld [vmem:[#allocation1 + $0x28b] ss:$16 sm:%s6011_s13]   ;;  %v13167_v12 = vsel %vm4109_vm2, %v6002_v60, %v5999_v5  ;;  %11450 = vrot.lane.b32.xlu1 %v11449_v4, %s11984_s16  ;;  %3588 = vst [vmem:[#allocation1 + $0x100] sm:$0xff] %v11029_v25  ;;  %324 = vst [vmem:[#allocation1 + $0x760] sm:$0xff] %v10621_v27  ;;  %v10637_v45 = vunpack.c.l.bf16 %v11936_v44  ;;  %v11938_v53 = vld [vmem:[%s14531_s0 + $0x380] sm:$0xff]   ;;  %s6226_s13 = smov 48 }
  0xf4   :  { %v6015_v6 = vld [vmem:[#allocation1 + $0x28b] ss:$16 sm:%s6014_s19]   ;;  %3364 = vst [vmem:[#allocation1 + $0x170] sm:$0xff] %v11001_v57  ;;  %3428 = vst [vmem:[#allocation1 + $0x150] sm:$0xff] %v11009_v3  ;;  %v10645_v54 = vunpack.c.l.bf16 %v11938_v53  ;;  %v11940_v59 = vld [vmem:[%s14531_s0 + $0x2b0] sm:$0xff]   ;;  %s6386_s19 = smov 48 }
  0xf5   :  { %v6020_v7 = vld [vmem:[#allocation1 + $0x28b] ss:$16 sm:%s6019_s27]   ;;  %v6017_v13 = vsel %vm4101_vm0, %v6015_v6, %v6012_v62  ;;  %388 = vst [vmem:[#allocation1 + $0x740] sm:$0xff] %v10629_v36  ;;  %452 = vst [vmem:[#allocation1 + $0x720] sm:$0xff] %v10637_v45  ;;  %v10749_v60 = vunpack.c.l.bf16 %v11940_v59  ;;  %v11942_v5 = vld [vmem:[%s14531_s0 + $0x2a0] sm:$0xff]   ;;  %s6185_s27 = smov 192 }
  0xf6   :  { %v11928_v10 = vld [vmem:[%s14531_s0 + $0x98] sm:$0xff]   ;;  %v11930_v18 = vld [vmem:[%s14531_s0 + $0x88] sm:$0xff]   ;;  %v6022_v20 = vsel %vm4105_vm1, %v6020_v7, %v6017_v13  ;;  %516 = vst [vmem:[#allocation1 + $0x700] sm:$0xff] %v10645_v54  ;;  %v10757_v6 = vunpack.c.l.bf16 %v11942_v5  ;;  %v13226_v7 = vpop.permute.xlu1 %11310 }
  0xf7   :  { %v11017_v11 = vunpack.c.l.bf16 %v11928_v10  ;;  %v6025_v14 = vld [vmem:[#allocation1 + $0x28b] ss:$16 sm:%s6024_s22]   ;;  %v11025_v19 = vunpack.c.l.bf16 %v11930_v18  ;;  %1348 = vst [vmem:[#allocation1 + $0x560] sm:$0xff] %v10749_v60  ;;  %s6244_s22 = smov 12 }
  0xf8   :  { %v6035_v15 = vld [vmem:[#allocation1 + $0x48b] ss:$16 sm:%s6034_s17]   ;;  %v6027_v30 = vsel %vm4109_vm2, %v6025_v14, %v6022_v20  ;;  %v11944_v14 = vld [vmem:[%s14531_s0 + $0x290] sm:$0xff]   ;;  %1412 = vst [vmem:[#allocation1 + $0x540] sm:$0xff] %v10757_v6  ;;  %s6249_s17 = smov 48 }
  0xf9   :  { %v6038_v21 = vld [vmem:[#allocation1 + $0x48b] ss:$16 sm:%s6037_s14]   ;;  %3492 = vst [vmem:[#allocation1 + $0x130] sm:$0xff] %v11017_v11  ;;  %3556 = vst [vmem:[#allocation1 + $0x110] sm:$0xff] %v11025_v19  ;;  %v11454_v39 = vpack.i.bf16 %v6027_v30, %v13167_v12  ;;  %s6152_s14 = smov 12 }
  0xfa   :  { %v6043_v22 = vld [vmem:[#allocation1 + $0x48b] ss:$16 sm:%s6042_s18]   ;;  %v6040_v31 = vsel %vm4101_vm0, %v6038_v21, %v6035_v15  ;;  %v10765_v15 = vunpack.c.l.bf16 %v11944_v14  ;;  %s6157_s18 = smov 48 }
  0xfb   :  { %v11933_v28 = vld [vmem:[%s14531_s0 + $0x3a8] sm:$0xff]   ;;  %v11935_v37 = vld [vmem:[%s14531_s0 + $0x398] sm:$0xff]   ;;  %v6045_v41 = vsel %vm4105_vm1, %v6043_v22, %v6040_v31  ;;  %11455 = vrot.lane.b32.xlu0 %v11454_v39, %s11984_s16  ;;  %v11946_v22 = vld [vmem:[%s14531_s0 + $0x280] sm:$0xff]  }
  0xfc   :  { %v10625_v29 = vunpack.c.l.bf16 %v11933_v28  ;;  %v6048_v32 = vld [vmem:[#allocation1 + $0x48b] ss:$16 sm:%s6047_s12]   ;;  %v10633_v38 = vunpack.c.l.bf16 %v11935_v37  ;;  %v10773_v23 = vunpack.c.l.bf16 %v11946_v22  ;;  %1476 = vst [vmem:[#allocation1 + $0x520] sm:$0xff] %v10765_v15  ;;  %v11949_v37 = vld [vmem:[%s14531_s0 + $0x1f0] sm:$0xff]   ;;  %s6162_s12 = smov 192 }
  0xfd   :  { %v6058_v34 = vld [vmem:[#allocation1 + $0x68b] ss:$16 sm:%s6057_s7]   ;;  %v6050_v48 = vsel %vm4109_vm2, %v6048_v32, %v6045_v41  ;;  %s6106_s7 = smov 12 }
  0xfe   :  { %v6061_v42 = vld [vmem:[#allocation1 + $0x68b] ss:$16 sm:%s6060_s20]   ;;  %356 = vst [vmem:[#allocation1 + $0x750] sm:$0xff] %v10625_v29  ;;  %420 = vst [vmem:[#allocation1 + $0x730] sm:$0xff] %v10633_v38  ;;  %s6126_s20 = smov 3  ;;  %v10845_v38 = vunpack.c.l.bf16 %v11949_v37 }
  0xff   :  { %v6066_v43 = vld [vmem:[#allocation1 + $0x68b] ss:$16 sm:%s6065_s21]   ;;  %v6063_v49 = vsel %vm4101_vm0, %v6061_v42, %v6058_v34  ;;  %1540 = vst [vmem:[#allocation1 + $0x500] sm:$0xff] %v10773_v23  ;;  %s6231_s21 = smov 192 }
 0x100   :  { %v11937_v46 = vld [vmem:[%s14531_s0 + $0x388] sm:$0xff]   ;;  %v11939_v40 = vld [vmem:[%s14531_s0 + $0x2b8] sm:$0xff]   ;;  %v6068_v56 = vsel %vm4105_vm1, %v6066_v43, %v6063_v49  ;;  %2116 = vst [vmem:[#allocation1 + $0x3e0] sm:$0xff] %v10845_v38 }
 0x101   :  { %v10641_v47 = vunpack.c.l.bf16 %v11937_v46  ;;  %v6071_v50 = vld [vmem:[#allocation1 + $0x68b] ss:$16 sm:%s6070_s25]   ;;  %v10745_v55 = vunpack.c.l.bf16 %v11939_v40  ;;  %s6134_s25 = smov 48  ;;  %v11951_v46 = vld [vmem:[%s14531_s0 + $0x1e0] sm:$0xff]   ;;  %v11953_v40 = vld [vmem:[%s14531_s0 + $0x1d0] sm:$0xff]  }
 0x102   :  { %v6081_v51 = vld [vmem:[#allocation1 + $0x10b] ss:$16 sm:%s6080_s2]   ;;  %v6073_v62 = vsel %vm4109_vm2, %v6071_v50, %v6068_v56  ;;  %s6294_s2 = smov 48 }
 0x103   :  { %v6084_v57 = vld [vmem:[#allocation1 + $0x10b] ss:$16 sm:%s6083_s30]   ;;  %484 = vst [vmem:[#allocation1 + $0x710] sm:$0xff] %v10641_v47  ;;  %1316 = vst [vmem:[#allocation1 + $0x570] sm:$0xff] %v10745_v55  ;;  %v11459_v8 = vpack.i.bf16 %v6073_v62, %v6050_v48  ;;  %s6149_s30 = smov 3  ;;  %v10853_v47 = vunpack.c.l.bf16 %v11951_v46  ;;  %v10861_v55 = vunpack.c.l.bf16 %v11953_v40  ;;  %v11955_v62 = vld [vmem:[%s14531_s0 + $0x1c0] sm:$0xff]  }
 0x104   :  { %v6089_v58 = vld [vmem:[#allocation1 + $0x10b] ss:$16 sm:%s6088_s29]   ;;  %v6086_v0 = vsel %vm4101_vm0, %v6084_v57, %v6081_v51  ;;  %s6203_s29 = smov 48 }
 0x105   :  { %v6094_v1 = vld [vmem:[#allocation1 + $0x10b] ss:$16 sm:%s6093_s11]   ;;  %v6091_v9 = vsel %vm4105_vm1, %v6089_v58, %v6086_v0  ;;  %11460 = vrot.lane.b32.xlu1 %v11459_v8, %s11984_s16  ;;  %2180 = vst [vmem:[#allocation1 + $0x3c0] sm:$0xff] %v10853_v47  ;;  %v10869_v0 = vunpack.c.l.bf16 %v11955_v62  ;;  %2244 = vst [vmem:[#allocation1 + $0x3a0] sm:$0xff] %v10861_v55  ;;  %v11957_v8 = vld [vmem:[%s14531_s0 + $0xf0] sm:$0xff]   ;;  %s6208_s11 = smov 192 }
 0x106   :  { %v6104_v2 = vld [vmem:[#allocation1 + $0x30b] ss:$16 sm:%s6103_s8]   ;;  %v6096_v16 = vsel %vm4109_vm2, %v6094_v1, %v6091_v9  ;;  %v10973_v9 = vunpack.c.l.bf16 %v11957_v8  ;;  %s6218_s8 = smov 3  ;;  %v11970_v62 = vld [vmem:[%s14531_s0 + $0x3c0] sm:$0xff]  }
 0x107   :  { %v11941_v3 = vld [vmem:[%s14531_s0 + $0x2a8] sm:$0xff]   ;;  %v11943_v12 = vld [vmem:[%s14531_s0 + $0x298] sm:$0xff]   ;;  %2308 = vst [vmem:[#allocation1 + $0x380] sm:$0xff] %v10869_v0  ;;  %v10613_v0 = vunpack.c.l.bf16 %v11970_v62 }
 0x108   :  { %v10753_v4 = vunpack.c.l.bf16 %v11941_v3  ;;  %v6107_v10 = vld [vmem:[#allocation1 + $0x30b] ss:$16 sm:%s6106_s7]   ;;  %v10761_v13 = vunpack.c.l.bf16 %v11943_v12  ;;  %s6172_s7 = smov 3  ;;  %3140 = vst [vmem:[#allocation1 + $0x1e0] sm:$0xff] %v10973_v9 }
 0x109   :  { %v6112_v11 = vld [vmem:[#allocation1 + $0x30b] ss:$16 sm:%s6111_s26]   ;;  %v6109_v17 = vsel %vm4101_vm0, %v6107_v10, %v6104_v2  ;;  %260 = vst [vmem:[#allocation1 + $0x780] sm:$0xff] %v10613_v0  ;;  %s6340_s26 = smov 48 }
 0x10a   :  { %v6117_v18 = vld [vmem:[#allocation1 + $0x30b] ss:$16 sm:%s6116_s5]   ;;  %1380 = vst [vmem:[#allocation1 + $0x550] sm:$0xff] %v10753_v4  ;;  %v6114_v25 = vsel %vm4105_vm1, %v6112_v11, %v6109_v17  ;;  %1444 = vst [vmem:[#allocation1 + $0x530] sm:$0xff] %v10761_v13  ;;  %s6180_s5 = smov 48 }
 0x10b   :  { %v6127_v19 = vld [vmem:[#allocation1 + $0x50b] ss:$16 sm:%s6126_s20]   ;;  %v6119_v30 = vsel %vm4109_vm2, %v6117_v18, %v6114_v25  ;;  %v11961_v25 = vld [vmem:[%s14531_s0 + $0xd0] sm:$0xff]   ;;  %s6368_s20 = smov 192 }
 0x10c   :  { %v11945_v20 = vld [vmem:[%s14531_s0 + $0x288] sm:$0xff]   ;;  %v11947_v28 = vld [vmem:[%s14531_s0 + $0x3b8] sm:$0xff]   ;;  %v11464_v39 = vpack.i.bf16 %v6119_v30, %v6096_v16  ;;  %v11959_v16 = vld [vmem:[%s14531_s0 + $0xe0] sm:$0xff]  }
 0x10d   :  { %v10769_v21 = vunpack.c.l.bf16 %v11945_v20  ;;  %v6130_v26 = vld [vmem:[#allocation1 + $0x50b] ss:$16 sm:%s6129_s24]   ;;  %v10617_v29 = vunpack.c.l.bf16 %v11947_v28  ;;  %s6195_s24 = smov 3  ;;  %v10981_v17 = vunpack.c.l.bf16 %v11959_v16  ;;  %v13360_v16 = vpop.permute.xlu1 %11320 }
 0x10e   :  { %v6135_v27 = vld [vmem:[#allocation1 + $0x50b] ss:$16 sm:%s6134_s25]   ;;  %v6132_v31 = vsel %vm4101_vm0, %v6130_v26, %v6127_v19  ;;  %11465 = vrot.lane.b32.xlu0 %v11464_v39, %s11984_s16  ;;  %v10989_v26 = vunpack.c.l.bf16 %v11961_v25  ;;  %s6404_s25 = smov 12 }
 0x10f   :  { %v6140_v32 = vld [vmem:[#allocation1 + $0x50b] ss:$16 sm:%s6139_s3]   ;;  %1508 = vst [vmem:[#allocation1 + $0x510] sm:$0xff] %v10769_v21  ;;  %v6137_v41 = vsel %vm4105_vm1, %v6135_v27, %v6132_v31  ;;  %292 = vst [vmem:[#allocation1 + $0x770] sm:$0xff] %v10617_v29  ;;  %s6432_s3 = smov 48 }
 0x110   :  { %v6150_v34 = vld [vmem:[#allocation1 + $0x70b] ss:$16 sm:%s6149_s30]   ;;  %v13264_v48 = vsel %vm4109_vm2, %v6140_v32, %v6137_v41  ;;  %s6198_s30 = smov 12  ;;  %3204 = vst [vmem:[#allocation1 + $0x1c0] sm:$0xff] %v10981_v17  ;;  %v11963_v32 = vld [vmem:[%s14531_s0 + $0xc0] sm:$0xff]   ;;  %3268 = vst [vmem:[#allocation1 + $0x1a0] sm:$0xff] %v10989_v26 }
 0x111   :  { %v11948_v35 = vld [vmem:[%s14531_s0 + $0x1f8] sm:$0xff]   ;;  %v11950_v44 = vld [vmem:[%s14531_s0 + $0x1e8] sm:$0xff]  }
 0x112   :  { %v10841_v36 = vunpack.c.l.bf16 %v11948_v35  ;;  %v6153_v42 = vld [vmem:[#allocation1 + $0x70b] ss:$16 sm:%s6152_s14]   ;;  %v10849_v45 = vunpack.c.l.bf16 %v11950_v44  ;;  %v11964_v35 = vld [vmem:[%s14531_s0 + $0x3f0] sm:$0xff]   ;;  %v11966_v44 = vld [vmem:[%s14531_s0 + $0x3e0] sm:$0xff]   ;;  %s6254_s14 = smov 192 }
 0x113   :  { %v6158_v43 = vld [vmem:[#allocation1 + $0x70b] ss:$16 sm:%s6157_s18]   ;;  %v6155_v49 = vsel %vm4101_vm0, %v6153_v42, %v6150_v34  ;;  %v10997_v34 = vunpack.c.l.bf16 %v11963_v32  ;;  %s6264_s18 = smov 3  ;;  %v11978_v32 = vld [vmem:[%s14531_s0 + $0x2c0] sm:$0xff]  }
 0x114   :  { %v6163_v50 = vld [vmem:[#allocation1 + $0x70b] ss:$16 sm:%s6162_s12]   ;;  %2084 = vst [vmem:[#allocation1 + $0x3f0] sm:$0xff] %v10841_v36  ;;  %v6160_v56 = vsel %vm4105_vm1, %v6158_v43, %v6155_v49  ;;  %2148 = vst [vmem:[#allocation1 + $0x3d0] sm:$0xff] %v10849_v45  ;;  %v10589_v36 = vunpack.c.l.bf16 %v11964_v35  ;;  %v10597_v45 = vunpack.c.l.bf16 %v11966_v44  ;;  %s6267_s12 = smov 12 }
 0x115   :  { %v6173_v51 = vld [vmem:[#allocation1 + $0x18b] ss:$16 sm:%s6172_s7]   ;;  %v6165_v3 = vsel %vm4109_vm2, %v6163_v50, %v6160_v56  ;;  %3332 = vst [vmem:[#allocation1 + $0x180] sm:$0xff] %v10997_v34  ;;  %s6272_s7 = smov 48  ;;  %v10741_v34 = vunpack.c.l.bf16 %v11978_v32 }
 0x116   :  { %v11952_v53 = vld [vmem:[%s14531_s0 + $0x1d8] sm:$0xff]   ;;  %v11954_v59 = vld [vmem:[%s14531_s0 + $0x1c8] sm:$0xff]   ;;  %v11469_v12 = vpack.i.bf16 %v6165_v3, %v13264_v48  ;;  %68 = vst [vmem:[#allocation1 + $0x7e0] sm:$0xff] %v10589_v36  ;;  %132 = vst [vmem:[#allocation1 + $0x7c0] sm:$0xff] %v10597_v45 }
 0x117   :  { %v10857_v54 = vunpack.c.l.bf16 %v11952_v53  ;;  %v6176_v57 = vld [vmem:[#allocation1 + $0x18b] ss:$16 sm:%s6175_s6]   ;;  %v10865_v60 = vunpack.c.l.bf16 %v11954_v59  ;;  %v11968_v53 = vld [vmem:[%s14531_s0 + $0x3d0] sm:$0xff]   ;;  %v6265_v59 = vld [vmem:[#allocation1 + $0xa] ss:$16 sm:%s6264_s18]   ;;  %s6277_s6 = smov 192 }
 0x118   :  { %v6181_v58 = vld [vmem:[#allocation1 + $0x18b] ss:$16 sm:%s6180_s5]   ;;  %v6178_v4 = vsel %vm4101_vm0, %v6176_v57, %v6173_v51  ;;  %11470 = vrot.lane.b32.xlu1 %v11469_v12, %s11984_s16  ;;  %1284 = vst [vmem:[#allocation1 + $0x580] sm:$0xff] %v10741_v34  ;;  %s6363_s5 = smov 48  ;;  %s6460_s18 = smov 192 }
 0x119   :  { %v11956_v1 = vld [vmem:[%s14531_s0 + $0xf8] sm:$0xff]   ;;  %2212 = vst [vmem:[#allocation1 + $0x3b0] sm:$0xff] %v10857_v54  ;;  %v11958_v10 = vld [vmem:[%s14531_s0 + $0xe8] sm:$0xff]   ;;  %v6183_v13 = vsel %vm4105_vm1, %v6181_v58, %v6178_v4  ;;  %2276 = vst [vmem:[#allocation1 + $0x390] sm:$0xff] %v10865_v60  ;;  %v10605_v54 = vunpack.c.l.bf16 %v11968_v53  ;;  %v13339_v60 = vpop.permute.xlu0 %11315 }
 0x11a   :  { %v10969_v2 = vunpack.c.l.bf16 %v11956_v1  ;;  %v6186_v5 = vld [vmem:[#allocation1 + $0x18b] ss:$16 sm:%s6185_s27]   ;;  %v10977_v11 = vunpack.c.l.bf16 %v11958_v10  ;;  %v6268_v4 = vld [vmem:[#allocation1 + $0xa] ss:$16 sm:%s6267_s12]   ;;  %s6391_s27 = smov 192  ;;  %s6496_s12 = smov 12 }
 0x11b   :  { %v6196_v6 = vld [vmem:[#allocation1 + $0x38b] ss:$16 sm:%s6195_s24]   ;;  %v13301_v20 = vsel %vm4109_vm2, %v6186_v5, %v6183_v13  ;;  %v6273_v5 = vld [vmem:[#allocation1 + $0xa] ss:$16 sm:%s6272_s7]   ;;  %196 = vst [vmem:[#allocation1 + $0x7a0] sm:$0xff] %v10605_v54  ;;  %v6270_v10 = vsel %vm4101_vm0, %v6268_v4, %v6265_v59  ;;  %s6335_s7 = smov 12 }
 0x11c   :  { %v6199_v14 = vld [vmem:[#allocation1 + $0x38b] ss:$16 sm:%s6198_s30]   ;;  %3108 = vst [vmem:[#allocation1 + $0x1f0] sm:$0xff] %v10969_v2  ;;  %3172 = vst [vmem:[#allocation1 + $0x1d0] sm:$0xff] %v10977_v11  ;;  %v6278_v11 = vld [vmem:[#allocation1 + $0xa] ss:$16 sm:%s6277_s6]  }
 0x11d   :  { %v6204_v15 = vld [vmem:[#allocation1 + $0x38b] ss:$16 sm:%s6203_s29]   ;;  %v6201_v21 = vsel %vm4101_vm0, %v6199_v14, %v6196_v6  ;;  %v11972_v6 = vld [vmem:[%s14531_s0 + $0x2f0] sm:$0xff]   ;;  %v11974_v14 = vld [vmem:[%s14531_s0 + $0x2e0] sm:$0xff]   ;;  %s6309_s29 = smov 3  ;;  %s11985_s6 = smov 80  }
 0x11e   :  { %v11960_v18 = vld [vmem:[%s14531_s0 + $0xd8] sm:$0xff]   ;;  %v11962_v27 = vld [vmem:[%s14531_s0 + $0xc8] sm:$0xff]   ;;  %v6206_v29 = vsel %vm4105_vm1, %v6204_v15, %v6201_v21  ;;  %v10717_v8 = vunpack.c.l.bf16 %v11972_v6  ;;  %v10725_v15 = vunpack.c.l.bf16 %v11974_v14  ;;  %s6401_s24 = smov 3  ;;  %s6437_s30 = smov 192 }
 0x11f   :  { %v10985_v19 = vunpack.c.l.bf16 %v11960_v18  ;;  %v6209_v22 = vld [vmem:[#allocation1 + $0x38b] ss:$16 sm:%s6208_s11]   ;;  %v10993_v28 = vunpack.c.l.bf16 %v11962_v27  ;;  %v6275_v18 = vsel %vm4105_vm1, %v6273_v5, %v6270_v10  ;;  %v6310_v36 = vld [vmem:[#allocation1 + $0x40a] ss:$16 sm:%s6309_s29]   ;;  %s6447_s29 = smov 3  ;;  %s6473_s11 = smov 12 }
 0x120   :  { %v6219_v23 = vld [vmem:[#allocation1 + $0x58b] ss:$16 sm:%s6218_s8]   ;;  %v6211_v39 = vsel %vm4109_vm2, %v6209_v22, %v6206_v29  ;;  %1092 = vst [vmem:[#allocation1 + $0x5e0] sm:$0xff] %v10717_v8  ;;  %v6280_v26 = vsel %vm4109_vm2, %v6278_v11, %v6275_v18  ;;  %v6300_v29 = vld [vmem:[#allocation1 + $0x20a] ss:$16 sm:%s6299_s1]   ;;  %1156 = vst [vmem:[#allocation1 + $0x5c0] sm:$0xff] %v10725_v15 }
 0x121   :  { %v6222_v30 = vld [vmem:[#allocation1 + $0x58b] ss:$16 sm:%s6221_s15]   ;;  %3236 = vst [vmem:[#allocation1 + $0x1b0] sm:$0xff] %v10985_v19  ;;  %3300 = vst [vmem:[#allocation1 + $0x190] sm:$0xff] %v10993_v28  ;;  %v11474_v48 = vpack.i.bf16 %v6211_v39, %v13301_v20  ;;  %v6295_v28 = vld [vmem:[#allocation1 + $0x20a] ss:$16 sm:%s6294_s2]  }
 0x122   :  { %v6227_v31 = vld [vmem:[#allocation1 + $0x58b] ss:$16 sm:%s6226_s13]   ;;  %v6224_v41 = vsel %vm4101_vm0, %v6222_v30, %v6219_v23  ;;  %v11976_v23 = vld [vmem:[%s14531_s0 + $0x2d0] sm:$0xff]   ;;  %s6322_s8 = smov 192  ;;  %s6345_s15 = smov 192 }
 0x123   :  { %v11965_v37 = vld [vmem:[%s14531_s0 + $0x3e8] sm:$0xff]   ;;  %v11967_v46 = vld [vmem:[%s14531_s0 + $0x3d8] sm:$0xff]   ;;  %v6229_v49 = vsel %vm4105_vm1, %v6227_v31, %v6224_v41  ;;  %11475 = vrot.lane.b32.xlu0 %v11474_v48, %s11984_s16  ;;  %v10733_v25 = vunpack.c.l.bf16 %v11976_v23  ;;  %s6355_s13 = smov 3  ;;  %s6409_s2 = smov 48 }
 0x124   :  { %v10593_v38 = vunpack.c.l.bf16 %v11965_v37  ;;  %v6232_v42 = vld [vmem:[#allocation1 + $0x58b] ss:$16 sm:%s6231_s21]   ;;  %v10601_v47 = vunpack.c.l.bf16 %v11967_v46  ;;  %s6286_s21 = smov 3  ;;  %v6313_v37 = vld [vmem:[#allocation1 + $0x40a] ss:$16 sm:%s6312_s10]   ;;  %s6414_s1 = smov 192 }
 0x125   :  { %v6242_v43 = vld [vmem:[#allocation1 + $0x78b] ss:$16 sm:%s6241_s23]   ;;  %v6234_v56 = vsel %vm4109_vm2, %v6232_v42, %v6229_v49  ;;  %s6289_s23 = smov 12  ;;  %v6287_v19 = vld [vmem:[#allocation1 + $0x20a] ss:$16 sm:%s6286_s21]   ;;  %1220 = vst [vmem:[#allocation1 + $0x5a0] sm:$0xff] %v10733_v25  ;;  %v6315_v42 = vsel %vm4101_vm0, %v6313_v37, %v6310_v36 }
 0x126   :  { %v6245_v50 = vld [vmem:[#allocation1 + $0x78b] ss:$16 sm:%s6244_s22]   ;;  %100 = vst [vmem:[#allocation1 + $0x7d0] sm:$0xff] %v10593_v38  ;;  %164 = vst [vmem:[#allocation1 + $0x7b0] sm:$0xff] %v10601_v47  ;;  %v6290_v20 = vld [vmem:[#allocation1 + $0x20a] ss:$16 sm:%s6289_s23]  }
 0x127   :  { %v6250_v51 = vld [vmem:[#allocation1 + $0x78b] ss:$16 sm:%s6249_s17]   ;;  %v6247_v57 = vsel %vm4101_vm0, %v6245_v50, %v6242_v43  ;;  %v6292_v27 = vsel %vm4101_vm0, %v6290_v20, %v6287_v19  ;;  %v6323_v44 = vld [vmem:[#allocation1 + $0x40a] ss:$16 sm:%s6322_s8]   ;;  %s6378_s21 = smov 3  ;;  %s6381_s23 = smov 12  ;;  %v13399_v20 = vpop.permute.xlu0 %11325 }
 0x128   :  { %v11969_v40 = vld [vmem:[%s14531_s0 + $0x3c8] sm:$0xff]   ;;  %v11971_v1 = vld [vmem:[%s14531_s0 + $0x2f8] sm:$0xff]   ;;  %v6252_v3 = vsel %vm4105_vm1, %v6250_v51, %v6247_v57  ;;  %v6297_v35 = vsel %vm4105_vm1, %v6295_v28, %v6292_v27  ;;  %s6424_s22 = smov 3  ;;  %s6427_s17 = smov 12 }
 0x129   :  { %v10609_v55 = vunpack.c.l.bf16 %v11969_v40  ;;  %v6255_v58 = vld [vmem:[#allocation1 + $0x78b] ss:$16 sm:%s6254_s14]   ;;  %v10713_v2 = vunpack.c.l.bf16 %v11971_v1  ;;  %v6302_v41 = vsel %vm4109_vm2, %v6300_v29, %v6297_v35  ;;  %v6336_v48 = vld [vmem:[#allocation1 + $0x60a] ss:$16 sm:%s6335_s7]   ;;  %s6450_s10 = smov 12  ;;  %s6455_s14 = smov 48 }
 0x12a   :  { %v6257_v9 = vsel %vm4109_vm2, %v6255_v58, %v6252_v3  ;;  %v11973_v12 = vld [vmem:[%s14531_s0 + $0x2e8] sm:$0xff]   ;;  %v11975_v21 = vld [vmem:[%s14531_s0 + $0x2d8] sm:$0xff]   ;;  %v11484_v45 = vpack.i.bf16 %v6302_v41, %v6280_v26  ;;  %s6483_s8 = smov 192  ;;  %s6506_s7 = smov 192 }
 0x12b   :  { %228 = vst [vmem:[#allocation1 + $0x790] sm:$0xff] %v10609_v55  ;;  %1060 = vst [vmem:[#allocation1 + $0x5f0] sm:$0xff] %v10713_v2  ;;  %v10721_v13 = vunpack.c.l.bf16 %v11973_v12  ;;  %v11479_v17 = vpack.i.bf16 %v6257_v9, %v6234_v56  ;;  %v10729_v22 = vunpack.c.l.bf16 %v11975_v21  ;;  %v11977_v30 = vld [vmem:[%s14531_s0 + $0x2c8] sm:$0xff]   ;;  %v11979_v38 = vld [vmem:[%s14531_s0 + $0x3f8] sm:$0xff]   ;;  %s6332_s0 = smov 3  ;;  %v13401_v21 = vpop.permute.xlu1 %11330 }
 0x12c   :  { %v10737_v31 = vunpack.c.l.bf16 %v11977_v30  ;;  %v10585_v39 = vunpack.c.l.bf16 %v11979_v38  ;;  %v6333_v47 = vld [vmem:[#allocation1 + $0x60a] ss:$16 sm:%s6332_s0]   ;;  %11485 = vrot.lane.b32.xlu0 %v11484_v45, %s11985_s6  ;;  %s6501_s0 = smov 48 }
 0x12d   :  { %1124 = vst [vmem:[#allocation1 + $0x5d0] sm:$0xff] %v10721_v13  ;;  %11480 = vrot.lane.b32.xlu1 %v11479_v17, %s11984_s16  ;;  %s6317_s16 = smov 48  ;;  %1188 = vst [vmem:[#allocation1 + $0x5b0] sm:$0xff] %v10729_v22  ;;  %v6338_v50 = vsel %vm4101_vm0, %v6336_v48, %v6333_v47  ;;  %v6341_v51 = vld [vmem:[#allocation1 + $0x60a] ss:$16 sm:%s6340_s26]   ;;  %s6516_s26 = smov 3 }
 0x12e   :  { %v6318_v43 = vld [vmem:[#allocation1 + $0x40a] ss:$16 sm:%s6317_s16]   ;;  %1252 = vst [vmem:[#allocation1 + $0x590] sm:$0xff] %v10737_v31  ;;  %36 = vst [vmem:[#allocation1 + $0x7f0] sm:$0xff] %v10585_v39  ;;  %v6343_v54 = vsel %vm4105_vm1, %v6341_v51, %v6338_v50  ;;  %s6478_s16 = smov 48 }
 0x12f   :  { %v6320_v46 = vsel %vm4105_vm1, %v6318_v43, %v6315_v42  ;;  %v6346_v53 = vld [vmem:[#allocation1 + $0x60a] ss:$16 sm:%s6345_s15]   ;;  %s6519_s15 = smov 12 }
 0x130   :  { %v6325_v49 = vsel %vm4109_vm2, %v6323_v44, %v6320_v46  ;;  %v6356_v40 = vld [vmem:[#allocation1 + $0x8a] ss:$16 sm:%s6355_s13]   ;;  %v6348_v56 = vsel %vm4109_vm2, %v6346_v53, %v6343_v54  ;;  %s6524_s13 = smov 48 }
 0x131   :  { %v6359_v55 = vld [vmem:[#allocation1 + $0x8a] ss:$16 sm:%s6358_s4]   ;;  %v11489_v62 = vpack.i.bf16 %v6348_v56, %v6325_v49  ;;  %s6529_s4 = smov 192  ;;  %v13419_v56 = vpop.permute.xlu1 %11340 }
 0x132   :  { %v6361_v57 = vsel %vm4101_vm0, %v6359_v55, %v6356_v40  ;;  %v6364_v58 = vld [vmem:[#allocation1 + $0x8a] ss:$16 sm:%s6363_s5]   ;;  %v13417_v55 = vpop.permute.xlu0 %11335  ;;  %s6539_s5 = smov 3 }
 0x133   :  { %v6369_v59 = vld [vmem:[#allocation1 + $0x8a] ss:$16 sm:%s6368_s20]   ;;  %v6366_v0 = vsel %vm4105_vm1, %v6364_v58, %v6361_v57  ;;  %11490 = vrot.lane.b32.xlu1 %v11489_v62, %s11985_s6  ;;  %s6542_s20 = smov 12 }
 0x134   :  { %v6379_v1 = vld [vmem:[#allocation1 + $0x28a] ss:$16 sm:%s6378_s21]   ;;  %v6371_v3 = vsel %vm4109_vm2, %v6369_v59, %v6366_v0  ;;  %s6547_s21 = smov 48 }
 0x135   :  { %v6382_v2 = vld [vmem:[#allocation1 + $0x28a] ss:$16 sm:%s6381_s23]   ;;  %s6552_s23 = smov 192 }
 0x136   :  { %v6384_v4 = vsel %vm4101_vm0, %v6382_v2, %v6379_v1  ;;  %v6387_v5 = vld [vmem:[#allocation1 + $0x28a] ss:$16 sm:%s6386_s19]   ;;  %s6562_s19 = smov 3 }
 0x137   :  { %v6392_v6 = vld [vmem:[#allocation1 + $0x28a] ss:$16 sm:%s6391_s27]   ;;  %v6389_v8 = vsel %vm4105_vm1, %v6387_v5, %v6384_v4  ;;  %s6565_s27 = smov 12 }
 0x138   :  { %v6402_v9 = vld [vmem:[#allocation1 + $0x48a] ss:$16 sm:%s6401_s24]   ;;  %v6394_v11 = vsel %vm4109_vm2, %v6392_v6, %v6389_v8  ;;  %s6570_s24 = smov 48 }
 0x139   :  { %v6405_v10 = vld [vmem:[#allocation1 + $0x48a] ss:$16 sm:%s6404_s25]   ;;  %v11494_v15 = vpack.i.bf16 %v6394_v11, %v6371_v3  ;;  %s6575_s25 = smov 192 }
 0x13a   :  { %v6407_v12 = vsel %vm4101_vm0, %v6405_v10, %v6402_v9  ;;  %v6410_v13 = vld [vmem:[#allocation1 + $0x48a] ss:$16 sm:%s6409_s2]   ;;  %s6585_s2 = smov 3 }
 0x13b   :  { %v6415_v14 = vld [vmem:[#allocation1 + $0x48a] ss:$16 sm:%s6414_s1]   ;;  %v6412_v17 = vsel %vm4105_vm1, %v6410_v13, %v6407_v12  ;;  %11495 = vrot.lane.b32.xlu0 %v11494_v15, %s11985_s6  ;;  %s6588_s1 = smov 12 }
 0x13c   :  { %v6425_v18 = vld [vmem:[#allocation1 + $0x68a] ss:$16 sm:%s6424_s22]   ;;  %v6417_v22 = vsel %vm4109_vm2, %v6415_v14, %v6412_v17  ;;  %s6593_s22 = smov 48 }
 0x13d   :  { %v6428_v19 = vld [vmem:[#allocation1 + $0x68a] ss:$16 sm:%s6427_s17]   ;;  %s6598_s17 = smov 192 }
 0x13e   :  { %v6430_v23 = vsel %vm4101_vm0, %v6428_v19, %v6425_v18  ;;  %v6433_v25 = vld [vmem:[#allocation1 + $0x68a] ss:$16 sm:%s6432_s3]   ;;  %s6608_s3 = smov 3 }
 0x13f   :  { %v6438_v26 = vld [vmem:[#allocation1 + $0x68a] ss:$16 sm:%s6437_s30]   ;;  %v6435_v27 = vsel %vm4105_vm1, %v6433_v25, %v6430_v23  ;;  %s6611_s30 = smov 12 }
 0x140   :  { %v6448_v28 = vld [vmem:[#allocation1 + $0x10a] ss:$16 sm:%s6447_s29]   ;;  %v6440_v30 = vsel %vm4109_vm2, %v6438_v26, %v6435_v27  ;;  %s6616_s29 = smov 48 }
 0x141   :  { %v6451_v29 = vld [vmem:[#allocation1 + $0x10a] ss:$16 sm:%s6450_s10]   ;;  %v11499_v35 = vpack.i.bf16 %v6440_v30, %v6417_v22  ;;  %s6621_s10 = smov 192 }
 0x142   :  { %v6453_v31 = vsel %vm4101_vm0, %v6451_v29, %v6448_v28  ;;  %v6456_v32 = vld [vmem:[#allocation1 + $0x10a] ss:$16 sm:%s6455_s14]   ;;  %s6631_s14 = smov 3 }
 0x143   :  { %v6461_v34 = vld [vmem:[#allocation1 + $0x10a] ss:$16 sm:%s6460_s18]   ;;  %v6458_v36 = vsel %vm4105_vm1, %v6456_v32, %v6453_v31  ;;  %11500 = vrot.lane.b32.xlu1 %v11499_v35, %s11985_s6  ;;  %v13435_v31 = vpop.permute.xlu0 %11345  ;;  %v13437_v32 = vpop.permute.xlu1 %11350  ;;  %s6634_s18 = smov 12 }
 0x144   :  { %v6471_v37 = vld [vmem:[#allocation1 + $0x30a] ss:$16 sm:%s6470_s28]   ;;  %v6463_v39 = vsel %vm4109_vm2, %v6461_v34, %v6458_v36  ;;  %s6639_s28 = smov 48 }
 0x145   :  { %v6474_v38 = vld [vmem:[#allocation1 + $0x30a] ss:$16 sm:%s6473_s11]   ;;  %s6644_s11 = smov 192 }
 0x146   :  { %v6476_v41 = vsel %vm4101_vm0, %v6474_v38, %v6471_v37  ;;  %v6479_v42 = vld [vmem:[#allocation1 + $0x30a] ss:$16 sm:%s6478_s16]   ;;  %s6653_s16 = smov 3 }
 0x147   :  { %v6484_v43 = vld [vmem:[#allocation1 + $0x30a] ss:$16 sm:%s6483_s8]   ;;  %v6481_v44 = vsel %vm4105_vm1, %v6479_v42, %v6476_v41  ;;  %v6635_v41 = vld [vmem:[#allocation1 + $0x9] ss:$16 sm:%s6634_s18]   ;;  %s6656_s8 = smov 12  ;;  %s6804_s18 = smov 192 }
 0x148   :  { %v6494_v45 = vld [vmem:[#allocation1 + $0x50a] ss:$16 sm:%s6493_s9]   ;;  %v6486_v47 = vsel %vm4109_vm2, %v6484_v43, %v6481_v44  ;;  %v6640_v44 = vld [vmem:[#allocation1 + $0x9] ss:$16 sm:%s6639_s28]   ;;  %s6661_s9 = smov 48  ;;  %s6814_s28 = smov 3 }
 0x149   :  { %v6497_v46 = vld [vmem:[#allocation1 + $0x50a] ss:$16 sm:%s6496_s12]   ;;  %v11504_v51 = vpack.i.bf16 %v6486_v47, %v6463_v39  ;;  %v6632_v39 = vld [vmem:[#allocation1 + $0x9] ss:$16 sm:%s6631_s14]   ;;  %s6666_s12 = smov 192  ;;  %s6799_s14 = smov 48 }
 0x14a   :  { %v6499_v48 = vsel %vm4101_vm0, %v6497_v46, %v6494_v45  ;;  %v6502_v49 = vld [vmem:[#allocation1 + $0x50a] ss:$16 sm:%s6501_s0]   ;;  %v6637_v43 = vsel %vm4101_vm0, %v6635_v41, %v6632_v39  ;;  %v6645_v45 = vld [vmem:[#allocation1 + $0x9] ss:$16 sm:%s6644_s11]   ;;  %s6676_s0 = smov 3  ;;  %s6817_s11 = smov 12 }
 0x14b   :  { %v6507_v50 = vld [vmem:[#allocation1 + $0x50a] ss:$16 sm:%s6506_s7]   ;;  %v6504_v53 = vsel %vm4105_vm1, %v6502_v49, %v6499_v48  ;;  %11505 = vrot.lane.b32.xlu0 %v11504_v51, %s11985_s6  ;;  %v6642_v47 = vsel %vm4105_vm1, %v6640_v44, %v6637_v43  ;;  %v6654_v48 = vld [vmem:[#allocation1 + $0x209] ss:$16 sm:%s6653_s16]   ;;  %s6684_s7 = smov 48  ;;  %s6822_s16 = smov 48 }
 0x14c   :  { %v6517_v54 = vld [vmem:[#allocation1 + $0x70a] ss:$16 sm:%s6516_s26]   ;;  %v6509_v57 = vsel %vm4109_vm2, %v6507_v50, %v6504_v53  ;;  %v6657_v49 = vld [vmem:[#allocation1 + $0x209] ss:$16 sm:%s6656_s8]   ;;  %v6647_v51 = vsel %vm4109_vm2, %v6645_v45, %v6642_v47  ;;  %s6689_s26 = smov 192  ;;  %s6827_s8 = smov 192 }
 0x14d   :  { %v6520_v40 = vld [vmem:[#allocation1 + $0x70a] ss:$16 sm:%s6519_s15]   ;;  %v6662_v50 = vld [vmem:[#allocation1 + $0x209] ss:$16 sm:%s6661_s9]   ;;  %v6659_v53 = vsel %vm4101_vm0, %v6657_v49, %v6654_v48  ;;  %s6699_s15 = smov 3  ;;  %s6837_s9 = smov 3 }
 0x14e   :  { %v6522_v58 = vsel %vm4101_vm0, %v6520_v40, %v6517_v54  ;;  %v6525_v59 = vld [vmem:[#allocation1 + $0x70a] ss:$16 sm:%s6524_s13]   ;;  %v6667_v54 = vld [vmem:[#allocation1 + $0x209] ss:$16 sm:%s6666_s12]   ;;  %s6702_s13 = smov 12  ;;  %s6840_s12 = smov 12 }
 0x14f   :  { %v6530_v62 = vld [vmem:[#allocation1 + $0x70a] ss:$16 sm:%s6529_s4]   ;;  %v6527_v0 = vsel %vm4105_vm1, %v6525_v59, %v6522_v58  ;;  %v6677_v40 = vld [vmem:[#allocation1 + $0x409] ss:$16 sm:%s6676_s0]   ;;  %s6707_s4 = smov 48  ;;  %s6845_s0 = smov 48 }
 0x150   :  { %v6540_v1 = vld [vmem:[#allocation1 + $0x18a] ss:$16 sm:%s6539_s5]   ;;  %v6532_v3 = vsel %vm4109_vm2, %v6530_v62, %v6527_v0  ;;  %v6685_v59 = vld [vmem:[#allocation1 + $0x409] ss:$16 sm:%s6684_s7]   ;;  %s6712_s5 = smov 192  ;;  %s6860_s7 = smov 3 }
 0x151   :  { %v6543_v2 = vld [vmem:[#allocation1 + $0x18a] ss:$16 sm:%s6542_s20]   ;;  %v11509_v8 = vpack.i.bf16 %v6532_v3, %v6509_v57  ;;  %v6664_v57 = vsel %vm4105_vm1, %v6662_v50, %v6659_v53  ;;  %v13452_v3 = vpop.permute.xlu0 %11355  ;;  %s6722_s20 = smov 3  ;;  %v6800_v49 = vld [vmem:[#allocation1 + $0x689] ss:$16 sm:%s6799_s14]   ;;  %s6975_s14 = smov 3 }
 0x152   :  { %v6545_v4 = vsel %vm4101_vm0, %v6543_v2, %v6540_v1  ;;  %v6548_v5 = vld [vmem:[#allocation1 + $0x18a] ss:$16 sm:%s6547_s21]   ;;  %v6669_v62 = vsel %vm4109_vm2, %v6667_v54, %v6664_v57  ;;  %v6690_v1 = vld [vmem:[#allocation1 + $0x409] ss:$16 sm:%s6689_s26]   ;;  %s6725_s21 = smov 12  ;;  %s6863_s26 = smov 12 }
 0x153   :  { %v6553_v6 = vld [vmem:[#allocation1 + $0x18a] ss:$16 sm:%s6552_s23]   ;;  %v6550_v9 = vsel %vm4105_vm1, %v6548_v5, %v6545_v4  ;;  %11510 = vrot.lane.b32.xlu1 %v11509_v8, %s11985_s6  ;;  %v6700_v2 = vld [vmem:[#allocation1 + $0x609] ss:$16 sm:%s6699_s15]   ;;  %v13454_v4 = vpop.permute.xlu1 %11360  ;;  %v11524_v5 = vpack.i.bf16 %v6669_v62, %v6647_v51  ;;  %s6730_s23 = smov 48  ;;  %s6868_s15 = smov 48 }
 0x154   :  { %v6563_v10 = vld [vmem:[#allocation1 + $0x38a] ss:$16 sm:%s6562_s19]   ;;  %v6555_v12 = vsel %vm4109_vm2, %v6553_v6, %v6550_v9  ;;  %v6703_v8 = vld [vmem:[#allocation1 + $0x609] ss:$16 sm:%s6702_s13]   ;;  %s11986_s19 = smov 72   ;;  %s6873_s13 = smov 192 }
 0x155   :  { %v6566_v11 = vld [vmem:[#allocation1 + $0x38a] ss:$16 sm:%s6565_s27]   ;;  %v6708_v9 = vld [vmem:[#allocation1 + $0x609] ss:$16 sm:%s6707_s4]   ;;  %s6735_s27 = smov 192  ;;  %v13470_v44 = vpop.permute.xlu0 %11365  ;;  %s6883_s4 = smov 3 }
 0x156   :  { %v6568_v13 = vsel %vm4101_vm0, %v6566_v11, %v6563_v10  ;;  %v6571_v14 = vld [vmem:[#allocation1 + $0x38a] ss:$16 sm:%s6570_s24]   ;;  %v6705_v11 = vsel %vm4101_vm0, %v6703_v8, %v6700_v2  ;;  %s6745_s24 = smov 3  ;;  %v6805_v53 = vld [vmem:[#allocation1 + $0x689] ss:$16 sm:%s6804_s18]   ;;  %s6978_s18 = smov 12 }
 0x157   :  { %v6576_v15 = vld [vmem:[#allocation1 + $0x38a] ss:$16 sm:%s6575_s25]   ;;  %v6573_v17 = vsel %vm4105_vm1, %v6571_v14, %v6568_v13  ;;  %v6723_v13 = vld [vmem:[#allocation1 + $0x89] ss:$16 sm:%s6722_s20]   ;;  %v6710_v14 = vsel %vm4105_vm1, %v6708_v9, %v6705_v11  ;;  %s6748_s25 = smov 12  ;;  %v13472_v45 = vpop.permute.xlu1 %11370  ;;  %s6891_s20 = smov 48 }
 0x158   :  { %v6586_v18 = vld [vmem:[#allocation1 + $0x58a] ss:$16 sm:%s6585_s2]   ;;  %v6578_v22 = vsel %vm4109_vm2, %v6576_v15, %v6573_v17  ;;  %v6726_v15 = vld [vmem:[#allocation1 + $0x89] ss:$16 sm:%s6725_s21]   ;;  %s6753_s2 = smov 48  ;;  %s6896_s21 = smov 192 }
 0x159   :  { %v6589_v19 = vld [vmem:[#allocation1 + $0x58a] ss:$16 sm:%s6588_s1]   ;;  %v11514_v27 = vpack.i.bf16 %v6578_v22, %v6555_v12  ;;  %v6713_v12 = vld [vmem:[#allocation1 + $0x609] ss:$16 sm:%s6712_s5]   ;;  %s6758_s1 = smov 192  ;;  %s6886_s5 = smov 12 }
 0x15a   :  { %v6591_v23 = vsel %vm4101_vm0, %v6589_v19, %v6586_v18  ;;  %v6594_v25 = vld [vmem:[#allocation1 + $0x58a] ss:$16 sm:%s6593_s22]   ;;  %v6731_v17 = vld [vmem:[#allocation1 + $0x89] ss:$16 sm:%s6730_s23]   ;;  %v6715_v18 = vsel %vm4109_vm2, %v6713_v12, %v6710_v14  ;;  %v6728_v19 = vsel %vm4101_vm0, %v6726_v15, %v6723_v13  ;;  %s6768_s22 = smov 3  ;;  %s6906_s23 = smov 3 }
 0x15b   :  { %v6599_v26 = vld [vmem:[#allocation1 + $0x58a] ss:$16 sm:%s6598_s17]   ;;  %v6596_v28 = vsel %vm4105_vm1, %v6594_v25, %v6591_v23  ;;  %11515 = vrot.lane.b32.xlu0 %v11514_v27, %s11985_s6  ;;  %v6736_v22 = vld [vmem:[#allocation1 + $0x89] ss:$16 sm:%s6735_s27]   ;;  %s6771_s17 = smov 12  ;;  %s6909_s27 = smov 12 }
 0x15c   :  { %v6609_v29 = vld [vmem:[#allocation1 + $0x78a] ss:$16 sm:%s6608_s3]   ;;  %v6601_v34 = vsel %vm4109_vm2, %v6599_v26, %v6596_v28  ;;  %v6746_v23 = vld [vmem:[#allocation1 + $0x289] ss:$16 sm:%s6745_s24]   ;;  %v6733_v26 = vsel %vm4105_vm1, %v6731_v17, %v6728_v19  ;;  %s6776_s3 = smov 48  ;;  %s6914_s24 = smov 48 }
 0x15d   :  { %v6612_v30 = vld [vmem:[#allocation1 + $0x78a] ss:$16 sm:%s6611_s30]   ;;  %v6749_v27 = vld [vmem:[#allocation1 + $0x289] ss:$16 sm:%s6748_s25]   ;;  %s6781_s30 = smov 192  ;;  %s6919_s25 = smov 192 }
 0x15e   :  { %v6614_v35 = vsel %vm4101_vm0, %v6612_v30, %v6609_v29  ;;  %v6617_v36 = vld [vmem:[#allocation1 + $0x78a] ss:$16 sm:%s6616_s29]   ;;  %v6754_v28 = vld [vmem:[#allocation1 + $0x289] ss:$16 sm:%s6753_s2]   ;;  %v6738_v29 = vsel %vm4109_vm2, %v6736_v22, %v6733_v26  ;;  %v6751_v30 = vsel %vm4101_vm0, %v6749_v27, %v6746_v23  ;;  %s6791_s29 = smov 3  ;;  %v13488_v23 = vpop.permute.xlu0 %11375  ;;  %s6929_s2 = smov 3 }
 0x15f   :  { %v6622_v37 = vld [vmem:[#allocation1 + $0x78a] ss:$16 sm:%s6621_s10]   ;;  %v6619_v38 = vsel %vm4105_vm1, %v6617_v36, %v6614_v35  ;;  %11525 = vrot.lane.b32.xlu0 %v11524_v5, %s11986_s19  ;;  %v6769_v35 = vld [vmem:[#allocation1 + $0x489] ss:$16 sm:%s6768_s22]   ;;  %v6756_v36 = vsel %vm4105_vm1, %v6754_v28, %v6751_v30  ;;  %s6794_s10 = smov 12  ;;  %s6937_s22 = smov 48 }
 0x160   :  { %v6624_v42 = vsel %vm4109_vm2, %v6622_v37, %v6619_v38  ;;  %v6772_v37 = vld [vmem:[#allocation1 + $0x489] ss:$16 sm:%s6771_s17]   ;;  %s6942_s17 = smov 192 }
 0x161   :  { %v11519_v46 = vpack.i.bf16 %v6624_v42, %v6601_v34  ;;  %v6759_v34 = vld [vmem:[#allocation1 + $0x289] ss:$16 sm:%s6758_s1]   ;;  %v6774_v41 = vsel %vm4101_vm0, %v6772_v37, %v6769_v35  ;;  %s6932_s1 = smov 12 }
 0x162   :  { %v6777_v38 = vld [vmem:[#allocation1 + $0x489] ss:$16 sm:%s6776_s3]   ;;  %v6761_v39 = vsel %vm4109_vm2, %v6759_v34, %v6756_v36  ;;  %s6952_s3 = smov 3 }
 0x163   :  { %11520 = vrot.lane.b32.xlu1 %v11519_v46, %s11985_s6  ;;  %s6679_s6 = smov 12  ;;  %v6782_v42 = vld [vmem:[#allocation1 + $0x489] ss:$16 sm:%s6781_s30]   ;;  %v11534_v46 = vpack.i.bf16 %v6761_v39, %v6738_v29  ;;  %v6779_v47 = vsel %vm4105_vm1, %v6777_v38, %v6774_v41  ;;  %s6955_s30 = smov 12 }
 0x164   :  { %v6680_v58 = vld [vmem:[#allocation1 + $0x409] ss:$16 sm:%s6679_s6]   ;;  %v6784_v50 = vsel %vm4109_vm2, %v6782_v42, %v6779_v47  ;;  %s6850_s6 = smov 192 }
 0x165   :  { %v6682_v0 = vsel %vm4101_vm0, %v6680_v58, %v6677_v40  ;;  %v6792_v43 = vld [vmem:[#allocation1 + $0x689] ss:$16 sm:%s6791_s29]   ;;  %11535 = vrot.lane.b32.xlu0 %v11534_v46, %s11986_s19  ;;  %s6960_s29 = smov 48 }
 0x166   :  { %v6687_v6 = vsel %vm4105_vm1, %v6685_v59, %v6682_v0  ;;  %v6795_v48 = vld [vmem:[#allocation1 + $0x689] ss:$16 sm:%s6794_s10]   ;;  %s6965_s10 = smov 192 }
 0x167   :  { %v6692_v10 = vsel %vm4109_vm2, %v6690_v1, %v6687_v6  ;;  %v6797_v51 = vsel %vm4101_vm0, %v6795_v48, %v6792_v43  ;;  %v6815_v54 = vld [vmem:[#allocation1 + $0x109] ss:$16 sm:%s6814_s28]   ;;  %s6983_s28 = smov 48 }
 0x168   :  { %v11529_v25 = vpack.i.bf16 %v6715_v18, %v6692_v10  ;;  %v6802_v40 = vsel %vm4105_vm1, %v6800_v49, %v6797_v51  ;;  %v6818_v57 = vld [vmem:[#allocation1 + $0x109] ss:$16 sm:%s6817_s11]   ;;  %s6988_s11 = smov 192 }
 0x169   :  { %v6823_v58 = vld [vmem:[#allocation1 + $0x109] ss:$16 sm:%s6822_s16]   ;;  %v6807_v59 = vsel %vm4109_vm2, %v6805_v53, %v6802_v40  ;;  %v6820_v62 = vsel %vm4101_vm0, %v6818_v57, %v6815_v54  ;;  %s6998_s16 = smov 3 }
 0x16a   :  { %11530 = vrot.lane.b32.xlu1 %v11529_v25, %s11986_s19  ;;  %v6828_v0 = vld [vmem:[#allocation1 + $0x109] ss:$16 sm:%s6827_s8]   ;;  %v11539_v2 = vpack.i.bf16 %v6807_v59, %v6784_v50  ;;  %v6825_v5 = vsel %vm4105_vm1, %v6823_v58, %v6820_v62  ;;  %v13490_v25 = vpop.permute.xlu1 %11380  ;;  %s7001_s8 = smov 12 }
 0x16b   :  { %v6838_v1 = vld [vmem:[#allocation1 + $0x309] ss:$16 sm:%s6837_s9]   ;;  %v6830_v9 = vsel %vm4109_vm2, %v6828_v0, %v6825_v5  ;;  %v13506_v5 = vpop.permute.xlu0 %11385  ;;  %s7006_s9 = smov 48 }
 0x16c   :  { %v6841_v6 = vld [vmem:[#allocation1 + $0x309] ss:$16 sm:%s6840_s12]   ;;  %s7011_s12 = smov 192 }
 0x16d   :  { %v6846_v8 = vld [vmem:[#allocation1 + $0x309] ss:$16 sm:%s6845_s0]   ;;  %v6843_v10 = vsel %vm4101_vm0, %v6841_v6, %v6838_v1  ;;  %s7020_s0 = smov 3 }
 0x16e   :  { %v6851_v11 = vld [vmem:[#allocation1 + $0x309] ss:$16 sm:%s6850_s6]   ;;  %11540 = vrot.lane.b32.xlu1 %v11539_v2, %s11986_s19  ;;  %v6848_v13 = vsel %vm4105_vm1, %v6846_v8, %v6843_v10  ;;  %v13508_v6 = vpop.permute.xlu1 %11390  ;;  %s7023_s6 = smov 12 }
 0x16f   :  { %v6861_v12 = vld [vmem:[#allocation1 + $0x509] ss:$16 sm:%s6860_s7]   ;;  %v6853_v17 = vsel %vm4109_vm2, %v6851_v11, %v6848_v13  ;;  %s7028_s7 = smov 48 }
 0x170   :  { %v6864_v14 = vld [vmem:[#allocation1 + $0x509] ss:$16 sm:%s6863_s26]   ;;  %v11544_v26 = vpack.i.bf16 %v6853_v17, %v6830_v9  ;;  %s7033_s26 = smov 192 }
 0x171   :  { %v6869_v15 = vld [vmem:[#allocation1 + $0x509] ss:$16 sm:%s6868_s15]   ;;  %v6866_v18 = vsel %vm4101_vm0, %v6864_v14, %v6861_v12  ;;  %s7043_s15 = smov 3 }
 0x172   :  { %v6874_v19 = vld [vmem:[#allocation1 + $0x509] ss:$16 sm:%s6873_s13]   ;;  %v6871_v27 = vsel %vm4105_vm1, %v6869_v15, %v6866_v18  ;;  %11545 = vrot.lane.b32.xlu0 %v11544_v26, %s11986_s19  ;;  %v6999_v15 = vld [vmem:[#allocation1 + $0x8] ss:$16 sm:%s6998_s16]   ;;  %s7046_s13 = smov 12  ;;  %s4206_s16 = smov 48 }
 0x173   :  { %v6884_v22 = vld [vmem:[#allocation1 + $0x709] ss:$16 sm:%s6883_s4]   ;;  %v6876_v30 = vsel %vm4109_vm2, %v6874_v19, %v6871_v27  ;;  %v7002_v18 = vld [vmem:[#allocation1 + $0x8] ss:$16 sm:%s7001_s8]   ;;  %s7056_s4 = smov 192  ;;  %s4211_s8 = smov 192 }
 0x174   :  { %v6887_v28 = vld [vmem:[#allocation1 + $0x709] ss:$16 sm:%s6886_s5]   ;;  %v7007_v19 = vld [vmem:[#allocation1 + $0x8] ss:$16 sm:%s7006_s9]   ;;  %v7004_v26 = vsel %vm4101_vm0, %v7002_v18, %v6999_v15  ;;  %s7066_s5 = smov 3  ;;  %v11327_v18 = vunpack.i.l.bf16 %v13399_v20  ;;  %v11328_v20 = vunpack.i.h.bf16 %v13399_v20  ;;  %s7089_s9 = smov 3 }
 0x175   :  { %v6892_v29 = vld [vmem:[#allocation1 + $0x709] ss:$16 sm:%s6891_s20]   ;;  %v6889_v34 = vsel %vm4101_vm0, %v6887_v28, %v6884_v22  ;;  %v7012_v27 = vld [vmem:[#allocation1 + $0x8] ss:$16 sm:%s7011_s12]   ;;  %s7069_s20 = smov 12  ;;  %s7092_s12 = smov 12 }
 0x176   :  { %v6897_v35 = vld [vmem:[#allocation1 + $0x709] ss:$16 sm:%s6896_s21]   ;;  %v6894_v37 = vsel %vm4105_vm1, %v6892_v29, %v6889_v34  ;;  %v7009_v29 = vsel %vm4105_vm1, %v7007_v19, %v7004_v26  ;;  %v7024_v34 = vld [vmem:[#allocation1 + $0x208] ss:$16 sm:%s7023_s6]   ;;  %s7074_s21 = smov 48  ;;  %s7102_s6 = smov 192 }
 0x177   :  { %v6907_v36 = vld [vmem:[#allocation1 + $0x189] ss:$16 sm:%s6906_s23]   ;;  %v6899_v41 = vsel %vm4109_vm2, %v6897_v35, %v6894_v37  ;;  %v7014_v35 = vsel %vm4109_vm2, %v7012_v27, %v7009_v29  ;;  %v7029_v37 = vld [vmem:[#allocation1 + $0x208] ss:$16 sm:%s7028_s7]   ;;  %s7079_s23 = smov 192  ;;  %s7112_s7 = smov 3 }
 0x178   :  { %v6910_v38 = vld [vmem:[#allocation1 + $0x189] ss:$16 sm:%s6909_s27]   ;;  %v11549_v47 = vpack.i.bf16 %v6899_v41, %v6876_v30  ;;  %v7021_v30 = vld [vmem:[#allocation1 + $0x208] ss:$16 sm:%s7020_s0]   ;;  %s4097_s27 = smov 3  ;;  %s7097_s0 = smov 48 }
 0x179   :  { %v6915_v39 = vld [vmem:[#allocation1 + $0x189] ss:$16 sm:%s6914_s24]   ;;  %v6912_v42 = vsel %vm4101_vm0, %v6910_v38, %v6907_v36  ;;  %v7026_v36 = vsel %vm4101_vm0, %v7024_v34, %v7021_v30  ;;  %v7034_v38 = vld [vmem:[#allocation1 + $0x208] ss:$16 sm:%s7033_s26]   ;;  %s4099_s24 = smov 12  ;;  %s7115_s26 = smov 12 }
 0x17a   :  { %v6920_v43 = vld [vmem:[#allocation1 + $0x189] ss:$16 sm:%s6919_s25]   ;;  %v6917_v48 = vsel %vm4105_vm1, %v6915_v39, %v6912_v42  ;;  %11550 = vrot.lane.b32.xlu1 %v11549_v47, %s11986_s19  ;;  %v7031_v39 = vsel %vm4105_vm1, %v7029_v37, %v7026_v36  ;;  %v7044_v41 = vld [vmem:[#allocation1 + $0x408] ss:$16 sm:%s7043_s15]   ;;  %s11987_s25 = smov 64   ;;  %s7120_s15 = smov 48 }
 0x17b   :  { %v6930_v46 = vld [vmem:[#allocation1 + $0x389] ss:$16 sm:%s6929_s2]   ;;  %v6922_v51 = vsel %vm4109_vm2, %v6920_v43, %v6917_v48  ;;  %v7047_v42 = vld [vmem:[#allocation1 + $0x408] ss:$16 sm:%s7046_s13]   ;;  %v7036_v43 = vsel %vm4109_vm2, %v7034_v38, %v7031_v39  ;;  %s4103_s2 = smov 48  ;;  %v11297_v39 = vunpack.i.l.bf16 %v12983_v24  ;;  %v11298_v24 = vunpack.i.h.bf16 %v12983_v24  ;;  %s7125_s13 = smov 192 }
 0x17c   :  { %v6933_v49 = vld [vmem:[#allocation1 + $0x389] ss:$16 sm:%s6932_s1]   ;;  %v7057_v48 = vld [vmem:[#allocation1 + $0x408] ss:$16 sm:%s7056_s4]   ;;  %s4107_s1 = smov 192  ;;  %s7138_s4 = smov 12 }
 0x17d   :  { %v6938_v50 = vld [vmem:[#allocation1 + $0x389] ss:$16 sm:%s6937_s22]   ;;  %v6935_v53 = vsel %vm4101_vm0, %v6933_v49, %v6930_v46  ;;  %v7049_v46 = vsel %vm4101_vm0, %v7047_v42, %v7044_v41  ;;  %v13524_v49 = vpop.permute.xlu0 %11395  ;;  %s4177_s22 = smov 3 }
 0x17e   :  { %v6943_v54 = vld [vmem:[#allocation1 + $0x389] ss:$16 sm:%s6942_s17]   ;;  %v6940_v57 = vsel %vm4105_vm1, %v6938_v50, %v6935_v53  ;;  %v13526_v50 = vpop.permute.xlu1 %11400  ;;  %s4180_s17 = smov 12  ;;  %v4178_v15 = vld [vmem:[#allocation1 + $0x200] ss:$16 sm:%s4177_s22]   ;;  %s4269_s22 = smov 48 }
 0x17f   :  { %v6953_v40 = vld [vmem:[#allocation1 + $0x589] ss:$16 sm:%s6952_s3]   ;;  %v6945_v62 = vsel %vm4109_vm2, %v6943_v54, %v6940_v57  ;;  %v7067_v54 = vld [vmem:[#allocation1 + $0x608] ss:$16 sm:%s7066_s5]   ;;  %s4185_s3 = smov 48  ;;  %s7143_s5 = smov 48 }
 0x180   :  { %v6956_v58 = vld [vmem:[#allocation1 + $0x589] ss:$16 sm:%s6955_s30]   ;;  %v11554_v8 = vpack.i.bf16 %v6945_v62, %v6922_v51  ;;  %v11564_v51 = vpack.i.bf16 %v7036_v43, %v7014_v35  ;;  %v7080_v62 = vld [vmem:[#allocation1 + $0x608] ss:$16 sm:%s7079_s23]   ;;  %s4190_s30 = smov 192  ;;  %s7161_s23 = smov 12 }
 0x181   :  { %v6961_v59 = vld [vmem:[#allocation1 + $0x589] ss:$16 sm:%s6960_s29]   ;;  %v6958_v0 = vsel %vm4101_vm0, %v6956_v58, %v6953_v40  ;;  %v7070_v40 = vld [vmem:[#allocation1 + $0x608] ss:$16 sm:%s7069_s20]   ;;  %v4186_v26 = vld [vmem:[#allocation1 + $0x200] ss:$16 sm:%s4185_s3]  }
 0x182   :  { %v6966_v1 = vld [vmem:[#allocation1 + $0x589] ss:$16 sm:%s6965_s10]   ;;  %v6963_v9 = vsel %vm4105_vm1, %v6961_v59, %v6958_v0  ;;  %11555 = vrot.lane.b32.xlu0 %v11554_v8, %s11986_s19  ;;  %v7072_v58 = vsel %vm4101_vm0, %v7070_v40, %v7067_v54  ;;  %v7075_v59 = vld [vmem:[#allocation1 + $0x608] ss:$16 sm:%s7074_s21]   ;;  %v4191_v27 = vld [vmem:[#allocation1 + $0x200] ss:$16 sm:%s4190_s30]  }
 0x183   :  { %v6976_v2 = vld [vmem:[#allocation1 + $0x789] ss:$16 sm:%s6975_s14]   ;;  %v6968_v12 = vsel %vm4109_vm2, %v6966_v1, %v6963_v9  ;;  %v7077_v0 = vsel %vm4105_vm1, %v7075_v59, %v7072_v58  ;;  %v4098_v1 = vld [vmem:[#allocation1] ss:$16 sm:%s4097_s27]   ;;  %s4114_s29 = smov 3  ;;  %s4117_s10 = smov 12 }
 0x184   :  { %v6979_v10 = vld [vmem:[#allocation1 + $0x789] ss:$16 sm:%s6978_s18]   ;;  %v7082_v8 = vsel %vm4109_vm2, %v7080_v62, %v7077_v0  ;;  %v4115_v30 = vld [vmem:[#allocation1 + $0x80] ss:$16 sm:%s4114_s29]   ;;  %s4122_s14 = smov 48  ;;  %s4127_s18 = smov 192 }
 0x185   :  { %v6984_v11 = vld [vmem:[#allocation1 + $0x789] ss:$16 sm:%s6983_s28]   ;;  %v6981_v13 = vsel %vm4101_vm0, %v6979_v10, %v6976_v2  ;;  %v4100_v2 = vld [vmem:[#allocation1] ss:$16 sm:%s4099_s24]   ;;  %s4198_s28 = smov 3  ;;  %s7148_s20 = smov 192 }
 0x186   :  { %v6989_v14 = vld [vmem:[#allocation1 + $0x789] ss:$16 sm:%s6988_s11]   ;;  %v6986_v17 = vsel %vm4105_vm1, %v6984_v11, %v6981_v13  ;;  %11565 = vrot.lane.b32.xlu0 %v11564_v51, %s11987_s25  ;;  %v4102_v9 = vsel %vm4101_vm0, %v4100_v2, %v4098_v1  ;;  %v4104_v10 = vld [vmem:[#allocation1] ss:$16 sm:%s4103_s2]   ;;  %s4201_s11 = smov 12  ;;  %s7158_s21 = smov 3 }
 0x187   :  { %v6991_v22 = vsel %vm4109_vm2, %v6989_v14, %v6986_v17  ;;  %v4108_v11 = vld [vmem:[#allocation1] ss:$16 sm:%s4107_s1]   ;;  %v4106_v14 = vsel %vm4105_vm1, %v4104_v10, %v4102_v9  ;;  %v7090_v59 = vld [vmem:[#allocation1 + $0x88] ss:$16 sm:%s7089_s9]   ;;  %s7166_s27 = smov 48  ;;  %s7171_s24 = smov 192 }
 0x188   :  { %v11559_v28 = vpack.i.bf16 %v6991_v22, %v6968_v12  ;;  %v11287_v12 = vunpack.i.l.bf16 %v12968_v61  ;;  %v4181_v17 = vld [vmem:[#allocation1 + $0x200] ss:$16 sm:%s4180_s17]   ;;  %v4110_v19 = vsel %vm4109_vm2, %v4108_v11, %v4106_v14  ;;  %v11288_v61 = vunpack.i.h.bf16 %v12968_v61  ;;  %v7093_v62 = vld [vmem:[#allocation1 + $0x88] ss:$16 sm:%s7092_s12]   ;;  %s4261_s2 = smov 3  ;;  %s4264_s1 = smov 12 }
 0x189   :  { %v4183_v22 = vsel %vm4101_vm0, %v4181_v17, %v4178_v15  ;;  %4112 = vst.msk [vmem:[#allocation0] sm:$0xff] %vm4111_vm3, %v4110_v19   ;;  %v4118_v34 = vld [vmem:[#allocation1 + $0x80] ss:$16 sm:%s4117_s10]   ;;  %v7095_v1 = vsel %vm4101_vm0, %v7093_v62, %v7090_v59  ;;  %v7098_v2 = vld [vmem:[#allocation1 + $0x88] ss:$16 sm:%s7097_s0]   ;;  %s4274_s17 = smov 192  ;;  %v11332_v59 = vunpack.i.l.bf16 %v13401_v21  ;;  %v11333_v21 = vunpack.i.h.bf16 %v13401_v21 }
 0x18a   :  { %11560 = vrot.lane.b32.xlu1 %v11559_v28, %s11986_s19  ;;  %s7051_s19 = smov 48  ;;  %v11367_v28 = vunpack.i.l.bf16 %v13470_v44  ;;  %v4188_v29 = vsel %vm4105_vm1, %v4186_v26, %v4183_v22  ;;  %4449 = vst.msk [vmem:[#allocation0] sm:$0xff] %vm4448_vm4, %v11287_v12   ;;  %v4120_v36 = vsel %vm4101_vm0, %v4118_v34, %v4115_v30  ;;  %v4123_v37 = vld [vmem:[#allocation1 + $0x80] ss:$16 sm:%s4122_s14]   ;;  %v11368_v44 = vunpack.i.h.bf16 %v13470_v44  ;;  %v7113_v10 = vld [vmem:[#allocation1 + $0x288] ss:$16 sm:%s7112_s7]  }
 0x18b   :  { %v7052_v47 = vld [vmem:[#allocation1 + $0x408] ss:$16 sm:%s7051_s19]   ;;  %v4193_v35 = vsel %vm4109_vm2, %v4191_v27, %v4188_v29  ;;  %v4128_v38 = vld [vmem:[#allocation1 + $0x80] ss:$16 sm:%s4127_s18]   ;;  %v4125_v41 = vsel %vm4105_vm1, %v4123_v37, %v4120_v36  ;;  %4816 = vst.msk [vmem:[#allocation0] sm:$0xff] %vm4815_vm5, %v11327_v18   ;;  %v7100_v9 = vsel %vm4105_vm1, %v7098_v2, %v7095_v1  ;;  %s7135_s19 = smov 3  ;;  %v11372_v2 = vunpack.i.l.bf16 %v13472_v45 }
 0x18c   :  { %v7054_v53 = vsel %vm4105_vm1, %v7052_v47, %v7049_v46  ;;  %4196 = vst.msk [vmem:[#allocation0 + $0x20] sm:$0xff] %vm4111_vm3, %v4193_v35   ;;  %v4199_v42 = vld [vmem:[#allocation1 + $0x280] ss:$16 sm:%s4198_s28]   ;;  %v11337_v46 = vunpack.i.l.bf16 %v13417_v55  ;;  %v13555_v47 = vpop.permute.xlu0 %11405  ;;  %v4130_v51 = vsel %vm4109_vm2, %v4128_v38, %v4125_v41  ;;  %v11338_v55 = vunpack.i.h.bf16 %v13417_v55  ;;  %v7116_v11 = vld [vmem:[#allocation1 + $0x288] ss:$16 sm:%s7115_s26]   ;;  %s4345_s3 = smov 3 }
 0x18d   :  { %v7059_v57 = vsel %vm4109_vm2, %v7057_v48, %v7054_v53  ;;  %v4202_v43 = vld [vmem:[#allocation1 + $0x280] ss:$16 sm:%s4201_s11]   ;;  %v13557_v48 = vpop.permute.xlu1 %11410  ;;  %4472 = vst.msk [vmem:[#allocation0 + $0x20] sm:$0xff] %vm4448_vm4, %v11288_v61   ;;  %v7121_v14 = vld [vmem:[#allocation1 + $0x288] ss:$16 sm:%s7120_s15]   ;;  %s4348_s30 = smov 12  ;;  %v11373_v45 = vunpack.i.h.bf16 %v13472_v45 }
 0x18e   :  { %v11569_v13 = vpack.i.bf16 %v7082_v8, %v7059_v57  ;;  %v4204_v53 = vsel %vm4101_vm0, %v4202_v43, %v4199_v42  ;;  %v4207_v54 = vld [vmem:[#allocation1 + $0x280] ss:$16 sm:%s4206_s16]   ;;  %5183 = vst.msk [vmem:[#allocation0] sm:$0xff] %vm5182_vm6, %v11367_v28   ;;  %v11377_v57 = vunpack.i.l.bf16 %v13488_v23  ;;  %v7103_v8 = vld [vmem:[#allocation1 + $0x88] ss:$16 sm:%s7102_s6]   ;;  %v11378_v23 = vunpack.i.h.bf16 %v13488_v23  ;;  %s4353_s29 = smov 48 }
 0x18f   :  { %v4212_v40 = vld [vmem:[#allocation1 + $0x280] ss:$16 sm:%s4211_s8]   ;;  %4133 = vst.msk [vmem:[#allocation0 + $0x8] sm:$0xff] %vm4111_vm3, %v4130_v51   ;;  %v4209_v58 = vsel %vm4105_vm1, %v4207_v54, %v4204_v53  ;;  %v7105_v12 = vsel %vm4109_vm2, %v7103_v8, %v7100_v9  ;;  %v7126_v15 = vld [vmem:[#allocation1 + $0x288] ss:$16 sm:%s7125_s13]   ;;  %v11292_v53 = vunpack.i.l.bf16 %v13054_v33  ;;  %s4358_s10 = smov 192  ;;  %v11293_v33 = vunpack.i.h.bf16 %v13054_v33 }
 0x190   :  { %11570 = vrot.lane.b32.xlu1 %v11569_v13, %s11987_s25  ;;  %4839 = vst.msk [vmem:[#allocation0 + $0x20] sm:$0xff] %vm4815_vm5, %v11328_v20   ;;  %v4214_v0 = vsel %vm4109_vm2, %v4212_v40, %v4209_v58  ;;  %v7118_v13 = vsel %vm4101_vm0, %v7116_v11, %v7113_v10  ;;  %v7136_v18 = vld [vmem:[#allocation1 + $0x488] ss:$16 sm:%s7135_s19]   ;;  %v13587_v20 = vpop.permute.xlu0 %11415  ;;  %v4262_v41 = vld [vmem:[#allocation1 + $0x400] ss:$16 sm:%s4261_s2]   ;;  %s4282_s14 = smov 3 }
 0x191   :  { %4541 = vst.msk [vmem:[#allocation0 + $0x8] sm:$0xff] %vm4448_vm4, %v11297_v39   ;;  %v7123_v17 = vsel %vm4105_vm1, %v7121_v14, %v7118_v13  ;;  %v7139_v19 = vld [vmem:[#allocation1 + $0x488] ss:$16 sm:%s7138_s4]   ;;  %v13589_v35 = vpop.permute.xlu1 %11420  ;;  %v4265_v42 = vld [vmem:[#allocation1 + $0x400] ss:$16 sm:%s4264_s1]   ;;  %s4285_s18 = smov 12  ;;  %v11302_v14 = vunpack.i.l.bf16 %v13084_v63  ;;  %v11303_v63 = vunpack.i.h.bf16 %v13084_v63 }
 0x192   :  { %5206 = vst.msk [vmem:[#allocation0 + $0x20] sm:$0xff] %vm5182_vm6, %v11368_v44   ;;  %v7128_v61 = vsel %vm4109_vm2, %v7126_v15, %v7123_v17  ;;  %v7141_v22 = vsel %vm4101_vm0, %v7139_v19, %v7136_v18  ;;  %v7144_v26 = vld [vmem:[#allocation1 + $0x488] ss:$16 sm:%s7143_s5]   ;;  %v4270_v51 = vld [vmem:[#allocation1 + $0x400] ss:$16 sm:%s4269_s22]   ;;  %s4290_s28 = smov 48  ;;  %v11342_v19 = vunpack.i.l.bf16 %v13419_v56  ;;  %v11343_v56 = vunpack.i.h.bf16 %v13419_v56 }
 0x193   :  { %4217 = vst.msk [vmem:[#allocation0 + $0x28] sm:$0xff] %vm4111_vm3, %v4214_v0   ;;  %v7149_v27 = vld [vmem:[#allocation1 + $0x488] ss:$16 sm:%s7148_s20]   ;;  %v11574_v28 = vpack.i.bf16 %v7128_v61, %v7105_v12  ;;  %v7146_v29 = vsel %vm4105_vm1, %v7144_v26, %v7141_v22  ;;  %v4349_v58 = vld [vmem:[#allocation1 + $0x600] ss:$16 sm:%s4348_s30]   ;;  %s4295_s11 = smov 192 }
 0x194   :  { %4908 = vst.msk [vmem:[#allocation0 + $0x8] sm:$0xff] %vm4815_vm5, %v11337_v46   ;;  %v7159_v30 = vld [vmem:[#allocation1 + $0x688] ss:$16 sm:%s7158_s21]   ;;  %v7151_v36 = vsel %vm4109_vm2, %v7149_v27, %v7146_v29  ;;  %v4267_v46 = vsel %vm4101_vm0, %v4265_v42, %v4262_v41  ;;  %v4354_v0 = vld [vmem:[#allocation1 + $0x600] ss:$16 sm:%s4353_s29]   ;;  %s4366_s16 = smov 3  ;;  %v13617_v61 = vpop.permute.xlu0 %11425 }
 0x195   :  { %4564 = vst.msk [vmem:[#allocation0 + $0x28] sm:$0xff] %vm4448_vm4, %v11298_v24   ;;  %v7162_v34 = vld [vmem:[#allocation1 + $0x688] ss:$16 sm:%s7161_s23]   ;;  %11575 = vrot.lane.b32.xlu0 %v11574_v28, %s11987_s25  ;;  %v4275_v24 = vld [vmem:[#allocation1 + $0x400] ss:$16 sm:%s4274_s17]   ;;  %v4272_v40 = vsel %vm4105_vm1, %v4270_v51, %v4267_v46  ;;  %s4369_s8 = smov 12  ;;  %v13619_v22 = vpop.permute.xlu1 %11430 }
 0x196   :  { %5275 = vst.msk [vmem:[#allocation0 + $0x8] sm:$0xff] %vm5182_vm6, %v11377_v57   ;;  %v7164_v37 = vsel %vm4101_vm0, %v7162_v34, %v7159_v30  ;;  %v7167_v38 = vld [vmem:[#allocation1 + $0x688] ss:$16 sm:%s7166_s27]   ;;  %v4346_v57 = vld [vmem:[#allocation1 + $0x600] ss:$16 sm:%s4345_s3]   ;;  %v4277_v62 = vsel %vm4109_vm2, %v4275_v24, %v4272_v40  ;;  %s4374_s9 = smov 48  ;;  %v11382_v30 = vunpack.i.l.bf16 %v13490_v25  ;;  %v11383_v25 = vunpack.i.h.bf16 %v13490_v25 }
 0x197   :  { %4931 = vst.msk [vmem:[#allocation0 + $0x28] sm:$0xff] %vm4815_vm5, %v11338_v55   ;;  %v7172_v39 = vld [vmem:[#allocation1 + $0x688] ss:$16 sm:%s7171_s24]   ;;  %v7169_v44 = vsel %vm4105_vm1, %v7167_v38, %v7164_v37  ;;  %v4351_v55 = vsel %vm4101_vm0, %v4349_v58, %v4346_v57  ;;  %v4359_v1 = vld [vmem:[#allocation1 + $0x600] ss:$16 sm:%s4358_s10]   ;;  %s4379_s12 = smov 192 }
 0x198   :  { %5298 = vst.msk [vmem:[#allocation0 + $0x28] sm:$0xff] %vm5182_vm6, %v11378_v23   ;;  %v7174_v43 = vsel %vm4109_vm2, %v7172_v39, %v7169_v44  ;;  %v4356_v8 = vsel %vm4105_vm1, %v4354_v0, %v4351_v55  ;;  %v4283_v23 = vld [vmem:[#allocation1 + $0x480] ss:$16 sm:%s4282_s14]   ;;  %s7181_s0 = smov 3  ;;  %s7184_s6 = smov 12 }
 0x199   :  { %v11579_v54 = vpack.i.bf16 %v7174_v43, %v7151_v36  ;;  %4280 = vst.msk [vmem:[#allocation0 + $0x40] sm:$0xff] %vm4111_vm3, %v4277_v62   ;;  %v4286_v9 = vld [vmem:[#allocation1 + $0x480] ss:$16 sm:%s4285_s18]   ;;  %v4361_v10 = vsel %vm4109_vm2, %v4359_v1, %v4356_v8  ;;  %v7182_v36 = vld [vmem:[#allocation1 + $0x108] ss:$16 sm:%s7181_s0]   ;;  %s7189_s7 = smov 48 }
 0x19a   :  { %4495 = vst.msk [vmem:[#allocation0 + $0x40] sm:$0xff] %vm4448_vm4, %v11292_v53   ;;  %v4288_v11 = vsel %vm4101_vm0, %v4286_v9, %v4283_v23  ;;  %v4291_v12 = vld [vmem:[#allocation1 + $0x480] ss:$16 sm:%s4290_s28]   ;;  %v7185_v37 = vld [vmem:[#allocation1 + $0x108] ss:$16 sm:%s7184_s6]   ;;  %s7194_s26 = smov 192  ;;  %v13649_v23 = vpop.permute.xlu0 %11435  ;;  %v13651_v9 = vpop.permute.xlu1 %11440 }
 0x19b   :  { %11580 = vrot.lane.b32.xlu1 %v11579_v54, %s11987_s25  ;;  %v4296_v13 = vld [vmem:[#allocation1 + $0x480] ss:$16 sm:%s4295_s11]   ;;  %4364 = vst.msk [vmem:[#allocation0 + $0x60] sm:$0xff] %vm4111_vm3, %v4361_v10   ;;  %v4293_v15 = vsel %vm4105_vm1, %v4291_v12, %v4288_v11  ;;  %v7187_v39 = vsel %vm4101_vm0, %v7185_v37, %v7182_v36  ;;  %v7190_v44 = vld [vmem:[#allocation1 + $0x108] ss:$16 sm:%s7189_s7]   ;;  %s7204_s15 = smov 3 }
 0x19c   :  { %v4367_v17 = vld [vmem:[#allocation1 + $0x680] ss:$16 sm:%s4366_s16]   ;;  %4862 = vst.msk [vmem:[#allocation0 + $0x40] sm:$0xff] %vm4815_vm5, %v11332_v59   ;;  %v4298_v26 = vsel %vm4109_vm2, %v4296_v13, %v4293_v15  ;;  %v7195_v41 = vld [vmem:[#allocation1 + $0x108] ss:$16 sm:%s7194_s26]   ;;  %s7207_s13 = smov 12  ;;  %v7192_v42 = vsel %vm4105_vm1, %v7190_v44, %v7187_v39 }
 0x19d   :  { %v4370_v18 = vld [vmem:[#allocation1 + $0x680] ss:$16 sm:%s4369_s8]   ;;  %4518 = vst.msk [vmem:[#allocation0 + $0x60] sm:$0xff] %vm4448_vm4, %v11293_v33   ;;  %v7205_v43 = vld [vmem:[#allocation1 + $0x308] ss:$16 sm:%s7204_s15]   ;;  %s7212_s19 = smov 48  ;;  %v7197_v51 = vsel %vm4109_vm2, %v7195_v41, %v7192_v42 }
 0x19e   :  { %v4372_v27 = vsel %vm4101_vm0, %v4370_v18, %v4367_v17  ;;  %v4375_v28 = vld [vmem:[#allocation1 + $0x680] ss:$16 sm:%s4374_s9]   ;;  %5229 = vst.msk [vmem:[#allocation0 + $0x40] sm:$0xff] %vm5182_vm6, %v11372_v2   ;;  %v7208_v46 = vld [vmem:[#allocation1 + $0x308] ss:$16 sm:%s7207_s13]   ;;  %s7217_s4 = smov 192 }
 0x19f   :  { %v4380_v29 = vld [vmem:[#allocation1 + $0x680] ss:$16 sm:%s4379_s12]   ;;  %4301 = vst.msk [vmem:[#allocation0 + $0x48] sm:$0xff] %vm4111_vm3, %v4298_v26   ;;  %v4377_v34 = vsel %vm4105_vm1, %v4375_v28, %v4372_v27  ;;  %v7210_v24 = vsel %vm4101_vm0, %v7208_v46, %v7205_v43  ;;  %v7213_v53 = vld [vmem:[#allocation1 + $0x308] ss:$16 sm:%s7212_s19]   ;;  %s7227_s5 = smov 3  ;;  %v11307_v26 = vunpack.i.l.bf16 %v13205_v52  ;;  %v11308_v52 = vunpack.i.h.bf16 %v13205_v52 }
 0x1a0   :  { %4885 = vst.msk [vmem:[#allocation0 + $0x60] sm:$0xff] %vm4815_vm5, %v11333_v21   ;;  %v4382_v38 = vsel %vm4109_vm2, %v4380_v29, %v4377_v34  ;;  %v7218_v54 = vld [vmem:[#allocation1 + $0x308] ss:$16 sm:%s7217_s4]   ;;  %s7230_s20 = smov 12  ;;  %v7215_v40 = vsel %vm4105_vm1, %v7213_v53, %v7210_v24  ;;  %s7235_s21 = smov 48 }
 0x1a1   :  { %4587 = vst.msk [vmem:[#allocation0 + $0x48] sm:$0xff] %vm4448_vm4, %v11302_v14   ;;  %v7228_v57 = vld [vmem:[#allocation1 + $0x508] ss:$16 sm:%s7227_s5]   ;;  %s7240_s23 = smov 192  ;;  %v7220_v59 = vsel %vm4109_vm2, %v7218_v54, %v7215_v40  ;;  %s7250_s27 = smov 3  ;;  %v11352_v40 = vunpack.i.l.bf16 %v13437_v32  ;;  %v11353_v32 = vunpack.i.h.bf16 %v13437_v32 }
 0x1a2   :  { %5252 = vst.msk [vmem:[#allocation0 + $0x60] sm:$0xff] %vm5182_vm6, %v11373_v45   ;;  %v7231_v58 = vld [vmem:[#allocation1 + $0x508] ss:$16 sm:%s7230_s20]   ;;  %s7253_s24 = smov 12  ;;  %v11584_v0 = vpack.i.bf16 %v7220_v59, %v7197_v51  ;;  %s7258_s2 = smov 48  ;;  %v11312_v51 = vunpack.i.l.bf16 %v13226_v7  ;;  %v11313_v7 = vunpack.i.h.bf16 %v13226_v7 }
 0x1a3   :  { %4385 = vst.msk [vmem:[#allocation0 + $0x68] sm:$0xff] %vm4111_vm3, %v4382_v38   ;;  %v7233_v62 = vsel %vm4101_vm0, %v7231_v58, %v7228_v57  ;;  %v7236_v33 = vld [vmem:[#allocation1 + $0x508] ss:$16 sm:%s7235_s21]   ;;  %s7263_s1 = smov 192  ;;  %s4135_s22 = smov 3  ;;  %v11387_v38 = vunpack.i.l.bf16 %v13506_v5  ;;  %v11388_v5 = vunpack.i.h.bf16 %v13506_v5  ;;  %v13679_v57 = vpop.permute.xlu0 %11445  ;;  %v13681_v58 = vpop.permute.xlu1 %11450 }
 0x1a4   :  { %4954 = vst.msk [vmem:[#allocation0 + $0x48] sm:$0xff] %vm4815_vm5, %v11342_v19   ;;  %v7241_v55 = vld [vmem:[#allocation1 + $0x508] ss:$16 sm:%s7240_s23]   ;;  %v7238_v1 = vsel %vm4105_vm1, %v7236_v33, %v7233_v62  ;;  %s4138_s17 = smov 12  ;;  %11585 = vrot.lane.b32.xlu0 %v11584_v0, %s11987_s25  ;;  %v4136_v14 = vld [vmem:[#allocation1 + $0x100] ss:$16 sm:%s4135_s22]   ;;  %v11392_v0 = vunpack.i.l.bf16 %v13508_v6  ;;  %v11393_v6 = vunpack.i.h.bf16 %v13508_v6 }
 0x1a5   :  { %4610 = vst.msk [vmem:[#allocation0 + $0x68] sm:$0xff] %vm4448_vm4, %v11303_v63   ;;  %v7251_v2 = vld [vmem:[#allocation1 + $0x708] ss:$16 sm:%s7250_s27]   ;;  %v7243_v21 = vsel %vm4109_vm2, %v7241_v55, %v7238_v1  ;;  %v4139_v45 = vld [vmem:[#allocation1 + $0x100] ss:$16 sm:%s4138_s17]   ;;  %s4143_s3 = smov 48 }
 0x1a6   :  { %5321 = vst.msk [vmem:[#allocation0 + $0x48] sm:$0xff] %vm5182_vm6, %v11382_v30   ;;  %v7254_v8 = vld [vmem:[#allocation1 + $0x708] ss:$16 sm:%s7253_s24]   ;;  %s4148_s30 = smov 192  ;;  %v4141_v17 = vsel %vm4101_vm0, %v4139_v45, %v4136_v14  ;;  %v4144_v18 = vld [vmem:[#allocation1 + $0x100] ss:$16 sm:%s4143_s3]   ;;  %v11347_v30 = vunpack.i.l.bf16 %v13435_v31  ;;  %v11348_v31 = vunpack.i.h.bf16 %v13435_v31  ;;  %v11317_v14 = vunpack.i.l.bf16 %v13339_v60 }
 0x1a7   :  { %4977 = vst.msk [vmem:[#allocation0 + $0x68] sm:$0xff] %vm4815_vm5, %v11343_v56   ;;  %v7256_v10 = vsel %vm4101_vm0, %v7254_v8, %v7251_v2  ;;  %v7259_v11 = vld [vmem:[#allocation1 + $0x708] ss:$16 sm:%s7258_s2]   ;;  %v4149_v19 = vld [vmem:[#allocation1 + $0x100] ss:$16 sm:%s4148_s30]   ;;  %s4219_s29 = smov 3  ;;  %v4146_v27 = vsel %vm4105_vm1, %v4144_v18, %v4141_v17  ;;  %v11323_v18 = vunpack.i.h.bf16 %v13360_v16 }
 0x1a8   :  { %5344 = vst.msk [vmem:[#allocation0 + $0x68] sm:$0xff] %vm5182_vm6, %v11383_v25   ;;  %v7264_v12 = vld [vmem:[#allocation1 + $0x708] ss:$16 sm:%s7263_s1]   ;;  %v7261_v13 = vsel %vm4105_vm1, %v7259_v11, %v7256_v10  ;;  %s4222_s10 = smov 12  ;;  %v4220_v28 = vld [vmem:[#allocation1 + $0x300] ss:$16 sm:%s4219_s29]   ;;  %v4151_v34 = vsel %vm4109_vm2, %v4149_v19, %v4146_v27  ;;  %v11322_v19 = vunpack.i.l.bf16 %v13360_v16 }
 0x1a9   :  { %v7266_v15 = vsel %vm4109_vm2, %v7264_v12, %v7261_v13  ;;  %v4223_v29 = vld [vmem:[#allocation1 + $0x300] ss:$16 sm:%s4222_s10]   ;;  %s4227_s14 = smov 48  ;;  %s4232_s18 = smov 192  ;;  %4154 = vst.msk [vmem:[#allocation0 + $0x10] sm:$0xff] %vm4111_vm3, %v4151_v34   ;;  %v11363_v34 = vunpack.i.h.bf16 %v13454_v4 }
 0x1aa   :  { %v11589_v63 = vpack.i.bf16 %v7266_v15, %v7243_v21  ;;  %v4225_v36 = vsel %vm4101_vm0, %v4223_v29, %v4220_v28  ;;  %v4228_v37 = vld [vmem:[#allocation1 + $0x300] ss:$16 sm:%s4227_s14]   ;;  %s4303_s28 = smov 3  ;;  %s4306_s11 = smov 12  ;;  %4633 = vst.msk [vmem:[#allocation0 + $0x10] sm:$0xff] %vm4448_vm4, %v11307_v26   ;;  %v11318_v21 = vunpack.i.h.bf16 %v13339_v60  ;;  %v11358_v26 = vunpack.i.h.bf16 %v13452_v3 }
 0x1ab   :  { %v4233_v56 = vld [vmem:[#allocation1 + $0x300] ss:$16 sm:%s4232_s18]   ;;  %v4230_v39 = vsel %vm4105_vm1, %v4228_v37, %v4225_v36  ;;  %s4311_s16 = smov 48  ;;  %s4316_s8 = smov 192  ;;  %5000 = vst.msk [vmem:[#allocation0 + $0x10] sm:$0xff] %vm4815_vm5, %v11347_v30   ;;  %v11357_v30 = vunpack.i.l.bf16 %v13452_v3 }
 0x1ac   :  { %11590 = vrot.lane.b32.xlu1 %v11589_v63, %s11987_s25  ;;  %v4304_v44 = vld [vmem:[#allocation1 + $0x500] ss:$16 sm:%s4303_s28]   ;;  %v4235_v25 = vsel %vm4109_vm2, %v4233_v56, %v4230_v39  ;;  %s4387_s9 = smov 3  ;;  %s4390_s12 = smov 12  ;;  %5367 = vst.msk [vmem:[#allocation0 + $0x10] sm:$0xff] %vm5182_vm6, %v11387_v38   ;;  %v11398_v38 = vunpack.i.h.bf16 %v13524_v49  ;;  %v11397_v39 = vunpack.i.l.bf16 %v13524_v49  ;;  %v11403_v49 = vunpack.i.h.bf16 %v13526_v50 }
 0x1ad   :  { %v4307_v41 = vld [vmem:[#allocation1 + $0x500] ss:$16 sm:%s4306_s11]   ;;  %4238 = vst.msk [vmem:[#allocation0 + $0x30] sm:$0xff] %vm4111_vm3, %v4235_v25   ;;  %s4395_s0 = smov 48  ;;  %s4400_s6 = smov 192 }
 0x1ae   :  { %v4309_v42 = vsel %vm4101_vm0, %v4307_v41, %v4304_v44  ;;  %v4312_v43 = vld [vmem:[#allocation1 + $0x500] ss:$16 sm:%s4311_s16]   ;;  %4656 = vst.msk [vmem:[#allocation0 + $0x30] sm:$0xff] %vm4448_vm4, %v11308_v52   ;;  %s7273_s7 = smov 3  ;;  %s7276_s26 = smov 12  ;;  %v11362_v52 = vunpack.i.l.bf16 %v13454_v4 }
 0x1af   :  { %v4317_v46 = vld [vmem:[#allocation1 + $0x500] ss:$16 sm:%s4316_s8]   ;;  %v4314_v24 = vsel %vm4105_vm1, %v4312_v43, %v4309_v42  ;;  %v7274_v2 = vld [vmem:[#allocation1 + $0x188] ss:$16 sm:%s7273_s7]   ;;  %s7281_s15 = smov 48  ;;  %s7286_s13 = smov 192  ;;  %v11402_v42 = vunpack.i.l.bf16 %v13526_v50  ;;  %v11408_v43 = vunpack.i.h.bf16 %v13555_v47 }
 0x1b0   :  { %v4388_v53 = vld [vmem:[#allocation1 + $0x700] ss:$16 sm:%s4387_s9]   ;;  %v4319_v59 = vsel %vm4109_vm2, %v4317_v46, %v4314_v24  ;;  %v7277_v8 = vld [vmem:[#allocation1 + $0x188] ss:$16 sm:%s7276_s26]   ;;  %5023 = vst.msk [vmem:[#allocation0 + $0x30] sm:$0xff] %vm4815_vm5, %v11348_v31   ;;  %s7296_s19 = smov 3 }
 0x1b1   :  { %v4391_v54 = vld [vmem:[#allocation1 + $0x700] ss:$16 sm:%s4390_s12]   ;;  %4322 = vst.msk [vmem:[#allocation0 + $0x50] sm:$0xff] %vm4111_vm3, %v4319_v59   ;;  %v7279_v11 = vsel %vm4101_vm0, %v7277_v8, %v7274_v2  ;;  %v7282_v12 = vld [vmem:[#allocation1 + $0x188] ss:$16 sm:%s7281_s15]   ;;  %s7299_s4 = smov 12  ;;  %v13727_v59 = vpop.permute.xlu1 %11460 }
 0x1b2   :  { %v4393_v62 = vsel %vm4101_vm0, %v4391_v54, %v4388_v53  ;;  %v4396_v33 = vld [vmem:[#allocation1 + $0x700] ss:$16 sm:%s4395_s0]   ;;  %4679 = vst.msk [vmem:[#allocation0 + $0x50] sm:$0xff] %vm4448_vm4, %v11312_v51   ;;  %v7287_v13 = vld [vmem:[#allocation1 + $0x188] ss:$16 sm:%s7286_s13]   ;;  %v7284_v45 = vsel %vm4105_vm1, %v7282_v12, %v7279_v11  ;;  %s7304_s5 = smov 48  ;;  %v11407_v53 = vunpack.i.l.bf16 %v13555_v47  ;;  %v11413_v54 = vunpack.i.h.bf16 %v13557_v48 }
 0x1b3   :  { %v4401_v55 = vld [vmem:[#allocation1 + $0x700] ss:$16 sm:%s4400_s6]   ;;  %v4398_v1 = vsel %vm4105_vm1, %v4396_v33, %v4393_v62  ;;  %5390 = vst.msk [vmem:[#allocation0 + $0x30] sm:$0xff] %vm5182_vm6, %v11388_v5   ;;  %v7297_v15 = vld [vmem:[#allocation1 + $0x388] ss:$16 sm:%s7296_s19]   ;;  %s7309_s20 = smov 192  ;;  %v7289_v63 = vsel %vm4109_vm2, %v7287_v13, %v7284_v45  ;;  %v11423_v11 = vunpack.i.h.bf16 %v13589_v35  ;;  %v11422_v12 = vunpack.i.l.bf16 %v13589_v35 }
 0x1b4   :  { %v4403_v10 = vsel %vm4109_vm2, %v4401_v55, %v4398_v1  ;;  %v7300_v17 = vld [vmem:[#allocation1 + $0x388] ss:$16 sm:%s7299_s4]   ;;  %5046 = vst.msk [vmem:[#allocation0 + $0x50] sm:$0xff] %vm4815_vm5, %v11352_v40   ;;  %s7319_s21 = smov 3  ;;  %s7322_s23 = smov 12  ;;  %v13725_v40 = vpop.permute.xlu0 %11455  ;;  %v11418_v1 = vunpack.i.h.bf16 %v13587_v20 }
 0x1b5   :  { %4406 = vst.msk [vmem:[#allocation0 + $0x70] sm:$0xff] %vm4111_vm3, %v4403_v10   ;;  %v7302_v27 = vsel %vm4101_vm0, %v7300_v17, %v7297_v15  ;;  %v7305_v28 = vld [vmem:[#allocation1 + $0x388] ss:$16 sm:%s7304_s5]   ;;  %s7327_s27 = smov 48  ;;  %s7332_s24 = smov 192  ;;  %v11417_v10 = vunpack.i.l.bf16 %v13587_v20  ;;  %v11428_v17 = vunpack.i.h.bf16 %v13617_v61 }
 0x1b6   :  { %4702 = vst.msk [vmem:[#allocation0 + $0x70] sm:$0xff] %vm4448_vm4, %v11313_v7   ;;  %v7310_v29 = vld [vmem:[#allocation1 + $0x388] ss:$16 sm:%s7309_s20]   ;;  %v7307_v36 = vsel %vm4105_vm1, %v7305_v28, %v7302_v27  ;;  %s7342_s2 = smov 3  ;;  %s7345_s1 = smov 12 }
 0x1b7   :  { %5413 = vst.msk [vmem:[#allocation0 + $0x50] sm:$0xff] %vm5182_vm6, %v11392_v0   ;;  %v7320_v37 = vld [vmem:[#allocation1 + $0x588] ss:$16 sm:%s7319_s21]   ;;  %v7312_v44 = vsel %vm4109_vm2, %v7310_v29, %v7307_v36  ;;  %s7350_s22 = smov 48  ;;  %s7355_s17 = smov 192  ;;  %v11412_v0 = vunpack.i.l.bf16 %v13557_v48 }
 0x1b8   :  { %v7323_v56 = vld [vmem:[#allocation1 + $0x588] ss:$16 sm:%s7322_s23]   ;;  %5069 = vst.msk [vmem:[#allocation0 + $0x70] sm:$0xff] %vm4815_vm5, %v11353_v32   ;;  %v11594_v46 = vpack.i.bf16 %v7312_v44, %v7289_v63  ;;  %s4156_s3 = smov 3  ;;  %s4159_s30 = smov 12  ;;  %v11427_v63 = vunpack.i.l.bf16 %v13617_v61 }
 0x1b9   :  { %v7325_v41 = vsel %vm4101_vm0, %v7323_v56, %v7320_v37  ;;  %v7328_v31 = vld [vmem:[#allocation1 + $0x588] ss:$16 sm:%s7327_s27]   ;;  %5436 = vst.msk [vmem:[#allocation0 + $0x70] sm:$0xff] %vm5182_vm6, %v11393_v6   ;;  %v4157_v8 = vld [vmem:[#allocation1 + $0x180] ss:$16 sm:%s4156_s3]   ;;  %s4164_s29 = smov 48  ;;  %v11433_v37 = vunpack.i.h.bf16 %v13619_v22  ;;  %v11432_v56 = vunpack.i.l.bf16 %v13619_v22 }
 0x1ba   :  { %v7333_v25 = vld [vmem:[#allocation1 + $0x588] ss:$16 sm:%s7332_s24]   ;;  %v7330_v51 = vsel %vm4105_vm1, %v7328_v31, %v7325_v41  ;;  %11595 = vrot.lane.b32.xlu0 %v11594_v46, %s11987_s25  ;;  %v4160_v32 = vld [vmem:[#allocation1 + $0x180] ss:$16 sm:%s4159_s30]   ;;  %s4169_s10 = smov 192  ;;  %s4240_s14 = smov 3  ;;  %v11438_v46 = vunpack.i.h.bf16 %v13649_v23 }
 0x1bb   :  { %v7343_v5 = vld [vmem:[#allocation1 + $0x788] ss:$16 sm:%s7342_s2]   ;;  %v7335_v7 = vsel %vm4109_vm2, %v7333_v25, %v7330_v51  ;;  %v4162_v6 = vsel %vm4101_vm0, %v4160_v32, %v4157_v8  ;;  %v4165_v45 = vld [vmem:[#allocation1 + $0x180] ss:$16 sm:%s4164_s29]   ;;  %s4243_s18 = smov 12  ;;  %s4248_s28 = smov 48  ;;  %v11437_v51 = vunpack.i.l.bf16 %v13649_v23 }
 0x1bc   :  { %v7346_v24 = vld [vmem:[#allocation1 + $0x788] ss:$16 sm:%s7345_s1]   ;;  %v4170_v15 = vld [vmem:[#allocation1 + $0x180] ss:$16 sm:%s4169_s10]   ;;  %v4167_v28 = vsel %vm4105_vm1, %v4165_v45, %v4162_v6  ;;  %s4253_s11 = smov 192  ;;  %s4324_s16 = smov 3  ;;  %v11452_v6 = vunpack.i.l.bf16 %v13681_v58 }
 0x1bd   :  { %v7348_v62 = vsel %vm4101_vm0, %v7346_v24, %v7343_v5  ;;  %v7351_v33 = vld [vmem:[#allocation1 + $0x788] ss:$16 sm:%s7350_s22]   ;;  %v4241_v29 = vld [vmem:[#allocation1 + $0x380] ss:$16 sm:%s4240_s14]   ;;  %v4172_v44 = vsel %vm4109_vm2, %v4170_v15, %v4167_v28  ;;  %s4327_s8 = smov 12  ;;  %s4337_s9 = smov 192  ;;  %v11457_v28 = vunpack.i.l.bf16 %v13725_v40 }
 0x1be   :  { %v7356_v55 = vld [vmem:[#allocation1 + $0x788] ss:$16 sm:%s7355_s17]   ;;  %v7353_v2 = vsel %vm4105_vm1, %v7351_v33, %v7348_v62  ;;  %v4244_v36 = vld [vmem:[#allocation1 + $0x380] ss:$16 sm:%s4243_s18]   ;;  %4175 = vst.msk [vmem:[#allocation0 + $0x18] sm:$0xff] %vm4111_vm3, %v4172_v44   ;;  %v11442_v62 = vunpack.i.l.bf16 %v13651_v9  ;;  %v11448_v33 = vunpack.i.h.bf16 %v13679_v57  ;;  %s4408_s12 = smov 3  ;;  %v13772_v44 = vpop.permute.xlu1 %11470 }
 0x1bf   :  { %v7358_v13 = vsel %vm4109_vm2, %v7356_v55, %v7353_v2  ;;  %v4246_v41 = vsel %vm4101_vm0, %v4244_v36, %v4241_v29  ;;  %v4249_v31 = vld [vmem:[#allocation1 + $0x380] ss:$16 sm:%s4248_s28]   ;;  %v11447_v55 = vunpack.i.l.bf16 %v13679_v57  ;;  %4725 = vst.msk [vmem:[#allocation0 + $0x18] sm:$0xff] %vm4448_vm4, %v11317_v14   ;;  %s4411_s0 = smov 12  ;;  %s4416_s6 = smov 48  ;;  %v11463_v29 = vunpack.i.h.bf16 %v13727_v59  ;;  %v13770_v36 = vpop.permute.xlu0 %11465 }
 0x1c0   :  { %v11599_v27 = vpack.i.bf16 %v7358_v13, %v7335_v7  ;;  %v4254_v25 = vld [vmem:[#allocation1 + $0x380] ss:$16 sm:%s4253_s11]   ;;  %v4251_v5 = vsel %vm4105_vm1, %v4249_v31, %v4246_v41  ;;  %v11453_v13 = vunpack.i.h.bf16 %v13681_v58  ;;  %s4421_s7 = smov 192  ;;  %5092 = vst.msk [vmem:[#allocation0 + $0x18] sm:$0xff] %vm4815_vm5, %v11357_v30   ;;  %v11458_v30 = vunpack.i.h.bf16 %v13725_v40  ;;  %s7365_s26 = smov 3 }
 0x1c1   :  { %v4325_v24 = vld [vmem:[#allocation1 + $0x580] ss:$16 sm:%s4324_s16]   ;;  %v4256_v2 = vsel %vm4109_vm2, %v4254_v25, %v4251_v5  ;;  %s7368_s15 = smov 12  ;;  %5459 = vst.msk [vmem:[#allocation0 + $0x18] sm:$0xff] %vm5182_vm6, %v11397_v39   ;;  %v11462_v39 = vunpack.i.l.bf16 %v13727_v59  ;;  %v11468_v25 = vunpack.i.h.bf16 %v13770_v36  ;;  %s7373_s13 = smov 48  ;;  %v11467_v3 = vunpack.i.l.bf16 %v13770_v36 }
 0x1c2   :  { %11600 = vrot.lane.b32.xlu1 %v11599_v27, %s11987_s25  ;;  %v4328_v7 = vld [vmem:[#allocation1 + $0x580] ss:$16 sm:%s4327_s8]   ;;  %s4332_s25 = smov 48  ;;  %4259 = vst.msk [vmem:[#allocation0 + $0x38] sm:$0xff] %vm4111_vm3, %v4256_v2   ;;  %s7378_s19 = smov 192  ;;  %v11472_v2 = vunpack.i.l.bf16 %v13772_v44 }
 0x1c3   :  { %v4330_v14 = vsel %vm4101_vm0, %v4328_v7, %v4325_v24  ;;  %v4333_v8 = vld [vmem:[#allocation1 + $0x580] ss:$16 sm:%s4332_s25]   ;;  %4748 = vst.msk [vmem:[#allocation0 + $0x38] sm:$0xff] %vm4448_vm4, %v11318_v21   ;;  %v7366_v24 = vld [vmem:[#allocation1 + $0x7] ss:$16 sm:%s7365_s26]   ;;  %s7387_s4 = smov 3  ;;  %v11476_v58 = vpop.permute.xlu0 %11475 }
 0x1c4   :  { %v4338_v32 = vld [vmem:[#allocation1 + $0x580] ss:$16 sm:%s4337_s9]   ;;  %v4335_v45 = vsel %vm4105_vm1, %v4333_v8, %v4330_v14  ;;  %v7369_v7 = vld [vmem:[#allocation1 + $0x7] ss:$16 sm:%s7368_s15]   ;;  %5115 = vst.msk [vmem:[#allocation0 + $0x38] sm:$0xff] %vm4815_vm5, %v11358_v26   ;;  %v11473_v26 = vunpack.i.h.bf16 %v13772_v44  ;;  %s7390_s5 = smov 12  ;;  %v11478_v40 = vunpack.i.h.bf16 %v11476_v58  ;;  %v11477_v59 = vunpack.i.l.bf16 %v11476_v58 }
 0x1c5   :  { %v4409_v15 = vld [vmem:[#allocation1 + $0x780] ss:$16 sm:%s4408_s12]   ;;  %v4340_v60 = vsel %vm4109_vm2, %v4338_v32, %v4335_v45  ;;  %v7374_v8 = vld [vmem:[#allocation1 + $0x7] ss:$16 sm:%s7373_s13]   ;;  %5482 = vst.msk [vmem:[#allocation0 + $0x38] sm:$0xff] %vm5182_vm6, %v11398_v38   ;;  %s7395_s20 = smov 48 }
 0x1c6   :  { %v4412_v27 = vld [vmem:[#allocation1 + $0x780] ss:$16 sm:%s4411_s0]   ;;  %4343 = vst.msk [vmem:[#allocation0 + $0x58] sm:$0xff] %vm4111_vm3, %v4340_v60   ;;  %v7379_v32 = vld [vmem:[#allocation1 + $0x7] ss:$16 sm:%s7378_s19]   ;;  %s7400_s21 = smov 192 }
 0x1c7   :  { %v4414_v21 = vsel %vm4101_vm0, %v4412_v27, %v4409_v15  ;;  %v4417_v41 = vld [vmem:[#allocation1 + $0x780] ss:$16 sm:%s4416_s6]   ;;  %4771 = vst.msk [vmem:[#allocation0 + $0x58] sm:$0xff] %vm4448_vm4, %v11322_v19   ;;  %v7371_v19 = vsel %vm4101_vm0, %v7369_v7, %v7366_v24  ;;  %v7388_v45 = vld [vmem:[#allocation1 + $0x207] ss:$16 sm:%s7387_s4]   ;;  %s7410_s23 = smov 3 }
 0x1c8   :  { %v4422_v31 = vld [vmem:[#allocation1 + $0x780] ss:$16 sm:%s4421_s7]   ;;  %v4419_v5 = vsel %vm4105_vm1, %v4417_v41, %v4414_v21  ;;  %v7376_v38 = vsel %vm4105_vm1, %v7374_v8, %v7371_v19  ;;  %5138 = vst.msk [vmem:[#allocation0 + $0x58] sm:$0xff] %vm4815_vm5, %v11362_v52   ;;  %v11443_v52 = vunpack.i.h.bf16 %v13651_v9  ;;  %v7391_v16 = vld [vmem:[#allocation1 + $0x207] ss:$16 sm:%s7390_s5]   ;;  %s7413_s27 = smov 12 }
 0x1c9   :  { %v4424_v14 = vsel %vm4109_vm2, %v4422_v31, %v4419_v5  ;;  %5505 = vst.msk [vmem:[#allocation0 + $0x58] sm:$0xff] %vm5182_vm6, %v11402_v42   ;;  %v7381_v50 = vsel %vm4109_vm2, %v7379_v32, %v7376_v38  ;;  %v7393_v47 = vsel %vm4101_vm0, %v7391_v16, %v7388_v45  ;;  %v7401_v48 = vld [vmem:[#allocation1 + $0x207] ss:$16 sm:%s7400_s21]   ;;  %s7418_s24 = smov 48  ;;  %s7423_s2 = smov 192 }
 0x1ca   :  { %4427 = vst.msk [vmem:[#allocation0 + $0x78] sm:$0xff] %vm4111_vm3, %v4424_v14   ;;  %v7411_v20 = vld [vmem:[#allocation1 + $0x407] ss:$16 sm:%s7410_s23]   ;;  %s7433_s1 = smov 3  ;;  %s7436_s22 = smov 12 }
 0x1cb   :  { %4794 = vst.msk [vmem:[#allocation0 + $0x78] sm:$0xff] %vm4448_vm4, %v11323_v18   ;;  %v7396_v18 = vld [vmem:[#allocation1 + $0x207] ss:$16 sm:%s7395_s20]   ;;  %s7441_s17 = smov 48  ;;  %s7446_s3 = smov 192 }
 0x1cc   :  { %5550 = vst.msk [vmem:[#allocation0] sm:$0xff] %vm5549_vm7, %v11407_v53   ;;  %5573 = vst.msk [vmem:[#allocation0 + $0x20] sm:$0xff] %vm5549_vm7, %v11408_v43   ;;  %v7398_v4 = vsel %vm4105_vm1, %v7396_v18, %v7393_v47  ;;  %v7414_v35 = vld [vmem:[#allocation1 + $0x407] ss:$16 sm:%s7413_s27]   ;;  %s7456_s30 = smov 3  ;;  %s7459_s29 = smov 12 }
 0x1cd   :  { %5596 = vst.msk [vmem:[#allocation0 + $0x40] sm:$0xff] %vm5549_vm7, %v11412_v0   ;;  %5619 = vst.msk [vmem:[#allocation0 + $0x60] sm:$0xff] %vm5549_vm7, %v11413_v54   ;;  %v7419_v61 = vld [vmem:[#allocation1 + $0x407] ss:$16 sm:%s7418_s24]   ;;  %v7403_v22 = vsel %vm4109_vm2, %v7401_v48, %v7398_v4  ;;  %v7416_v23 = vsel %vm4101_vm0, %v7414_v35, %v7411_v20  ;;  %s7464_s10 = smov 48  ;;  %s11988_s14 = smov 56  }
 0x1ce   :  { %5642 = vst.msk [vmem:[#allocation0 + $0x8] sm:$0xff] %vm5549_vm7, %v11417_v10   ;;  %5665 = vst.msk [vmem:[#allocation0 + $0x28] sm:$0xff] %vm5549_vm7, %v11418_v1   ;;  %v7424_v9 = vld [vmem:[#allocation1 + $0x407] ss:$16 sm:%s7423_s2]   ;;  %v11604_v42 = vpack.i.bf16 %v7403_v22, %v7381_v50  ;;  %v7421_v43 = vsel %vm4105_vm1, %v7419_v61, %v7416_v23  ;;  %s7469_s18 = smov 192  ;;  %s7479_s28 = smov 3 }
 0x1cf   :  { %5688 = vst.msk [vmem:[#allocation0 + $0x48] sm:$0xff] %vm5549_vm7, %v11422_v12   ;;  %5711 = vst.msk [vmem:[#allocation0 + $0x68] sm:$0xff] %vm5549_vm7, %v11423_v11   ;;  %v7434_v57 = vld [vmem:[#allocation1 + $0x607] ss:$16 sm:%s7433_s1]   ;;  %v7426_v0 = vsel %vm4109_vm2, %v7424_v9, %v7421_v43  ;;  %s7482_s11 = smov 12  ;;  %s7487_s16 = smov 48 }
 0x1d0   :  { %5734 = vst.msk [vmem:[#allocation0 + $0x10] sm:$0xff] %vm5549_vm7, %v11427_v63   ;;  %5757 = vst.msk [vmem:[#allocation0 + $0x30] sm:$0xff] %vm5549_vm7, %v11428_v17   ;;  %v7437_v53 = vld [vmem:[#allocation1 + $0x607] ss:$16 sm:%s7436_s22]   ;;  %11605 = vrot.lane.b32.xlu0 %v11604_v42, %s11988_s14  ;;  %s7492_s8 = smov 192  ;;  %s7502_s25 = smov 3 }
 0x1d1   :  { %5780 = vst.msk [vmem:[#allocation0 + $0x50] sm:$0xff] %vm5549_vm7, %v11432_v56   ;;  %5803 = vst.msk [vmem:[#allocation0 + $0x70] sm:$0xff] %vm5549_vm7, %v11433_v37   ;;  %v7442_v54 = vld [vmem:[#allocation1 + $0x607] ss:$16 sm:%s7441_s17]   ;;  %v7439_v1 = vsel %vm4101_vm0, %v7437_v53, %v7434_v57  ;;  %s7505_s9 = smov 12  ;;  %s7510_s12 = smov 48 }
 0x1d2   :  { %5826 = vst.msk [vmem:[#allocation0 + $0x18] sm:$0xff] %vm5549_vm7, %v11437_v51   ;;  %5849 = vst.msk [vmem:[#allocation0 + $0x38] sm:$0xff] %vm5549_vm7, %v11438_v46   ;;  %v7447_v10 = vld [vmem:[#allocation1 + $0x607] ss:$16 sm:%s7446_s3]   ;;  %v7444_v63 = vsel %vm4105_vm1, %v7442_v54, %v7439_v1  ;;  %s7515_s0 = smov 192  ;;  %s7525_s6 = smov 3 }
 0x1d3   :  { %5161 = vst.msk [vmem:[#allocation0 + $0x78] sm:$0xff] %vm4815_vm5, %v11363_v34   ;;  %v11481_v34 = vpop.permute.xlu1 %11480  ;;  %v7457_v11 = vld [vmem:[#allocation1 + $0x87] ss:$16 sm:%s7456_s30]   ;;  %v7449_v46 = vsel %vm4109_vm2, %v7447_v10, %v7444_v63  ;;  %s7528_s7 = smov 12  ;;  %s7533_s26 = smov 48 }
 0x1d4   :  { %5872 = vst.msk [vmem:[#allocation0 + $0x58] sm:$0xff] %vm5549_vm7, %v11442_v62   ;;  %v11483_v12 = vunpack.i.h.bf16 %v11481_v34  ;;  %v11482_v17 = vunpack.i.l.bf16 %v11481_v34  ;;  %v7460_v37 = vld [vmem:[#allocation1 + $0x87] ss:$16 sm:%s7459_s29]   ;;  %s7538_s15 = smov 192  ;;  %s7548_s13 = smov 3 }
 0x1d5   :  { %5917 = vst.msk [vmem:[#allocation0] sm:$0xff] %vm5916_vm8, %v11447_v55   ;;  %5940 = vst.msk [vmem:[#allocation0 + $0x20] sm:$0xff] %vm5916_vm8, %v11448_v33   ;;  %v7465_v56 = vld [vmem:[#allocation1 + $0x87] ss:$16 sm:%s7464_s10]   ;;  %v7462_v51 = vsel %vm4101_vm0, %v7460_v37, %v7457_v11  ;;  %v11609_v55 = vpack.i.bf16 %v7449_v46, %v7426_v0  ;;  %s7551_s19 = smov 12  ;;  %s7556_s4 = smov 48 }
 0x1d6   :  { %5963 = vst.msk [vmem:[#allocation0 + $0x40] sm:$0xff] %vm5916_vm8, %v11452_v6   ;;  %5986 = vst.msk [vmem:[#allocation0 + $0x60] sm:$0xff] %vm5916_vm8, %v11453_v13   ;;  %v7470_v62 = vld [vmem:[#allocation1 + $0x87] ss:$16 sm:%s7469_s18]   ;;  %v7467_v13 = vsel %vm4105_vm1, %v7465_v56, %v7462_v51  ;;  %s7561_s5 = smov 192  ;;  %s7571_s20 = smov 3 }
 0x1d7   :  { %6009 = vst.msk [vmem:[#allocation0 + $0x8] sm:$0xff] %vm5916_vm8, %v11457_v28   ;;  %6032 = vst.msk [vmem:[#allocation0 + $0x28] sm:$0xff] %vm5916_vm8, %v11458_v30   ;;  %v7480_v33 = vld [vmem:[#allocation1 + $0x287] ss:$16 sm:%s7479_s28]   ;;  %v7472_v27 = vsel %vm4109_vm2, %v7470_v62, %v7467_v13  ;;  %11610 = vrot.lane.b32.xlu1 %v11609_v55, %s11988_s14  ;;  %s7574_s21 = smov 12  ;;  %s7579_s23 = smov 48 }
 0x1d8   :  { %6055 = vst.msk [vmem:[#allocation0 + $0x48] sm:$0xff] %vm5916_vm8, %v11462_v39   ;;  %6078 = vst.msk [vmem:[#allocation0 + $0x68] sm:$0xff] %vm5916_vm8, %v11463_v29   ;;  %v7483_v6 = vld [vmem:[#allocation1 + $0x287] ss:$16 sm:%s7482_s11]   ;;  %s7584_s27 = smov 192  ;;  %s7594_s24 = smov 3 }
 0x1d9   :  { %6101 = vst.msk [vmem:[#allocation0 + $0x10] sm:$0xff] %vm5916_vm8, %v11467_v3   ;;  %6124 = vst.msk [vmem:[#allocation0 + $0x30] sm:$0xff] %vm5916_vm8, %v11468_v25   ;;  %v7488_v15 = vld [vmem:[#allocation1 + $0x287] ss:$16 sm:%s7487_s16]   ;;  %v7485_v30 = vsel %vm4101_vm0, %v7483_v6, %v7480_v33  ;;  %v13917_v3 = vpop.permute.xlu0 %11485  ;;  %s7597_s2 = smov 12  ;;  %s7602_s1 = smov 48 }
 0x1da   :  { %6147 = vst.msk [vmem:[#allocation0 + $0x50] sm:$0xff] %vm5916_vm8, %v11472_v2   ;;  %6170 = vst.msk [vmem:[#allocation0 + $0x70] sm:$0xff] %vm5916_vm8, %v11473_v26   ;;  %v7493_v28 = vld [vmem:[#allocation1 + $0x287] ss:$16 sm:%s7492_s8]   ;;  %v7490_v36 = vsel %vm4105_vm1, %v7488_v15, %v7485_v30  ;;  %v13919_v26 = vpop.permute.xlu1 %11490  ;;  %s7607_s22 = smov 192  ;;  %s7617_s17 = smov 3 }
 0x1db   :  { %5528 = vst.msk [vmem:[#allocation0 + $0x78] sm:$0xff] %vm5182_vm6, %v11403_v49   ;;  %v7503_v29 = vld [vmem:[#allocation1 + $0x487] ss:$16 sm:%s7502_s25]   ;;  %v7495_v21 = vsel %vm4109_vm2, %v7493_v28, %v7490_v36  ;;  %s7620_s3 = smov 12  ;;  %s7625_s30 = smov 48  ;;  %v11488_v36 = vunpack.i.h.bf16 %v13917_v3 }
 0x1dc   :  { %5895 = vst.msk [vmem:[#allocation0 + $0x78] sm:$0xff] %vm5549_vm7, %v11443_v52   ;;  %v7506_v44 = vld [vmem:[#allocation1 + $0x487] ss:$16 sm:%s7505_s9]   ;;  %v11614_v25 = vpack.i.bf16 %v7495_v21, %v7472_v27  ;;  %s7630_s29 = smov 192  ;;  %s7640_s10 = smov 3 }
 0x1dd   :  { %6193 = vst.msk [vmem:[#allocation0 + $0x18] sm:$0xff] %vm5916_vm8, %v11477_v59   ;;  %6216 = vst.msk [vmem:[#allocation0 + $0x38] sm:$0xff] %vm5916_vm8, %v11478_v40   ;;  %v7511_v60 = vld [vmem:[#allocation1 + $0x487] ss:$16 sm:%s7510_s12]   ;;  %v7508_v41 = vsel %vm4101_vm0, %v7506_v44, %v7503_v29  ;;  %v13935_v0 = vpop.permute.xlu0 %11495  ;;  %s7643_s18 = smov 12  ;;  %s7648_s28 = smov 48 }
 0x1de   :  { %6239 = vst.msk [vmem:[#allocation0 + $0x58] sm:$0xff] %vm5916_vm8, %v11482_v17   ;;  %6262 = vst.msk [vmem:[#allocation0 + $0x78] sm:$0xff] %vm5916_vm8, %v11483_v12   ;;  %v7516_v31 = vld [vmem:[#allocation1 + $0x487] ss:$16 sm:%s7515_s0]   ;;  %v7513_v5 = vsel %vm4105_vm1, %v7511_v60, %v7508_v41  ;;  %11615 = vrot.lane.b32.xlu0 %v11614_v25, %s11988_s14  ;;  %v13937_v1 = vpop.permute.xlu1 %11500  ;;  %s7653_s11 = smov 192  ;;  %s7663_s16 = smov 3  ;;  %v11487_v41 = vunpack.i.l.bf16 %v13917_v3  ;;  %v11498_v3 = vunpack.i.h.bf16 %v13935_v0 }
 0x1df   :  { %v7526_v39 = vld [vmem:[#allocation1 + $0x687] ss:$16 sm:%s7525_s6]   ;;  %v7518_v2 = vsel %vm4109_vm2, %v7516_v31, %v7513_v5  ;;  %s7666_s8 = smov 12  ;;  %s7671_s25 = smov 48  ;;  %v11493_v31 = vunpack.i.h.bf16 %v13919_v26  ;;  %6307 = vst.msk [vmem:[#allocation0 + $0x20] sm:$0xff] %vm6283_vm9, %v11488_v36  }
 0x1e0   :  { %v7529_v24 = vld [vmem:[#allocation1 + $0x687] ss:$16 sm:%s7528_s7]   ;;  %s7676_s9 = smov 192  ;;  %s7686_s12 = smov 3  ;;  %6284 = vst.msk [vmem:[#allocation0] sm:$0xff] %vm6283_vm9, %v11487_v41   ;;  %6399 = vst.msk [vmem:[#allocation0 + $0x28] sm:$0xff] %vm6283_vm9, %v11498_v3  }
 0x1e1   :  { %v7534_v7 = vld [vmem:[#allocation1 + $0x687] ss:$16 sm:%s7533_s26]   ;;  %v7531_v14 = vsel %vm4101_vm0, %v7529_v24, %v7526_v39  ;;  %s7689_s0 = smov 12  ;;  %s7694_s6 = smov 48  ;;  %v11492_v39 = vunpack.i.l.bf16 %v13919_v26  ;;  %v11497_v26 = vunpack.i.l.bf16 %v13935_v0  ;;  %6353 = vst.msk [vmem:[#allocation0 + $0x60] sm:$0xff] %vm6283_vm9, %v11493_v31  }
 0x1e2   :  { %v7539_v19 = vld [vmem:[#allocation1 + $0x687] ss:$16 sm:%s7538_s15]   ;;  %v7536_v32 = vsel %vm4105_vm1, %v7534_v7, %v7531_v14  ;;  %s7699_s7 = smov 192  ;;  %s7709_s26 = smov 3 }
 0x1e3   :  { %v7549_v8 = vld [vmem:[#allocation1 + $0x107] ss:$16 sm:%s7548_s13]   ;;  %v7541_v45 = vsel %vm4109_vm2, %v7539_v19, %v7536_v32  ;;  %s7712_s15 = smov 12  ;;  %s7717_s13 = smov 48  ;;  %v11503_v32 = vunpack.i.h.bf16 %v13937_v1  ;;  %6330 = vst.msk [vmem:[#allocation0 + $0x40] sm:$0xff] %vm6283_vm9, %v11492_v39   ;;  %6376 = vst.msk [vmem:[#allocation0 + $0x8] sm:$0xff] %vm6283_vm9, %v11497_v26  }
 0x1e4   :  { %v7552_v49 = vld [vmem:[#allocation1 + $0x107] ss:$16 sm:%s7551_s19]   ;;  %v11619_v50 = vpack.i.bf16 %v7541_v45, %v7518_v2  ;;  %s7722_s19 = smov 192  ;;  %v11511_v45 = vpop.permute.xlu1 %11510 }
 0x1e5   :  { %v7557_v38 = vld [vmem:[#allocation1 + $0x107] ss:$16 sm:%s7556_s4]   ;;  %v7554_v52 = vsel %vm4101_vm0, %v7552_v49, %v7549_v8  ;;  %s7732_s4 = smov 3  ;;  %v11502_v49 = vunpack.i.l.bf16 %v13937_v1  ;;  %6445 = vst.msk [vmem:[#allocation0 + $0x68] sm:$0xff] %vm6283_vm9, %v11503_v32  }
 0x1e6   :  { %v7562_v16 = vld [vmem:[#allocation1 + $0x107] ss:$16 sm:%s7561_s5]   ;;  %v7559_v47 = vsel %vm4105_vm1, %v7557_v38, %v7554_v52  ;;  %11620 = vrot.lane.b32.xlu1 %v11619_v50, %s11988_s14  ;;  %v11506_v38 = vpop.permute.xlu0 %11505  ;;  %v7733_v50 = vld [vmem:[#allocation1 + $0x6] ss:$16 sm:%s7732_s4]   ;;  %s7735_s5 = smov 12  ;;  %s7900_s4 = smov 48 }
 0x1e7   :  { %v7572_v18 = vld [vmem:[#allocation1 + $0x307] ss:$16 sm:%s7571_s20]   ;;  %v7564_v4 = vsel %vm4109_vm2, %v7562_v16, %v7559_v47  ;;  %s7740_s20 = smov 48  ;;  %v11508_v47 = vunpack.i.h.bf16 %v11506_v38  ;;  %6422 = vst.msk [vmem:[#allocation0 + $0x48] sm:$0xff] %vm6283_vm9, %v11502_v49  }
 0x1e8   :  { %v7575_v48 = vld [vmem:[#allocation1 + $0x307] ss:$16 sm:%s7574_s21]   ;;  %s7745_s21 = smov 192 }
 0x1e9   :  { %v7580_v20 = vld [vmem:[#allocation1 + $0x307] ss:$16 sm:%s7579_s23]   ;;  %v7577_v35 = vsel %vm4101_vm0, %v7575_v48, %v7572_v18  ;;  %v11507_v48 = vunpack.i.l.bf16 %v11506_v38  ;;  %s7754_s23 = smov 3  ;;  %6491 = vst.msk [vmem:[#allocation0 + $0x30] sm:$0xff] %vm6283_vm9, %v11508_v47  }
 0x1ea   :  { %v7585_v61 = vld [vmem:[#allocation1 + $0x307] ss:$16 sm:%s7584_s27]   ;;  %v7582_v23 = vsel %vm4105_vm1, %v7580_v20, %v7577_v35  ;;  %v7741_v35 = vld [vmem:[#allocation1 + $0x6] ss:$16 sm:%s7740_s20]   ;;  %s7757_s27 = smov 12  ;;  %s7915_s20 = smov 3 }
 0x1eb   :  { %v7595_v22 = vld [vmem:[#allocation1 + $0x507] ss:$16 sm:%s7594_s24]   ;;  %v7587_v58 = vsel %vm4109_vm2, %v7585_v61, %v7582_v23  ;;  %v11513_v61 = vunpack.i.h.bf16 %v11511_v45  ;;  %s7762_s24 = smov 48  ;;  %6468 = vst.msk [vmem:[#allocation0 + $0x10] sm:$0xff] %vm6283_vm9, %v11507_v48  }
 0x1ec   :  { %v7598_v9 = vld [vmem:[#allocation1 + $0x507] ss:$16 sm:%s7597_s2]   ;;  %v11624_v53 = vpack.i.bf16 %v7587_v58, %v7564_v4  ;;  %v7736_v4 = vld [vmem:[#allocation1 + $0x6] ss:$16 sm:%s7735_s5]   ;;  %s7767_s2 = smov 192  ;;  %s7905_s5 = smov 192 }
 0x1ed   :  { %v7603_v57 = vld [vmem:[#allocation1 + $0x507] ss:$16 sm:%s7602_s1]   ;;  %v7600_v34 = vsel %vm4101_vm0, %v7598_v9, %v7595_v22  ;;  %v11512_v22 = vunpack.i.l.bf16 %v11511_v45  ;;  %v7738_v9 = vsel %vm4101_vm0, %v7736_v4, %v7733_v50  ;;  %6537 = vst.msk [vmem:[#allocation0 + $0x70] sm:$0xff] %vm6283_vm9, %v11513_v61   ;;  %s7777_s1 = smov 3  ;;  %v7901_v61 = vld [vmem:[#allocation1 + $0x686] ss:$16 sm:%s7900_s4]  }
 0x1ee   :  { %v7608_v42 = vld [vmem:[#allocation1 + $0x507] ss:$16 sm:%s7607_s22]   ;;  %v7605_v54 = vsel %vm4105_vm1, %v7603_v57, %v7600_v34  ;;  %11625 = vrot.lane.b32.xlu0 %v11624_v53, %s11988_s14  ;;  %v7746_v57 = vld [vmem:[#allocation1 + $0x6] ss:$16 sm:%s7745_s21]   ;;  %v7743_v34 = vsel %vm4105_vm1, %v7741_v35, %v7738_v9  ;;  %s7780_s22 = smov 12  ;;  %s7918_s21 = smov 12 }
 0x1ef   :  { %v7618_v43 = vld [vmem:[#allocation1 + $0x707] ss:$16 sm:%s7617_s17]   ;;  %v7610_v10 = vsel %vm4109_vm2, %v7608_v42, %v7605_v54  ;;  %v7755_v42 = vld [vmem:[#allocation1 + $0x206] ss:$16 sm:%s7754_s23]   ;;  %6514 = vst.msk [vmem:[#allocation0 + $0x50] sm:$0xff] %vm6283_vm9, %v11512_v22   ;;  %v7748_v53 = vsel %vm4109_vm2, %v7746_v57, %v7743_v34  ;;  %s7790_s17 = smov 192 }
 0x1f0   :  { %v7621_v40 = vld [vmem:[#allocation1 + $0x707] ss:$16 sm:%s7620_s3]   ;;  %v7778_v1 = vld [vmem:[#allocation1 + $0x406] ss:$16 sm:%s7777_s1]   ;;  %s7800_s3 = smov 3  ;;  %s7923_s23 = smov 48 }
 0x1f1   :  { %v7626_v59 = vld [vmem:[#allocation1 + $0x707] ss:$16 sm:%s7625_s30]   ;;  %v7623_v11 = vsel %vm4101_vm0, %v7621_v40, %v7618_v43  ;;  %v7758_v43 = vld [vmem:[#allocation1 + $0x206] ss:$16 sm:%s7757_s27]   ;;  %s7803_s30 = smov 12  ;;  %s7928_s27 = smov 192 }
 0x1f2   :  { %v7631_v12 = vld [vmem:[#allocation1 + $0x707] ss:$16 sm:%s7630_s29]   ;;  %v7628_v63 = vsel %vm4105_vm1, %v7626_v59, %v7623_v11  ;;  %v7760_v54 = vsel %vm4101_vm0, %v7758_v43, %v7755_v42  ;;  %v7763_v40 = vld [vmem:[#allocation1 + $0x206] ss:$16 sm:%s7762_s24]   ;;  %s7808_s29 = smov 48  ;;  %s7938_s24 = smov 3 }
 0x1f3   :  { %v7641_v17 = vld [vmem:[#allocation1 + $0x187] ss:$16 sm:%s7640_s10]   ;;  %v7633_v46 = vsel %vm4109_vm2, %v7631_v12, %v7628_v63  ;;  %v7768_v59 = vld [vmem:[#allocation1 + $0x206] ss:$16 sm:%s7767_s2]   ;;  %v7765_v0 = vsel %vm4105_vm1, %v7763_v40, %v7760_v54  ;;  %s7813_s10 = smov 192  ;;  %s7941_s2 = smov 12 }
 0x1f4   :  { %v7644_v37 = vld [vmem:[#allocation1 + $0x187] ss:$16 sm:%s7643_s18]   ;;  %v11629_v55 = vpack.i.bf16 %v7633_v46, %v7610_v10  ;;  %v7781_v10 = vld [vmem:[#allocation1 + $0x406] ss:$16 sm:%s7780_s22]   ;;  %v7770_v11 = vsel %vm4109_vm2, %v7768_v59, %v7765_v0  ;;  %s7823_s18 = smov 3  ;;  %s7946_s1 = smov 48 }
 0x1f5   :  { %v7649_v56 = vld [vmem:[#allocation1 + $0x187] ss:$16 sm:%s7648_s28]   ;;  %v7646_v51 = vsel %vm4101_vm0, %v7644_v37, %v7641_v17  ;;  %v7783_v12 = vsel %vm4101_vm0, %v7781_v10, %v7778_v1  ;;  %v7791_v63 = vld [vmem:[#allocation1 + $0x406] ss:$16 sm:%s7790_s17]   ;;  %v11644_v37 = vpack.i.bf16 %v7770_v11, %v7748_v53  ;;  %s7826_s28 = smov 12  ;;  %s7951_s22 = smov 192 }
 0x1f6   :  { %v7654_v62 = vld [vmem:[#allocation1 + $0x187] ss:$16 sm:%s7653_s11]   ;;  %v7651_v13 = vsel %vm4105_vm1, %v7649_v56, %v7646_v51  ;;  %11630 = vrot.lane.b32.xlu1 %v11629_v55, %s11988_s14  ;;  %v7801_v46 = vld [vmem:[#allocation1 + $0x606] ss:$16 sm:%s7800_s3]   ;;  %s11989_s11 = smov 48   ;;  %s7964_s17 = smov 12 }
 0x1f7   :  { %v7664_v33 = vld [vmem:[#allocation1 + $0x387] ss:$16 sm:%s7663_s16]   ;;  %v7656_v27 = vsel %vm4109_vm2, %v7654_v62, %v7651_v13  ;;  %v7804_v51 = vld [vmem:[#allocation1 + $0x606] ss:$16 sm:%s7803_s30]   ;;  %v11516_v62 = vpop.permute.xlu0 %11515  ;;  %s7831_s16 = smov 48  ;;  %s7969_s3 = smov 48 }
 0x1f8   :  { %v7667_v6 = vld [vmem:[#allocation1 + $0x387] ss:$16 sm:%s7666_s8]   ;;  %v7806_v13 = vsel %vm4101_vm0, %v7804_v51, %v7801_v46  ;;  %v7827_v36 = vld [vmem:[#allocation1 + $0x86] ss:$16 sm:%s7826_s28]   ;;  %s7836_s8 = smov 192  ;;  %s7974_s30 = smov 192 }
 0x1f9   :  { %v7672_v15 = vld [vmem:[#allocation1 + $0x387] ss:$16 sm:%s7671_s25]   ;;  %v7669_v30 = vsel %vm4101_vm0, %v7667_v6, %v7664_v33  ;;  %v11521_v33 = vpop.permute.xlu1 %11520  ;;  %v7809_v6 = vld [vmem:[#allocation1 + $0x606] ss:$16 sm:%s7808_s29]   ;;  %s7846_s25 = smov 3  ;;  %s7984_s29 = smov 3 }
 0x1fa   :  { %v7677_v28 = vld [vmem:[#allocation1 + $0x387] ss:$16 sm:%s7676_s9]   ;;  %v7674_v44 = vsel %vm4105_vm1, %v7672_v15, %v7669_v30  ;;  %v7814_v15 = vld [vmem:[#allocation1 + $0x606] ss:$16 sm:%s7813_s10]   ;;  %v11517_v30 = vunpack.i.l.bf16 %v11516_v62  ;;  %s7849_s9 = smov 12  ;;  %s7987_s10 = smov 12 }
 0x1fb   :  { %v7687_v29 = vld [vmem:[#allocation1 + $0x587] ss:$16 sm:%s7686_s12]   ;;  %v7679_v25 = vsel %vm4109_vm2, %v7677_v28, %v7674_v44  ;;  %v7811_v28 = vsel %vm4105_vm1, %v7809_v6, %v7806_v13  ;;  %v11523_v44 = vunpack.i.h.bf16 %v11521_v33  ;;  %v7832_v31 = vld [vmem:[#allocation1 + $0x86] ss:$16 sm:%s7831_s16]   ;;  %s7854_s12 = smov 48  ;;  %v14005_v48 = vpop.permute.xlu0 %11525  ;;  %s7997_s28 = smov 192 }
 0x1fc   :  { %v7690_v60 = vld [vmem:[#allocation1 + $0x587] ss:$16 sm:%s7689_s0]   ;;  %v11634_v2 = vpack.i.bf16 %v7679_v25, %v7656_v27  ;;  %v11518_v27 = vunpack.i.h.bf16 %v11516_v62  ;;  %v7837_v39 = vld [vmem:[#allocation1 + $0x86] ss:$16 sm:%s7836_s8]   ;;  %6560 = vst.msk [vmem:[#allocation0 + $0x18] sm:$0xff] %vm6283_vm9, %v11517_v30   ;;  %s7859_s0 = smov 192 }
 0x1fd   :  { %v7695_v21 = vld [vmem:[#allocation1 + $0x587] ss:$16 sm:%s7694_s6]   ;;  %v7692_v5 = vsel %vm4101_vm0, %v7690_v60, %v7687_v29  ;;  %v7824_v29 = vld [vmem:[#allocation1 + $0x86] ss:$16 sm:%s7823_s18]   ;;  %v11522_v60 = vunpack.i.l.bf16 %v11521_v33  ;;  %6629 = vst.msk [vmem:[#allocation0 + $0x78] sm:$0xff] %vm6283_vm9, %v11523_v44   ;;  %s7869_s6 = smov 3 }
 0x1fe   :  { %v7700_v24 = vld [vmem:[#allocation1 + $0x587] ss:$16 sm:%s7699_s7]   ;;  %v7697_v14 = vsel %vm4105_vm1, %v7695_v21, %v7692_v5  ;;  %11635 = vrot.lane.b32.xlu0 %v11634_v2, %s11988_s14  ;;  %v7816_v21 = vsel %vm4109_vm2, %v7814_v15, %v7811_v28  ;;  %v7829_v41 = vsel %vm4101_vm0, %v7827_v36, %v7824_v29  ;;  %6583 = vst.msk [vmem:[#allocation0 + $0x38] sm:$0xff] %vm6283_vm9, %v11518_v27   ;;  %v7855_v2 = vld [vmem:[#allocation1 + $0x286] ss:$16 sm:%s7854_s12]   ;;  %s7872_s7 = smov 12 }
 0x1ff   :  { %v7710_v7 = vld [vmem:[#allocation1 + $0x787] ss:$16 sm:%s7709_s26]   ;;  %v7702_v52 = vsel %vm4109_vm2, %v7700_v24, %v7697_v14  ;;  %v7834_v5 = vsel %vm4105_vm1, %v7832_v31, %v7829_v41  ;;  %v7847_v24 = vld [vmem:[#allocation1 + $0x286] ss:$16 sm:%s7846_s25]   ;;  %6606 = vst.msk [vmem:[#allocation0 + $0x58] sm:$0xff] %vm6283_vm9, %v11522_v60   ;;  %s7877_s26 = smov 48  ;;  %v14023_v6 = vpop.permute.xlu0 %11535 }
 0x200   :  { %v7713_v19 = vld [vmem:[#allocation1 + $0x787] ss:$16 sm:%s7712_s15]   ;;  %v7839_v3 = vsel %vm4109_vm2, %v7837_v39, %v7834_v5  ;;  %v7860_v14 = vld [vmem:[#allocation1 + $0x286] ss:$16 sm:%s7859_s0]   ;;  %s7882_s15 = smov 192  ;;  %s7992_s18 = smov 48 }
 0x201   :  { %v7718_v8 = vld [vmem:[#allocation1 + $0x787] ss:$16 sm:%s7717_s13]   ;;  %v7715_v16 = vsel %vm4101_vm0, %v7713_v19, %v7710_v7  ;;  %v7850_v7 = vld [vmem:[#allocation1 + $0x286] ss:$16 sm:%s7849_s9]   ;;  %s7892_s13 = smov 3  ;;  %s8007_s16 = smov 3 }
 0x202   :  { %v7723_v18 = vld [vmem:[#allocation1 + $0x787] ss:$16 sm:%s7722_s19]   ;;  %v7720_v20 = vsel %vm4105_vm1, %v7718_v8, %v7715_v16  ;;  %11645 = vrot.lane.b32.xlu0 %v11644_v37, %s11989_s11  ;;  %v7852_v26 = vsel %vm4101_vm0, %v7850_v7, %v7847_v24  ;;  %v7870_v8 = vld [vmem:[#allocation1 + $0x486] ss:$16 sm:%s7869_s6]   ;;  %s7895_s19 = smov 12  ;;  %s8010_s8 = smov 12 }
 0x203   :  { %v7725_v23 = vsel %vm4109_vm2, %v7723_v18, %v7720_v20  ;;  %v7857_v19 = vsel %vm4105_vm1, %v7855_v2, %v7852_v26  ;;  %v7873_v32 = vld [vmem:[#allocation1 + $0x486] ss:$16 sm:%s7872_s7]   ;;  %v14007_v20 = vpop.permute.xlu1 %11530  ;;  %s8015_s25 = smov 48  ;;  %s8020_s9 = smov 192 }
 0x204   :  { %v11639_v58 = vpack.i.bf16 %v7725_v23, %v7702_v52  ;;  %v7862_v49 = vsel %vm4109_vm2, %v7860_v14, %v7857_v19  ;;  %v7875_v38 = vsel %vm4101_vm0, %v7873_v32, %v7870_v8  ;;  %v7878_v45 = vld [vmem:[#allocation1 + $0x486] ss:$16 sm:%s7877_s26]   ;;  %s8030_s12 = smov 3  ;;  %s8033_s0 = smov 12  ;;  %v11528_v19 = vunpack.i.h.bf16 %v14005_v48 }
 0x205   :  { %v7883_v52 = vld [vmem:[#allocation1 + $0x486] ss:$16 sm:%s7882_s15]   ;;  %v11654_v16 = vpack.i.bf16 %v7862_v49, %v7839_v3  ;;  %v7880_v18 = vsel %vm4105_vm1, %v7878_v45, %v7875_v38  ;;  %s8038_s6 = smov 48  ;;  %s8043_s7 = smov 192  ;;  %v11527_v38 = vunpack.i.l.bf16 %v14005_v48  ;;  %v11533_v45 = vunpack.i.h.bf16 %v14007_v20 }
 0x206   :  { %11640 = vrot.lane.b32.xlu1 %v11639_v58, %s11988_s14  ;;  %s7785_s14 = smov 48  ;;  %v7893_v50 = vld [vmem:[#allocation1 + $0x686] ss:$16 sm:%s7892_s13]   ;;  %v7885_v4 = vsel %vm4109_vm2, %v7883_v52, %v7880_v18  ;;  %s8053_s26 = smov 3  ;;  %v11532_v52 = vunpack.i.l.bf16 %v14007_v20  ;;  %v11538_v48 = vunpack.i.h.bf16 %v14023_v6  ;;  %v11537_v20 = vunpack.i.l.bf16 %v14023_v6  ;;  %6674 = vst.msk [vmem:[#allocation0 + $0x20] sm:$0xff] %vm6650_vm10, %v11528_v19  }
 0x207   :  { %v7786_v17 = vld [vmem:[#allocation1 + $0x406] ss:$16 sm:%s7785_s14]   ;;  %11655 = vrot.lane.b32.xlu0 %v11654_v16, %s11989_s11  ;;  %s7961_s14 = smov 3  ;;  %v14025_v15 = vpop.permute.xlu1 %11540  ;;  %s8056_s15 = smov 12  ;;  %6651 = vst.msk [vmem:[#allocation0] sm:$0xff] %vm6650_vm10, %v11527_v38   ;;  %6720 = vst.msk [vmem:[#allocation0 + $0x60] sm:$0xff] %vm6650_vm10, %v11533_v45  }
 0x208   :  { %v7788_v56 = vsel %vm4105_vm1, %v7786_v17, %v7783_v12  ;;  %v7896_v47 = vld [vmem:[#allocation1 + $0x686] ss:$16 sm:%s7895_s19]   ;;  %s8061_s13 = smov 48  ;;  %s8066_s19 = smov 192  ;;  %6697 = vst.msk [vmem:[#allocation0 + $0x40] sm:$0xff] %vm6650_vm10, %v11532_v52   ;;  %6743 = vst.msk [vmem:[#allocation0 + $0x8] sm:$0xff] %vm6650_vm10, %v11537_v20  }
 0x209   :  { %v7793_v55 = vsel %vm4109_vm2, %v7791_v63, %v7788_v56  ;;  %v7898_v35 = vsel %vm4101_vm0, %v7896_v47, %v7893_v50  ;;  %v7906_v22 = vld [vmem:[#allocation1 + $0x686] ss:$16 sm:%s7905_s5]   ;;  %s8076_s4 = smov 3  ;;  %s8079_s5 = smov 12  ;;  %6766 = vst.msk [vmem:[#allocation0 + $0x28] sm:$0xff] %vm6650_vm10, %v11538_v48  }
 0x20a   :  { %v11649_v25 = vpack.i.bf16 %v7816_v21, %v7793_v55  ;;  %v7903_v23 = vsel %vm4105_vm1, %v7901_v61, %v7898_v35  ;;  %v7916_v9 = vld [vmem:[#allocation1 + $0x106] ss:$16 sm:%s7915_s20]   ;;  %s8084_s20 = smov 48 }
 0x20b   :  { %v7919_v57 = vld [vmem:[#allocation1 + $0x106] ss:$16 sm:%s7918_s21]   ;;  %v7908_v58 = vsel %vm4109_vm2, %v7906_v22, %v7903_v23  ;;  %s8089_s21 = smov 192  ;;  %v11543_v23 = vunpack.i.h.bf16 %v14025_v15 }
 0x20c   :  { %11650 = vrot.lane.b32.xlu1 %v11649_v25, %s11989_s11  ;;  %v7921_v34 = vsel %vm4101_vm0, %v7919_v57, %v7916_v9  ;;  %v7924_v42 = vld [vmem:[#allocation1 + $0x106] ss:$16 sm:%s7923_s23]   ;;  %v11659_v53 = vpack.i.bf16 %v7908_v58, %v7885_v4  ;;  %v11542_v9 = vunpack.i.l.bf16 %v14025_v15  ;;  %v11546_v57 = vpop.permute.xlu0 %11545  ;;  %v11551_v58 = vpop.permute.xlu1 %11550  ;;  %s8099_s23 = smov 3 }
 0x20d   :  { %v7929_v43 = vld [vmem:[#allocation1 + $0x106] ss:$16 sm:%s7928_s27]   ;;  %v7926_v54 = vsel %vm4105_vm1, %v7924_v42, %v7921_v34  ;;  %s8102_s27 = smov 12  ;;  %6812 = vst.msk [vmem:[#allocation0 + $0x68] sm:$0xff] %vm6650_vm10, %v11543_v23  }
 0x20e   :  { %v7939_v40 = vld [vmem:[#allocation1 + $0x306] ss:$16 sm:%s7938_s24]   ;;  %v7931_v0 = vsel %vm4109_vm2, %v7929_v43, %v7926_v54  ;;  %v11548_v54 = vunpack.i.h.bf16 %v11546_v57  ;;  %s8107_s24 = smov 48  ;;  %6789 = vst.msk [vmem:[#allocation0 + $0x48] sm:$0xff] %vm6650_vm10, %v11542_v9  }
 0x20f   :  { %v7942_v59 = vld [vmem:[#allocation1 + $0x306] ss:$16 sm:%s7941_s2]   ;;  %s8112_s2 = smov 192 }
 0x210   :  { %v7944_v1 = vsel %vm4101_vm0, %v7942_v59, %v7939_v40  ;;  %v7947_v10 = vld [vmem:[#allocation1 + $0x306] ss:$16 sm:%s7946_s1]   ;;  %11660 = vrot.lane.b32.xlu1 %v11659_v53, %s11989_s11  ;;  %v11547_v40 = vunpack.i.l.bf16 %v11546_v57  ;;  %s8121_s1 = smov 3  ;;  %6858 = vst.msk [vmem:[#allocation0 + $0x30] sm:$0xff] %vm6650_vm10, %v11548_v54  }
 0x211   :  { %v7952_v11 = vld [vmem:[#allocation1 + $0x306] ss:$16 sm:%s7951_s22]   ;;  %v7949_v12 = vsel %vm4105_vm1, %v7947_v10, %v7944_v1  ;;  %v8103_v1 = vld [vmem:[#allocation1 + $0x5] ss:$16 sm:%s8102_s27]   ;;  %v11553_v10 = vunpack.i.h.bf16 %v11551_v58  ;;  %s8124_s22 = smov 12  ;;  %s8272_s27 = smov 192 }
 0x212   :  { %v7962_v17 = vld [vmem:[#allocation1 + $0x506] ss:$16 sm:%s7961_s14]   ;;  %v7954_v37 = vsel %vm4109_vm2, %v7952_v11, %v7949_v12  ;;  %v11552_v11 = vunpack.i.l.bf16 %v11551_v58  ;;  %s8129_s14 = smov 48  ;;  %6835 = vst.msk [vmem:[#allocation0 + $0x10] sm:$0xff] %vm6650_vm10, %v11547_v40  }
 0x213   :  { %v7965_v63 = vld [vmem:[#allocation1 + $0x506] ss:$16 sm:%s7964_s17]   ;;  %v11664_v62 = vpack.i.bf16 %v7954_v37, %v7931_v0  ;;  %v8100_v0 = vld [vmem:[#allocation1 + $0x5] ss:$16 sm:%s8099_s23]   ;;  %s8134_s17 = smov 192  ;;  %6904 = vst.msk [vmem:[#allocation0 + $0x70] sm:$0xff] %vm6650_vm10, %v11553_v10  }
 0x214   :  { %v7967_v56 = vsel %vm4101_vm0, %v7965_v63, %v7962_v17  ;;  %v7970_v46 = vld [vmem:[#allocation1 + $0x506] ss:$16 sm:%s7969_s3]   ;;  %v8105_v17 = vsel %vm4101_vm0, %v8103_v1, %v8100_v0  ;;  %v8108_v63 = vld [vmem:[#allocation1 + $0x5] ss:$16 sm:%s8107_s24]   ;;  %s8144_s3 = smov 3  ;;  %6881 = vst.msk [vmem:[#allocation0 + $0x50] sm:$0xff] %vm6650_vm10, %v11552_v11  }
 0x215   :  { %v7975_v51 = vld [vmem:[#allocation1 + $0x506] ss:$16 sm:%s7974_s30]   ;;  %v7972_v33 = vsel %vm4105_vm1, %v7970_v46, %v7967_v56  ;;  %11665 = vrot.lane.b32.xlu0 %v11664_v62, %s11989_s11  ;;  %v8113_v37 = vld [vmem:[#allocation1 + $0x5] ss:$16 sm:%s8112_s2]   ;;  %v8110_v46 = vsel %vm4105_vm1, %v8108_v63, %v8105_v17  ;;  %s8152_s30 = smov 48  ;;  %s8267_s23 = smov 48 }
 0x216   :  { %v7985_v55 = vld [vmem:[#allocation1 + $0x706] ss:$16 sm:%s7984_s29]   ;;  %v7977_v27 = vsel %vm4109_vm2, %v7975_v51, %v7972_v33  ;;  %v8122_v51 = vld [vmem:[#allocation1 + $0x205] ss:$16 sm:%s8121_s1]   ;;  %s8157_s29 = smov 192  ;;  %s8282_s24 = smov 3 }
 0x217   :  { %v7988_v13 = vld [vmem:[#allocation1 + $0x706] ss:$16 sm:%s7987_s10]   ;;  %v8125_v62 = vld [vmem:[#allocation1 + $0x205] ss:$16 sm:%s8124_s22]   ;;  %s8167_s10 = smov 3  ;;  %s8285_s2 = smov 12 }
 0x218   :  { %v7990_v30 = vsel %vm4101_vm0, %v7988_v13, %v7985_v55  ;;  %v7993_v28 = vld [vmem:[#allocation1 + $0x706] ss:$16 sm:%s7992_s18]   ;;  %v8130_v33 = vld [vmem:[#allocation1 + $0x205] ss:$16 sm:%s8129_s14]   ;;  %v8115_v55 = vsel %vm4109_vm2, %v8113_v37, %v8110_v46  ;;  %v8127_v13 = vsel %vm4101_vm0, %v8125_v62, %v8122_v51  ;;  %s8170_s18 = smov 12  ;;  %s8290_s1 = smov 48 }
 0x219   :  { %v7998_v29 = vld [vmem:[#allocation1 + $0x706] ss:$16 sm:%s7997_s28]   ;;  %v7995_v36 = vsel %vm4105_vm1, %v7993_v28, %v7990_v30  ;;  %v8135_v6 = vld [vmem:[#allocation1 + $0x205] ss:$16 sm:%s8134_s17]   ;;  %s8175_s28 = smov 48  ;;  %s8295_s22 = smov 192 }
 0x21a   :  { %v8008_v44 = vld [vmem:[#allocation1 + $0x186] ss:$16 sm:%s8007_s16]   ;;  %v8000_v21 = vsel %vm4109_vm2, %v7998_v29, %v7995_v36  ;;  %v8145_v15 = vld [vmem:[#allocation1 + $0x405] ss:$16 sm:%s8144_s3]   ;;  %s8180_s16 = smov 192  ;;  %s8305_s14 = smov 3 }
 0x21b   :  { %v8011_v60 = vld [vmem:[#allocation1 + $0x186] ss:$16 sm:%s8010_s8]   ;;  %v11669_v25 = vpack.i.bf16 %v8000_v21, %v7977_v27  ;;  %v8132_v27 = vsel %vm4105_vm1, %v8130_v33, %v8127_v13  ;;  %v8153_v28 = vld [vmem:[#allocation1 + $0x405] ss:$16 sm:%s8152_s30]   ;;  %v11556_v21 = vpop.permute.xlu0 %11555  ;;  %s8190_s8 = smov 3  ;;  %s8308_s17 = smov 12 }
 0x21c   :  { %v8013_v41 = vsel %vm4101_vm0, %v8011_v60, %v8008_v44  ;;  %v8016_v31 = vld [vmem:[#allocation1 + $0x186] ss:$16 sm:%s8015_s25]   ;;  %v8137_v29 = vsel %vm4109_vm2, %v8135_v6, %v8132_v27  ;;  %v8158_v44 = vld [vmem:[#allocation1 + $0x405] ss:$16 sm:%s8157_s29]   ;;  %s8193_s25 = smov 12  ;;  %s8313_s3 = smov 48 }
 0x21d   :  { %v8021_v39 = vld [vmem:[#allocation1 + $0x186] ss:$16 sm:%s8020_s9]   ;;  %v8018_v5 = vsel %vm4105_vm1, %v8016_v31, %v8013_v41  ;;  %11670 = vrot.lane.b32.xlu1 %v11669_v25, %s11989_s11  ;;  %v8168_v60 = vld [vmem:[#allocation1 + $0x605] ss:$16 sm:%s8167_s10]   ;;  %v11561_v41 = vpop.permute.xlu1 %11560  ;;  %v11684_v31 = vpack.i.bf16 %v8137_v29, %v8115_v55  ;;  %s8198_s9 = smov 48  ;;  %s8328_s30 = smov 3 }
 0x21e   :  { %v8031_v24 = vld [vmem:[#allocation1 + $0x386] ss:$16 sm:%s8030_s12]   ;;  %v8023_v3 = vsel %vm4109_vm2, %v8021_v39, %v8018_v5  ;;  %v8171_v25 = vld [vmem:[#allocation1 + $0x605] ss:$16 sm:%s8170_s18]   ;;  %v11563_v19 = vunpack.i.h.bf16 %v11561_v41  ;;  %s11990_s12 = smov 40   ;;  %s8331_s29 = smov 12 }
 0x21f   :  { %v8034_v7 = vld [vmem:[#allocation1 + $0x386] ss:$16 sm:%s8033_s0]   ;;  %v8176_v5 = vld [vmem:[#allocation1 + $0x605] ss:$16 sm:%s8175_s28]   ;;  %s8203_s0 = smov 192  ;;  %v14093_v0 = vpop.permute.xlu0 %11565  ;;  %s8336_s10 = smov 48 }
 0x220   :  { %v8036_v26 = vsel %vm4101_vm0, %v8034_v7, %v8031_v24  ;;  %v8039_v2 = vld [vmem:[#allocation1 + $0x386] ss:$16 sm:%s8038_s6]   ;;  %v11558_v24 = vunpack.i.h.bf16 %v11556_v21  ;;  %v11557_v7 = vunpack.i.l.bf16 %v11556_v21  ;;  %v8199_v38 = vld [vmem:[#allocation1 + $0x85] ss:$16 sm:%s8198_s9]   ;;  %s8213_s6 = smov 3  ;;  %6996 = vst.msk [vmem:[#allocation0 + $0x78] sm:$0xff] %vm6650_vm10, %v11563_v19  }
 0x221   :  { %v8044_v14 = vld [vmem:[#allocation1 + $0x386] ss:$16 sm:%s8043_s7]   ;;  %v8041_v8 = vsel %vm4105_vm1, %v8039_v2, %v8036_v26  ;;  %v8173_v26 = vsel %vm4101_vm0, %v8171_v25, %v8168_v60  ;;  %v8181_v2 = vld [vmem:[#allocation1 + $0x605] ss:$16 sm:%s8180_s16]   ;;  %s8216_s7 = smov 12  ;;  %v14095_v1 = vpop.permute.xlu1 %11570  ;;  %s8341_s18 = smov 192 }
 0x222   :  { %v8054_v32 = vld [vmem:[#allocation1 + $0x586] ss:$16 sm:%s8053_s26]   ;;  %v8046_v16 = vsel %vm4109_vm2, %v8044_v14, %v8041_v8  ;;  %v8191_v14 = vld [vmem:[#allocation1 + $0x85] ss:$16 sm:%s8190_s8]   ;;  %v11562_v8 = vunpack.i.l.bf16 %v11561_v41  ;;  %6927 = vst.msk [vmem:[#allocation0 + $0x18] sm:$0xff] %vm6650_vm10, %v11557_v7   ;;  %6950 = vst.msk [vmem:[#allocation0 + $0x38] sm:$0xff] %vm6650_vm10, %v11558_v24  }
 0x223   :  { %v8057_v49 = vld [vmem:[#allocation1 + $0x586] ss:$16 sm:%s8056_s15]   ;;  %v11674_v4 = vpack.i.bf16 %v8046_v16, %v8023_v3  ;;  %v8204_v16 = vld [vmem:[#allocation1 + $0x85] ss:$16 sm:%s8203_s0]   ;;  %s8221_s26 = smov 48  ;;  %s8226_s15 = smov 192 }
 0x224   :  { %v8059_v18 = vsel %vm4101_vm0, %v8057_v49, %v8054_v32  ;;  %v8062_v50 = vld [vmem:[#allocation1 + $0x586] ss:$16 sm:%s8061_s13]   ;;  %v8178_v32 = vsel %vm4105_vm1, %v8176_v5, %v8173_v26  ;;  %v8194_v49 = vld [vmem:[#allocation1 + $0x85] ss:$16 sm:%s8193_s25]   ;;  %6973 = vst.msk [vmem:[#allocation0 + $0x58] sm:$0xff] %vm6650_vm10, %v11562_v8   ;;  %s8236_s13 = smov 3 }
 0x225   :  { %v8067_v47 = vld [vmem:[#allocation1 + $0x586] ss:$16 sm:%s8066_s19]   ;;  %v8064_v35 = vsel %vm4105_vm1, %v8062_v50, %v8059_v18  ;;  %11675 = vrot.lane.b32.xlu0 %v11674_v4, %s11989_s11  ;;  %v8183_v45 = vsel %vm4109_vm2, %v8181_v2, %v8178_v32  ;;  %v8196_v52 = vsel %vm4101_vm0, %v8194_v49, %v8191_v14  ;;  %v8214_v18 = vld [vmem:[#allocation1 + $0x285] ss:$16 sm:%s8213_s6]   ;;  %s8239_s19 = smov 12  ;;  %s8351_s28 = smov 3  ;;  %v14113_v26 = vpop.permute.xlu1 %11580 }
 0x226   :  { %v8077_v61 = vld [vmem:[#allocation1 + $0x786] ss:$16 sm:%s8076_s4]   ;;  %v8069_v34 = vsel %vm4109_vm2, %v8067_v47, %v8064_v35  ;;  %v8201_v47 = vsel %vm4105_vm1, %v8199_v38, %v8196_v52  ;;  %v8217_v48 = vld [vmem:[#allocation1 + $0x285] ss:$16 sm:%s8216_s7]   ;;  %s8244_s4 = smov 48  ;;  %s8354_s16 = smov 12 }
 0x227   :  { %v8080_v22 = vld [vmem:[#allocation1 + $0x786] ss:$16 sm:%s8079_s5]   ;;  %v8222_v20 = vld [vmem:[#allocation1 + $0x285] ss:$16 sm:%s8221_s26]   ;;  %v8206_v4 = vsel %vm4109_vm2, %v8204_v16, %v8201_v47  ;;  %v8219_v35 = vsel %vm4101_vm0, %v8217_v48, %v8214_v18  ;;  %s8249_s5 = smov 192  ;;  %s8359_s8 = smov 48 }
 0x228   :  { %v8082_v42 = vsel %vm4101_vm0, %v8080_v22, %v8077_v61  ;;  %v8085_v43 = vld [vmem:[#allocation1 + $0x786] ss:$16 sm:%s8084_s20]   ;;  %v8227_v61 = vld [vmem:[#allocation1 + $0x285] ss:$16 sm:%s8226_s15]   ;;  %v8224_v23 = vsel %vm4105_vm1, %v8222_v20, %v8219_v35  ;;  %s8259_s20 = smov 3  ;;  %s8364_s25 = smov 192 }
 0x229   :  { %v8090_v53 = vld [vmem:[#allocation1 + $0x786] ss:$16 sm:%s8089_s21]   ;;  %v8087_v59 = vsel %vm4105_vm1, %v8085_v43, %v8082_v42  ;;  %11685 = vrot.lane.b32.xlu0 %v11684_v31, %s11990_s12  ;;  %v8237_v22 = vld [vmem:[#allocation1 + $0x485] ss:$16 sm:%s8236_s13]   ;;  %v8229_v58 = vsel %vm4109_vm2, %v8227_v61, %v8224_v23  ;;  %s8262_s21 = smov 12  ;;  %s8374_s9 = smov 3  ;;  %v11568_v23 = vunpack.i.h.bf16 %v14093_v0 }
 0x22a   :  { %v8092_v12 = vsel %vm4109_vm2, %v8090_v53, %v8087_v59  ;;  %v8240_v9 = vld [vmem:[#allocation1 + $0x485] ss:$16 sm:%s8239_s19]   ;;  %v11694_v53 = vpack.i.bf16 %v8229_v58, %v8206_v4  ;;  %s8377_s0 = smov 12  ;;  %s8382_s6 = smov 48 }
 0x22b   :  { %v11679_v56 = vpack.i.bf16 %v8092_v12, %v8069_v34  ;;  %v8245_v57 = vld [vmem:[#allocation1 + $0x485] ss:$16 sm:%s8244_s4]   ;;  %v8242_v34 = vsel %vm4101_vm0, %v8240_v9, %v8237_v22  ;;  %s8387_s7 = smov 192  ;;  %s8397_s26 = smov 3  ;;  %7041 = vst.msk [vmem:[#allocation0 + $0x20] sm:$0xff] %vm7017_vm11, %v11568_v23  }
 0x22c   :  { %v8250_v42 = vld [vmem:[#allocation1 + $0x485] ss:$16 sm:%s8249_s5]   ;;  %v8247_v54 = vsel %vm4105_vm1, %v8245_v57, %v8242_v34  ;;  %s8400_s15 = smov 12  ;;  %s8405_s13 = smov 48  ;;  %v11567_v34 = vunpack.i.l.bf16 %v14093_v0 }
 0x22d   :  { %11680 = vrot.lane.b32.xlu1 %v11679_v56, %s11989_s11  ;;  %s8147_s11 = smov 12  ;;  %v8260_v43 = vld [vmem:[#allocation1 + $0x685] ss:$16 sm:%s8259_s20]   ;;  %v8252_v10 = vsel %vm4109_vm2, %v8250_v42, %v8247_v54  ;;  %11695 = vrot.lane.b32.xlu0 %v11694_v53, %s11990_s12  ;;  %s8410_s19 = smov 192  ;;  %v11573_v42 = vunpack.i.h.bf16 %v14095_v1 }
 0x22e   :  { %v8148_v30 = vld [vmem:[#allocation1 + $0x405] ss:$16 sm:%s8147_s11]   ;;  %s8318_s11 = smov 192  ;;  %s8420_s4 = smov 3  ;;  %7018 = vst.msk [vmem:[#allocation0] sm:$0xff] %vm7017_vm11, %v11567_v34  }
 0x22f   :  { %v8150_v36 = vsel %vm4101_vm0, %v8148_v30, %v8145_v15  ;;  %v8263_v40 = vld [vmem:[#allocation1 + $0x685] ss:$16 sm:%s8262_s21]   ;;  %s8423_s5 = smov 12  ;;  %s8428_s20 = smov 48  ;;  %7087 = vst.msk [vmem:[#allocation0 + $0x60] sm:$0xff] %vm7017_vm11, %v11573_v42  }
 0x230   :  { %v8155_v39 = vsel %vm4105_vm1, %v8153_v28, %v8150_v36  ;;  %v8268_v59 = vld [vmem:[#allocation1 + $0x685] ss:$16 sm:%s8267_s23]   ;;  %v8265_v11 = vsel %vm4101_vm0, %v8263_v40, %v8260_v43  ;;  %s8433_s21 = smov 192  ;;  %s8443_s23 = smov 3  ;;  %v11572_v43 = vunpack.i.l.bf16 %v14095_v1 }
 0x231   :  { %v8160_v3 = vsel %vm4109_vm2, %v8158_v44, %v8155_v39  ;;  %v8273_v12 = vld [vmem:[#allocation1 + $0x685] ss:$16 sm:%s8272_s27]   ;;  %v8270_v63 = vsel %vm4105_vm1, %v8268_v59, %v8265_v11  ;;  %s8446_s27 = smov 12 }
 0x232   :  { %v11689_v50 = vpack.i.bf16 %v8183_v45, %v8160_v3  ;;  %v8283_v17 = vld [vmem:[#allocation1 + $0x105] ss:$16 sm:%s8282_s24]   ;;  %v8275_v46 = vsel %vm4109_vm2, %v8273_v12, %v8270_v63  ;;  %v14111_v3 = vpop.permute.xlu0 %11575  ;;  %s8451_s24 = smov 48  ;;  %v11583_v63 = vunpack.i.h.bf16 %v14113_v26  ;;  %7064 = vst.msk [vmem:[#allocation0 + $0x40] sm:$0xff] %vm7017_vm11, %v11572_v43  }
 0x233   :  { %v8286_v37 = vld [vmem:[#allocation1 + $0x105] ss:$16 sm:%s8285_s2]   ;;  %v11699_v55 = vpack.i.bf16 %v8275_v46, %v8252_v10  ;;  %v11578_v0 = vunpack.i.h.bf16 %v14111_v3  ;;  %v11577_v1 = vunpack.i.l.bf16 %v14111_v3  ;;  %s8456_s2 = smov 192  ;;  %v11591_v46 = vpop.permute.xlu1 %11590 }
 0x234   :  { %11690 = vrot.lane.b32.xlu1 %v11689_v50, %s11990_s12  ;;  %v8291_v56 = vld [vmem:[#allocation1 + $0x105] ss:$16 sm:%s8290_s1]   ;;  %v8288_v51 = vsel %vm4101_vm0, %v8286_v37, %v8283_v17  ;;  %s8466_s1 = smov 3  ;;  %v11582_v37 = vunpack.i.l.bf16 %v14113_v26  ;;  %7179 = vst.msk [vmem:[#allocation0 + $0x68] sm:$0xff] %vm7017_vm11, %v11583_v63  }
 0x235   :  { %v8296_v62 = vld [vmem:[#allocation1 + $0x105] ss:$16 sm:%s8295_s22]   ;;  %v8293_v13 = vsel %vm4105_vm1, %v8291_v56, %v8288_v51  ;;  %s8469_s22 = smov 12  ;;  %7110 = vst.msk [vmem:[#allocation0 + $0x8] sm:$0xff] %vm7017_vm11, %v11577_v1   ;;  %7133 = vst.msk [vmem:[#allocation0 + $0x28] sm:$0xff] %vm7017_vm11, %v11578_v0  }
 0x236   :  { %v8306_v33 = vld [vmem:[#allocation1 + $0x305] ss:$16 sm:%s8305_s14]   ;;  %v8298_v27 = vsel %vm4109_vm2, %v8296_v62, %v8293_v13  ;;  %v11586_v56 = vpop.permute.xlu0 %11585  ;;  %s8474_s14 = smov 48  ;;  %7156 = vst.msk [vmem:[#allocation0 + $0x48] sm:$0xff] %vm7017_vm11, %v11582_v37  }
 0x237   :  { %v8309_v6 = vld [vmem:[#allocation1 + $0x305] ss:$16 sm:%s8308_s17]   ;;  %v11588_v13 = vunpack.i.h.bf16 %v11586_v56  ;;  %s8479_s17 = smov 192 }
 0x238   :  { %v8314_v15 = vld [vmem:[#allocation1 + $0x305] ss:$16 sm:%s8313_s3]   ;;  %v8311_v30 = vsel %vm4101_vm0, %v8309_v6, %v8306_v33  ;;  %11700 = vrot.lane.b32.xlu1 %v11699_v55, %s11990_s12  ;;  %v8467_v55 = vld [vmem:[#allocation1 + $0x4] ss:$16 sm:%s8466_s1]   ;;  %v11587_v6 = vunpack.i.l.bf16 %v11586_v56  ;;  %s8488_s3 = smov 3  ;;  %s8634_s1 = smov 48 }
 0x239   :  { %v8319_v28 = vld [vmem:[#allocation1 + $0x305] ss:$16 sm:%s8318_s11]   ;;  %v8316_v36 = vsel %vm4105_vm1, %v8314_v15, %v8311_v30  ;;  %v8475_v30 = vld [vmem:[#allocation1 + $0x4] ss:$16 sm:%s8474_s14]   ;;  %s8491_s11 = smov 12  ;;  %7225 = vst.msk [vmem:[#allocation0 + $0x30] sm:$0xff] %vm7017_vm11, %v11588_v13  }
 0x23a   :  { %v8329_v29 = vld [vmem:[#allocation1 + $0x505] ss:$16 sm:%s8328_s30]   ;;  %v8321_v21 = vsel %vm4109_vm2, %v8319_v28, %v8316_v36  ;;  %v11593_v28 = vunpack.i.h.bf16 %v11591_v46  ;;  %s8496_s30 = smov 48  ;;  %7202 = vst.msk [vmem:[#allocation0 + $0x10] sm:$0xff] %vm7017_vm11, %v11587_v6   ;;  %s8649_s14 = smov 3 }
 0x23b   :  { %v8332_v44 = vld [vmem:[#allocation1 + $0x505] ss:$16 sm:%s8331_s29]   ;;  %v11704_v25 = vpack.i.bf16 %v8321_v21, %v8298_v27  ;;  %v8470_v27 = vld [vmem:[#allocation1 + $0x4] ss:$16 sm:%s8469_s22]   ;;  %s8501_s29 = smov 192  ;;  %s8639_s22 = smov 192 }
 0x23c   :  { %v8337_v60 = vld [vmem:[#allocation1 + $0x505] ss:$16 sm:%s8336_s10]   ;;  %v8334_v41 = vsel %vm4101_vm0, %v8332_v44, %v8329_v29  ;;  %v11592_v29 = vunpack.i.l.bf16 %v11591_v46  ;;  %v8472_v44 = vsel %vm4101_vm0, %v8470_v27, %v8467_v55  ;;  %7271 = vst.msk [vmem:[#allocation0 + $0x70] sm:$0xff] %vm7017_vm11, %v11593_v28   ;;  %s8511_s10 = smov 3  ;;  %v8635_v27 = vld [vmem:[#allocation1 + $0x684] ss:$16 sm:%s8634_s1]  }
 0x23d   :  { %v8342_v31 = vld [vmem:[#allocation1 + $0x505] ss:$16 sm:%s8341_s18]   ;;  %v8339_v5 = vsel %vm4105_vm1, %v8337_v60, %v8334_v41  ;;  %11705 = vrot.lane.b32.xlu0 %v11704_v25, %s11990_s12  ;;  %v8480_v60 = vld [vmem:[#allocation1 + $0x4] ss:$16 sm:%s8479_s17]   ;;  %v8477_v41 = vsel %vm4105_vm1, %v8475_v30, %v8472_v44  ;;  %s8514_s18 = smov 12  ;;  %s8652_s17 = smov 12 }
 0x23e   :  { %v8352_v39 = vld [vmem:[#allocation1 + $0x705] ss:$16 sm:%s8351_s28]   ;;  %v8344_v2 = vsel %vm4109_vm2, %v8342_v31, %v8339_v5  ;;  %v8489_v31 = vld [vmem:[#allocation1 + $0x204] ss:$16 sm:%s8488_s3]   ;;  %7248 = vst.msk [vmem:[#allocation0 + $0x50] sm:$0xff] %vm7017_vm11, %v11592_v29   ;;  %v8482_v25 = vsel %vm4109_vm2, %v8480_v60, %v8477_v41  ;;  %s8524_s28 = smov 192 }
 0x23f   :  { %v8355_v24 = vld [vmem:[#allocation1 + $0x705] ss:$16 sm:%s8354_s16]   ;;  %v8512_v26 = vld [vmem:[#allocation1 + $0x404] ss:$16 sm:%s8511_s10]   ;;  %s8534_s16 = smov 3  ;;  %s8657_s3 = smov 48 }
 0x240   :  { %v8360_v7 = vld [vmem:[#allocation1 + $0x705] ss:$16 sm:%s8359_s8]   ;;  %v8357_v14 = vsel %vm4101_vm0, %v8355_v24, %v8352_v39  ;;  %v8492_v39 = vld [vmem:[#allocation1 + $0x204] ss:$16 sm:%s8491_s11]   ;;  %s8537_s8 = smov 12  ;;  %s8662_s11 = smov 192 }
 0x241   :  { %v8365_v19 = vld [vmem:[#allocation1 + $0x705] ss:$16 sm:%s8364_s25]   ;;  %v8362_v32 = vsel %vm4105_vm1, %v8360_v7, %v8357_v14  ;;  %v8494_v5 = vsel %vm4101_vm0, %v8492_v39, %v8489_v31  ;;  %v8497_v24 = vld [vmem:[#allocation1 + $0x204] ss:$16 sm:%s8496_s30]   ;;  %s8542_s25 = smov 48  ;;  %s8672_s30 = smov 3 }
 0x242   :  { %v8375_v8 = vld [vmem:[#allocation1 + $0x185] ss:$16 sm:%s8374_s9]   ;;  %v8367_v45 = vsel %vm4109_vm2, %v8365_v19, %v8362_v32  ;;  %v8502_v7 = vld [vmem:[#allocation1 + $0x204] ss:$16 sm:%s8501_s29]   ;;  %v8499_v3 = vsel %vm4105_vm1, %v8497_v24, %v8494_v5  ;;  %s8547_s9 = smov 192  ;;  %s8675_s29 = smov 12 }
 0x243   :  { %v8378_v49 = vld [vmem:[#allocation1 + $0x185] ss:$16 sm:%s8377_s0]   ;;  %v11709_v50 = vpack.i.bf16 %v8367_v45, %v8344_v2  ;;  %v8515_v2 = vld [vmem:[#allocation1 + $0x404] ss:$16 sm:%s8514_s18]   ;;  %v8504_v14 = vsel %vm4109_vm2, %v8502_v7, %v8499_v3  ;;  %s8557_s0 = smov 3  ;;  %s8680_s10 = smov 48 }
 0x244   :  { %v8383_v38 = vld [vmem:[#allocation1 + $0x185] ss:$16 sm:%s8382_s6]   ;;  %v8380_v52 = vsel %vm4101_vm0, %v8378_v49, %v8375_v8  ;;  %v8517_v19 = vsel %vm4101_vm0, %v8515_v2, %v8512_v26  ;;  %v8525_v32 = vld [vmem:[#allocation1 + $0x404] ss:$16 sm:%s8524_s28]   ;;  %v11724_v49 = vpack.i.bf16 %v8504_v14, %v8482_v25  ;;  %s8560_s6 = smov 12  ;;  %s8685_s18 = smov 192 }
 0x245   :  { %v8388_v16 = vld [vmem:[#allocation1 + $0x185] ss:$16 sm:%s8387_s7]   ;;  %v8385_v47 = vsel %vm4105_vm1, %v8383_v38, %v8380_v52  ;;  %11710 = vrot.lane.b32.xlu1 %v11709_v50, %s11990_s12  ;;  %v8535_v45 = vld [vmem:[#allocation1 + $0x604] ss:$16 sm:%s8534_s16]   ;;  %s11991_s7 = smov 32   ;;  %s8698_s28 = smov 12 }
 0x246   :  { %v8398_v18 = vld [vmem:[#allocation1 + $0x385] ss:$16 sm:%s8397_s26]   ;;  %v8390_v4 = vsel %vm4109_vm2, %v8388_v16, %v8385_v47  ;;  %v8538_v52 = vld [vmem:[#allocation1 + $0x604] ss:$16 sm:%s8537_s8]   ;;  %s8565_s26 = smov 48  ;;  %s8703_s16 = smov 48 }
 0x247   :  { %v8401_v48 = vld [vmem:[#allocation1 + $0x385] ss:$16 sm:%s8400_s15]   ;;  %v8543_v50 = vld [vmem:[#allocation1 + $0x604] ss:$16 sm:%s8542_s25]   ;;  %s8570_s15 = smov 192  ;;  %s8708_s8 = smov 192 }
 0x248   :  { %v8406_v20 = vld [vmem:[#allocation1 + $0x385] ss:$16 sm:%s8405_s13]   ;;  %v8403_v35 = vsel %vm4101_vm0, %v8401_v48, %v8398_v18  ;;  %v8540_v18 = vsel %vm4101_vm0, %v8538_v52, %v8535_v45  ;;  %v8548_v47 = vld [vmem:[#allocation1 + $0x604] ss:$16 sm:%s8547_s9]   ;;  %s8580_s13 = smov 3  ;;  %s8718_s25 = smov 3 }
 0x249   :  { %v8411_v61 = vld [vmem:[#allocation1 + $0x385] ss:$16 sm:%s8410_s19]   ;;  %v8408_v9 = vsel %vm4105_vm1, %v8406_v20, %v8403_v35  ;;  %v8545_v48 = vsel %vm4105_vm1, %v8543_v50, %v8540_v18  ;;  %v8558_v20 = vld [vmem:[#allocation1 + $0x84] ss:$16 sm:%s8557_s0]   ;;  %v11596_v35 = vpop.permute.xlu0 %11595  ;;  %s8583_s19 = smov 12  ;;  %s8721_s9 = smov 12 }
 0x24a   :  { %v8421_v22 = vld [vmem:[#allocation1 + $0x585] ss:$16 sm:%s8420_s4]   ;;  %v8413_v53 = vsel %vm4109_vm2, %v8411_v61, %v8408_v9  ;;  %v8550_v61 = vsel %vm4109_vm2, %v8548_v47, %v8545_v48  ;;  %v8566_v23 = vld [vmem:[#allocation1 + $0x84] ss:$16 sm:%s8565_s26]   ;;  %s8588_s4 = smov 48  ;;  %s8726_s0 = smov 48 }
 0x24b   :  { %v8424_v57 = vld [vmem:[#allocation1 + $0x585] ss:$16 sm:%s8423_s5]   ;;  %v11714_v10 = vpack.i.bf16 %v8413_v53, %v8390_v4  ;;  %v8561_v4 = vld [vmem:[#allocation1 + $0x84] ss:$16 sm:%s8560_s6]   ;;  %s8593_s5 = smov 192  ;;  %s8731_s6 = smov 192 }
 0x24c   :  { %v8429_v58 = vld [vmem:[#allocation1 + $0x585] ss:$16 sm:%s8428_s20]   ;;  %v8426_v54 = vsel %vm4101_vm0, %v8424_v57, %v8421_v22  ;;  %v8563_v22 = vsel %vm4101_vm0, %v8561_v4, %v8558_v20  ;;  %v8571_v9 = vld [vmem:[#allocation1 + $0x84] ss:$16 sm:%s8570_s15]   ;;  %v11598_v57 = vunpack.i.h.bf16 %v11596_v35  ;;  %s8603_s20 = smov 3  ;;  %s8741_s26 = smov 3 }
 0x24d   :  { %v8434_v40 = vld [vmem:[#allocation1 + $0x585] ss:$16 sm:%s8433_s21]   ;;  %v8431_v11 = vsel %vm4105_vm1, %v8429_v58, %v8426_v54  ;;  %11715 = vrot.lane.b32.xlu0 %v11714_v10, %s11990_s12  ;;  %v11597_v58 = vunpack.i.l.bf16 %v11596_v35  ;;  %v8568_v42 = vsel %vm4105_vm1, %v8566_v23, %v8563_v22  ;;  %v8581_v43 = vld [vmem:[#allocation1 + $0x284] ss:$16 sm:%s8580_s13]   ;;  %s8606_s21 = smov 12  ;;  %s8744_s15 = smov 12 }
 0x24e   :  { %v8444_v59 = vld [vmem:[#allocation1 + $0x785] ss:$16 sm:%s8443_s23]   ;;  %v8436_v51 = vsel %vm4109_vm2, %v8434_v40, %v8431_v11  ;;  %v8584_v53 = vld [vmem:[#allocation1 + $0x284] ss:$16 sm:%s8583_s19]   ;;  %v8573_v54 = vsel %vm4109_vm2, %v8571_v9, %v8568_v42  ;;  %7317 = vst.msk [vmem:[#allocation0 + $0x38] sm:$0xff] %vm7017_vm11, %v11598_v57   ;;  %s8611_s23 = smov 48 }
 0x24f   :  { %v8447_v12 = vld [vmem:[#allocation1 + $0x785] ss:$16 sm:%s8446_s27]   ;;  %v8586_v40 = vsel %vm4101_vm0, %v8584_v53, %v8581_v43  ;;  %v8594_v0 = vld [vmem:[#allocation1 + $0x284] ss:$16 sm:%s8593_s5]   ;;  %7294 = vst.msk [vmem:[#allocation0 + $0x18] sm:$0xff] %vm7017_vm11, %v11597_v58   ;;  %s8616_s27 = smov 192  ;;  %v14201_v58 = vpop.permute.xlu0 %11605 }
 0x250   :  { %v8452_v17 = vld [vmem:[#allocation1 + $0x785] ss:$16 sm:%s8451_s24]   ;;  %v8449_v62 = vsel %vm4101_vm0, %v8447_v12, %v8444_v59  ;;  %v8589_v59 = vld [vmem:[#allocation1 + $0x284] ss:$16 sm:%s8588_s4]   ;;  %v11601_v12 = vpop.permute.xlu1 %11600  ;;  %s8626_s24 = smov 3  ;;  %s8749_s13 = smov 48 }
 0x251   :  { %v8457_v33 = vld [vmem:[#allocation1 + $0x785] ss:$16 sm:%s8456_s2]   ;;  %v8454_v15 = vsel %vm4105_vm1, %v8452_v17, %v8449_v62  ;;  %11725 = vrot.lane.b32.xlu0 %v11724_v49, %s11991_s7  ;;  %v8591_v1 = vsel %vm4105_vm1, %v8589_v59, %v8586_v40  ;;  %v8604_v10 = vld [vmem:[#allocation1 + $0x484] ss:$16 sm:%s8603_s20]   ;;  %s8629_s2 = smov 12  ;;  %v11603_v46 = vunpack.i.h.bf16 %v11601_v12  ;;  %s8754_s19 = smov 192 }
 0x252   :  { %v8459_v36 = vsel %vm4109_vm2, %v8457_v33, %v8454_v15  ;;  %v8607_v11 = vld [vmem:[#allocation1 + $0x484] ss:$16 sm:%s8606_s21]   ;;  %v8596_v17 = vsel %vm4109_vm2, %v8594_v0, %v8591_v1  ;;  %s8764_s4 = smov 3  ;;  %s8767_s5 = smov 12 }
 0x253   :  { %v11719_v21 = vpack.i.bf16 %v8459_v36, %v8436_v51  ;;  %v8609_v63 = vsel %vm4101_vm0, %v8607_v11, %v8604_v10  ;;  %v8612_v37 = vld [vmem:[#allocation1 + $0x484] ss:$16 sm:%s8611_s23]   ;;  %v11602_v51 = vunpack.i.l.bf16 %v11601_v12  ;;  %v11734_v62 = vpack.i.bf16 %v8596_v17, %v8573_v54  ;;  %7363 = vst.msk [vmem:[#allocation0 + $0x78] sm:$0xff] %vm7017_vm11, %v11603_v46   ;;  %s8772_s20 = smov 48  ;;  %s8777_s21 = smov 192 }
 0x254   :  { %v8617_v56 = vld [vmem:[#allocation1 + $0x484] ss:$16 sm:%s8616_s27]   ;;  %v8614_v33 = vsel %vm4105_vm1, %v8612_v37, %v8609_v63  ;;  %s8787_s23 = smov 3  ;;  %s8790_s27 = smov 12 }
 0x255   :  { %11720 = vrot.lane.b32.xlu1 %v11719_v21, %s11990_s12  ;;  %s8519_s12 = smov 48  ;;  %v8627_v55 = vld [vmem:[#allocation1 + $0x684] ss:$16 sm:%s8626_s24]   ;;  %v8619_v6 = vsel %vm4109_vm2, %v8617_v56, %v8614_v33  ;;  %7340 = vst.msk [vmem:[#allocation0 + $0x58] sm:$0xff] %vm7017_vm11, %v11602_v51   ;;  %11735 = vrot.lane.b32.xlu0 %v11734_v62, %s11991_s7  ;;  %s8795_s24 = smov 48  ;;  %v11611_v56 = vpop.permute.xlu1 %11610 }
 0x256   :  { %v8520_v8 = vld [vmem:[#allocation1 + $0x404] ss:$16 sm:%s8519_s12]   ;;  %s8695_s12 = smov 3  ;;  %s8810_s1 = smov 3 }
 0x257   :  { %v8522_v38 = vsel %vm4105_vm1, %v8520_v8, %v8517_v19  ;;  %v8630_v13 = vld [vmem:[#allocation1 + $0x684] ss:$16 sm:%s8629_s2]   ;;  %s8800_s2 = smov 192 }
 0x258   :  { %v8527_v16 = vsel %vm4109_vm2, %v8525_v32, %v8522_v38  ;;  %v8632_v15 = vsel %vm4101_vm0, %v8630_v13, %v8627_v55  ;;  %v8640_v30 = vld [vmem:[#allocation1 + $0x684] ss:$16 sm:%s8639_s22]   ;;  %s8813_s22 = smov 12  ;;  %v11608_v55 = vunpack.i.h.bf16 %v14201_v58  ;;  %v11607_v13 = vunpack.i.l.bf16 %v14201_v58 }
 0x259   :  { %v11729_v34 = vpack.i.bf16 %v8550_v61, %v8527_v16  ;;  %v8637_v28 = vsel %vm4105_vm1, %v8635_v27, %v8632_v15  ;;  %v8650_v29 = vld [vmem:[#allocation1 + $0x104] ss:$16 sm:%s8649_s14]   ;;  %s8818_s14 = smov 48 }
 0x25a   :  { %v8653_v36 = vld [vmem:[#allocation1 + $0x104] ss:$16 sm:%s8652_s17]   ;;  %v8642_v44 = vsel %vm4109_vm2, %v8640_v30, %v8637_v28  ;;  %s8823_s17 = smov 192  ;;  %v11613_v28 = vunpack.i.h.bf16 %v11611_v56  ;;  %7385 = vst.msk [vmem:[#allocation0] sm:$0xff] %vm7384_vm12, %v11607_v13   ;;  %7408 = vst.msk [vmem:[#allocation0 + $0x20] sm:$0xff] %vm7384_vm12, %v11608_v55  }
 0x25b   :  { %11730 = vrot.lane.b32.xlu1 %v11729_v34, %s11991_s7  ;;  %v8655_v60 = vsel %vm4101_vm0, %v8653_v36, %v8650_v29  ;;  %v8658_v21 = vld [vmem:[#allocation1 + $0x104] ss:$16 sm:%s8657_s3]   ;;  %v11739_v31 = vpack.i.bf16 %v8642_v44, %v8619_v6  ;;  %s8833_s3 = smov 3  ;;  %v11612_v29 = vunpack.i.l.bf16 %v11611_v56 }
 0x25c   :  { %v8663_v41 = vld [vmem:[#allocation1 + $0x104] ss:$16 sm:%s8662_s11]   ;;  %v8660_v39 = vsel %vm4105_vm1, %v8658_v21, %v8655_v60  ;;  %s8836_s11 = smov 12  ;;  %v8834_v44 = vld [vmem:[#allocation1 + $0x3] ss:$16 sm:%s8833_s3]   ;;  %7454 = vst.msk [vmem:[#allocation0 + $0x60] sm:$0xff] %vm7384_vm12, %v11613_v28  }
 0x25d   :  { %v8673_v25 = vld [vmem:[#allocation1 + $0x304] ss:$16 sm:%s8672_s30]   ;;  %v8665_v24 = vsel %vm4109_vm2, %v8663_v41, %v8660_v39  ;;  %v8837_v60 = vld [vmem:[#allocation1 + $0x3] ss:$16 sm:%s8836_s11]   ;;  %s8841_s30 = smov 48  ;;  %7431 = vst.msk [vmem:[#allocation0 + $0x40] sm:$0xff] %vm7384_vm12, %v11612_v29  }
 0x25e   :  { %v8676_v5 = vld [vmem:[#allocation1 + $0x304] ss:$16 sm:%s8675_s29]   ;;  %s8846_s29 = smov 192  ;;  %v8839_v41 = vsel %vm4101_vm0, %v8837_v60, %v8834_v44  ;;  %s9001_s3 = smov 48 }
 0x25f   :  { %v8678_v7 = vsel %vm4101_vm0, %v8676_v5, %v8673_v25  ;;  %v8681_v3 = vld [vmem:[#allocation1 + $0x304] ss:$16 sm:%s8680_s10]   ;;  %11740 = vrot.lane.b32.xlu1 %v11739_v31, %s11991_s7  ;;  %v8842_v31 = vld [vmem:[#allocation1 + $0x3] ss:$16 sm:%s8841_s30]   ;;  %s8855_s10 = smov 3  ;;  %v11616_v25 = vpop.permute.xlu0 %11615  ;;  %s9006_s11 = smov 192 }
 0x260   :  { %v8686_v26 = vld [vmem:[#allocation1 + $0x304] ss:$16 sm:%s8685_s18]   ;;  %v8683_v2 = vsel %vm4105_vm1, %v8681_v3, %v8678_v7  ;;  %v8847_v39 = vld [vmem:[#allocation1 + $0x3] ss:$16 sm:%s8846_s29]   ;;  %s8858_s18 = smov 12  ;;  %v11618_v3 = vunpack.i.h.bf16 %v11616_v25  ;;  %s9016_s30 = smov 3 }
 0x261   :  { %v8696_v14 = vld [vmem:[#allocation1 + $0x504] ss:$16 sm:%s8695_s12]   ;;  %v8688_v8 = vsel %vm4109_vm2, %v8686_v26, %v8683_v2  ;;  %v8856_v7 = vld [vmem:[#allocation1 + $0x203] ss:$16 sm:%s8855_s10]   ;;  %s8863_s12 = smov 48  ;;  %s9019_s29 = smov 12 }
 0x262   :  { %v8699_v19 = vld [vmem:[#allocation1 + $0x504] ss:$16 sm:%s8698_s28]   ;;  %v11744_v45 = vpack.i.bf16 %v8688_v8, %v8665_v24  ;;  %v8844_v24 = vsel %vm4105_vm1, %v8842_v31, %v8839_v41  ;;  %v8859_v26 = vld [vmem:[#allocation1 + $0x203] ss:$16 sm:%s8858_s18]   ;;  %s8868_s28 = smov 192  ;;  %7500 = vst.msk [vmem:[#allocation0 + $0x28] sm:$0xff] %vm7384_vm12, %v11618_v3  }
 0x263   :  { %v8701_v32 = vsel %vm4101_vm0, %v8699_v19, %v8696_v14  ;;  %v8704_v49 = vld [vmem:[#allocation1 + $0x504] ss:$16 sm:%s8703_s16]   ;;  %v8864_v2 = vld [vmem:[#allocation1 + $0x203] ss:$16 sm:%s8863_s12]   ;;  %s8878_s16 = smov 3  ;;  %v11617_v14 = vunpack.i.l.bf16 %v11616_v25  ;;  %v8849_v19 = vsel %vm4109_vm2, %v8847_v39, %v8844_v24  ;;  %v8861_v8 = vsel %vm4101_vm0, %v8859_v26, %v8856_v7  ;;  %s9024_s10 = smov 48 }
 0x264   :  { %v8709_v38 = vld [vmem:[#allocation1 + $0x504] ss:$16 sm:%s8708_s8]   ;;  %v8706_v52 = vsel %vm4105_vm1, %v8704_v49, %v8701_v32  ;;  %11745 = vrot.lane.b32.xlu0 %v11744_v45, %s11991_s7  ;;  %v8869_v32 = vld [vmem:[#allocation1 + $0x203] ss:$16 sm:%s8868_s28]   ;;  %s8886_s8 = smov 48  ;;  %s9029_s18 = smov 192 }
 0x265   :  { %v8719_v16 = vld [vmem:[#allocation1 + $0x704] ss:$16 sm:%s8718_s25]   ;;  %v8711_v50 = vsel %vm4109_vm2, %v8709_v38, %v8706_v52  ;;  %v8879_v49 = vld [vmem:[#allocation1 + $0x403] ss:$16 sm:%s8878_s16]   ;;  %v8866_v38 = vsel %vm4105_vm1, %v8864_v2, %v8861_v8  ;;  %s8891_s25 = smov 192  ;;  %7477 = vst.msk [vmem:[#allocation0 + $0x8] sm:$0xff] %vm7384_vm12, %v11617_v14  }
 0x266   :  { %v8722_v18 = vld [vmem:[#allocation1 + $0x704] ss:$16 sm:%s8721_s9]   ;;  %v8887_v52 = vld [vmem:[#allocation1 + $0x403] ss:$16 sm:%s8886_s8]   ;;  %s8901_s9 = smov 3  ;;  %s9039_s12 = smov 3 }
 0x267   :  { %v8724_v47 = vsel %vm4101_vm0, %v8722_v18, %v8719_v16  ;;  %v8727_v48 = vld [vmem:[#allocation1 + $0x704] ss:$16 sm:%s8726_s0]   ;;  %v11621_v16 = vpop.permute.xlu1 %11620  ;;  %v8871_v18 = vsel %vm4109_vm2, %v8869_v32, %v8866_v38  ;;  %s8904_s0 = smov 12  ;;  %v9002_v41 = vld [vmem:[#allocation1 + $0x683] ss:$16 sm:%s9001_s3]   ;;  %s9042_s28 = smov 12 }
 0x268   :  { %v8732_v20 = vld [vmem:[#allocation1 + $0x704] ss:$16 sm:%s8731_s6]   ;;  %v8729_v4 = vsel %vm4105_vm1, %v8727_v48, %v8724_v47  ;;  %v8892_v47 = vld [vmem:[#allocation1 + $0x403] ss:$16 sm:%s8891_s25]   ;;  %s8909_s6 = smov 48  ;;  %s9047_s16 = smov 48 }
 0x269   :  { %v8742_v35 = vld [vmem:[#allocation1 + $0x184] ss:$16 sm:%s8741_s26]   ;;  %v8734_v22 = vsel %vm4109_vm2, %v8732_v20, %v8729_v4  ;;  %v8902_v48 = vld [vmem:[#allocation1 + $0x603] ss:$16 sm:%s8901_s9]   ;;  %v11623_v20 = vunpack.i.h.bf16 %v11621_v16  ;;  %v11622_v4 = vunpack.i.l.bf16 %v11621_v16  ;;  %s8914_s26 = smov 192  ;;  %s9062_s8 = smov 3 }
 0x26a   :  { %v8745_v61 = vld [vmem:[#allocation1 + $0x184] ss:$16 sm:%s8744_s15]   ;;  %v11749_v34 = vpack.i.bf16 %v8734_v22, %v8711_v50  ;;  %v8905_v22 = vld [vmem:[#allocation1 + $0x603] ss:$16 sm:%s8904_s0]   ;;  %s8924_s15 = smov 3  ;;  %s9065_s25 = smov 12 }
 0x26b   :  { %v8747_v23 = vsel %vm4101_vm0, %v8745_v61, %v8742_v35  ;;  %v8750_v9 = vld [vmem:[#allocation1 + $0x184] ss:$16 sm:%s8749_s13]   ;;  %v11764_v35 = vpack.i.bf16 %v8871_v18, %v8849_v19  ;;  %v8915_v58 = vld [vmem:[#allocation1 + $0x603] ss:$16 sm:%s8914_s26]   ;;  %s8927_s13 = smov 12  ;;  %7523 = vst.msk [vmem:[#allocation0 + $0x48] sm:$0xff] %vm7384_vm12, %v11622_v4  }
 0x26c   :  { %v8755_v57 = vld [vmem:[#allocation1 + $0x184] ss:$16 sm:%s8754_s19]   ;;  %v8752_v42 = vsel %vm4105_vm1, %v8750_v9, %v8747_v23  ;;  %11750 = vrot.lane.b32.xlu1 %v11749_v34, %s11991_s7  ;;  %v8910_v23 = vld [vmem:[#allocation1 + $0x603] ss:$16 sm:%s8909_s6]   ;;  %s8932_s19 = smov 48  ;;  %7546 = vst.msk [vmem:[#allocation0 + $0x68] sm:$0xff] %vm7384_vm12, %v11623_v20  }
 0x26d   :  { %v8765_v43 = vld [vmem:[#allocation1 + $0x384] ss:$16 sm:%s8764_s4]   ;;  %v8757_v54 = vsel %vm4109_vm2, %v8755_v57, %v8752_v42  ;;  %v8907_v57 = vsel %vm4101_vm0, %v8905_v22, %v8902_v48  ;;  %v8925_v34 = vld [vmem:[#allocation1 + $0x83] ss:$16 sm:%s8924_s15]   ;;  %s11992_s4 = smov 24   ;;  %s9070_s9 = smov 48 }
 0x26e   :  { %v8768_v53 = vld [vmem:[#allocation1 + $0x384] ss:$16 sm:%s8767_s5]   ;;  %v8912_v42 = vsel %vm4105_vm1, %v8910_v23, %v8907_v57  ;;  %s8937_s5 = smov 192  ;;  %v9007_v25 = vld [vmem:[#allocation1 + $0x683] ss:$16 sm:%s9006_s11]   ;;  %s9075_s0 = smov 192 }
 0x26f   :  { %v8770_v40 = vsel %vm4101_vm0, %v8768_v53, %v8765_v43  ;;  %v8773_v59 = vld [vmem:[#allocation1 + $0x384] ss:$16 sm:%s8772_s20]   ;;  %v8928_v43 = vld [vmem:[#allocation1 + $0x83] ss:$16 sm:%s8927_s13]   ;;  %s8947_s20 = smov 3  ;;  %s9085_s6 = smov 3 }
 0x270   :  { %v8778_v0 = vld [vmem:[#allocation1 + $0x384] ss:$16 sm:%s8777_s21]   ;;  %v8775_v1 = vsel %vm4105_vm1, %v8773_v59, %v8770_v40  ;;  %v8933_v53 = vld [vmem:[#allocation1 + $0x83] ss:$16 sm:%s8932_s19]   ;;  %v8917_v40 = vsel %vm4109_vm2, %v8915_v58, %v8912_v42  ;;  %v8930_v59 = vsel %vm4101_vm0, %v8928_v43, %v8925_v34  ;;  %s8950_s21 = smov 12  ;;  %s9088_s26 = smov 12 }
 0x271   :  { %v8788_v10 = vld [vmem:[#allocation1 + $0x584] ss:$16 sm:%s8787_s23]   ;;  %v8780_v12 = vsel %vm4109_vm2, %v8778_v0, %v8775_v1  ;;  %v8938_v0 = vld [vmem:[#allocation1 + $0x83] ss:$16 sm:%s8937_s5]   ;;  %s8955_s23 = smov 48  ;;  %s9093_s15 = smov 48 }
 0x272   :  { %v8791_v11 = vld [vmem:[#allocation1 + $0x584] ss:$16 sm:%s8790_s27]   ;;  %v11754_v46 = vpack.i.bf16 %v8780_v12, %v8757_v54  ;;  %v11626_v54 = vpop.permute.xlu0 %11625  ;;  %v8948_v1 = vld [vmem:[#allocation1 + $0x283] ss:$16 sm:%s8947_s20]   ;;  %s8960_s27 = smov 192  ;;  %s9098_s13 = smov 192 }
 0x273   :  { %v8793_v17 = vsel %vm4101_vm0, %v8791_v11, %v8788_v10  ;;  %v8796_v63 = vld [vmem:[#allocation1 + $0x584] ss:$16 sm:%s8795_s24]   ;;  %v11628_v10 = vunpack.i.h.bf16 %v11626_v54  ;;  %v11627_v11 = vunpack.i.l.bf16 %v11626_v54  ;;  %s8970_s24 = smov 3  ;;  %v9020_v7 = vld [vmem:[#allocation1 + $0x103] ss:$16 sm:%s9019_s29]   ;;  %s9108_s19 = smov 3 }
 0x274   :  { %v8801_v37 = vld [vmem:[#allocation1 + $0x584] ss:$16 sm:%s8800_s2]   ;;  %v8798_v51 = vsel %vm4105_vm1, %v8796_v63, %v8793_v17  ;;  %11755 = vrot.lane.b32.xlu0 %v11754_v46, %s11991_s7  ;;  %v8935_v17 = vsel %vm4105_vm1, %v8933_v53, %v8930_v59  ;;  %v8951_v63 = vld [vmem:[#allocation1 + $0x283] ss:$16 sm:%s8950_s21]   ;;  %s8973_s2 = smov 12  ;;  %s9111_s5 = smov 12 }
 0x275   :  { %v8811_v62 = vld [vmem:[#allocation1 + $0x784] ss:$16 sm:%s8810_s1]   ;;  %v8803_v6 = vsel %vm4109_vm2, %v8801_v37, %v8798_v51  ;;  %v8956_v37 = vld [vmem:[#allocation1 + $0x283] ss:$16 sm:%s8955_s23]   ;;  %v8940_v56 = vsel %vm4109_vm2, %v8938_v0, %v8935_v17  ;;  %v8953_v46 = vsel %vm4101_vm0, %v8951_v63, %v8948_v1  ;;  %s8978_s1 = smov 48  ;;  %7569 = vst.msk [vmem:[#allocation0 + $0x10] sm:$0xff] %vm7384_vm12, %v11627_v11  }
 0x276   :  { %v8814_v33 = vld [vmem:[#allocation1 + $0x784] ss:$16 sm:%s8813_s22]   ;;  %v8961_v51 = vld [vmem:[#allocation1 + $0x283] ss:$16 sm:%s8960_s27]   ;;  %7592 = vst.msk [vmem:[#allocation0 + $0x30] sm:$0xff] %vm7384_vm12, %v11628_v10   ;;  %s8983_s22 = smov 192  ;;  %v11636_v26 = vpop.permute.xlu0 %11635 }
 0x277   :  { %v8816_v15 = vsel %vm4101_vm0, %v8814_v33, %v8811_v62  ;;  %v8819_v27 = vld [vmem:[#allocation1 + $0x784] ss:$16 sm:%s8818_s14]   ;;  %v8971_v62 = vld [vmem:[#allocation1 + $0x483] ss:$16 sm:%s8970_s24]   ;;  %v8958_v33 = vsel %vm4105_vm1, %v8956_v37, %v8953_v46  ;;  %s8993_s14 = smov 3  ;;  %v11638_v32 = vunpack.i.h.bf16 %v11636_v26  ;;  %s9116_s20 = smov 48 }
 0x278   :  { %v8824_v30 = vld [vmem:[#allocation1 + $0x784] ss:$16 sm:%s8823_s17]   ;;  %v8821_v36 = vsel %vm4105_vm1, %v8819_v27, %v8816_v15  ;;  %11765 = vrot.lane.b32.xlu0 %v11764_v35, %s11992_s4  ;;  %v8974_v55 = vld [vmem:[#allocation1 + $0x483] ss:$16 sm:%s8973_s2]   ;;  %v8963_v15 = vsel %vm4109_vm2, %v8961_v51, %v8958_v33  ;;  %s8996_s17 = smov 12  ;;  %s9121_s21 = smov 192 }
 0x279   :  { %v8826_v21 = vsel %vm4109_vm2, %v8824_v30, %v8821_v36  ;;  %v8979_v13 = vld [vmem:[#allocation1 + $0x483] ss:$16 sm:%s8978_s1]   ;;  %v8976_v27 = vsel %vm4101_vm0, %v8974_v55, %v8971_v62  ;;  %v11774_v44 = vpack.i.bf16 %v8963_v15, %v8940_v56  ;;  %7684 = vst.msk [vmem:[#allocation0 + $0x38] sm:$0xff] %vm7384_vm12, %v11638_v32   ;;  %s9131_s23 = smov 3  ;;  %s9134_s27 = smov 12 }
 0x27a   :  { %v11759_v5 = vpack.i.bf16 %v8826_v21, %v8803_v6  ;;  %v11631_v6 = vpop.permute.xlu1 %11630  ;;  %v8984_v30 = vld [vmem:[#allocation1 + $0x483] ss:$16 sm:%s8983_s22]   ;;  %v8981_v60 = vsel %vm4105_vm1, %v8979_v13, %v8976_v27  ;;  %v14275_v17 = vpop.permute.xlu0 %11645  ;;  %s9139_s24 = smov 48  ;;  %s9144_s2 = smov 192 }
 0x27b   :  { %v8994_v28 = vld [vmem:[#allocation1 + $0x683] ss:$16 sm:%s8993_s14]   ;;  %v11633_v29 = vunpack.i.h.bf16 %v11631_v6  ;;  %v11632_v36 = vunpack.i.l.bf16 %v11631_v6  ;;  %v8986_v31 = vsel %vm4109_vm2, %v8984_v30, %v8981_v60  ;;  %s9154_s1 = smov 3  ;;  %s9157_s22 = smov 12 }
 0x27c   :  { %11760 = vrot.lane.b32.xlu1 %v11759_v5, %s11991_s7  ;;  %s8881_s7 = smov 12  ;;  %v8997_v21 = vld [vmem:[#allocation1 + $0x683] ss:$16 sm:%s8996_s17]   ;;  %11775 = vrot.lane.b32.xlu0 %v11774_v44, %s11992_s4  ;;  %s9162_s14 = smov 48 }
 0x27d   :  { %v8882_v45 = vld [vmem:[#allocation1 + $0x403] ss:$16 sm:%s8881_s7]   ;;  %v8999_v39 = vsel %vm4101_vm0, %v8997_v21, %v8994_v28  ;;  %7615 = vst.msk [vmem:[#allocation0 + $0x50] sm:$0xff] %vm7384_vm12, %v11632_v36   ;;  %7638 = vst.msk [vmem:[#allocation0 + $0x70] sm:$0xff] %vm7384_vm12, %v11633_v29   ;;  %s9052_s7 = smov 192  ;;  %s9167_s17 = smov 192 }
 0x27e   :  { %v8884_v50 = vsel %vm4101_vm0, %v8882_v45, %v8879_v49  ;;  %v9017_v5 = vld [vmem:[#allocation1 + $0x103] ss:$16 sm:%s9016_s30]   ;;  %v9004_v24 = vsel %vm4105_vm1, %v9002_v41, %v8999_v39  ;;  %v11637_v49 = vunpack.i.l.bf16 %v11636_v26  ;;  %s9177_s3 = smov 3  ;;  %s9180_s11 = smov 12  ;;  %v11647_v39 = vunpack.i.l.bf16 %v14275_v17 }
 0x27f   :  { %v8889_v61 = vsel %vm4105_vm1, %v8887_v52, %v8884_v50  ;;  %v9025_v3 = vld [vmem:[#allocation1 + $0x103] ss:$16 sm:%s9024_s10]   ;;  %v9009_v2 = vsel %vm4109_vm2, %v9007_v25, %v9004_v24  ;;  %v9022_v14 = vsel %vm4101_vm0, %v9020_v7, %v9017_v5  ;;  %s9185_s30 = smov 48  ;;  %s9190_s29 = smov 192 }
 0x280   :  { %v8894_v9 = vsel %vm4109_vm2, %v8892_v47, %v8889_v61  ;;  %v9030_v19 = vld [vmem:[#allocation1 + $0x103] ss:$16 sm:%s9029_s18]   ;;  %v11779_v38 = vpack.i.bf16 %v9009_v2, %v8986_v31  ;;  %v9027_v45 = vsel %vm4105_vm1, %v9025_v3, %v9022_v14  ;;  %7661 = vst.msk [vmem:[#allocation0 + $0x18] sm:$0xff] %vm7384_vm12, %v11637_v49   ;;  %v11641_v61 = vpop.permute.xlu1 %11640  ;;  %v11648_v31 = vunpack.i.h.bf16 %v14275_v17  ;;  %s9200_s10 = smov 3  ;;  %s9203_s18 = smov 12 }
 0x281   :  { %v11769_v12 = vpack.i.bf16 %v8917_v40, %v8894_v9  ;;  %v9040_v8 = vld [vmem:[#allocation1 + $0x303] ss:$16 sm:%s9039_s12]   ;;  %v9032_v18 = vsel %vm4109_vm2, %v9030_v19, %v9027_v45  ;;  %v11643_v58 = vunpack.i.h.bf16 %v11641_v61  ;;  %v11642_v34 = vunpack.i.l.bf16 %v11641_v61  ;;  %s9208_s12 = smov 48  ;;  %v9204_v49 = vld [vmem:[#allocation1 + $0x2] ss:$16 sm:%s9203_s18]   ;;  %v11656_v45 = vpop.permute.xlu0 %11655  ;;  %7752 = vst.msk [vmem:[#allocation0] sm:$0xff] %vm7751_vm13, %v11647_v39  }
 0x282   :  { %v9043_v52 = vld [vmem:[#allocation1 + $0x303] ss:$16 sm:%s9042_s28]   ;;  %s9213_s28 = smov 192  ;;  %7775 = vst.msk [vmem:[#allocation0 + $0x20] sm:$0xff] %vm7751_vm13, %v11648_v31   ;;  %s9373_s18 = smov 192 }
 0x283   :  { %11770 = vrot.lane.b32.xlu1 %v11769_v12, %s11992_s4  ;;  %v9048_v16 = vld [vmem:[#allocation1 + $0x303] ss:$16 sm:%s9047_s16]   ;;  %v9045_v50 = vsel %vm4101_vm0, %v9043_v52, %v9040_v8  ;;  %7707 = vst.msk [vmem:[#allocation0 + $0x58] sm:$0xff] %vm7384_vm12, %v11642_v34   ;;  %7730 = vst.msk [vmem:[#allocation0 + $0x78] sm:$0xff] %vm7384_vm12, %v11643_v58   ;;  %v9201_v8 = vld [vmem:[#allocation1 + $0x2] ss:$16 sm:%s9200_s10]  }
 0x284   :  { %v9053_v47 = vld [vmem:[#allocation1 + $0x303] ss:$16 sm:%s9052_s7]   ;;  %v9050_v20 = vsel %vm4105_vm1, %v9048_v16, %v9045_v50  ;;  %v11651_v36 = vpop.permute.xlu1 %11650  ;;  %v9206_v16 = vsel %vm4101_vm0, %v9204_v49, %v9201_v8  ;;  %s9222_s16 = smov 3  ;;  %s9225_s7 = smov 12  ;;  %v11658_v50 = vunpack.i.h.bf16 %v11656_v45 }
 0x285   :  { %v9063_v48 = vld [vmem:[#allocation1 + $0x503] ss:$16 sm:%s9062_s8]   ;;  %v9055_v22 = vsel %vm4109_vm2, %v9053_v47, %v9050_v20  ;;  %v11653_v3 = vunpack.i.h.bf16 %v11651_v36  ;;  %v11652_v26 = vunpack.i.l.bf16 %v11651_v36  ;;  %v9223_v20 = vld [vmem:[#allocation1 + $0x202] ss:$16 sm:%s9222_s16]   ;;  %s9230_s8 = smov 48  ;;  %s9368_s10 = smov 48 }
 0x286   :  { %v9066_v4 = vld [vmem:[#allocation1 + $0x503] ss:$16 sm:%s9065_s25]   ;;  %v11784_v42 = vpack.i.bf16 %v9055_v22, %v9032_v18  ;;  %v9214_v18 = vld [vmem:[#allocation1 + $0x2] ss:$16 sm:%s9213_s28]   ;;  %s9235_s25 = smov 192  ;;  %7867 = vst.msk [vmem:[#allocation0 + $0x28] sm:$0xff] %vm7751_vm13, %v11658_v50  }
 0x287   :  { %11780 = vrot.lane.b32.xlu1 %v11779_v38, %s11992_s4  ;;  %v9071_v35 = vld [vmem:[#allocation1 + $0x503] ss:$16 sm:%s9070_s9]   ;;  %v9068_v23 = vsel %vm4101_vm0, %v9066_v4, %v9063_v48  ;;  %v9209_v38 = vld [vmem:[#allocation1 + $0x2] ss:$16 sm:%s9208_s12]   ;;  %7821 = vst.msk [vmem:[#allocation0 + $0x60] sm:$0xff] %vm7751_vm13, %v11653_v3   ;;  %7798 = vst.msk [vmem:[#allocation0 + $0x40] sm:$0xff] %vm7751_vm13, %v11652_v26  }
 0x288   :  { %v9076_v9 = vld [vmem:[#allocation1 + $0x503] ss:$16 sm:%s9075_s0]   ;;  %v9073_v43 = vsel %vm4105_vm1, %v9071_v35, %v9068_v23  ;;  %11785 = vrot.lane.b32.xlu0 %v11784_v42, %s11992_s4  ;;  %v9211_v48 = vsel %vm4105_vm1, %v9209_v38, %v9206_v16  ;;  %v9226_v4 = vld [vmem:[#allocation1 + $0x202] ss:$16 sm:%s9225_s7]   ;;  %v11657_v35 = vunpack.i.l.bf16 %v11656_v45  ;;  %s9245_s9 = smov 3  ;;  %s9248_s0 = smov 12  ;;  %v11661_v42 = vpop.permute.xlu1 %11660 }
 0x289   :  { %v9086_v57 = vld [vmem:[#allocation1 + $0x703] ss:$16 sm:%s9085_s6]   ;;  %v9078_v40 = vsel %vm4109_vm2, %v9076_v9, %v9073_v43  ;;  %v9216_v61 = vsel %vm4109_vm2, %v9214_v18, %v9211_v48  ;;  %v9228_v22 = vsel %vm4101_vm0, %v9226_v4, %v9223_v20  ;;  %v9231_v23 = vld [vmem:[#allocation1 + $0x202] ss:$16 sm:%s9230_s8]   ;;  %s9258_s6 = smov 192  ;;  %s9383_s12 = smov 3 }
 0x28a   :  { %v9089_v53 = vld [vmem:[#allocation1 + $0x703] ss:$16 sm:%s9088_s26]   ;;  %v9236_v9 = vld [vmem:[#allocation1 + $0x202] ss:$16 sm:%s9235_s25]   ;;  %7844 = vst.msk [vmem:[#allocation0 + $0x8] sm:$0xff] %vm7751_vm13, %v11657_v35   ;;  %s9268_s26 = smov 3 }
 0x28b   :  { %v9094_v54 = vld [vmem:[#allocation1 + $0x703] ss:$16 sm:%s9093_s15]   ;;  %v9091_v59 = vsel %vm4101_vm0, %v9089_v53, %v9086_v57  ;;  %v9233_v57 = vsel %vm4105_vm1, %v9231_v23, %v9228_v22  ;;  %v9246_v58 = vld [vmem:[#allocation1 + $0x402] ss:$16 sm:%s9245_s9]   ;;  %s9271_s15 = smov 12  ;;  %s9386_s28 = smov 12 }
 0x28c   :  { %v9099_v0 = vld [vmem:[#allocation1 + $0x703] ss:$16 sm:%s9098_s13]   ;;  %v9096_v10 = vsel %vm4105_vm1, %v9094_v54, %v9091_v59  ;;  %v9249_v34 = vld [vmem:[#allocation1 + $0x402] ss:$16 sm:%s9248_s0]   ;;  %v9238_v43 = vsel %vm4109_vm2, %v9236_v9, %v9233_v57  ;;  %v11663_v59 = vunpack.i.h.bf16 %v11661_v42  ;;  %s9276_s13 = smov 48  ;;  %s9391_s16 = smov 48 }
 0x28d   :  { %v9109_v1 = vld [vmem:[#allocation1 + $0x183] ss:$16 sm:%s9108_s19]   ;;  %v9101_v63 = vsel %vm4109_vm2, %v9099_v0, %v9096_v10  ;;  %v9251_v53 = vsel %vm4101_vm0, %v9249_v34, %v9246_v58  ;;  %v11662_v0 = vunpack.i.l.bf16 %v11661_v42  ;;  %s9281_s19 = smov 192  ;;  %v9369_v16 = vld [vmem:[#allocation1 + $0x682] ss:$16 sm:%s9368_s10]   ;;  %s9396_s7 = smov 192 }
 0x28e   :  { %v9112_v11 = vld [vmem:[#allocation1 + $0x183] ss:$16 sm:%s9111_s5]   ;;  %v11789_v51 = vpack.i.bf16 %v9101_v63, %v9078_v40  ;;  %v9259_v40 = vld [vmem:[#allocation1 + $0x402] ss:$16 sm:%s9258_s6]   ;;  %s9291_s5 = smov 3  ;;  %7913 = vst.msk [vmem:[#allocation0 + $0x68] sm:$0xff] %vm7751_vm13, %v11663_v59  }
 0x28f   :  { %v9117_v12 = vld [vmem:[#allocation1 + $0x183] ss:$16 sm:%s9116_s20]   ;;  %v9114_v37 = vsel %vm4101_vm0, %v9112_v11, %v9109_v1  ;;  %v11804_v1 = vpack.i.bf16 %v9238_v43, %v9216_v61  ;;  %v9269_v11 = vld [vmem:[#allocation1 + $0x602] ss:$16 sm:%s9268_s26]   ;;  %s9294_s20 = smov 12  ;;  %7890 = vst.msk [vmem:[#allocation0 + $0x48] sm:$0xff] %vm7751_vm13, %v11662_v0  }
 0x290   :  { %v9122_v56 = vld [vmem:[#allocation1 + $0x183] ss:$16 sm:%s9121_s21]   ;;  %v9119_v62 = vsel %vm4105_vm1, %v9117_v12, %v9114_v37  ;;  %11790 = vrot.lane.b32.xlu1 %v11789_v51, %s11992_s4  ;;  %v9272_v12 = vld [vmem:[#allocation1 + $0x602] ss:$16 sm:%s9271_s15]   ;;  %s11993_s21 = smov 16   ;;  %s9406_s8 = smov 3 }
 0x291   :  { %v9132_v46 = vld [vmem:[#allocation1 + $0x383] ss:$16 sm:%s9131_s23]   ;;  %v9124_v13 = vsel %vm4109_vm2, %v9122_v56, %v9119_v62  ;;  %v9274_v63 = vsel %vm4101_vm0, %v9272_v12, %v9269_v11  ;;  %v9277_v37 = vld [vmem:[#allocation1 + $0x602] ss:$16 sm:%s9276_s13]   ;;  %s9299_s23 = smov 48  ;;  %s9409_s25 = smov 12 }
 0x292   :  { %v9135_v33 = vld [vmem:[#allocation1 + $0x383] ss:$16 sm:%s9134_s27]   ;;  %v9282_v56 = vld [vmem:[#allocation1 + $0x602] ss:$16 sm:%s9281_s19]   ;;  %s9304_s27 = smov 192  ;;  %s9414_s9 = smov 48 }
 0x293   :  { %v9140_v55 = vld [vmem:[#allocation1 + $0x383] ss:$16 sm:%s9139_s24]   ;;  %v9137_v6 = vsel %vm4101_vm0, %v9135_v33, %v9132_v46  ;;  %v9279_v46 = vsel %vm4105_vm1, %v9277_v37, %v9274_v63  ;;  %v9292_v51 = vld [vmem:[#allocation1 + $0x82] ss:$16 sm:%s9291_s5]   ;;  %v11666_v33 = vpop.permute.xlu0 %11665  ;;  %s9314_s24 = smov 3  ;;  %s9419_s0 = smov 192 }
 0x294   :  { %v9145_v15 = vld [vmem:[#allocation1 + $0x383] ss:$16 sm:%s9144_s2]   ;;  %v9142_v30 = vsel %vm4105_vm1, %v9140_v55, %v9137_v6  ;;  %v9295_v62 = vld [vmem:[#allocation1 + $0x82] ss:$16 sm:%s9294_s20]   ;;  %v9284_v55 = vsel %vm4109_vm2, %v9282_v56, %v9279_v46  ;;  %s9317_s2 = smov 12  ;;  %s9432_s6 = smov 12 }
 0x295   :  { %v9155_v27 = vld [vmem:[#allocation1 + $0x583] ss:$16 sm:%s9154_s1]   ;;  %v9147_v44 = vsel %vm4109_vm2, %v9145_v15, %v9142_v30  ;;  %v9300_v6 = vld [vmem:[#allocation1 + $0x82] ss:$16 sm:%s9299_s23]   ;;  %v11667_v30 = vunpack.i.l.bf16 %v11666_v33  ;;  %s9322_s1 = smov 48  ;;  %s9437_s26 = smov 48 }
 0x296   :  { %v9158_v28 = vld [vmem:[#allocation1 + $0x583] ss:$16 sm:%s9157_s22]   ;;  %v11794_v25 = vpack.i.bf16 %v9147_v44, %v9124_v13  ;;  %v9297_v13 = vsel %vm4101_vm0, %v9295_v62, %v9292_v51  ;;  %v9305_v15 = vld [vmem:[#allocation1 + $0x82] ss:$16 sm:%s9304_s27]   ;;  %s9327_s22 = smov 192  ;;  %s9442_s15 = smov 192 }
 0x297   :  { %v9163_v29 = vld [vmem:[#allocation1 + $0x583] ss:$16 sm:%s9162_s14]   ;;  %v9160_v60 = vsel %vm4101_vm0, %v9158_v28, %v9155_v27  ;;  %v11668_v27 = vunpack.i.h.bf16 %v11666_v33  ;;  %v9315_v36 = vld [vmem:[#allocation1 + $0x282] ss:$16 sm:%s9314_s24]   ;;  %s9337_s14 = smov 3  ;;  %7936 = vst.msk [vmem:[#allocation0 + $0x10] sm:$0xff] %vm7751_vm13, %v11667_v30   ;;  %v11676_v20 = vpop.permute.xlu0 %11675 }
 0x298   :  { %v9168_v21 = vld [vmem:[#allocation1 + $0x583] ss:$16 sm:%s9167_s17]   ;;  %v9165_v5 = vsel %vm4105_vm1, %v9163_v29, %v9160_v60  ;;  %11795 = vrot.lane.b32.xlu0 %v11794_v25, %s11992_s4  ;;  %v9302_v29 = vsel %vm4105_vm1, %v9300_v6, %v9297_v13  ;;  %v9318_v44 = vld [vmem:[#allocation1 + $0x282] ss:$16 sm:%s9317_s2]   ;;  %s9340_s17 = smov 12  ;;  %v11678_v23 = vunpack.i.h.bf16 %v11676_v20  ;;  %v11677_v9 = vunpack.i.l.bf16 %v11676_v20  ;;  %s9452_s13 = smov 3 }
 0x299   :  { %v9178_v41 = vld [vmem:[#allocation1 + $0x783] ss:$16 sm:%s9177_s3]   ;;  %v9170_v2 = vsel %vm4109_vm2, %v9168_v21, %v9165_v5  ;;  %v9307_v60 = vsel %vm4109_vm2, %v9305_v15, %v9302_v29  ;;  %v9320_v21 = vsel %vm4101_vm0, %v9318_v44, %v9315_v36  ;;  %v9328_v31 = vld [vmem:[#allocation1 + $0x282] ss:$16 sm:%s9327_s22]   ;;  %7959 = vst.msk [vmem:[#allocation0 + $0x30] sm:$0xff] %vm7751_vm13, %v11668_v27   ;;  %s9345_s3 = smov 48 }
 0x29a   :  { %v9181_v24 = vld [vmem:[#allocation1 + $0x783] ss:$16 sm:%s9180_s11]   ;;  %v9338_v25 = vld [vmem:[#allocation1 + $0x482] ss:$16 sm:%s9337_s14]   ;;  %s9350_s11 = smov 192  ;;  %8028 = vst.msk [vmem:[#allocation0 + $0x18] sm:$0xff] %vm7751_vm13, %v11677_v9  }
 0x29b   :  { %v9186_v7 = vld [vmem:[#allocation1 + $0x783] ss:$16 sm:%s9185_s30]   ;;  %v9183_v14 = vsel %vm4101_vm0, %v9181_v24, %v9178_v41  ;;  %v9323_v41 = vld [vmem:[#allocation1 + $0x282] ss:$16 sm:%s9322_s1]   ;;  %v11671_v24 = vpop.permute.xlu1 %11670  ;;  %s9360_s30 = smov 3  ;;  %8051 = vst.msk [vmem:[#allocation0 + $0x38] sm:$0xff] %vm7751_vm13, %v11678_v23  }
 0x29c   :  { %v9191_v19 = vld [vmem:[#allocation1 + $0x783] ss:$16 sm:%s9190_s29]   ;;  %v9188_v32 = vsel %vm4105_vm1, %v9186_v7, %v9183_v14  ;;  %11805 = vrot.lane.b32.xlu0 %v11804_v1, %s11993_s21  ;;  %v9325_v39 = vsel %vm4105_vm1, %v9323_v41, %v9320_v21  ;;  %v9341_v5 = vld [vmem:[#allocation1 + $0x482] ss:$16 sm:%s9340_s17]   ;;  %s9363_s29 = smov 12  ;;  %v11673_v14 = vunpack.i.h.bf16 %v11671_v24  ;;  %s9455_s19 = smov 12  ;;  %v14353_v21 = vpop.permute.xlu0 %11685 }
 0x29d   :  { %v9193_v52 = vsel %vm4109_vm2, %v9191_v19, %v9188_v32  ;;  %v9330_v7 = vsel %vm4109_vm2, %v9328_v31, %v9325_v39  ;;  %v9343_v3 = vsel %vm4101_vm0, %v9341_v5, %v9338_v25  ;;  %v9346_v26 = vld [vmem:[#allocation1 + $0x482] ss:$16 sm:%s9345_s3]   ;;  %v11672_v19 = vunpack.i.l.bf16 %v11671_v24  ;;  %s9460_s5 = smov 48  ;;  %s9465_s20 = smov 192 }
 0x29e   :  { %v11799_v47 = vpack.i.bf16 %v9193_v52, %v9170_v2  ;;  %v9351_v2 = vld [vmem:[#allocation1 + $0x482] ss:$16 sm:%s9350_s11]   ;;  %v11814_v8 = vpack.i.bf16 %v9330_v7, %v9307_v60  ;;  %v9348_v32 = vsel %vm4105_vm1, %v9346_v26, %v9343_v3  ;;  %8005 = vst.msk [vmem:[#allocation0 + $0x70] sm:$0xff] %vm7751_vm13, %v11673_v14   ;;  %s9475_s23 = smov 3  ;;  %s9478_s27 = smov 12 }
 0x29f   :  { %v9361_v49 = vld [vmem:[#allocation1 + $0x682] ss:$16 sm:%s9360_s30]   ;;  %v9353_v45 = vsel %vm4109_vm2, %v9351_v2, %v9348_v32  ;;  %7982 = vst.msk [vmem:[#allocation0 + $0x50] sm:$0xff] %vm7751_vm13, %v11672_v19   ;;  %s9483_s24 = smov 48  ;;  %s9488_s2 = smov 192 }
 0x2a0   :  { %11800 = vrot.lane.b32.xlu1 %v11799_v47, %s11992_s4  ;;  %s9253_s4 = smov 48  ;;  %v9364_v38 = vld [vmem:[#allocation1 + $0x682] ss:$16 sm:%s9363_s29]   ;;  %11815 = vrot.lane.b32.xlu0 %v11814_v8, %s11993_s21  ;;  %s9498_s1 = smov 3 }
 0x2a1   :  { %v9254_v54 = vld [vmem:[#allocation1 + $0x402] ss:$16 sm:%s9253_s4]   ;;  %v9366_v52 = vsel %vm4101_vm0, %v9364_v38, %v9361_v49  ;;  %s9429_s4 = smov 3  ;;  %s9501_s22 = smov 12 }
 0x2a2   :  { %v9256_v10 = vsel %vm4105_vm1, %v9254_v54, %v9251_v53  ;;  %v9374_v18 = vld [vmem:[#allocation1 + $0x682] ss:$16 sm:%s9373_s18]   ;;  %v9371_v50 = vsel %vm4105_vm1, %v9369_v16, %v9366_v52  ;;  %s9506_s14 = smov 48  ;;  %s9511_s17 = smov 192 }
 0x2a3   :  { %v9261_v17 = vsel %vm4109_vm2, %v9259_v40, %v9256_v10  ;;  %v9384_v47 = vld [vmem:[#allocation1 + $0x102] ss:$16 sm:%s9383_s12]   ;;  %v9376_v4 = vsel %vm4109_vm2, %v9374_v18, %v9371_v50  ;;  %v11681_v10 = vpop.permute.xlu1 %11680  ;;  %s9521_s3 = smov 3  ;;  %s9524_s11 = smov 12  ;;  %v11688_v50 = vunpack.i.h.bf16 %v14353_v21 }
 0x2a4   :  { %v11809_v28 = vpack.i.bf16 %v9284_v55, %v9261_v17  ;;  %v9387_v48 = vld [vmem:[#allocation1 + $0x102] ss:$16 sm:%s9386_s28]   ;;  %v11819_v57 = vpack.i.bf16 %v9376_v4, %v9353_v45  ;;  %v11683_v37 = vunpack.i.h.bf16 %v11681_v10  ;;  %v11682_v56 = vunpack.i.l.bf16 %v11681_v10  ;;  %s9529_s30 = smov 48  ;;  %s9534_s29 = smov 192 }
 0x2a5   :  { %v9389_v35 = vsel %vm4101_vm0, %v9387_v48, %v9384_v47  ;;  %v9392_v61 = vld [vmem:[#allocation1 + $0x102] ss:$16 sm:%s9391_s16]   ;;  %s9544_s10 = smov 3  ;;  %s9547_s18 = smov 12  ;;  %v11687_v47 = vunpack.i.l.bf16 %v14353_v21  ;;  %8142 = vst.msk [vmem:[#allocation0 + $0x20] sm:$0xff] %vm8118_vm14, %v11688_v50  }
 0x2a6   :  { %11810 = vrot.lane.b32.xlu1 %v11809_v28, %s11993_s21  ;;  %v9397_v22 = vld [vmem:[#allocation1 + $0x102] ss:$16 sm:%s9396_s7]   ;;  %v9394_v58 = vsel %vm4105_vm1, %v9392_v61, %v9389_v35  ;;  %8074 = vst.msk [vmem:[#allocation0 + $0x58] sm:$0xff] %vm7751_vm13, %v11682_v56   ;;  %8097 = vst.msk [vmem:[#allocation0 + $0x78] sm:$0xff] %vm7751_vm13, %v11683_v37   ;;  %s9552_s12 = smov 48  ;;  %s9557_s28 = smov 192 }
 0x2a7   :  { %v9407_v34 = vld [vmem:[#allocation1 + $0x302] ss:$16 sm:%s9406_s8]   ;;  %v9399_v43 = vsel %vm4109_vm2, %v9397_v22, %v9394_v58  ;;  %v11691_v38 = vpop.permute.xlu1 %11690  ;;  %s9567_s16 = smov 3  ;;  %s9570_s7 = smov 12  ;;  %8119 = vst.msk [vmem:[#allocation0] sm:$0xff] %vm8118_vm14, %v11687_v47  }
 0x2a8   :  { %v9410_v42 = vld [vmem:[#allocation1 + $0x302] ss:$16 sm:%s9409_s25]   ;;  %v11693_v61 = vunpack.i.h.bf16 %v11691_v38  ;;  %v11692_v22 = vunpack.i.l.bf16 %v11691_v38  ;;  %v9568_v9 = vld [vmem:[#allocation1 + $0x1] ss:$16 sm:%s9567_s16]   ;;  %s9575_s8 = smov 48  ;;  %s9580_s25 = smov 192 }
 0x2a9   :  { %v9412_v53 = vsel %vm4101_vm0, %v9410_v42, %v9407_v34  ;;  %v9415_v54 = vld [vmem:[#allocation1 + $0x302] ss:$16 sm:%s9414_s9]   ;;  %v9576_v42 = vld [vmem:[#allocation1 + $0x1] ss:$16 sm:%s9575_s8]   ;;  %s9589_s9 = smov 3  ;;  %s9735_s16 = smov 48 }
 0x2aa   :  { %v9420_v40 = vld [vmem:[#allocation1 + $0x302] ss:$16 sm:%s9419_s0]   ;;  %11820 = vrot.lane.b32.xlu1 %v11819_v57, %s11993_s21  ;;  %v9417_v59 = vsel %vm4105_vm1, %v9415_v54, %v9412_v53  ;;  %v9571_v57 = vld [vmem:[#allocation1 + $0x1] ss:$16 sm:%s9570_s7]   ;;  %v11696_v53 = vpop.permute.xlu0 %11695  ;;  %s9592_s0 = smov 12  ;;  %8165 = vst.msk [vmem:[#allocation0 + $0x40] sm:$0xff] %vm8118_vm14, %v11692_v22  }
 0x2ab   :  { %v9430_v0 = vld [vmem:[#allocation1 + $0x502] ss:$16 sm:%s9429_s4]   ;;  %v9422_v11 = vsel %vm4109_vm2, %v9420_v40, %v9417_v59  ;;  %v9573_v34 = vsel %vm4101_vm0, %v9571_v57, %v9568_v9  ;;  %v9590_v59 = vld [vmem:[#allocation1 + $0x201] ss:$16 sm:%s9589_s9]   ;;  %s9597_s4 = smov 48  ;;  %8188 = vst.msk [vmem:[#allocation0 + $0x60] sm:$0xff] %vm8118_vm14, %v11693_v61  }
 0x2ac   :  { %v9433_v1 = vld [vmem:[#allocation1 + $0x502] ss:$16 sm:%s9432_s6]   ;;  %v11824_v46 = vpack.i.bf16 %v9422_v11, %v9399_v43  ;;  %v9581_v43 = vld [vmem:[#allocation1 + $0x1] ss:$16 sm:%s9580_s25]   ;;  %v9578_v40 = vsel %vm4105_vm1, %v9576_v42, %v9573_v34  ;;  %s9602_s6 = smov 192  ;;  %v11697_v11 = vunpack.i.l.bf16 %v11696_v53  ;;  %s9740_s7 = smov 192 }
 0x2ad   :  { %v9435_v12 = vsel %vm4101_vm0, %v9433_v1, %v9430_v0  ;;  %v9438_v17 = vld [vmem:[#allocation1 + $0x502] ss:$16 sm:%s9437_s26]   ;;  %v11698_v0 = vunpack.i.h.bf16 %v11696_v53  ;;  %v9593_v1 = vld [vmem:[#allocation1 + $0x201] ss:$16 sm:%s9592_s0]   ;;  %s9612_s26 = smov 3  ;;  %s9750_s8 = smov 3 }
 0x2ae   :  { %v9443_v63 = vld [vmem:[#allocation1 + $0x502] ss:$16 sm:%s9442_s15]   ;;  %v9440_v51 = vsel %vm4105_vm1, %v9438_v17, %v9435_v12  ;;  %11825 = vrot.lane.b32.xlu0 %v11824_v46, %s11993_s21  ;;  %v9598_v10 = vld [vmem:[#allocation1 + $0x201] ss:$16 sm:%s9597_s4]   ;;  %v9583_v12 = vsel %vm4109_vm2, %v9581_v43, %v9578_v40  ;;  %v9595_v17 = vsel %vm4101_vm0, %v9593_v1, %v9590_v59  ;;  %s9620_s15 = smov 48  ;;  %8211 = vst.msk [vmem:[#allocation0 + $0x8] sm:$0xff] %vm8118_vm14, %v11697_v11  }
 0x2af   :  { %v9453_v62 = vld [vmem:[#allocation1 + $0x702] ss:$16 sm:%s9452_s13]   ;;  %v9445_v55 = vsel %vm4109_vm2, %v9443_v63, %v9440_v51  ;;  %v9603_v63 = vld [vmem:[#allocation1 + $0x201] ss:$16 sm:%s9602_s6]   ;;  %8234 = vst.msk [vmem:[#allocation0 + $0x28] sm:$0xff] %vm8118_vm14, %v11698_v0   ;;  %v9600_v56 = vsel %vm4105_vm1, %v9598_v10, %v9595_v17  ;;  %s9625_s13 = smov 192 }
 0x2b0   :  { %v9456_v33 = vld [vmem:[#allocation1 + $0x702] ss:$16 sm:%s9455_s19]   ;;  %v9613_v37 = vld [vmem:[#allocation1 + $0x401] ss:$16 sm:%s9612_s26]   ;;  %s9635_s19 = smov 3  ;;  %s9753_s25 = smov 12 }
 0x2b1   :  { %v9458_v13 = vsel %vm4101_vm0, %v9456_v33, %v9453_v62  ;;  %v9461_v6 = vld [vmem:[#allocation1 + $0x702] ss:$16 sm:%s9460_s5]   ;;  %v9621_v51 = vld [vmem:[#allocation1 + $0x401] ss:$16 sm:%s9620_s15]   ;;  %v11701_v62 = vpop.permute.xlu1 %11700  ;;  %v9605_v33 = vsel %vm4109_vm2, %v9603_v63, %v9600_v56  ;;  %s9638_s5 = smov 12  ;;  %s9758_s9 = smov 48 }
 0x2b2   :  { %v9466_v15 = vld [vmem:[#allocation1 + $0x702] ss:$16 sm:%s9465_s20]   ;;  %v9463_v27 = vsel %vm4105_vm1, %v9461_v6, %v9458_v13  ;;  %v9626_v13 = vld [vmem:[#allocation1 + $0x401] ss:$16 sm:%s9625_s13]   ;;  %s9643_s20 = smov 48  ;;  %s9763_s0 = smov 192 }
 0x2b3   :  { %v9476_v30 = vld [vmem:[#allocation1 + $0x182] ss:$16 sm:%s9475_s23]   ;;  %v9468_v29 = vsel %vm4109_vm2, %v9466_v15, %v9463_v27  ;;  %v9636_v6 = vld [vmem:[#allocation1 + $0x601] ss:$16 sm:%s9635_s19]   ;;  %v11703_v15 = vunpack.i.h.bf16 %v11701_v62  ;;  %v11702_v27 = vunpack.i.l.bf16 %v11701_v62  ;;  %s9648_s23 = smov 192  ;;  %s9773_s4 = smov 3 }
 0x2b4   :  { %v9479_v28 = vld [vmem:[#allocation1 + $0x182] ss:$16 sm:%s9478_s27]   ;;  %v11829_v41 = vpack.i.bf16 %v9468_v29, %v9445_v55  ;;  %v9639_v29 = vld [vmem:[#allocation1 + $0x601] ss:$16 sm:%s9638_s5]   ;;  %s9658_s27 = smov 3  ;;  %s9776_s6 = smov 12 }
 0x2b5   :  { %v9481_v36 = vsel %vm4101_vm0, %v9479_v28, %v9476_v30  ;;  %v9484_v44 = vld [vmem:[#allocation1 + $0x182] ss:$16 sm:%s9483_s24]   ;;  %v11844_v30 = vpack.i.bf16 %v9605_v33, %v9583_v12  ;;  %v9649_v21 = vld [vmem:[#allocation1 + $0x601] ss:$16 sm:%s9648_s23]   ;;  %s9661_s24 = smov 12  ;;  %8257 = vst.msk [vmem:[#allocation0 + $0x48] sm:$0xff] %vm8118_vm14, %v11702_v27  }
 0x2b6   :  { %v9489_v60 = vld [vmem:[#allocation1 + $0x182] ss:$16 sm:%s9488_s2]   ;;  %v9486_v31 = vsel %vm4105_vm1, %v9484_v44, %v9481_v36  ;;  %11830 = vrot.lane.b32.xlu1 %v11829_v41, %s11993_s21  ;;  %v9644_v36 = vld [vmem:[#allocation1 + $0x601] ss:$16 sm:%s9643_s20]   ;;  %s9666_s2 = smov 48  ;;  %8280 = vst.msk [vmem:[#allocation0 + $0x68] sm:$0xff] %vm8118_vm14, %v11703_v15  }
 0x2b7   :  { %v9499_v39 = vld [vmem:[#allocation1 + $0x382] ss:$16 sm:%s9498_s1]   ;;  %v9491_v5 = vsel %vm4109_vm2, %v9489_v60, %v9486_v31  ;;  %v9641_v60 = vsel %vm4101_vm0, %v9639_v29, %v9636_v6  ;;  %v9659_v41 = vld [vmem:[#allocation1 + $0x81] ss:$16 sm:%s9658_s27]   ;;  %s11994_s1 = smov 8   ;;  %s9781_s26 = smov 48 }
 0x2b8   :  { %v9502_v25 = vld [vmem:[#allocation1 + $0x382] ss:$16 sm:%s9501_s22]   ;;  %v9646_v31 = vsel %vm4105_vm1, %v9644_v36, %v9641_v60  ;;  %s9671_s22 = smov 192  ;;  %v9736_v34 = vld [vmem:[#allocation1 + $0x681] ss:$16 sm:%s9735_s16]   ;;  %s9796_s15 = smov 3 }
 0x2b9   :  { %v9504_v24 = vsel %vm4101_vm0, %v9502_v25, %v9499_v39  ;;  %v9507_v7 = vld [vmem:[#allocation1 + $0x382] ss:$16 sm:%s9506_s14]   ;;  %v9662_v39 = vld [vmem:[#allocation1 + $0x81] ss:$16 sm:%s9661_s24]   ;;  %s9681_s14 = smov 3  ;;  %s9799_s13 = smov 12 }
 0x2ba   :  { %v9512_v3 = vld [vmem:[#allocation1 + $0x382] ss:$16 sm:%s9511_s17]   ;;  %v9509_v26 = vsel %vm4105_vm1, %v9507_v7, %v9504_v24  ;;  %v9667_v25 = vld [vmem:[#allocation1 + $0x81] ss:$16 sm:%s9666_s2]   ;;  %v9651_v24 = vsel %vm4109_vm2, %v9649_v21, %v9646_v31  ;;  %v9664_v7 = vsel %vm4101_vm0, %v9662_v39, %v9659_v41  ;;  %s9684_s17 = smov 12  ;;  %s9804_s19 = smov 48 }
 0x2bb   :  { %v9522_v2 = vld [vmem:[#allocation1 + $0x582] ss:$16 sm:%s9521_s3]   ;;  %v9514_v19 = vsel %vm4109_vm2, %v9512_v3, %v9509_v26  ;;  %v9672_v3 = vld [vmem:[#allocation1 + $0x81] ss:$16 sm:%s9671_s22]   ;;  %s9689_s3 = smov 48  ;;  %s9809_s5 = smov 192 }
 0x2bc   :  { %v9525_v14 = vld [vmem:[#allocation1 + $0x582] ss:$16 sm:%s9524_s11]   ;;  %v11834_v45 = vpack.i.bf16 %v9514_v19, %v9491_v5  ;;  %v11706_v5 = vpop.permute.xlu0 %11705  ;;  %v9682_v26 = vld [vmem:[#allocation1 + $0x281] ss:$16 sm:%s9681_s14]   ;;  %s9694_s11 = smov 192  ;;  %s9819_s20 = smov 3 }
 0x2bd   :  { %v9527_v8 = vsel %vm4101_vm0, %v9525_v14, %v9522_v2  ;;  %v9530_v32 = vld [vmem:[#allocation1 + $0x582] ss:$16 sm:%s9529_s30]   ;;  %v11708_v2 = vunpack.i.h.bf16 %v11706_v5  ;;  %v11707_v14 = vunpack.i.l.bf16 %v11706_v5  ;;  %s9704_s30 = smov 3  ;;  %v9741_v53 = vld [vmem:[#allocation1 + $0x681] ss:$16 sm:%s9740_s7]   ;;  %s9822_s23 = smov 12 }
 0x2be   :  { %v9535_v49 = vld [vmem:[#allocation1 + $0x582] ss:$16 sm:%s9534_s29]   ;;  %v9532_v52 = vsel %vm4105_vm1, %v9530_v32, %v9527_v8  ;;  %11835 = vrot.lane.b32.xlu0 %v11834_v45, %s11993_s21  ;;  %v9669_v8 = vsel %vm4105_vm1, %v9667_v25, %v9664_v7  ;;  %v9685_v32 = vld [vmem:[#allocation1 + $0x281] ss:$16 sm:%s9684_s17]   ;;  %s9707_s29 = smov 12  ;;  %s9827_s27 = smov 48 }
 0x2bf   :  { %v9545_v16 = vld [vmem:[#allocation1 + $0x782] ss:$16 sm:%s9544_s10]   ;;  %v9537_v48 = vsel %vm4109_vm2, %v9535_v49, %v9532_v52  ;;  %v9690_v49 = vld [vmem:[#allocation1 + $0x281] ss:$16 sm:%s9689_s3]   ;;  %v9674_v38 = vsel %vm4109_vm2, %v9672_v3, %v9669_v8  ;;  %v9687_v45 = vsel %vm4101_vm0, %v9685_v32, %v9682_v26  ;;  %s9712_s10 = smov 48  ;;  %8303 = vst.msk [vmem:[#allocation0 + $0x10] sm:$0xff] %vm8118_vm14, %v11707_v14  }
 0x2c0   :  { %v9548_v18 = vld [vmem:[#allocation1 + $0x782] ss:$16 sm:%s9547_s18]   ;;  %v9695_v52 = vld [vmem:[#allocation1 + $0x281] ss:$16 sm:%s9694_s11]   ;;  %8326 = vst.msk [vmem:[#allocation0 + $0x30] sm:$0xff] %vm8118_vm14, %v11708_v2   ;;  %s9717_s18 = smov 192  ;;  %v11716_v1 = vpop.permute.xlu0 %11715 }
 0x2c1   :  { %v9550_v20 = vsel %vm4101_vm0, %v9548_v18, %v9545_v16  ;;  %v9553_v4 = vld [vmem:[#allocation1 + $0x782] ss:$16 sm:%s9552_s12]   ;;  %v9705_v16 = vld [vmem:[#allocation1 + $0x481] ss:$16 sm:%s9704_s30]   ;;  %v9692_v18 = vsel %vm4105_vm1, %v9690_v49, %v9687_v45  ;;  %s9727_s12 = smov 3  ;;  %v11718_v63 = vunpack.i.h.bf16 %v11716_v1  ;;  %s9832_s24 = smov 192 }
 0x2c2   :  { %v9558_v35 = vld [vmem:[#allocation1 + $0x782] ss:$16 sm:%s9557_s28]   ;;  %v9555_v23 = vsel %vm4105_vm1, %v9553_v4, %v9550_v20  ;;  %11845 = vrot.lane.b32.xlu0 %v11844_v30, %s11994_s1  ;;  %v9708_v50 = vld [vmem:[#allocation1 + $0x481] ss:$16 sm:%s9707_s29]   ;;  %v9697_v20 = vsel %vm4109_vm2, %v9695_v52, %v9692_v18  ;;  %s9730_s28 = smov 12  ;;  %s9842_s2 = smov 3 }
 0x2c3   :  { %v9560_v58 = vsel %vm4109_vm2, %v9558_v35, %v9555_v23  ;;  %v9713_v47 = vld [vmem:[#allocation1 + $0x481] ss:$16 sm:%s9712_s10]   ;;  %v9710_v4 = vsel %vm4101_vm0, %v9708_v50, %v9705_v16  ;;  %v11854_v9 = vpack.i.bf16 %v9697_v20, %v9674_v38  ;;  %8418 = vst.msk [vmem:[#allocation0 + $0x38] sm:$0xff] %vm8118_vm14, %v11718_v63   ;;  %s9845_s22 = smov 12  ;;  %s9850_s14 = smov 48 }
 0x2c4   :  { %v11839_v54 = vpack.i.bf16 %v9560_v58, %v9537_v48  ;;  %v11711_v48 = vpop.permute.xlu1 %11710  ;;  %v9718_v35 = vld [vmem:[#allocation1 + $0x481] ss:$16 sm:%s9717_s18]   ;;  %v9715_v57 = vsel %vm4105_vm1, %v9713_v47, %v9710_v4  ;;  %s9855_s17 = smov 192  ;;  %s9865_s3 = smov 3  ;;  %v11726_v8 = vpop.permute.xlu0 %11725 }
 0x2c5   :  { %v9728_v61 = vld [vmem:[#allocation1 + $0x681] ss:$16 sm:%s9727_s12]   ;;  %v11713_v22 = vunpack.i.h.bf16 %v11711_v48  ;;  %v11712_v23 = vunpack.i.l.bf16 %v11711_v48  ;;  %v9720_v42 = vsel %vm4109_vm2, %v9718_v35, %v9715_v57  ;;  %s9868_s11 = smov 12  ;;  %s9873_s30 = smov 48  ;;  %v11728_v35 = vunpack.i.h.bf16 %v11726_v8 }
 0x2c6   :  { %11840 = vrot.lane.b32.xlu1 %v11839_v54, %s11993_s21  ;;  %s9615_s21 = smov 12  ;;  %v9731_v58 = vld [vmem:[#allocation1 + $0x681] ss:$16 sm:%s9730_s28]   ;;  %11855 = vrot.lane.b32.xlu0 %v11854_v9, %s11994_s1  ;;  %s9878_s29 = smov 192 }
 0x2c7   :  { %v9616_v46 = vld [vmem:[#allocation1 + $0x401] ss:$16 sm:%s9615_s21]   ;;  %v9733_v43 = vsel %vm4101_vm0, %v9731_v58, %v9728_v61  ;;  %8349 = vst.msk [vmem:[#allocation0 + $0x50] sm:$0xff] %vm8118_vm14, %v11712_v23   ;;  %8372 = vst.msk [vmem:[#allocation0 + $0x70] sm:$0xff] %vm8118_vm14, %v11713_v22   ;;  %s9786_s21 = smov 192  ;;  %s9888_s10 = smov 3  ;;  %v11727_v61 = vunpack.i.l.bf16 %v11726_v8 }
 0x2c8   :  { %v9618_v55 = vsel %vm4101_vm0, %v9616_v46, %v9613_v37  ;;  %v9751_v54 = vld [vmem:[#allocation1 + $0x101] ss:$16 sm:%s9750_s8]   ;;  %v9738_v40 = vsel %vm4105_vm1, %v9736_v34, %v9733_v43  ;;  %v11717_v37 = vunpack.i.l.bf16 %v11716_v1  ;;  %s9891_s18 = smov 12  ;;  %s9896_s12 = smov 48  ;;  %8509 = vst.msk [vmem:[#allocation0 + $0x20] sm:$0xff] %vm8485_vm15, %v11728_v35   ;;  %v11736_v63 = vpop.permute.xlu0 %11735 }
 0x2c9   :  { %v9623_v28 = vsel %vm4105_vm1, %v9621_v51, %v9618_v55  ;;  %v9754_v59 = vld [vmem:[#allocation1 + $0x101] ss:$16 sm:%s9753_s25]   ;;  %v9743_v10 = vsel %vm4109_vm2, %v9741_v53, %v9738_v40  ;;  %s9901_s28 = smov 192  ;;  %s9911_s16 = smov 3  ;;  %8486 = vst.msk [vmem:[#allocation0] sm:$0xff] %vm8485_vm15, %v11727_v61  }
 0x2ca   :  { %v9628_v44 = vsel %vm4109_vm2, %v9626_v13, %v9623_v28  ;;  %v9759_v0 = vld [vmem:[#allocation1 + $0x101] ss:$16 sm:%s9758_s9]   ;;  %v9756_v11 = vsel %vm4101_vm0, %v9754_v59, %v9751_v54  ;;  %v11859_v56 = vpack.i.bf16 %v9743_v10, %v9720_v42  ;;  %8395 = vst.msk [vmem:[#allocation0 + $0x18] sm:$0xff] %vm8118_vm14, %v11717_v37   ;;  %v11721_v28 = vpop.permute.xlu1 %11720  ;;  %s9914_s7 = smov 12  ;;  %s9919_s8 = smov 48 }
 0x2cb   :  { %v11849_v19 = vpack.i.bf16 %v9651_v24, %v9628_v44  ;;  %v9764_v12 = vld [vmem:[#allocation1 + $0x101] ss:$16 sm:%s9763_s0]   ;;  %v9761_v46 = vsel %vm4105_vm1, %v9759_v0, %v9756_v11  ;;  %v11723_v21 = vunpack.i.h.bf16 %v11721_v28  ;;  %v11722_v41 = vunpack.i.l.bf16 %v11721_v28  ;;  %s9924_s25 = smov 192  ;;  %s14558_s0 = sld [smem:[#allocation11_spill]] }
 0x2cc   :  { %v9774_v17 = vld [vmem:[#allocation1 + $0x301] ss:$16 sm:%s9773_s4]   ;;  %v9766_v33 = vsel %vm4109_vm2, %v9764_v12, %v9761_v46  ;;  %v11737_v46 = vunpack.i.l.bf16 %v11736_v63 }
 0x2cd   :  { %11850 = vrot.lane.b32.xlu1 %v11849_v19, %s11994_s1  ;;  %v9777_v51 = vld [vmem:[#allocation1 + $0x301] ss:$16 sm:%s9776_s6]   ;;  %8441 = vst.msk [vmem:[#allocation0 + $0x58] sm:$0xff] %vm8118_vm14, %v11722_v41   ;;  %8464 = vst.msk [vmem:[#allocation0 + $0x78] sm:$0xff] %vm8118_vm14, %v11723_v21  }
 0x2ce   :  { %v9782_v62 = vld [vmem:[#allocation1 + $0x301] ss:$16 sm:%s9781_s26]   ;;  %v9779_v55 = vsel %vm4101_vm0, %v9777_v51, %v9774_v17  ;;  %v11731_v57 = vpop.permute.xlu1 %11730  ;;  %8578 = vst.msk [vmem:[#allocation0 + $0x8] sm:$0xff] %vm8485_vm15, %v11737_v46  }
 0x2cf   :  { %v9787_v13 = vld [vmem:[#allocation1 + $0x301] ss:$16 sm:%s9786_s21]   ;;  %v9784_v15 = vsel %vm4105_vm1, %v9782_v62, %v9779_v55  ;;  %v11733_v53 = vunpack.i.h.bf16 %v11731_v57  ;;  %v11732_v54 = vunpack.i.l.bf16 %v11731_v57 }
 0x2d0   :  { %v9797_v6 = vld [vmem:[#allocation1 + $0x501] ss:$16 sm:%s9796_s15]   ;;  %v9789_v29 = vsel %vm4109_vm2, %v9787_v13, %v9784_v15 }
 0x2d1   :  { %11860 = vrot.lane.b32.xlu1 %v11859_v56, %s11994_s1  ;;  %v9800_v27 = vld [vmem:[#allocation1 + $0x501] ss:$16 sm:%s9799_s13]   ;;  %v11864_v31 = vpack.i.bf16 %v9789_v29, %v9766_v33  ;;  %8532 = vst.msk [vmem:[#allocation0 + $0x40] sm:$0xff] %vm8485_vm15, %v11732_v54   ;;  %8555 = vst.msk [vmem:[#allocation0 + $0x60] sm:$0xff] %vm8485_vm15, %v11733_v53   ;;  %v11738_v56 = vunpack.i.h.bf16 %v11736_v63 }
 0x2d2   :  { %v9805_v30 = vld [vmem:[#allocation1 + $0x501] ss:$16 sm:%s9804_s19]   ;;  %v9802_v36 = vsel %vm4101_vm0, %v9800_v27, %v9797_v6  ;;  %v11741_v62 = vpop.permute.xlu1 %11740 }
 0x2d3   :  { %v9810_v44 = vld [vmem:[#allocation1 + $0x501] ss:$16 sm:%s9809_s5]   ;;  %v9807_v39 = vsel %vm4105_vm1, %v9805_v30, %v9802_v36  ;;  %11865 = vrot.lane.b32.xlu0 %v11864_v31, %s11994_s1  ;;  %8601 = vst.msk [vmem:[#allocation0 + $0x28] sm:$0xff] %vm8485_vm15, %v11738_v56   ;;  %v11743_v33 = vunpack.i.h.bf16 %v11741_v62  ;;  %v11742_v55 = vunpack.i.l.bf16 %v11741_v62 }
 0x2d4   :  { %v9820_v60 = vld [vmem:[#allocation1 + $0x701] ss:$16 sm:%s9819_s20]   ;;  %v9812_v24 = vsel %vm4109_vm2, %v9810_v44, %v9807_v39 }
 0x2d5   :  { %v9823_v25 = vld [vmem:[#allocation1 + $0x701] ss:$16 sm:%s9822_s23]   ;;  %8624 = vst.msk [vmem:[#allocation0 + $0x48] sm:$0xff] %vm8485_vm15, %v11742_v55   ;;  %8647 = vst.msk [vmem:[#allocation0 + $0x68] sm:$0xff] %vm8485_vm15, %v11743_v33  }
 0x2d6   :  { %v9828_v5 = vld [vmem:[#allocation1 + $0x701] ss:$16 sm:%s9827_s27]   ;;  %v9825_v7 = vsel %vm4101_vm0, %v9823_v25, %v9820_v60  ;;  %v11746_v13 = vpop.permute.xlu0 %11745 }
 0x2d7   :  { %v9833_v3 = vld [vmem:[#allocation1 + $0x701] ss:$16 sm:%s9832_s24]   ;;  %v9830_v2 = vsel %vm4105_vm1, %v9828_v5, %v9825_v7  ;;  %v11748_v6 = vunpack.i.h.bf16 %v11746_v13  ;;  %v11747_v15 = vunpack.i.l.bf16 %v11746_v13 }
 0x2d8   :  { %v9843_v26 = vld [vmem:[#allocation1 + $0x181] ss:$16 sm:%s9842_s2]   ;;  %v9835_v32 = vsel %vm4109_vm2, %v9833_v3, %v9830_v2 }
 0x2d9   :  { %v9846_v14 = vld [vmem:[#allocation1 + $0x181] ss:$16 sm:%s9845_s22]   ;;  %v11869_v52 = vpack.i.bf16 %v9835_v32, %v9812_v24  ;;  %8670 = vst.msk [vmem:[#allocation0 + $0x10] sm:$0xff] %vm8485_vm15, %v11747_v15   ;;  %8693 = vst.msk [vmem:[#allocation0 + $0x30] sm:$0xff] %vm8485_vm15, %v11748_v6  }
 0x2da   :  { %v9851_v19 = vld [vmem:[#allocation1 + $0x181] ss:$16 sm:%s9850_s14]   ;;  %v9848_v49 = vsel %vm4101_vm0, %v9846_v14, %v9843_v26 }
 0x2db   :  { %v9856_v38 = vld [vmem:[#allocation1 + $0x181] ss:$16 sm:%s9855_s17]   ;;  %v9853_v16 = vsel %vm4105_vm1, %v9851_v19, %v9848_v49  ;;  %11870 = vrot.lane.b32.xlu1 %v11869_v52, %s11994_s1 }
 0x2dc   :  { %v9866_v45 = vld [vmem:[#allocation1 + $0x381] ss:$16 sm:%s9865_s3]   ;;  %v9858_v47 = vsel %vm4109_vm2, %v9856_v38, %v9853_v16 }
 0x2dd   :  { %v9869_v18 = vld [vmem:[#allocation1 + $0x381] ss:$16 sm:%s9868_s11]  }
 0x2de   :  { %v9874_v50 = vld [vmem:[#allocation1 + $0x381] ss:$16 sm:%s9873_s30]   ;;  %v9871_v48 = vsel %vm4101_vm0, %v9869_v18, %v9866_v45  ;;  %v11751_v27 = vpop.permute.xlu1 %11750 }
 0x2df   :  { %v9879_v20 = vld [vmem:[#allocation1 + $0x381] ss:$16 sm:%s9878_s29]   ;;  %v9876_v22 = vsel %vm4105_vm1, %v9874_v50, %v9871_v48  ;;  %v11753_v30 = vunpack.i.h.bf16 %v11751_v27  ;;  %v11752_v28 = vunpack.i.l.bf16 %v11751_v27 }
 0x2e0   :  { %v9889_v4 = vld [vmem:[#allocation1 + $0x581] ss:$16 sm:%s9888_s10]   ;;  %v9881_v58 = vsel %vm4109_vm2, %v9879_v20, %v9876_v22 }
 0x2e1   :  { %v9892_v23 = vld [vmem:[#allocation1 + $0x581] ss:$16 sm:%s9891_s18]   ;;  %v11874_v40 = vpack.i.bf16 %v9881_v58, %v9858_v47  ;;  %8716 = vst.msk [vmem:[#allocation0 + $0x50] sm:$0xff] %vm8485_vm15, %v11752_v28   ;;  %8739 = vst.msk [vmem:[#allocation0 + $0x70] sm:$0xff] %vm8485_vm15, %v11753_v30  }
 0x2e2   :  { %v9897_v9 = vld [vmem:[#allocation1 + $0x581] ss:$16 sm:%s9896_s12]   ;;  %v9894_v34 = vsel %vm4101_vm0, %v9892_v23, %v9889_v4 }
 0x2e3   :  { %v9902_v42 = vld [vmem:[#allocation1 + $0x581] ss:$16 sm:%s9901_s28]   ;;  %v9899_v59 = vsel %vm4105_vm1, %v9897_v9, %v9894_v34  ;;  %11875 = vrot.lane.b32.xlu0 %v11874_v40, %s11994_s1 }
 0x2e4   :  { %v9912_v43 = vld [vmem:[#allocation1 + $0x781] ss:$16 sm:%s9911_s16]   ;;  %v9904_v10 = vsel %vm4109_vm2, %v9902_v42, %v9899_v59 }
 0x2e5   :  { %v9915_v0 = vld [vmem:[#allocation1 + $0x781] ss:$16 sm:%s9914_s7]  }
 0x2e6   :  { %v9920_v1 = vld [vmem:[#allocation1 + $0x781] ss:$16 sm:%s9919_s8]   ;;  %v9917_v11 = vsel %vm4101_vm0, %v9915_v0, %v9912_v43  ;;  %v11756_v29 = vpop.permute.xlu0 %11755  ;;  %vm8852_vm0 = vcmask 261312  }
 0x2e7   :  { %v9925_v12 = vld [vmem:[#allocation1 + $0x781] ss:$16 sm:%s9924_s25]   ;;  %v9922_v17 = vsel %vm4105_vm1, %v9920_v1, %v9917_v11  ;;  %v11758_v36 = vunpack.i.h.bf16 %v11756_v29  ;;  %v11757_v44 = vunpack.i.l.bf16 %v11756_v29  ;;  %vm9219_vm1 = vcmask 195712  }
 0x2e8   :  { %v9927_v37 = vsel %vm4109_vm2, %v9925_v12, %v9922_v17  ;;  %vm9586_vm2 = vcmask 130112  }
 0x2e9   :  { %v11879_v51 = vpack.i.bf16 %v9927_v37, %v9904_v10  ;;  %8762 = vst.msk [vmem:[#allocation0 + $0x18] sm:$0xff] %vm8485_vm15, %v11757_v44   ;;  %8785 = vst.msk [vmem:[#allocation0 + $0x38] sm:$0xff] %vm8485_vm15, %v11758_v36  }
 0x2ea   :  { %v11766_v31 = vpop.permute.xlu0 %11765 }
 0x2eb   :  { %11880 = vrot.lane.b32.xlu1 %v11879_v51, %s11994_s1  ;;  %v11768_v39 = vunpack.i.h.bf16 %v11766_v31  ;;  %v11767_v25 = vunpack.i.l.bf16 %v11766_v31 }
 0x2ed   :  { %8853 = vst.msk [vmem:[#allocation0] sm:$0xff] %vm8852_vm0, %v11767_v25   ;;  %8876 = vst.msk [vmem:[#allocation0 + $0x20] sm:$0xff] %vm8852_vm0, %v11768_v39  }
 0x2ee   :  { %v11761_v60 = vpop.permute.xlu1 %11760  ;;  %v11776_v3 = vpop.permute.xlu0 %11775 }
 0x2ef   :  { %v11763_v21 = vunpack.i.h.bf16 %v11761_v60  ;;  %v11762_v41 = vunpack.i.l.bf16 %v11761_v60  ;;  %v11778_v26 = vunpack.i.h.bf16 %v11776_v3  ;;  %v11777_v2 = vunpack.i.l.bf16 %v11776_v3 }
 0x2f1   :  { %8808 = vst.msk [vmem:[#allocation0 + $0x58] sm:$0xff] %vm8485_vm15, %v11762_v41   ;;  %8831 = vst.msk [vmem:[#allocation0 + $0x78] sm:$0xff] %vm8485_vm15, %v11763_v21  }
 0x2f2   :  { %8945 = vst.msk [vmem:[#allocation0 + $0x8] sm:$0xff] %vm8852_vm0, %v11777_v2   ;;  %8968 = vst.msk [vmem:[#allocation0 + $0x28] sm:$0xff] %vm8852_vm0, %v11778_v26  }
 0x2f5   :  { %v11771_v5 = vpop.permute.xlu1 %11770 }
 0x2f6   :  { %v11773_v24 = vunpack.i.h.bf16 %v11771_v5  ;;  %v11772_v7 = vunpack.i.l.bf16 %v11771_v5 }
 0x2f8   :  { %8899 = vst.msk [vmem:[#allocation0 + $0x40] sm:$0xff] %vm8852_vm0, %v11772_v7   ;;  %8922 = vst.msk [vmem:[#allocation0 + $0x60] sm:$0xff] %vm8852_vm0, %v11773_v24  }
 0x2f9   :  { %v11781_v14 = vpop.permute.xlu1 %11780 }
 0x2fa   :  { %v11783_v19 = vunpack.i.h.bf16 %v11781_v14  ;;  %v11782_v8 = vunpack.i.l.bf16 %v11781_v14  ;;  %v11786_v32 = vpop.permute.xlu0 %11785 }
 0x2fb   :  { %v11788_v49 = vunpack.i.h.bf16 %v11786_v32  ;;  %v11787_v38 = vunpack.i.l.bf16 %v11786_v32 }
 0x2fc   :  { %8991 = vst.msk [vmem:[#allocation0 + $0x48] sm:$0xff] %vm8852_vm0, %v11782_v8   ;;  %9014 = vst.msk [vmem:[#allocation0 + $0x68] sm:$0xff] %vm8852_vm0, %v11783_v19  }
 0x2fd   :  { %9037 = vst.msk [vmem:[#allocation0 + $0x10] sm:$0xff] %vm8852_vm0, %v11787_v38   ;;  %9060 = vst.msk [vmem:[#allocation0 + $0x30] sm:$0xff] %vm8852_vm0, %v11788_v49  }
 0x302   :  { %v11791_v45 = vpop.permute.xlu1 %11790 }
 0x303   :  { %v11793_v52 = vunpack.i.h.bf16 %v11791_v45  ;;  %v11792_v16 = vunpack.i.l.bf16 %v11791_v45 }
 0x305   :  { %9083 = vst.msk [vmem:[#allocation0 + $0x50] sm:$0xff] %vm8852_vm0, %v11792_v16   ;;  %9106 = vst.msk [vmem:[#allocation0 + $0x70] sm:$0xff] %vm8852_vm0, %v11793_v52  }
 0x30a   :  { %v11796_v18 = vpop.permute.xlu0 %11795 }
 0x30b   :  { %v11798_v50 = vunpack.i.h.bf16 %v11796_v18  ;;  %v11797_v47 = vunpack.i.l.bf16 %v11796_v18 }
 0x30d   :  { %9129 = vst.msk [vmem:[#allocation0 + $0x18] sm:$0xff] %vm8852_vm0, %v11797_v47   ;;  %9152 = vst.msk [vmem:[#allocation0 + $0x38] sm:$0xff] %vm8852_vm0, %v11798_v50  }
 0x30e   :  { %v11806_v35 = vpop.permute.xlu0 %11805 }
 0x30f   :  { %v11808_v61 = vunpack.i.h.bf16 %v11806_v35  ;;  %v11807_v22 = vunpack.i.l.bf16 %v11806_v35 }
 0x311   :  { %9220 = vst.msk [vmem:[#allocation0] sm:$0xff] %vm9219_vm1, %v11807_v22   ;;  %9243 = vst.msk [vmem:[#allocation0 + $0x20] sm:$0xff] %vm9219_vm1, %v11808_v61  }
 0x312   :  { %v11801_v48 = vpop.permute.xlu1 %11800  ;;  %v11816_v58 = vpop.permute.xlu0 %11815 }
 0x313   :  { %v11803_v20 = vunpack.i.h.bf16 %v11801_v48  ;;  %v11802_v4 = vunpack.i.l.bf16 %v11801_v48  ;;  %v11818_v34 = vunpack.i.h.bf16 %v11816_v58  ;;  %v11817_v42 = vunpack.i.l.bf16 %v11816_v58 }
 0x315   :  { %9175 = vst.msk [vmem:[#allocation0 + $0x58] sm:$0xff] %vm8852_vm0, %v11802_v4   ;;  %9198 = vst.msk [vmem:[#allocation0 + $0x78] sm:$0xff] %vm8852_vm0, %v11803_v20  }
 0x316   :  { %9312 = vst.msk [vmem:[#allocation0 + $0x8] sm:$0xff] %vm9219_vm1, %v11817_v42   ;;  %9335 = vst.msk [vmem:[#allocation0 + $0x28] sm:$0xff] %vm9219_vm1, %v11818_v34  }
 0x318   :  { %v11811_v23 = vpop.permute.xlu1 %11810 }
 0x319   :  { %v11813_v9 = vunpack.i.h.bf16 %v11811_v23  ;;  %v11812_v57 = vunpack.i.l.bf16 %v11811_v23 }
 0x31b   :  { %9266 = vst.msk [vmem:[#allocation0 + $0x40] sm:$0xff] %vm9219_vm1, %v11812_v57   ;;  %9289 = vst.msk [vmem:[#allocation0 + $0x60] sm:$0xff] %vm9219_vm1, %v11813_v9  }
 0x31c   :  { %v11821_v43 = vpop.permute.xlu1 %11820 }
 0x31d   :  { %v11823_v53 = vunpack.i.h.bf16 %v11821_v43  ;;  %v11822_v54 = vunpack.i.l.bf16 %v11821_v43 }
 0x31f   :  { %9358 = vst.msk [vmem:[#allocation0 + $0x48] sm:$0xff] %vm9219_vm1, %v11822_v54   ;;  %9381 = vst.msk [vmem:[#allocation0 + $0x68] sm:$0xff] %vm9219_vm1, %v11823_v53  }
 0x320   :  { %v11826_v40 = vpop.permute.xlu0 %11825 }
 0x321   :  { %v11828_v59 = vunpack.i.h.bf16 %v11826_v40  ;;  %v11827_v0 = vunpack.i.l.bf16 %v11826_v40 }
 0x323   :  { %9404 = vst.msk [vmem:[#allocation0 + $0x10] sm:$0xff] %vm9219_vm1, %v11827_v0   ;;  %9427 = vst.msk [vmem:[#allocation0 + $0x30] sm:$0xff] %vm9219_vm1, %v11828_v59  }
 0x328   :  { %v11831_v1 = vpop.permute.xlu1 %11830 }
 0x329   :  { %v11833_v10 = vunpack.i.h.bf16 %v11831_v1  ;;  %v11832_v11 = vunpack.i.l.bf16 %v11831_v1 }
 0x32b   :  { %9450 = vst.msk [vmem:[#allocation0 + $0x50] sm:$0xff] %vm9219_vm1, %v11832_v11   ;;  %9473 = vst.msk [vmem:[#allocation0 + $0x70] sm:$0xff] %vm9219_vm1, %v11833_v10  }
 0x330   :  { %v11836_v12 = vpop.permute.xlu0 %11835 }
 0x331   :  { %v11838_v17 = vunpack.i.h.bf16 %v11836_v12  ;;  %v11837_v63 = vunpack.i.l.bf16 %v11836_v12 }
 0x333   :  { %9496 = vst.msk [vmem:[#allocation0 + $0x18] sm:$0xff] %vm9219_vm1, %v11837_v63   ;;  %9519 = vst.msk [vmem:[#allocation0 + $0x38] sm:$0xff] %vm9219_vm1, %v11838_v17  }
 0x334   :  { %v11846_v51 = vpop.permute.xlu0 %11845 }
 0x335   :  { %v11848_v62 = vunpack.i.h.bf16 %v11846_v51  ;;  %v11847_v33 = vunpack.i.l.bf16 %v11846_v51 }
 0x337   :  { %9587 = vst.msk [vmem:[#allocation0] sm:$0xff] %vm9586_vm2, %v11847_v33   ;;  %9610 = vst.msk [vmem:[#allocation0 + $0x20] sm:$0xff] %vm9586_vm2, %v11848_v62  }
 0x338   :  { %v11841_v37 = vpop.permute.xlu1 %11840  ;;  %v11856_v15 = vpop.permute.xlu0 %11855 }
 0x339   :  { %v11843_v56 = vunpack.i.h.bf16 %v11841_v37  ;;  %v11842_v46 = vunpack.i.l.bf16 %v11841_v37  ;;  %v11858_v27 = vunpack.i.h.bf16 %v11856_v15  ;;  %v11857_v30 = vunpack.i.l.bf16 %v11856_v15 }
 0x33b   :  { %9542 = vst.msk [vmem:[#allocation0 + $0x58] sm:$0xff] %vm9219_vm1, %v11842_v46   ;;  %9565 = vst.msk [vmem:[#allocation0 + $0x78] sm:$0xff] %vm9219_vm1, %v11843_v56  }
 0x33c   :  { %9679 = vst.msk [vmem:[#allocation0 + $0x8] sm:$0xff] %vm9586_vm2, %v11857_v30   ;;  %9702 = vst.msk [vmem:[#allocation0 + $0x28] sm:$0xff] %vm9586_vm2, %v11858_v27  }
 0x33e   :  { %v9937_v60 = vld [vmem:[#allocation0] sm:$0xff] }
 0x33f   :  { %v11851_v55 = vpop.permute.xlu1 %11850  ;;  %v9962_v31 = vld [vmem:[#allocation0 + $0x20] sm:$0xff] }
 0x340   :  { %v11853_v13 = vunpack.i.h.bf16 %v11851_v55  ;;  %v11852_v6 = vunpack.i.l.bf16 %v11851_v55 }
 0x342   :  { %9633 = vst.msk [vmem:[#allocation0 + $0x40] sm:$0xff] %vm9586_vm2, %v11852_v6   ;;  %9656 = vst.msk [vmem:[#allocation0 + $0x60] sm:$0xff] %vm9586_vm2, %v11853_v13  }
 0x343   :  { %v11861_v28 = vpop.permute.xlu1 %11860  ;;  %v9942_v39 = vld [vmem:[#allocation0 + $0x8] sm:$0xff] }
 0x344   :  { %v11863_v29 = vunpack.i.h.bf16 %v11861_v28  ;;  %v11862_v36 = vunpack.i.l.bf16 %v11861_v28  ;;  %v9969_v25 = vld [vmem:[#allocation0 + $0x28] sm:$0xff]  ;;  %v11098_v24 = vpack.c.bf16 %v9942_v39, %v9937_v60 }
 0x345   :  { %v11866_v44 = vpop.permute.xlu0 %11865  ;;  %v11108_v5 = vpack.c.bf16 %v9969_v25, %v9962_v31 }
 0x346   :  { %9725 = vst.msk [vmem:[#allocation0 + $0x48] sm:$0xff] %vm9586_vm2, %v11862_v36   ;;  %9748 = vst.msk [vmem:[#allocation0 + $0x68] sm:$0xff] %vm9586_vm2, %v11863_v29   ;;  %v11868_v21 = vunpack.i.h.bf16 %v11866_v44  ;;  %v11867_v41 = vunpack.i.l.bf16 %v11866_v44 }
 0x347   :  { %11263 = vst [vmem:[%s14558_s0 + $0x10] sm:$0xff] %v11108_v5   ;;  %11099 = vst [vmem:[%s14558_s0] sm:$0xff] %v11098_v24  }
 0x348   :  { %9771 = vst.msk [vmem:[#allocation0 + $0x10] sm:$0xff] %vm9586_vm2, %v11867_v41   ;;  %9794 = vst.msk [vmem:[#allocation0 + $0x30] sm:$0xff] %vm9586_vm2, %v11868_v21  }
 0x349   :  { %v9990_v3 = vld [vmem:[#allocation0 + $0x40] sm:$0xff] }
 0x34a   :  { %v10018_v14 = vld [vmem:[#allocation0 + $0x60] sm:$0xff] }
 0x34d   :  { %v11871_v7 = vpop.permute.xlu1 %11870  ;;  %v9997_v19 = vld [vmem:[#allocation0 + $0x48] sm:$0xff] }
 0x34e   :  { %v11873_v26 = vunpack.i.h.bf16 %v11871_v7  ;;  %v11872_v2 = vunpack.i.l.bf16 %v11871_v7  ;;  %v10025_v8 = vld [vmem:[#allocation0 + $0x68] sm:$0xff]  ;;  %v11118_v32 = vpack.c.bf16 %v9997_v19, %v9990_v3 }
 0x34f   :  { %v11128_v49 = vpack.c.bf16 %v10025_v8, %v10018_v14  ;;  %v9948_v47 = vld [vmem:[#allocation0 + $0x10] sm:$0xff] }
 0x350   :  { %9817 = vst.msk [vmem:[#allocation0 + $0x50] sm:$0xff] %vm9586_vm2, %v11872_v2   ;;  %9840 = vst.msk [vmem:[#allocation0 + $0x70] sm:$0xff] %vm9586_vm2, %v11873_v26   ;;  %v9976_v48 = vld [vmem:[#allocation0 + $0x30] sm:$0xff] }
 0x351   :  { %11265 = vst [vmem:[%s14558_s0 + $0x20] sm:$0xff] %v11118_v32   ;;  %11267 = vst [vmem:[%s14558_s0 + $0x30] sm:$0xff] %v11128_v49  }
 0x355   :  { %v11876_v38 = vpop.permute.xlu0 %11875 }
 0x356   :  { %v11878_v45 = vunpack.i.h.bf16 %v11876_v38  ;;  %v11877_v52 = vunpack.i.l.bf16 %v11876_v38 }
 0x357   :  { %v10004_v22 = vld [vmem:[#allocation0 + $0x50] sm:$0xff] }
 0x358   :  { %9863 = vst.msk [vmem:[#allocation0 + $0x18] sm:$0xff] %vm9586_vm2, %v11877_v52   ;;  %9886 = vst.msk [vmem:[#allocation0 + $0x38] sm:$0xff] %vm9586_vm2, %v11878_v45   ;;  %v10032_v23 = vld [vmem:[#allocation0 + $0x70] sm:$0xff] }
 0x35d   :  { %v11881_v16 = vpop.permute.xlu1 %11880 }
 0x35e   :  { %v11883_v18 = vunpack.i.h.bf16 %v11881_v16  ;;  %v11882_v50 = vunpack.i.l.bf16 %v11881_v16 }
 0x35f   :  { %v9955_v20 = vld [vmem:[#allocation0 + $0x18] sm:$0xff] }
 0x360   :  { %9909 = vst.msk [vmem:[#allocation0 + $0x58] sm:$0xff] %vm9586_vm2, %v11882_v50   ;;  %9932 = vst.msk [vmem:[#allocation0 + $0x78] sm:$0xff] %vm9586_vm2, %v11883_v18   ;;  %v9983_v4 = vld [vmem:[#allocation0 + $0x38] sm:$0xff]  ;;  %v11103_v35 = vpack.c.bf16 %v9955_v20, %v9948_v47 }
 0x361   :  { %v11113_v61 = vpack.c.bf16 %v9983_v4, %v9976_v48 }
 0x362   :  { %11262 = vst [vmem:[%s14558_s0 + $0x8] sm:$0xff] %v11103_v35  }
 0x363   :  { %11264 = vst [vmem:[%s14558_s0 + $0x18] sm:$0xff] %v11113_v61  }
 0x367   :  { %v10011_v9 = vld [vmem:[#allocation0 + $0x58] sm:$0xff] }
 0x368   :  { %v10039_v57 = vld [vmem:[#allocation0 + $0x78] sm:$0xff]  ;;  %v11123_v58 = vpack.c.bf16 %v10011_v9, %v10004_v22 }
 0x369   :  { %v11133_v34 = vpack.c.bf16 %v10039_v57, %v10032_v23 }
 0x36a   :  { %11266 = vst [vmem:[%s14558_s0 + $0x28] sm:$0xff] %v11123_v58  }
 0x36b   :  { %11268 = vst [vmem:[%s14558_s0 + $0x38] sm:$0xff] %v11133_v34  }

// kernel: up_forward.1
= control target key start
LH: loop header
LB: loop body
LE: loop exit
PB: predicated region body
PF: predicated region fallthrough
CT: control target
= control target key end

     0   :  { %vm39_vm0 = vcmask 130048   ;;  %v1330_v31 = vmov 0   ;;  %s1331_s22 = smov 64   ;;  %vm157_vm1 = vcmask 523264   ;;  %v460_v54 = vlaneseq  ;;  %s1333_s29 = smov 8   ;;  %s1771_s1 = inlined_call_operand.vmem [shape: f32[16,64], index: 1, kind: input, shape index: {}]   ;;  %s1772_s2 = inlined_call_operand.vmem [shape: f32[32,16], index: 2, kind: input, shape index: {}]   ;;  %s1773_s3 = inlined_call_operand.vmem [shape: bf16[128,384], index: 3, kind: input, shape index: {}]   ;;  %s1774_s0 = inlined_call_operand.vmem [shape: f32[32,64], index: 0, kind: input, shape index: {}]   ;;  %s1775_s4 = inlined_call_operand.vmem [shape: bf16[128,384], index: 4, kind: input, shape index: {}]   ;;  %s1776_s5 = inlined_call_operand.vmem [shape: f32[1,128], index: 5, kind: input, shape index: {}]   ;;  %s1777_s6 = inlined_call_operand.vmem [shape: f32[1,128], index: 6, kind: input, shape index: {}]   ;;  %s1778_s7 = inlined_call_operand.vmem [shape: f32[1,128], index: 7, kind: input, shape index: {}]   ;;  %s1779_s8 = inlined_call_operand.vmem [shape: f32[1,128], index: 8, kind: input, shape index: {}]   ;;  %s1780_s9 = inlined_call_operand.vmem [shape: f32[32,128], index: 9, kind: output, shape index: {}]  }
   0x1   :  { %v37_v0 = vld [vmem:[%s1771_s1] sm:$0xff]  ;;  %v38_v1 = vld [vmem:[%s1771_s1 + $0x8] sm:$0xff]  ;;  %v35_v5 = vld [vmem:[%s1772_s2 + $0x10] sm:$0xff]  ;;  %356 = vmatprep.mubr.bf16.mxu1 %v1330_v31  ;;  %vm430_vm2 = vcmask 1040384   ;;  %vm447_vm4 = vcmask 1046528   ;;  %s1334_s30 = smov 40  }
   0x2   :  { %v33_v2 = vld [vmem:[%s1772_s2] sm:$0xff]  ;;  %v1231_v3 = vpack.c.bf16 %v38_v1, %v37_v0  ;;  %v34_v4 = vld [vmem:[%s1772_s2 + $0x8] sm:$0xff]  ;;  %v36_v6 = vld [vmem:[%s1772_s2 + $0x18] sm:$0xff]  ;;  %v1508_v55 = vshrl.u32 %v460_v54, 7  ;;  %s1335_s10 = smov 16   ;;  %s1336_s11 = smov 56  }
   0x3   :  { %1185 = vmatprep.mubr.msk.f32.mxu0 %vm39_vm0, %v33_v2  ;;  %v1262_v7 = vld [vmem:[%s1773_s3 + $0x4] ss:$12 sps:$4 sm:$0xff]   ;;  %v1264_v8 = vld [vmem:[%s1773_s3] ss:$12 sps:$4 sm:$0xff]   ;;  %v1265_v9 = vld [vmem:[%s1773_s3 + $0x1c] ss:$12 sps:$4 sm:$0xff]  }
   0x4   :  { %1232 = vmatprep.subr.bf16.mxu0 %v1231_v3  ;;  %324 = vmatprep.subr.bf16.mxu1 %v1262_v7  ;;  %v1267_v10 = vld [vmem:[%s1773_s3 + $0x8] ss:$12 sps:$4 sm:$0xff]   ;;  %v1268_v11 = vld [vmem:[%s1773_s3 + $0x18] ss:$12 sps:$4 sm:$0xff]   ;;  %v1271_v13 = vld [vmem:[%s1773_s3 + $0x20] ss:$12 sps:$4 sm:$0xff]  }
   0x5   :  { %1234 = vmatpush3.bf16.msra.mxu0 %v1231_v3  ;;  %325 = vmatpush1.bf16.msra.mxu1 %v1264_v8  ;;  %v1269_v12 = vld [vmem:[%s1773_s3 + $0x34] ss:$12 sps:$4 sm:$0xff]   ;;  %v1272_v14 = vld [vmem:[%s1773_s3 + $0x30] ss:$12 sps:$4 sm:$0xff]   ;;  %v1275_v15 = vld [vmem:[%s1773_s3 + $0x38] ss:$12 sps:$4 sm:$0xff]  }
   0x6   :  { %326 = vmatprep.subr.bf16.mxu1 %v1265_v9  ;;  %1191 = vmatprep.subr.bf16.mxu0 %v1267_v10  ;;  %v1273_v16 = vld [vmem:[%s1773_s3 + $0x4c] ss:$12 sps:$4 sm:$0xff]   ;;  %v1276_v17 = vld [vmem:[%s1773_s3 + $0x48] ss:$12 sps:$4 sm:$0xff]   ;;  %v1279_v18 = vld [vmem:[%s1773_s3 + $0x50] ss:$12 sps:$4 sm:$0xff]  }
   0x7   :  { %v1277_v19 = vld [vmem:[%s1773_s3 + $0x64] ss:$12 sps:$4 sm:$0xff]   ;;  %v1280_v20 = vld [vmem:[%s1773_s3 + $0x60] ss:$12 sps:$4 sm:$0xff]   ;;  %v1281_v21 = vld [vmem:[%s1773_s3 + $0x7c] ss:$12 sps:$4 sm:$0xff]  }
   0x8   :  { %1186 = vmatmul.mubr.msk.f32.vlgmr.msra.gmra.mrb[0].mxu0 %vm39_vm0, %v34_v4  ;;  %v1283_v22 = vld [vmem:[%s1773_s3 + $0x68] ss:$12 sps:$4 sm:$0xff]   ;;  %v1284_v23 = vld [vmem:[%s1773_s3 + $0x78] ss:$12 sps:$4 sm:$0xff]   ;;  %v1287_v24 = vld [vmem:[%s1773_s3 + $0x80] ss:$12 sps:$4 sm:$0xff]  }
   0x9   :  { %1188 = vmatprep.mubr.msk.f32.mxu0 %vm39_vm0, %v35_v5  ;;  %1192 = vmatpush3.bf16.msra.mxu0 %v1267_v10  ;;  %v1285_v25 = vld [vmem:[%s1773_s3 + $0x94] ss:$12 sps:$4 sm:$0xff]   ;;  %v1288_v26 = vld [vmem:[%s1773_s3 + $0x90] ss:$12 sps:$4 sm:$0xff]   ;;  %v1289_v27 = vld [vmem:[%s1773_s3 + $0xac] ss:$12 sps:$4 sm:$0xff]  }
   0xa   :  { %327 = vmatpush1.bf16.msra.mxu1 %v1268_v11  ;;  %1193 = vmatprep.subr.bf16.mxu0 %v1271_v13  ;;  %v1291_v28 = vld [vmem:[%s1773_s3 + $0x98] ss:$12 sps:$4 sm:$0xff]   ;;  %v1292_v29 = vld [vmem:[%s1773_s3 + $0xa8] ss:$12 sps:$4 sm:$0xff]   ;;  %v1293_v30 = vld [vmem:[%s1773_s3 + $0xb0] ss:$12 sps:$4 sm:$0xff]  }
   0xb   :  { %328 = vmatprep.subr.bf16.mxu1 %v1269_v12  ;;  %v137_v39 = vld [vmem:[%s1774_s0] sm:$0xff]  ;;  %v138_v40 = vld [vmem:[%s1774_s0 + $0x8] sm:$0xff]  ;;  %v139_v46 = vld [vmem:[%s1774_s0 + $0x10] sm:$0xff]  ;;  %v469_v56 = vand.u32 15, %v1508_v55  ;;  %v462_v58 = vadd.s32 8, %v1508_v55  ;;  %v463_v62 = vadd.s32 16, %v1508_v55 }
   0xc   :  { %1189 = vmatmul.mubr.msk.f32.gmra.mrb[2].mxu0 %vm39_vm0, %v36_v6  ;;  %v140_v47 = vld [vmem:[%s1774_s0 + $0x18] sm:$0xff]  ;;  %v464_v6 = vadd.s32 24, %v1508_v55  ;;  %s1332_s0 = smov 24   ;;  %s1337_s12 = smov 32  }
   0xd   :  { %1194 = vmatpush3.bf16.msra.mxu0 %v1271_v13  ;;  %vm1512_vm3 = vcmp.eq.s32.totalorder %v469_v56, 0  ;;  %v476_v5 = vand.u32 15, %v462_v58  ;;  %v483_v10 = vand.u32 15, %v463_v62  ;;  %s1338_s13 = smov 72   ;;  %s1339_s14 = smov 48  }
   0xe   :  { %329 = vmatpush1.bf16.msra.mxu1 %v1272_v14  ;;  %1195 = vmatprep.subr.bf16.mxu0 %v1275_v15  ;;  %s1340_s15 = smov 88   ;;  %s1341_s16 = smov 104  }
   0xf   :  { %330 = vmatprep.subr.bf16.mxu1 %v1273_v16  ;;  %vm1522_vm5 = vcmp.eq.s32.totalorder %v476_v5, 15  ;;  %vm1527_vm6 = vcmp.eq.s32.totalorder %v483_v10, 0  ;;  %s1342_s17 = smov 80   ;;  %s1343_s18 = smov 120   ;;  %v1296_v5 = vld [vmem:[%s1775_s4 + $0x4] ss:$12 sps:$4 sm:$0xff]  }
  0x10   :  { %s1344_s19 = smov 96   ;;  %s1345_s1 = smov 112   ;;  %v1301_v10 = vld [vmem:[%s1775_s4 + $0x20] ss:$12 sps:$4 sm:$0xff]  }
  0x11   :  { %1196 = vmatpush3.bf16.msra.mxu0 %v1275_v15 }
  0x12   :  { %331 = vmatpush1.bf16.msra.mxu1 %v1276_v17  ;;  %1197 = vmatprep.subr.bf16.mxu0 %v1279_v18 }
  0x13   :  { %332 = vmatprep.subr.bf16.mxu1 %v1277_v19 }
  0x15   :  { %1198 = vmatpush3.bf16.msra.mxu0 %v1279_v18 }
  0x16   :  { %333 = vmatpush1.bf16.msra.mxu1 %v1280_v20  ;;  %1199 = vmatprep.subr.bf16.mxu0 %v1283_v22  ;;  %v490_v20 = vand.u32 15, %v464_v6  ;;  %v1294_v6 = vld [vmem:[%s1775_s4] ss:$12 sps:$4 sm:$0xff]  }
  0x17   :  { %334 = vmatprep.subr.bf16.mxu1 %v1281_v21 }
  0x18   :  { %vm1543_vm7 = vcmp.eq.s32.totalorder %v490_v20, 15  ;;  %v1313_v20 = vld [vmem:[%s1775_s4 + $0x68] ss:$12 sps:$4 sm:$0xff]  }
  0x19   :  { %1200 = vmatpush3.bf16.msra.mxu0 %v1283_v22 }
  0x1a   :  { %335 = vmatpush1.bf16.msra.mxu1 %v1284_v23  ;;  %1201 = vmatprep.subr.bf16.mxu0 %v1287_v24 }
  0x1b   :  { %336 = vmatprep.subr.bf16.mxu1 %v1285_v25 }
  0x1d   :  { %1202 = vmatpush3.bf16.msra.mxu0 %v1287_v24 }
  0x1e   :  { %337 = vmatpush1.bf16.msra.mxu1 %v1288_v26  ;;  %1203 = vmatprep.subr.bf16.mxu0 %v1291_v28 }
  0x1f   :  { %338 = vmatprep.subr.bf16.mxu1 %v1289_v27 }
  0x21   :  { %1204 = vmatpush3.bf16.msra.mxu0 %v1291_v28 }
  0x22   :  { %339 = vmatpush1.bf16.msra.mxu1 %v1292_v29  ;;  %1205 = vmatprep.subr.bf16.mxu0 %v1293_v30 }
  0x23   :  { %822 = vmatprep.subr.bf16.mxu1 %v1296_v5 }
  0x25   :  { %1206 = vmatpush3.bf16.msra.mxu0 %v1293_v30 }
  0xdb   :  { %v1187_v32 = vpop.f32.mrb[0].mxu0 }
  0xdc   :  { %v118_v33 = vpop.f32.mrb[1].mxu0 }
  0xdd   :  { %v1252_v34 = vpack.i.bf16 %v1187_v32, %v118_v33 }
  0xdf   :  { %1253 = vrot.lane.b32.xlu0 %v1252_v34, %s1331_s22  ;;  %v1190_v35 = vpop.f32.mrb[2].mxu0 }
  0xe0   :  { %v128_v36 = vpop.f32.mrb[3].mxu0 }
  0xe1   :  { %v1257_v37 = vpack.i.bf16 %v1190_v35, %v128_v36 }
  0xe3   :  { %1258 = vrot.lane.b32.xlu0 %v1257_v37, %s1331_s22 }
 0x151   :  { %v1254_v38 = vpop.permute.xlu0 %1253 }
 0x152   :  { %v1256_v41 = vunpack.i.h.bf16 %v1254_v38  ;;  %v1255_v42 = vunpack.i.l.bf16 %v1254_v38 }
 0x154   :  { %v158_v43 = vsel %vm157_vm1, %v137_v39, %v1255_v42  ;;  %v159_v44 = vsel %vm157_vm1, %v138_v40, %v1256_v41 }
 0x155   :  { %v1259_v45 = vpop.permute.xlu0 %1258  ;;  %v162_v48 = vpack.c.bf16 %v159_v44, %v158_v43 }
 0x156   :  { %v1261_v49 = vunpack.i.h.bf16 %v1259_v45  ;;  %v1260_v50 = vunpack.i.l.bf16 %v1259_v45 }
 0x157   :  { %357 = vmatmul.mubr.bf16.vlgmr.msra.gmra.mrb[0].mxu1 %v162_v48  ;;  %1207 = vmatprep.mubr.bf16.mxu0 %v162_v48 }
 0x158   :  { %v160_v51 = vsel %vm157_vm1, %v139_v46, %v1260_v50  ;;  %v161_v52 = vsel %vm157_vm1, %v140_v47, %v1261_v49  ;;  %366 = vmatprep.mubr.bf16.mxu1 %v1330_v31  ;;  %823 = vmatpush1.bf16.msra.mxu1 %v1294_v6 }
 0x159   :  { %v163_v53 = vpack.c.bf16 %v161_v52, %v160_v51 }
 0x15b   :  { %1208 = vmatmul.mubr.bf16.vlgmr.msra.gmra.mrb[4].mxu0 %v163_v53 }
 0x15f   :  { %367 = vmatmul.mubr.bf16.gmra.mrb[4].mxu1 %v163_v53 }
 0x160   :  { %854 = vmatprep.mubr.bf16.mxu1 %v1330_v31 }
 0x22a   :  { %v358_v57 = vpop.f32.mrb[0].mxu1 }
 0x22b   :  { %v431_v59 = vrot.slane %v358_v57, 7  ;;  %v360_v60 = vpop.f32.mrb[1].mxu1 }
 0x22c   :  { %v362_v63 = vpop.f32.mrb[2].mxu1 }
 0x22d   :  { %v442_v0 = vsel %vm430_vm2, 0.0, %v431_v59  ;;  %v432_v1 = vrot.slane %v362_v63, 7  ;;  %v364_v2 = vpop.f32.mrb[3].mxu1 }
 0x22e   :  { %v517_v3 = vsel %vm1512_vm3, 0.0, %v442_v0  ;;  %v1209_v4 = vpop.f32.mrb[4].mxu0 }
 0x22f   :  { %v521_v7 = vadd.f32 %v517_v3, %v360_v60  ;;  %v433_v8 = vsel %vm430_vm2, %v431_v59, %v432_v1  ;;  %v411_v9 = vpop.f32.mrb[5].mxu0  ;;  %v451_v13 = vrot.slane %v1209_v4, 1 }
 0x230   :  { %v522_v11 = vadd.f32 %v433_v8, %v364_v2  ;;  %v1210_v12 = vpop.f32.mrb[6].mxu0  ;;  %v448_v16 = vrot.slane %v411_v9, 1  ;;  %v1300_v8 = vld [vmem:[%s1775_s4 + $0x1c] ss:$12 sps:$4 sm:$0xff]   ;;  %v1298_v9 = vld [vmem:[%s1775_s4 + $0x18] ss:$12 sps:$4 sm:$0xff]  }
 0x231   :  { %v453_v14 = vrot.slane %v1210_v12, 1  ;;  %v414_v15 = vpop.f32.mrb[7].mxu0  ;;  %824 = vmatprep.subr.bf16.mxu1 %v1300_v8  ;;  %v1302_v12 = vld [vmem:[%s1775_s4 + $0x30] ss:$12 sps:$4 sm:$0xff]  }
 0x232   :  { %v449_v17 = vrot.slane %v414_v15, 1  ;;  %v368_v19 = vpop.f32.mrb[4].mxu1  ;;  %825 = vmatpush1.bf16.msra.mxu1 %v1298_v9  ;;  %v1306_v15 = vld [vmem:[%s1775_s4 + $0x48] ss:$12 sps:$4 sm:$0xff]  }
 0x233   :  { %v434_v21 = vrot.slane %v368_v19, 7  ;;  %v370_v22 = vpop.f32.mrb[5].mxu1  ;;  %v454_v23 = vsel %vm447_vm4, %v451_v13, %v453_v14  ;;  %v459_v34 = vsel %vm447_vm4, %v453_v14, 0.0  ;;  %v1308_v14 = vld [vmem:[%s1775_s4 + $0x4c] ss:$12 sps:$4 sm:$0xff]  }
 0x234   :  { %v450_v25 = vsel %vm447_vm4, %v448_v16, %v449_v17  ;;  %v452_v26 = vsel %vm447_vm4, %v449_v17, %v451_v13  ;;  %v372_v27 = vpop.f32.mrb[6].mxu1  ;;  %v532_v45 = vsel %vm1543_vm7, 0.0, %v459_v34  ;;  %v1305_v13 = vld [vmem:[%s1775_s4 + $0x38] ss:$12 sps:$4 sm:$0xff]   ;;  %v1309_v16 = vld [vmem:[%s1775_s4 + $0x50] ss:$12 sps:$4 sm:$0xff]  }
 0x235   :  { %v530_v28 = vsel %vm1522_vm5, 0.0, %v452_v26  ;;  %v1535_v29 = vadd.f32 %v521_v7, %v450_v25  ;;  %v435_v30 = vsel %vm430_vm2, %v432_v1, %v434_v21  ;;  %v436_v32 = vrot.slane %v372_v27, 7  ;;  %v374_v33 = vpop.f32.mrb[7].mxu1  ;;  %v1297_v7 = vld [vmem:[%s1775_s4 + $0x8] ss:$12 sps:$4 sm:$0xff]  }
 0x236   :  { %v1539_v35 = vadd.f32 %v530_v28, %v522_v11  ;;  %v519_v36 = vsel %vm1527_vm6, 0.0, %v435_v30  ;;  %1211 = vmatprep.subr.bf16.mxu0 %v1297_v7  ;;  %v1304_v11 = vld [vmem:[%s1775_s4 + $0x34] ss:$12 sps:$4 sm:$0xff]   ;;  %v1312_v17 = vld [vmem:[%s1775_s4 + $0x64] ss:$12 sps:$4 sm:$0xff]  }
 0x237   :  { %v548_v38 = vmul.f32 %v1535_v29, %v1535_v29  ;;  %v523_v39 = vadd.f32 %v519_v36, %v370_v22  ;;  %v437_v40 = vsel %vm430_vm2, %v434_v21, %v436_v32  ;;  %1212 = vmatpush3.bf16.msra.mxu0 %v1297_v7  ;;  %826 = vmatprep.subr.bf16.mxu1 %v1304_v11  ;;  %v1310_v19 = vld [vmem:[%s1775_s4 + $0x60] ss:$12 sps:$4 sm:$0xff]   ;;  %v1316_v21 = vld [vmem:[%s1775_s4 + $0x7c] ss:$12 sps:$4 sm:$0xff]   ;;  %v1314_v22 = vld [vmem:[%s1775_s4 + $0x78] ss:$12 sps:$4 sm:$0xff]  }
 0x238   :  { %v549_v41 = vmul.f32 %v1539_v35, %v1539_v35  ;;  %v539_v42 = vadd.f32 %v1539_v35, %v1535_v29  ;;  %v524_v43 = vadd.f32 %v437_v40, %v374_v33  ;;  %1213 = vmatprep.subr.bf16.mxu0 %v1301_v10  ;;  %827 = vmatpush1.bf16.msra.mxu1 %v1302_v12  ;;  %v1320_v25 = vld [vmem:[%s1775_s4 + $0x94] ss:$12 sps:$4 sm:$0xff]   ;;  %v1318_v26 = vld [vmem:[%s1775_s4 + $0x90] ss:$12 sps:$4 sm:$0xff]   ;;  %v1321_v27 = vld [vmem:[%s1775_s4 + $0x98] ss:$12 sps:$4 sm:$0xff]  }
 0x239   :  { %v1554_v44 = vadd.f32 %v523_v39, %v454_v23  ;;  %828 = vmatprep.subr.bf16.mxu1 %v1308_v14  ;;  %v1317_v23 = vld [vmem:[%s1775_s4 + $0x80] ss:$12 sps:$4 sm:$0xff]   ;;  %v1325_v30 = vld [vmem:[%s1775_s4 + $0xb0] ss:$12 sps:$4 sm:$0xff]   ;;  %v1322_v32 = vld [vmem:[%s1775_s4 + $0xa8] ss:$12 sps:$4 sm:$0xff]  }
 0x23a   :  { %v552_v46 = vadd.f32 %v549_v41, %v548_v38  ;;  %v1558_v47 = vadd.f32 %v532_v45, %v524_v43  ;;  %v1324_v28 = vld [vmem:[%s1775_s4 + $0xac] ss:$12 sps:$4 sm:$0xff]   ;;  %v1346_v11 = vmov 1966171168  }
 0x23b   :  { %v540_v48 = vadd.f32 %v539_v42, %v1554_v44  ;;  %v550_v49 = vmul.f32 %v1554_v44, %v1554_v44  ;;  %1214 = vmatpush3.bf16.msra.mxu0 %v1301_v10  ;;  %v618_v12 = vunpack.c.l.s4 %v1346_v11 }
 0x23c   :  { %v551_v50 = vmul.f32 %v1558_v47, %v1558_v47  ;;  %1215 = vmatprep.subr.bf16.mxu0 %v1305_v13  ;;  %829 = vmatpush1.bf16.msra.mxu1 %v1306_v15 }
 0x23d   :  { %v553_v51 = vadd.f32 %v552_v46, %v550_v49  ;;  %v541_v52 = vadd.f32 %v540_v48, %v1558_v47  ;;  %830 = vmatprep.subr.bf16.mxu1 %v1312_v17 }
 0x23f   :  { %v542_v53 = vrot.slane %v541_v52, 4  ;;  %v554_v54 = vadd.f32 %v553_v51, %v551_v50  ;;  %1216 = vmatpush3.bf16.msra.mxu0 %v1305_v13  ;;  %v619_v13 = vunpack.c.0.s8 %v618_v12 }
 0x240   :  { %1217 = vmatprep.subr.bf16.mxu0 %v1309_v16  ;;  %831 = vmatpush1.bf16.msra.mxu1 %v1310_v19  ;;  %v537_v19 = vld [vmem:[%s1776_s5] sm:$0x1] }
 0x241   :  { %v543_v56 = vadd.f32 %v542_v53, %v541_v52  ;;  %v555_v57 = vrot.slane %v554_v54, 4  ;;  %832 = vmatprep.subr.bf16.mxu1 %v1316_v21  ;;  %v1673_v14 = vsub.s32 %v619_v13, %v1508_v55 }
 0x243   :  { %v544_v58 = vrot.slane %v543_v56, 2  ;;  %v556_v59 = vadd.f32 %v555_v57, %v554_v54  ;;  %1218 = vmatpush3.bf16.msra.mxu0 %v1309_v16 }
 0x244   :  { %1219 = vmatprep.subr.bf16.mxu0 %v1313_v20  ;;  %833 = vmatpush1.bf16.msra.mxu1 %v1314_v22 }
 0x245   :  { %v545_v60 = vadd.f32 %v544_v58, %v543_v56  ;;  %v557_v62 = vrot.slane %v556_v59, 2  ;;  %834 = vmatprep.subr.bf16.mxu1 %v1320_v25 }
 0x247   :  { %v546_v63 = vrot.slane %v545_v60, 1  ;;  %v558_v0 = vadd.f32 %v557_v62, %v556_v59  ;;  %1220 = vmatpush3.bf16.msra.mxu0 %v1313_v20  ;;  %v1680_v20 = vsub.s32 0, %v1508_v55 }
 0x248   :  { %1221 = vmatprep.subr.bf16.mxu0 %v1317_v23  ;;  %835 = vmatpush1.bf16.msra.mxu1 %v1318_v26 }
 0x249   :  { %v559_v1 = vrot.slane %v558_v0, 1  ;;  %v547_v2 = vadd.f32 %v546_v63, %v545_v60  ;;  %836 = vmatprep.subr.bf16.mxu1 %v1324_v28 }
 0x24b   :  { %v560_v3 = vadd.f32 %v559_v1, %v558_v0  ;;  %1222 = vmatpush3.bf16.msra.mxu0 %v1317_v23  ;;  %v538_v23 = vld [vmem:[%s1777_s6] sm:$0x1] }
 0x24c   :  { %1223 = vmatprep.subr.bf16.mxu0 %v1321_v27  ;;  %837 = vmatpush1.bf16.msra.mxu1 %v1322_v32 }
 0x24d   :  { %v1567_v4 = vsel %vm430_vm2, %v547_v2, %v560_v3 }
 0x24e   :  { %568 = vrot.lane.b32.xlu0 %v1567_v4, %s1332_s0  ;;  %562 = vrot.lane.b32.xlu1 %v1567_v4, %s1333_s29 }
 0x24f   :  { %1224 = vmatpush3.bf16.msra.mxu0 %v1321_v27 }
 0x250   :  { %1225 = vmatprep.subr.bf16.mxu0 %v1325_v30 }
 0x252   :  { %574 = vrot.lane.b32.xlu0 %v1567_v4, %s1334_s30  ;;  %565 = vrot.lane.b32.xlu1 %v1567_v4, %s1335_s10 }
 0x253   :  { %1226 = vmatpush3.bf16.msra.mxu0 %v1325_v30 }
 0x256   :  { %580 = vrot.lane.b32.xlu0 %v1567_v4, %s1336_s11  ;;  %571 = vrot.lane.b32.xlu1 %v1567_v4, %s1337_s12 }
 0x25a   :  { %586 = vrot.lane.b32.xlu0 %v1567_v4, %s1338_s13  ;;  %577 = vrot.lane.b32.xlu1 %v1567_v4, %s1339_s14 }
 0x25e   :  { %592 = vrot.lane.b32.xlu0 %v1567_v4, %s1340_s15  ;;  %583 = vrot.lane.b32.xlu1 %v1567_v4, %s1331_s22 }
 0x262   :  { %598 = vrot.lane.b32.xlu0 %v1567_v4, %s1341_s16  ;;  %589 = vrot.lane.b32.xlu1 %v1567_v4, %s1342_s17 }
 0x266   :  { %604 = vrot.lane.b32.xlu0 %v1567_v4, %s1343_s18  ;;  %595 = vrot.lane.b32.xlu1 %v1567_v4, %s1344_s19 }
 0x26a   :  { %601 = vrot.lane.b32.xlu1 %v1567_v4, %s1345_s1 }
 0x2c0   :  { %v569_v33 = vpop.permute.xlu0 %568  ;;  %v563_v34 = vpop.permute.xlu1 %562 }
 0x2c1   :  { %v564_v36 = vadd.f32 %v563_v34, %v1567_v4 }
 0x2c4   :  { %v575_v38 = vpop.permute.xlu0 %574  ;;  %v566_v39 = vpop.permute.xlu1 %565 }
 0x2c5   :  { %v567_v40 = vadd.f32 %v566_v39, %v564_v36 }
 0x2c7   :  { %v570_v41 = vadd.f32 %v569_v33, %v567_v40 }
 0x2c8   :  { %v581_v42 = vpop.permute.xlu0 %580  ;;  %v572_v43 = vpop.permute.xlu1 %571 }
 0x2c9   :  { %v573_v45 = vadd.f32 %v572_v43, %v570_v41 }
 0x2cb   :  { %v576_v46 = vadd.f32 %v575_v38, %v573_v45 }
 0x2cc   :  { %v587_v48 = vpop.permute.xlu0 %586  ;;  %v578_v49 = vpop.permute.xlu1 %577 }
 0x2cd   :  { %v579_v50 = vadd.f32 %v578_v49, %v576_v46 }
 0x2cf   :  { %v582_v51 = vadd.f32 %v581_v42, %v579_v50 }
 0x2d0   :  { %v584_v52 = vpop.permute.xlu1 %583  ;;  %v593_v54 = vpop.permute.xlu0 %592 }
 0x2d1   :  { %v585_v53 = vadd.f32 %v584_v52, %v582_v51 }
 0x2d3   :  { %v588_v56 = vadd.f32 %v587_v48, %v585_v53 }
 0x2d4   :  { %v590_v57 = vpop.permute.xlu1 %589  ;;  %v599_v60 = vpop.permute.xlu0 %598 }
 0x2d5   :  { %v591_v58 = vadd.f32 %v590_v57, %v588_v56 }
 0x2d7   :  { %v594_v59 = vadd.f32 %v593_v54, %v591_v58 }
 0x2d8   :  { %v596_v62 = vpop.permute.xlu1 %595  ;;  %v605_v3 = vpop.permute.xlu0 %604 }
 0x2d9   :  { %v597_v63 = vadd.f32 %v596_v62, %v594_v59 }
 0x2db   :  { %v600_v0 = vadd.f32 %v599_v60, %v597_v63 }
 0x2dc   :  { %v602_v1 = vpop.permute.xlu1 %601 }
 0x2dd   :  { %v603_v2 = vadd.f32 %v602_v1, %v600_v0 }
 0x2df   :  { %v606_v4 = vadd.f32 %v605_v3, %v603_v2 }
 0x2e1   :  { %v607_v5 = vmul.f32 0.001953125, %v606_v4 }
 0x2e3   :  { %v608_v6 = vmul.f32 %v607_v5, %v607_v5 }
 0x2e5   :  { %v610_v7 = vrot.slane %v608_v6, 7 }
 0x2e7   :  { %v612_v8 = vsub.f32 %v607_v5, %v610_v7 }
 0x2e9   :  { %v613_v9 = vmax.f32 %v612_v8, 0.0 }
 0x2eb   :  { %v614_v10 = vadd.f32 1e-05, %v613_v9 }
 0x2ed   :  { %1326 = vrsqrt.f32 %v614_v10 }
 0x2f7   :  { %v1327_v15 = vpop.eup %1326 }
 0x2f8   :  { %v623_v16 = vrot.slane %v1327_v15, %v1673_v14 }
 0x2fa   :  { %v624_v17 = vcombine.high %v623_v16, %v623_v16 }
 0x2fc   :  { %v631_v21 = vrot.slane %v624_v17, %v1673_v14 }
 0x2fe   :  { %v633_v22 = vmul.f32 %v631_v21, %v537_v19 }
 0x300   :  { %v634_v25 = vmul.f32 %v633_v22, %v607_v5  ;;  %v640_v26 = vrot.slane %v633_v22, %v1680_v20 }
 0x302   :  { %v635_v27 = vsub.f32 %v538_v23, %v634_v25  ;;  %v642_v28 = vmul.f32 %v640_v26, %v1535_v29  ;;  %v643_v32 = vmul.f32 %v640_v26, %v1539_v35  ;;  %v644_v55 = vmul.f32 %v640_v26, %v1554_v44 }
 0x303   :  { %v645_v33 = vmul.f32 %v640_v26, %v1558_v47 }
 0x304   :  { %v650_v30 = vrot.slane %v635_v27, %v1680_v20 }
 0x306   :  { %v652_v34 = vadd.f32 %v650_v30, %v642_v28  ;;  %v653_v36 = vadd.f32 %v650_v30, %v643_v32  ;;  %v654_v38 = vadd.f32 %v650_v30, %v644_v55  ;;  %v655_v39 = vadd.f32 %v650_v30, %v645_v33 }
 0x308   :  { %v656_v40 = vmax.f32 %v652_v34, 0.0  ;;  %v657_v41 = vmax.f32 %v653_v36, 0.0  ;;  %v658_v42 = vmax.f32 %v654_v38, 0.0  ;;  %v659_v43 = vmax.f32 %v655_v39, 0.0 }
 0x30a   :  { %v660_v45 = vpack.c.bf16 %v657_v41, %v656_v40  ;;  %v661_v46 = vpack.c.bf16 %v659_v43, %v658_v42 }
 0x30c   :  { %855 = vmatmul.mubr.bf16.vlgmr.msra.gmra.mrb[8].mxu1 %v660_v45  ;;  %1227 = vmatprep.mubr.bf16.mxu0 %v660_v45 }
 0x30d   :  { %1228 = vmatmul.mubr.bf16.vlgmr.msra.gmra.mrb[8].mxu0 %v661_v46  ;;  %864 = vmatprep.mubr.bf16.mxu1 %v1330_v31 }
 0x314   :  { %865 = vmatmul.mubr.bf16.gmra.mrb[12].mxu1 %v661_v46 }
 0x3df   :  { %v856_v29 = vpop.f32.mrb[8].mxu1 }
 0x3e0   :  { %v928_v35 = vrot.slane %v856_v29, 7  ;;  %v858_v44 = vpop.f32.mrb[9].mxu1  ;;  %v1229_v47 = vpop.f32.mrb[8].mxu0 }
 0x3e1   :  { %v860_v48 = vpop.f32.mrb[10].mxu1  ;;  %v909_v49 = vpop.f32.mrb[9].mxu0  ;;  %v947_v56 = vrot.slane %v1229_v47, 1 }
 0x3e2   :  { %v939_v50 = vsel %vm430_vm2, 0.0, %v928_v35  ;;  %v929_v51 = vrot.slane %v860_v48, 7  ;;  %v862_v52 = vpop.f32.mrb[11].mxu1  ;;  %v1230_v53 = vpop.f32.mrb[10].mxu0  ;;  %v944_v31 = vrot.slane %v909_v49, 1 }
 0x3e3   :  { %v956_v54 = vsel %vm1512_vm3, 0.0, %v939_v50  ;;  %v949_v57 = vrot.slane %v1230_v53, 1  ;;  %v912_v58 = vpop.f32.mrb[11].mxu0 }
 0x3e4   :  { %v960_v59 = vadd.f32 %v956_v54, %v858_v44  ;;  %v930_v60 = vsel %vm430_vm2, %v928_v35, %v929_v51  ;;  %v945_v62 = vrot.slane %v912_v58, 1 }
 0x3e5   :  { %v961_v63 = vadd.f32 %v930_v60, %v862_v52  ;;  %v950_v0 = vsel %vm447_vm4, %v947_v56, %v949_v57  ;;  %v955_v12 = vsel %vm447_vm4, %v949_v57, 0.0 }
 0x3e6   :  { %v946_v1 = vsel %vm447_vm4, %v944_v31, %v945_v62  ;;  %v948_v2 = vsel %vm447_vm4, %v945_v62, %v947_v56  ;;  %v967_v23 = vsel %vm1543_vm7, 0.0, %v955_v12 }
 0x3e7   :  { %v965_v3 = vsel %vm1522_vm5, 0.0, %v948_v2  ;;  %v1702_v61 = vadd.f32 %v960_v59, %v946_v1  ;;  %v866_v4 = vpop.f32.mrb[12].mxu1 }
 0x3e8   :  { %v1704_v5 = vadd.f32 %v965_v3, %v961_v63  ;;  %v931_v6 = vrot.slane %v866_v4, 7  ;;  %v868_v7 = vpop.f32.mrb[13].mxu1 }
 0x3e9   :  { %v870_v8 = vpop.f32.mrb[14].mxu1  ;;  %v983_v18 = vmul.f32 %v1702_v61, %v1702_v61 }
 0x3ea   :  { %v932_v9 = vsel %vm430_vm2, %v929_v51, %v931_v6  ;;  %v933_v10 = vrot.slane %v870_v8, 7  ;;  %v872_v11 = vpop.f32.mrb[15].mxu1  ;;  %v984_v15 = vmul.f32 %v1704_v5, %v1704_v5  ;;  %v974_v22 = vadd.f32 %v1704_v5, %v1702_v61 }
 0x3eb   :  { %v958_v13 = vsel %vm1527_vm6, 0.0, %v932_v9 }
 0x3ec   :  { %v962_v16 = vadd.f32 %v958_v13, %v868_v7  ;;  %v934_v17 = vsel %vm430_vm2, %v931_v6, %v933_v10  ;;  %v987_v27 = vadd.f32 %v984_v15, %v983_v18 }
 0x3ed   :  { %v963_v19 = vadd.f32 %v934_v17, %v872_v11 }
 0x3ee   :  { %v1715_v21 = vadd.f32 %v962_v16, %v950_v0 }
 0x3ef   :  { %v1721_v24 = vadd.f32 %v967_v23, %v963_v19 }
 0x3f0   :  { %v975_v25 = vadd.f32 %v974_v22, %v1715_v21  ;;  %v985_v26 = vmul.f32 %v1715_v21, %v1715_v21 }
 0x3f1   :  { %v986_v28 = vmul.f32 %v1721_v24, %v1721_v24 }
 0x3f2   :  { %v988_v30 = vadd.f32 %v987_v27, %v985_v26  ;;  %v976_v32 = vadd.f32 %v975_v25, %v1721_v24  ;;  %v972_v26 = vld [vmem:[%s1778_s7] sm:$0x1] }
 0x3f4   :  { %v977_v55 = vrot.slane %v976_v32, 4  ;;  %v989_v33 = vadd.f32 %v988_v30, %v986_v28  ;;  %v973_v30 = vld [vmem:[%s1779_s8] sm:$0x1] }
 0x3f6   :  { %v978_v34 = vadd.f32 %v977_v55, %v976_v32  ;;  %v990_v36 = vrot.slane %v989_v33, 4 }
 0x3f8   :  { %v979_v37 = vrot.slane %v978_v34, 2  ;;  %v991_v38 = vadd.f32 %v990_v36, %v989_v33 }
 0x3fa   :  { %v980_v39 = vadd.f32 %v979_v37, %v978_v34  ;;  %v992_v40 = vrot.slane %v991_v38, 2 }
 0x3fc   :  { %v981_v41 = vrot.slane %v980_v39, 1  ;;  %v993_v42 = vadd.f32 %v992_v40, %v991_v38 }
 0x3fe   :  { %v994_v43 = vrot.slane %v993_v42, 1  ;;  %v982_v45 = vadd.f32 %v981_v41, %v980_v39 }
 0x400   :  { %v995_v46 = vadd.f32 %v994_v43, %v993_v42 }
 0x402   :  { %v996_v29 = vsel %vm430_vm2, %v982_v45, %v995_v46 }
 0x403   :  { %1000 = vrot.lane.b32.xlu0 %v996_v29, %s1335_s10  ;;  %997 = vrot.lane.b32.xlu1 %v996_v29, %s1333_s29 }
 0x407   :  { %1006 = vrot.lane.b32.xlu0 %v996_v29, %s1337_s12  ;;  %1003 = vrot.lane.b32.xlu1 %v996_v29, %s1332_s0 }
 0x40b   :  { %1012 = vrot.lane.b32.xlu0 %v996_v29, %s1339_s14  ;;  %1009 = vrot.lane.b32.xlu1 %v996_v29, %s1334_s30 }
 0x40f   :  { %1018 = vrot.lane.b32.xlu0 %v996_v29, %s1331_s22  ;;  %1015 = vrot.lane.b32.xlu1 %v996_v29, %s1336_s11 }
 0x413   :  { %1024 = vrot.lane.b32.xlu0 %v996_v29, %s1342_s17  ;;  %1021 = vrot.lane.b32.xlu1 %v996_v29, %s1338_s13 }
 0x417   :  { %1030 = vrot.lane.b32.xlu0 %v996_v29, %s1344_s19  ;;  %1027 = vrot.lane.b32.xlu1 %v996_v29, %s1340_s15 }
 0x41b   :  { %1036 = vrot.lane.b32.xlu0 %v996_v29, %s1345_s1  ;;  %1033 = vrot.lane.b32.xlu1 %v996_v29, %s1341_s16 }
 0x41f   :  { %1039 = vrot.lane.b32.xlu1 %v996_v29, %s1343_s18 }
 0x475   :  { %v1001_v35 = vpop.permute.xlu0 %1000  ;;  %v998_v44 = vpop.permute.xlu1 %997 }
 0x476   :  { %v999_v47 = vadd.f32 %v998_v44, %v996_v29 }
 0x478   :  { %v1002_v48 = vadd.f32 %v1001_v35, %v999_v47 }
 0x479   :  { %v1007_v49 = vpop.permute.xlu0 %1006  ;;  %v1004_v50 = vpop.permute.xlu1 %1003 }
 0x47a   :  { %v1005_v51 = vadd.f32 %v1004_v50, %v1002_v48 }
 0x47c   :  { %v1008_v52 = vadd.f32 %v1007_v49, %v1005_v51 }
 0x47d   :  { %v1013_v53 = vpop.permute.xlu0 %1012  ;;  %v1010_v54 = vpop.permute.xlu1 %1009 }
 0x47e   :  { %v1011_v56 = vadd.f32 %v1010_v54, %v1008_v52 }
 0x480   :  { %v1014_v57 = vadd.f32 %v1013_v53, %v1011_v56 }
 0x481   :  { %v1019_v58 = vpop.permute.xlu0 %1018  ;;  %v1016_v59 = vpop.permute.xlu1 %1015 }
 0x482   :  { %v1017_v31 = vadd.f32 %v1016_v59, %v1014_v57 }
 0x484   :  { %v1020_v60 = vadd.f32 %v1019_v58, %v1017_v31 }
 0x485   :  { %v1025_v62 = vpop.permute.xlu0 %1024  ;;  %v1022_v63 = vpop.permute.xlu1 %1021 }
 0x486   :  { %v1023_v0 = vadd.f32 %v1022_v63, %v1020_v60 }
 0x488   :  { %v1026_v1 = vadd.f32 %v1025_v62, %v1023_v0 }
 0x489   :  { %v1031_v2 = vpop.permute.xlu0 %1030  ;;  %v1028_v3 = vpop.permute.xlu1 %1027 }
 0x48a   :  { %v1029_v4 = vadd.f32 %v1028_v3, %v1026_v1 }
 0x48c   :  { %v1032_v6 = vadd.f32 %v1031_v2, %v1029_v4 }
 0x48d   :  { %v1034_v7 = vpop.permute.xlu1 %1033  ;;  %v1037_v9 = vpop.permute.xlu0 %1036 }
 0x48e   :  { %v1035_v8 = vadd.f32 %v1034_v7, %v1032_v6 }
 0x490   :  { %v1038_v10 = vadd.f32 %v1037_v9, %v1035_v8 }
 0x491   :  { %v1040_v11 = vpop.permute.xlu1 %1039 }
 0x492   :  { %v1041_v12 = vadd.f32 %v1040_v11, %v1038_v10 }
 0x494   :  { %v1042_v13 = vmul.f32 0.001953125, %v1041_v12 }
 0x496   :  { %v1043_v18 = vmul.f32 %v1042_v13, %v1042_v13 }
 0x498   :  { %v1045_v15 = vrot.slane %v1043_v18, 7 }
 0x49a   :  { %v1047_v16 = vsub.f32 %v1042_v13, %v1045_v15 }
 0x49c   :  { %v1048_v17 = vmax.f32 %v1047_v16, 0.0 }
 0x49e   :  { %v1049_v19 = vadd.f32 1e-05, %v1048_v17 }
 0x4a0   :  { %1328 = vrsqrt.f32 %v1049_v19 }
 0x4aa   :  { %v1329_v22 = vpop.eup %1328 }
 0x4ab   :  { %v1058_v23 = vrot.slane %v1329_v22, %v1673_v14 }
 0x4ad   :  { %v1059_v25 = vcombine.high %v1058_v23, %v1058_v23 }
 0x4af   :  { %v1066_v27 = vrot.slane %v1059_v25, %v1673_v14 }
 0x4b1   :  { %v1068_v28 = vmul.f32 %v1066_v27, %v972_v26 }
 0x4b3   :  { %v1069_v32 = vmul.f32 %v1068_v28, %v1042_v13  ;;  %v1075_v55 = vrot.slane %v1068_v28, %v1680_v20 }
 0x4b5   :  { %v1070_v33 = vsub.f32 %v973_v30, %v1069_v32  ;;  %v1077_v34 = vmul.f32 %v1075_v55, %v1702_v61  ;;  %v1078_v36 = vmul.f32 %v1075_v55, %v1704_v5  ;;  %v1079_v37 = vmul.f32 %v1075_v55, %v1715_v21 }
 0x4b6   :  { %v1080_v38 = vmul.f32 %v1075_v55, %v1721_v24 }
 0x4b7   :  { %v1085_v39 = vrot.slane %v1070_v33, %v1680_v20 }
 0x4b9   :  { %v1087_v14 = vadd.f32 %v1085_v39, %v1077_v34  ;;  %v1088_v40 = vadd.f32 %v1085_v39, %v1078_v36  ;;  %v1089_v41 = vadd.f32 %v1085_v39, %v1079_v37  ;;  %v1090_v42 = vadd.f32 %v1085_v39, %v1080_v38 }
 0x4bb   :  { %v1091_v43 = vmax.f32 %v1087_v14, 0.0  ;;  %v1092_v45 = vmax.f32 %v1088_v40, 0.0  ;;  %v1093_v46 = vmax.f32 %v1089_v41, 0.0  ;;  %v1094_v29 = vmax.f32 %v1090_v42, 0.0 }
 0x4bd   :  { %1095 = vst [vmem:[%s1780_s9] sm:$0xff] %v1091_v43  ;;  %1096 = vst [vmem:[%s1780_s9 + $0x8] sm:$0xff] %v1092_v45 }
 0x4be   :  { %1097 = vst [vmem:[%s1780_s9 + $0x10] sm:$0xff] %v1093_v46  ;;  %1098 = vst [vmem:[%s1780_s9 + $0x18] sm:$0xff] %v1094_v29 }

</bundles_post_ra>
